<compile_context>
chip_gen: v5e
topology: v5e:2x2
jax: 0.10.0
libtpu: 0.0.40
codegen_flags: <defaults>
</compile_context>

<pallas_src>
import math
import functools
import numpy as np

import jax
import jax.numpy as jnp
from jax import lax
from jax.experimental import pallas as pl
from jax.experimental.pallas import tpu as pltpu

F32_TINY = float(np.finfo(np.float32).tiny)   # clamp floor used by safe_cumprod
F32_MIN = float(np.finfo(np.float32).min)     # masked_fill value (reference only)


def _mt_mha_kernel(q_ref, k_ref, v_ref, keep_ref, upper_ref, wo_ref, bo_ref, sbias_ref,
                   o_ref, ctx_ref, carry_ref, *, n_head, n_feat, cast_dtype):
    """Grid = (batch, T1-tile, T2-chunk).  The T2-chunk axis is the streamed reduction:
    K/V/mask arrive one chunk at a time; the monotonic-attention state (per-head context
    and the running log-carry of the exclusive cumprod) lives in VMEM scratch."""
    c = pl.program_id(2)
    last = pl.num_programs(2) - 1
    cd = cast_dtype

    @pl.when(c == 0)
    def _init():
        ctx_ref[...] = jnp.zeros_like(ctx_ref)
        carry_ref[...] = jnp.zeros_like(carry_ref)

    sb = sbias_ref[0, 0]                 # src_att_bias scalar, read once from SMEM
    keep = keep_ref[0]                   # (1, t2c) f32: 1 = valid, 0 = masked / padding
    upper = upper_ref[...]               # (t2c, t2c) strictly-upper-triangular f32

    for h in range(n_head):              # static unroll; leading-axis ref indexing is free
        qh = q_ref[0, h]                 # (t1, d_k)   (already scaled by 1/sqrt(d_k))
        kh = k_ref[0, h]                 # (t2c, d_k)
        vh = v_ref[0, h]                 # (t2c, d_k)

        # Scores for this chunk only: contract d_k directly (no K transpose).
        s = lax.dot_general(qh, kh, (((1,), (1,)), ((), ())),
                            preferred_element_type=jnp.float32)        # (t1, t2c)
        # p_choose_i: masked / padded keys are forced to exactly 0 (matches masked_fill).
        p = jax.nn.sigmoid(s + sb) * keep
        # log(1 - p) with the same clamp as the reference safe_cumprod.
        logc = jnp.log(jnp.clip(1.0 - p, F32_TINY, 1.0))
        # Exclusive cumsum inside the chunk (strictly-upper matmul) + carry of all previous
        # chunks -> exclusive cumprod of (1 - p) in log space.
        excl = jnp.dot(logc, upper, preferred_element_type=jnp.float32) + carry_ref[h]
        attn = p * jnp.exp(excl)
        ctx_ref[h] = ctx_ref[h] + jnp.dot(attn.astype(cd), vh,
                                          preferred_element_type=jnp.float32)
        carry_ref[h] = carry_ref[h] + jnp.sum(logc, axis=-1, keepdims=True)

    @pl.when(c == last)
    def _finalize():
        # Output projection accumulated per head through Wo row slabs -> lane-dense (t1, F).
        out = jnp.zeros((o_ref.shape[1], n_feat), jnp.float32)
        for h in range(n_head):
            out = out + jnp.dot(ctx_ref[h].astype(cd), wo_ref[h],
                                preferred_element_type=jnp.float32)
        o_ref[0] = (out + bo_ref[...]).astype(o_ref.dtype)


def mt_multihead_attention(query, key, value, mask, params, n_head,
                           compute_dtype=jnp.bfloat16, block_t1=128, t2_chunk=128):
    B, T1, F = query.shape
    T2 = key.shape[1]
    d_k = F // n_head
    scale = 1.0 / math.sqrt(d_k)

    # ---- Q/K/V projections: fused lane-dense (T, F) @ (F, F) matmuls in plain XLA (f32),
    #      computed once per call (not once per T1 tile).  Scale folded into Wq / bq.
    q = query @ (params["wq"].T * scale) + params["bq"] * scale
    k = key @ params["wk"].T + params["bk"]
    v = value @ params["wv"].T + params["bv"]
    # (B, H, T, d_k): head index on a leading axis so the kernel never lane-slices.
    q = q.reshape(B, T1, n_head, d_k).transpose(0, 2, 1, 3).astype(compute_dtype)
    k = k.reshape(B, T2, n_head, d_k).transpose(0, 2, 1, 3).astype(compute_dtype)
    v = v.reshape(B, T2, n_head, d_k).transpose(0, 2, 1, 3).astype(compute_dtype)

    # ---- Pad T1 / T2 up to the tile / chunk size; pads are masked out via `keep`.
    T1p = pl.cdiv(T1, block_t1) * block_t1
    T2p = pl.cdiv(T2, t2_chunk) * t2_chunk
    if T1p != T1:
        q = jnp.pad(q, ((0, 0), (0, 0), (0, T1p - T1), (0, 0)))
    if T2p != T2:
        k = jnp.pad(k, ((0, 0), (0, 0), (0, T2p - T2), (0, 0)))
        v = jnp.pad(v, ((0, 0), (0, 0), (0, T2p - T2), (0, 0)))
    keep = (mask != 0).astype(jnp.float32).reshape(B, 1, T2)
    if T2p != T2:
        keep = jnp.pad(keep, ((0, 0), (0, 0), (0, T2p - T2)))

    n_t1 = T1p // block_t1
    n_chunks = T2p // t2_chunk

    # Output projection as per-head row slabs (H, d_k, F); bias kept in f32.
    wo3 = params["wo"].T.reshape(n_head, d_k, F).astype(compute_dtype)
    bo2 = params["bo"].reshape(1, F).astype(jnp.float32)
    sbias = params["src_att_bias"].reshape(1, 1).astype(jnp.float32)

    # Strictly-upper-triangular (t2_chunk, t2_chunk): in-chunk exclusive cumsum as one matmul.
    idx = np.arange(t2_chunk)
    upper = jnp.asarray((idx[:, None] < idx[None, :]).astype(np.float32))

    kernel = functools.partial(_mt_mha_kernel, n_head=n_head, n_feat=F,
                               cast_dtype=compute_dtype)

    out = pl.pallas_call(
        kernel,
        out_shape=jax.ShapeDtypeStruct((B, T1p, F), jnp.float32),
        grid=(B, n_t1, n_chunks),
        in_specs=[
            pl.BlockSpec((1, n_head, block_t1, d_k), lambda b, i, c: (b, 0, i, 0)),  # Q tile
            pl.BlockSpec((1, n_head, t2_chunk, d_k), lambda b, i, c: (b, 0, c, 0)),  # K chunk
            pl.BlockSpec((1, n_head, t2_chunk, d_k), lambda b, i, c: (b, 0, c, 0)),  # V chunk
            pl.BlockSpec((1, 1, t2_chunk), lambda b, i, c: (b, 0, c)),               # keep mask
            pl.BlockSpec((t2_chunk, t2_chunk), lambda b, i, c: (0, 0)),              # upper tri
            pl.BlockSpec((n_head, d_k, F), lambda b, i, c: (0, 0, 0)),               # Wo rows
            pl.BlockSpec((1, F), lambda b, i, c: (0, 0)),                            # bo
            pl.BlockSpec(memory_space=pltpu.MemorySpace.SMEM),                       # src_att_bias
        ],
        out_specs=pl.BlockSpec((1, block_t1, F), lambda b, i, c: (b, i, 0)),
        scratch_shapes=[
            pltpu.VMEM((n_head, block_t1, d_k), jnp.float32),   # per-head context accumulator
            pltpu.VMEM((n_head, block_t1, 1), jnp.float32),     # per-head running log carry
        ],
        compiler_params=pltpu.CompilerParams(
            dimension_semantics=("parallel", "parallel", "arbitrary"),
            # Cap only; actual per-step footprint is a few MiB with chunked K/V streaming.
            vmem_limit_bytes=48 * 1024 * 1024),
    )(q, k, v, keep, upper, wo3, bo2, sbias)

    if T1p != T1:
        out = out[:, :T1, :]
    return out


def reference_mt_mha(query, key, value, mask, params, n_head):
    """Pure-JAX reference matching the PyTorch module (eval mode)."""
    B, T1, F = query.shape
    T2 = key.shape[1]
    d_k = F // n_head

    def lin(x, w, b):
        return x @ w.T + b

    q = lin(query, params["wq"], params["bq"]).reshape(B, T1, n_head, d_k).transpose(0, 2, 1, 3)
    k = lin(key, params["wk"], params["bk"]).reshape(B, T2, n_head, d_k).transpose(0, 2, 1, 3)
    v = lin(value, params["wv"], params["bv"]).reshape(B, T2, n_head, d_k).transpose(0, 2, 1, 3)

    scores = jnp.einsum("bhqd,bhkd->bhqk", q, k) / math.sqrt(d_k) + params["src_att_bias"][0, 0]
    m = (mask[:, None, :, :] == 0)                               # (B,1,1,T2)
    scores = jnp.where(m, F32_MIN, scores)
    p = jax.nn.sigmoid(scores)
    p = jnp.where(m, 0.0, p)

    one_minus = 1.0 - p
    logc = jnp.log(jnp.clip(one_minus[..., :-1], F32_TINY, 1.0))
    excl = jnp.concatenate(
        [jnp.ones(p.shape[:-1] + (1,), p.dtype), jnp.exp(jnp.cumsum(logc, axis=-1))], axis=-1)
    attn = p * excl

    x = jnp.einsum("bhqk,bhkd->bhqd", attn, v)
    x = x.transpose(0, 2, 1, 3).reshape(B, T1, F)
    return lin(x, params["wo"], params["bo"])


def _make_params(key0, n_feat):
    ks = jax.random.split(key0, 8)

    def w_init(k, shape, scale=0.1):
        return (scale * jax.random.normal(k, shape)).astype(jnp.float32)

    return {
        "wq": w_init(ks[0], (n_feat, n_feat)), "bq": w_init(ks[1], (n_feat,)),
        "wk": w_init(ks[2], (n_feat, n_feat)), "bk": w_init(ks[3], (n_feat,)),
        "wv": w_init(ks[4], (n_feat, n_feat)), "bv": w_init(ks[5], (n_feat,)),
        "wo": w_init(ks[6], (n_feat, n_feat)), "bo": w_init(ks[7], (n_feat,)),
        "src_att_bias": jnp.zeros((1, 1), jnp.float32),   # nn.init.constant_(bias_init=0.0)
    }


if __name__ == "__main__":
    n_head, n_feat = 4, 32
    B, T1, T2 = 2, 8, 8

    key0 = jax.random.PRNGKey(0)
    ks = jax.random.split(key0, 4)
    params = _make_params(ks[0], n_feat)

    query = jax.random.normal(ks[1], (B, T1, n_feat), dtype=jnp.float32)
    key_t = jax.random.normal(ks[2], (B, T2, n_feat), dtype=jnp.float32)
    value = jax.random.normal(ks[3], (B, T2, n_feat), dtype=jnp.float32)

    # mask: (B, 1, T2), 1 = valid, 0 = padded; batch0 full length, batch1 length 6
    lengths = jnp.array([T2, 6])
    mask = (jnp.arange(T2)[None, None, :] < lengths[:, None, None]).astype(jnp.int32)

    ref = jax.block_until_ready(reference_mt_mha(query, key_t, value, mask, params, n_head))

    # f32 MXU path: tight match against the reference.
    out_f32 = mt_multihead_attention(query, key_t, value, mask, params, n_head,
                                     compute_dtype=jnp.float32)
    out_f32 = jax.block_until_ready(out_f32)
    assert out_f32.shape == (B, T1, n_feat)
    np.testing.assert_allclose(np.asarray(out_f32), np.asarray(ref), rtol=2e-3, atol=2e-3)

    # bf16 MXU operands (f32 accumulation & elementwise): looser tolerance.
    out_bf16 = mt_multihead_attention(query, key_t, value, mask, params, n_head,
                                      compute_dtype=jnp.bfloat16)
    out_bf16 = jax.block_until_ready(out_bf16)
    np.testing.assert_allclose(np.asarray(out_bf16), np.asarray(ref), rtol=3e-2, atol=3e-2)

    # Larger, non-divisible shapes: exercises T1/T2 padding and the multi-chunk carry path.
    B2, T1b, T2b = 2, 40, 200
    kb = jax.random.split(jax.random.PRNGKey(7), 3)
    query2 = jax.random.normal(kb[0], (B2, T1b, n_feat), dtype=jnp.float32)
    key2 = jax.random.normal(kb[1], (B2, T2b, n_feat), dtype=jnp.float32)
    value2 = jax.random.normal(kb[2], (B2, T2b, n_feat), dtype=jnp.float32)
    lengths2 = jnp.array([T2b, 150])
    mask2 = (jnp.arange(T2b)[None, None, :] < lengths2[:, None, None]).astype(jnp.int32)

    ref2 = jax.block_until_ready(reference_mt_mha(query2, key2, value2, mask2, params, n_head))
    out2 = mt_multihead_attention(query2, key2, value2, mask2, params, n_head,
                                  compute_dtype=jnp.float32)
    out2 = jax.block_until_ready(out2)
    assert out2.shape == (B2, T1b, n_feat)
    np.testing.assert_allclose(np.asarray(out2), np.asarray(ref2), rtol=5e-3, atol=5e-3)

    print("KERNEL_OK")
</pallas_src>

<mosaic_0001>
module attributes {stable_mosaic.version = 11 : i64} {
  func.func @_mt_mha_kernel(%arg0: i32, %arg1: i32, %arg2: i32, %arg3: memref<1x4x128x8xf32, #tpu.memory_space<vmem>>, %arg4: memref<1x4x128x8xf32, #tpu.memory_space<vmem>>, %arg5: memref<1x4x128x8xf32, #tpu.memory_space<vmem>>, %arg6: memref<1x1x128xf32, #tpu.memory_space<vmem>>, %arg7: memref<128x128xf32, #tpu.memory_space<vmem>>, %arg8: memref<4x8x32xf32, #tpu.memory_space<vmem>>, %arg9: memref<1x32xf32, #tpu.memory_space<vmem>>, %arg10: memref<1x1xf32, #tpu.memory_space<smem>>, %arg11: memref<1x128x32xf32, #tpu.memory_space<vmem>>, %arg12: memref<4x128x8xf32, #tpu.memory_space<vmem>>, %arg13: memref<4x128x1xf32, #tpu.memory_space<vmem>>) attributes {dimension_semantics = [#tpu.dimension_semantics<parallel>, #tpu.dimension_semantics<parallel>, #tpu.dimension_semantics<arbitrary>], iteration_bounds = array<i64: 2, 1, 1>, scalar_prefetch = 0 : i64, scratch_operands = 2 : i64, tpu.core_type = #tpu.core_type<tc>, window_params = [{transform_indices = @transform_0, window_bounds = array<i64: 1, 4, 128, 8>}, {transform_indices = @transform_1, window_bounds = array<i64: 1, 4, 128, 8>}, {transform_indices = @transform_2, window_bounds = array<i64: 1, 4, 128, 8>}, {transform_indices = @transform_3, window_bounds = array<i64: 1, 1, 128>}, {pipeline_mode = #tpu.pipeline_mode<synchronous>, transform_indices = @transform_4, window_bounds = array<i64: 128, 128>}, {pipeline_mode = #tpu.pipeline_mode<synchronous>, transform_indices = @transform_5, window_bounds = array<i64: 4, 8, 32>}, {pipeline_mode = #tpu.pipeline_mode<synchronous>, transform_indices = @transform_6, window_bounds = array<i64: 1, 32>}, {transform_indices = @transform_7, window_bounds = array<i64: 1, 1>}, {transform_indices = @transform_8, window_bounds = array<i64: 1, 128, 32>}]} {
    %c0_i32 = arith.constant 0 : i32
    %0 = arith.cmpi eq, %arg2, %c0_i32 : i32
    %1 = arith.extui %0 : i1 to i32
    %c0_i32_0 = arith.constant 0 : i32
    %2 = arith.cmpi ne, %1, %c0_i32_0 : i32
    scf.if %2 {
      %cst_145 = arith.constant 0.000000e+00 : f32
      %190 = vector.broadcast %cst_145 : f32 to vector<4x128x8xf32>
      %c0_146 = arith.constant 0 : index
      %c0_147 = arith.constant 0 : index
      %c0_148 = arith.constant 0 : index
      %191 = vector.load %arg12[%c0_146, %c0_147, %c0_148] : memref<4x128x8xf32, #tpu.memory_space<vmem>>, vector<4x128x8xf32>
      tpu.vector_store %arg12[%c0_146, %c0_147, %c0_148], %190 {strides = array<i32>} : memref<4x128x8xf32, #tpu.memory_space<vmem>>, vector<4x128x8xf32>,
      %cst_149 = arith.constant 0.000000e+00 : f32
      %192 = vector.broadcast %cst_149 : f32 to vector<4x128x1xf32>
      %c0_150 = arith.constant 0 : index
      %c0_151 = arith.constant 0 : index
      %c0_152 = arith.constant 0 : index
      %193 = vector.load %arg13[%c0_150, %c0_151, %c0_152] : memref<4x128x1xf32, #tpu.memory_space<vmem>>, vector<4x128x1xf32>
      tpu.vector_store %arg13[%c0_150, %c0_151, %c0_152], %192 {strides = array<i32>} : memref<4x128x1xf32, #tpu.memory_space<vmem>>, vector<4x128x1xf32>,
    } else {
    }
    %c0 = arith.constant 0 : index
    %c0_1 = arith.constant 0 : index
    %3 = memref.load %arg10[%c0, %c0_1] : memref<1x1xf32, #tpu.memory_space<smem>>
    %c0_2 = arith.constant 0 : index
    %c0_3 = arith.constant 0 : index
    %c0_4 = arith.constant 0 : index
    %4 = vector.load %arg6[%c0_2, %c0_3, %c0_4] : memref<1x1x128xf32, #tpu.memory_space<vmem>>, vector<1x1x128xf32>
    %5 = vector.shape_cast %4 : vector<1x1x128xf32> to vector<1x128xf32>
    %c0_5 = arith.constant 0 : index
    %c0_6 = arith.constant 0 : index
    %6 = vector.load %arg7[%c0_5, %c0_6] : memref<128x128xf32, #tpu.memory_space<vmem>>, vector<128x128xf32>
    %c0_7 = arith.constant 0 : index
    %c0_8 = arith.constant 0 : index
    %c0_9 = arith.constant 0 : index
    %c0_10 = arith.constant 0 : index
    %7 = vector.load %arg3[%c0_7, %c0_8, %c0_9, %c0_10] : memref<1x4x128x8xf32, #tpu.memory_space<vmem>>, vector<1x1x128x8xf32>
    %8 = vector.shape_cast %7 : vector<1x1x128x8xf32> to vector<128x8xf32>
    %c0_11 = arith.constant 0 : index
    %c0_12 = arith.constant 0 : index
    %c0_13 = arith.constant 0 : index
    %c0_14 = arith.constant 0 : index
    %9 = vector.load %arg4[%c0_11, %c0_12, %c0_13, %c0_14] : memref<1x4x128x8xf32, #tpu.memory_space<vmem>>, vector<1x1x128x8xf32>
    %10 = vector.shape_cast %9 : vector<1x1x128x8xf32> to vector<128x8xf32>
    %c0_15 = arith.constant 0 : index
    %c0_16 = arith.constant 0 : index
    %c0_17 = arith.constant 0 : index
    %c0_18 = arith.constant 0 : index
    %11 = vector.load %arg5[%c0_15, %c0_16, %c0_17, %c0_18] : memref<1x4x128x8xf32, #tpu.memory_space<vmem>>, vector<1x1x128x8xf32>
    %12 = vector.shape_cast %11 : vector<1x1x128x8xf32> to vector<128x8xf32>
    %cst = arith.constant dense<0.000000e+00> : vector<128x128xf32>
    %13 = tpu.matmul %8, %10, %cst {dimension_numbers = #tpu.dot_dimension_numbers<[1], [1], [0], [0], [0, 0, 1, 0], [], []>} : vector<128x8xf32>, vector<128x8xf32>, vector<128x128xf32> -> vector<128x128xf32>
    %14 = vector.broadcast %3 : f32 to vector<128x128xf32>
    %15 = arith.addf %13, %14 : vector<128x128xf32>
    %16 = arith.negf %15 : vector<128x128xf32>
    %17 = math.exp %16 : vector<128x128xf32>
    %cst_19 = arith.constant 1.000000e+00 : f32
    %18 = vector.broadcast %cst_19 : f32 to vector<128x128xf32>
    %19 = arith.addf %18, %17 : vector<128x128xf32>
    %20 = arith.divf %18, %19 : vector<128x128xf32>
    %21 = vector.broadcast %5 : vector<1x128xf32> to vector<128x128xf32>
    %22 = arith.mulf %20, %21 : vector<128x128xf32>
    %cst_20 = arith.constant 1.000000e+00 : f32
    %23 = vector.broadcast %cst_20 : f32 to vector<128x128xf32>
    %24 = arith.subf %23, %22 : vector<128x128xf32>
    %cst_21 = arith.constant 1.17549435E-38 : f32
    %cst_22 = arith.constant 1.000000e+00 : f32
    %25 = vector.broadcast %cst_21 : f32 to vector<128x128xf32>
    %26 = arith.maximumf %25, %24 : vector<128x128xf32>
    %27 = vector.broadcast %cst_22 : f32 to vector<128x128xf32>
    %28 = arith.minimumf %27, %26 : vector<128x128xf32>
    %29 = math.log %28 : vector<128x128xf32>
    %cst_23 = arith.constant dense<0.000000e+00> : vector<128x128xf32>
    %30 = tpu.matmul %29, %6, %cst_23 {dimension_numbers = #tpu.dot_dimension_numbers<[1], [0], [0], [1], [0, 0, 1, 1], [], []>} : vector<128x128xf32>, vector<128x128xf32>, vector<128x128xf32> -> vector<128x128xf32>
    %c0_24 = arith.constant 0 : index
    %c0_25 = arith.constant 0 : index
    %c0_26 = arith.constant 0 : index
    %31 = vector.load %arg13[%c0_24, %c0_25, %c0_26] : memref<4x128x1xf32, #tpu.memory_space<vmem>>, vector<1x128x1xf32>
    %32 = vector.shape_cast %31 : vector<1x128x1xf32> to vector<128x1xf32>
    %33 = vector.broadcast %32 : vector<128x1xf32> to vector<128x128xf32>
    %34 = arith.addf %30, %33 : vector<128x128xf32>
    %35 = math.exp %34 : vector<128x128xf32>
    %36 = arith.mulf %22, %35 : vector<128x128xf32>
    %c0_27 = arith.constant 0 : index
    %c0_28 = arith.constant 0 : index
    %c0_29 = arith.constant 0 : index
    %37 = vector.load %arg12[%c0_27, %c0_28, %c0_29] : memref<4x128x8xf32, #tpu.memory_space<vmem>>, vector<1x128x8xf32>
    %38 = vector.shape_cast %37 : vector<1x128x8xf32> to vector<128x8xf32>
    %cst_30 = arith.constant dense<0.000000e+00> : vector<128x8xf32>
    %39 = tpu.matmul %36, %12, %cst_30 {dimension_numbers = #tpu.dot_dimension_numbers<[1], [0], [0], [1], [0, 0, 1, 1], [], []>} : vector<128x128xf32>, vector<128x8xf32>, vector<128x8xf32> -> vector<128x8xf32>
    %40 = arith.addf %38, %39 : vector<128x8xf32>
    %c0_31 = arith.constant 0 : index
    %c0_32 = arith.constant 0 : index
    %c0_33 = arith.constant 0 : index
    %41 = vector.load %arg12[%c0_31, %c0_32, %c0_33] : memref<4x128x8xf32, #tpu.memory_space<vmem>>, vector<1x128x8xf32>
    %42 = vector.shape_cast %41 : vector<1x128x8xf32> to vector<128x8xf32>
    %43 = vector.shape_cast %40 : vector<128x8xf32> to vector<1x128x8xf32>
    tpu.vector_store %arg12[%c0_31, %c0_32, %c0_33], %43 {strides = array<i32>} : memref<4x128x8xf32, #tpu.memory_space<vmem>>, vector<1x128x8xf32>,
    %c0_34 = arith.constant 0 : index
    %c0_35 = arith.constant 0 : index
    %c0_36 = arith.constant 0 : index
    %44 = vector.load %arg13[%c0_34, %c0_35, %c0_36] : memref<4x128x1xf32, #tpu.memory_space<vmem>>, vector<1x128x1xf32>
    %45 = vector.shape_cast %44 : vector<1x128x1xf32> to vector<128x1xf32>
    %cst_37 = arith.constant dense<0.000000e+00> : vector<128xf32>
    %46 = vector.multi_reduction <add>, %29, %cst_37 [1] : vector<128x128xf32> to vector<128xf32>
    %47 = vector.shape_cast %46 : vector<128xf32> to vector<128x1xf32>
    %48 = arith.addf %45, %47 : vector<128x1xf32>
    %c0_38 = arith.constant 0 : index
    %c0_39 = arith.constant 0 : index
    %c0_40 = arith.constant 0 : index
    %49 = vector.load %arg13[%c0_38, %c0_39, %c0_40] : memref<4x128x1xf32, #tpu.memory_space<vmem>>, vector<1x128x1xf32>
    %50 = vector.shape_cast %49 : vector<1x128x1xf32> to vector<128x1xf32>
    %51 = vector.shape_cast %48 : vector<128x1xf32> to vector<1x128x1xf32>
    tpu.vector_store %arg13[%c0_38, %c0_39, %c0_40], %51 {strides = array<i32>} : memref<4x128x1xf32, #tpu.memory_space<vmem>>, vector<1x128x1xf32>,
    %c0_41 = arith.constant 0 : index
    %c1 = arith.constant 1 : index
    %c0_42 = arith.constant 0 : index
    %c0_43 = arith.constant 0 : index
    %52 = vector.load %arg3[%c0_41, %c1, %c0_42, %c0_43] : memref<1x4x128x8xf32, #tpu.memory_space<vmem>>, vector<1x1x128x8xf32>
    %53 = vector.shape_cast %52 : vector<1x1x128x8xf32> to vector<128x8xf32>
    %c0_44 = arith.constant 0 : index
    %c1_45 = arith.constant 1 : index
    %c0_46 = arith.constant 0 : index
    %c0_47 = arith.constant 0 : index
    %54 = vector.load %arg4[%c0_44, %c1_45, %c0_46, %c0_47] : memref<1x4x128x8xf32, #tpu.memory_space<vmem>>, vector<1x1x128x8xf32>
    %55 = vector.shape_cast %54 : vector<1x1x128x8xf32> to vector<128x8xf32>
    %c0_48 = arith.constant 0 : index
    %c1_49 = arith.constant 1 : index
    %c0_50 = arith.constant 0 : index
    %c0_51 = arith.constant 0 : index
    %56 = vector.load %arg5[%c0_48, %c1_49, %c0_50, %c0_51] : memref<1x4x128x8xf32, #tpu.memory_space<vmem>>, vector<1x1x128x8xf32>
    %57 = vector.shape_cast %56 : vector<1x1x128x8xf32> to vector<128x8xf32>
    %cst_52 = arith.constant dense<0.000000e+00> : vector<128x128xf32>
    %58 = tpu.matmul %53, %55, %cst_52 {dimension_numbers = #tpu.dot_dimension_numbers<[1], [1], [0], [0], [0, 0, 1, 0], [], []>} : vector<128x8xf32>, vector<128x8xf32>, vector<128x128xf32> -> vector<128x128xf32>
    %59 = vector.broadcast %3 : f32 to vector<128x128xf32>
    %60 = arith.addf %58, %59 : vector<128x128xf32>
    %61 = arith.negf %60 : vector<128x128xf32>
    %62 = math.exp %61 : vector<128x128xf32>
    %cst_53 = arith.constant 1.000000e+00 : f32
    %63 = vector.broadcast %cst_53 : f32 to vector<128x128xf32>
    %64 = arith.addf %63, %62 : vector<128x128xf32>
    %65 = arith.divf %63, %64 : vector<128x128xf32>
    %66 = vector.broadcast %5 : vector<1x128xf32> to vector<128x128xf32>
    %67 = arith.mulf %65, %66 : vector<128x128xf32>
    %cst_54 = arith.constant 1.000000e+00 : f32
    %68 = vector.broadcast %cst_54 : f32 to vector<128x128xf32>
    %69 = arith.subf %68, %67 : vector<128x128xf32>
    %cst_55 = arith.constant 1.17549435E-38 : f32
    %cst_56 = arith.constant 1.000000e+00 : f32
    %70 = vector.broadcast %cst_55 : f32 to vector<128x128xf32>
    %71 = arith.maximumf %70, %69 : vector<128x128xf32>
    %72 = vector.broadcast %cst_56 : f32 to vector<128x128xf32>
    %73 = arith.minimumf %72, %71 : vector<128x128xf32>
    %74 = math.log %73 : vector<128x128xf32>
    %cst_57 = arith.constant dense<0.000000e+00> : vector<128x128xf32>
    %75 = tpu.matmul %74, %6, %cst_57 {dimension_numbers = #tpu.dot_dimension_numbers<[1], [0], [0], [1], [0, 0, 1, 1], [], []>} : vector<128x128xf32>, vector<128x128xf32>, vector<128x128xf32> -> vector<128x128xf32>
    %c1_58 = arith.constant 1 : index
    %c0_59 = arith.constant 0 : index
    %c0_60 = arith.constant 0 : index
    %76 = vector.load %arg13[%c1_58, %c0_59, %c0_60] : memref<4x128x1xf32, #tpu.memory_space<vmem>>, vector<1x128x1xf32>
    %77 = vector.shape_cast %76 : vector<1x128x1xf32> to vector<128x1xf32>
    %78 = vector.broadcast %77 : vector<128x1xf32> to vector<128x128xf32>
    %79 = arith.addf %75, %78 : vector<128x128xf32>
    %80 = math.exp %79 : vector<128x128xf32>
    %81 = arith.mulf %67, %80 : vector<128x128xf32>
    %c1_61 = arith.constant 1 : index
    %c0_62 = arith.constant 0 : index
    %c0_63 = arith.constant 0 : index
    %82 = vector.load %arg12[%c1_61, %c0_62, %c0_63] : memref<4x128x8xf32, #tpu.memory_space<vmem>>, vector<1x128x8xf32>
    %83 = vector.shape_cast %82 : vector<1x128x8xf32> to vector<128x8xf32>
    %cst_64 = arith.constant dense<0.000000e+00> : vector<128x8xf32>
    %84 = tpu.matmul %81, %57, %cst_64 {dimension_numbers = #tpu.dot_dimension_numbers<[1], [0], [0], [1], [0, 0, 1, 1], [], []>} : vector<128x128xf32>, vector<128x8xf32>, vector<128x8xf32> -> vector<128x8xf32>
    %85 = arith.addf %83, %84 : vector<128x8xf32>
    %c1_65 = arith.constant 1 : index
    %c0_66 = arith.constant 0 : index
    %c0_67 = arith.constant 0 : index
    %86 = vector.load %arg12[%c1_65, %c0_66, %c0_67] : memref<4x128x8xf32, #tpu.memory_space<vmem>>, vector<1x128x8xf32>
    %87 = vector.shape_cast %86 : vector<1x128x8xf32> to vector<128x8xf32>
    %88 = vector.shape_cast %85 : vector<128x8xf32> to vector<1x128x8xf32>
    tpu.vector_store %arg12[%c1_65, %c0_66, %c0_67], %88 {strides = array<i32>} : memref<4x128x8xf32, #tpu.memory_space<vmem>>, vector<1x128x8xf32>,
    %c1_68 = arith.constant 1 : index
    %c0_69 = arith.constant 0 : index
    %c0_70 = arith.constant 0 : index
    %89 = vector.load %arg13[%c1_68, %c0_69, %c0_70] : memref<4x128x1xf32, #tpu.memory_space<vmem>>, vector<1x128x1xf32>
    %90 = vector.shape_cast %89 : vector<1x128x1xf32> to vector<128x1xf32>
    %cst_71 = arith.constant dense<0.000000e+00> : vector<128xf32>
    %91 = vector.multi_reduction <add>, %74, %cst_71 [1] : vector<128x128xf32> to vector<128xf32>
    %92 = vector.shape_cast %91 : vector<128xf32> to vector<128x1xf32>
    %93 = arith.addf %90, %92 : vector<128x1xf32>
    %c1_72 = arith.constant 1 : index
    %c0_73 = arith.constant 0 : index
    %c0_74 = arith.constant 0 : index
    %94 = vector.load %arg13[%c1_72, %c0_73, %c0_74] : memref<4x128x1xf32, #tpu.memory_space<vmem>>, vector<1x128x1xf32>
    %95 = vector.shape_cast %94 : vector<1x128x1xf32> to vector<128x1xf32>
    %96 = vector.shape_cast %93 : vector<128x1xf32> to vector<1x128x1xf32>
    tpu.vector_store %arg13[%c1_72, %c0_73, %c0_74], %96 {strides = array<i32>} : memref<4x128x1xf32, #tpu.memory_space<vmem>>, vector<1x128x1xf32>,
    %c0_75 = arith.constant 0 : index
    %c2 = arith.constant 2 : index
    %c0_76 = arith.constant 0 : index
    %c0_77 = arith.constant 0 : index
    %97 = vector.load %arg3[%c0_75, %c2, %c0_76, %c0_77] : memref<1x4x128x8xf32, #tpu.memory_space<vmem>>, vector<1x1x128x8xf32>
    %98 = vector.shape_cast %97 : vector<1x1x128x8xf32> to vector<128x8xf32>
    %c0_78 = arith.constant 0 : index
    %c2_79 = arith.constant 2 : index
    %c0_80 = arith.constant 0 : index
    %c0_81 = arith.constant 0 : index
    %99 = vector.load %arg4[%c0_78, %c2_79, %c0_80, %c0_81] : memref<1x4x128x8xf32, #tpu.memory_space<vmem>>, vector<1x1x128x8xf32>
    %100 = vector.shape_cast %99 : vector<1x1x128x8xf32> to vector<128x8xf32>
    %c0_82 = arith.constant 0 : index
    %c2_83 = arith.constant 2 : index
    %c0_84 = arith.constant 0 : index
    %c0_85 = arith.constant 0 : index
    %101 = vector.load %arg5[%c0_82, %c2_83, %c0_84, %c0_85] : memref<1x4x128x8xf32, #tpu.memory_space<vmem>>, vector<1x1x128x8xf32>
    %102 = vector.shape_cast %101 : vector<1x1x128x8xf32> to vector<128x8xf32>
    %cst_86 = arith.constant dense<0.000000e+00> : vector<128x128xf32>
    %103 = tpu.matmul %98, %100, %cst_86 {dimension_numbers = #tpu.dot_dimension_numbers<[1], [1], [0], [0], [0, 0, 1, 0], [], []>} : vector<128x8xf32>, vector<128x8xf32>, vector<128x128xf32> -> vector<128x128xf32>
    %104 = vector.broadcast %3 : f32 to vector<128x128xf32>
    %105 = arith.addf %103, %104 : vector<128x128xf32>
    %106 = arith.negf %105 : vector<128x128xf32>
    %107 = math.exp %106 : vector<128x128xf32>
    %cst_87 = arith.constant 1.000000e+00 : f32
    %108 = vector.broadcast %cst_87 : f32 to vector<128x128xf32>
    %109 = arith.addf %108, %107 : vector<128x128xf32>
    %110 = arith.divf %108, %109 : vector<128x128xf32>
    %111 = vector.broadcast %5 : vector<1x128xf32> to vector<128x128xf32>
    %112 = arith.mulf %110, %111 : vector<128x128xf32>
    %cst_88 = arith.constant 1.000000e+00 : f32
    %113 = vector.broadcast %cst_88 : f32 to vector<128x128xf32>
    %114 = arith.subf %113, %112 : vector<128x128xf32>
    %cst_89 = arith.constant 1.17549435E-38 : f32
    %cst_90 = arith.constant 1.000000e+00 : f32
    %115 = vector.broadcast %cst_89 : f32 to vector<128x128xf32>
    %116 = arith.maximumf %115, %114 : vector<128x128xf32>
    %117 = vector.broadcast %cst_90 : f32 to vector<128x128xf32>
    %118 = arith.minimumf %117, %116 : vector<128x128xf32>
    %119 = math.log %118 : vector<128x128xf32>
    %cst_91 = arith.constant dense<0.000000e+00> : vector<128x128xf32>
    %120 = tpu.matmul %119, %6, %cst_91 {dimension_numbers = #tpu.dot_dimension_numbers<[1], [0], [0], [1], [0, 0, 1, 1], [], []>} : vector<128x128xf32>, vector<128x128xf32>, vector<128x128xf32> -> vector<128x128xf32>
    %c2_92 = arith.constant 2 : index
    %c0_93 = arith.constant 0 : index
    %c0_94 = arith.constant 0 : index
    %121 = vector.load %arg13[%c2_92, %c0_93, %c0_94] : memref<4x128x1xf32, #tpu.memory_space<vmem>>, vector<1x128x1xf32>
    %122 = vector.shape_cast %121 : vector<1x128x1xf32> to vector<128x1xf32>
    %123 = vector.broadcast %122 : vector<128x1xf32> to vector<128x128xf32>
    %124 = arith.addf %120, %123 : vector<128x128xf32>
    %125 = math.exp %124 : vector<128x128xf32>
    %126 = arith.mulf %112, %125 : vector<128x128xf32>
    %c2_95 = arith.constant 2 : index
    %c0_96 = arith.constant 0 : index
    %c0_97 = arith.constant 0 : index
    %127 = vector.load %arg12[%c2_95, %c0_96, %c0_97] : memref<4x128x8xf32, #tpu.memory_space<vmem>>, vector<1x128x8xf32>
    %128 = vector.shape_cast %127 : vector<1x128x8xf32> to vector<128x8xf32>
    %cst_98 = arith.constant dense<0.000000e+00> : vector<128x8xf32>
    %129 = tpu.matmul %126, %102, %cst_98 {dimension_numbers = #tpu.dot_dimension_numbers<[1], [0], [0], [1], [0, 0, 1, 1], [], []>} : vector<128x128xf32>, vector<128x8xf32>, vector<128x8xf32> -> vector<128x8xf32>
    %130 = arith.addf %128, %129 : vector<128x8xf32>
    %c2_99 = arith.constant 2 : index
    %c0_100 = arith.constant 0 : index
    %c0_101 = arith.constant 0 : index
    %131 = vector.load %arg12[%c2_99, %c0_100, %c0_101] : memref<4x128x8xf32, #tpu.memory_space<vmem>>, vector<1x128x8xf32>
    %132 = vector.shape_cast %131 : vector<1x128x8xf32> to vector<128x8xf32>
    %133 = vector.shape_cast %130 : vector<128x8xf32> to vector<1x128x8xf32>
    tpu.vector_store %arg12[%c2_99, %c0_100, %c0_101], %133 {strides = array<i32>} : memref<4x128x8xf32, #tpu.memory_space<vmem>>, vector<1x128x8xf32>,
    %c2_102 = arith.constant 2 : index
    %c0_103 = arith.constant 0 : index
    %c0_104 = arith.constant 0 : index
    %134 = vector.load %arg13[%c2_102, %c0_103, %c0_104] : memref<4x128x1xf32, #tpu.memory_space<vmem>>, vector<1x128x1xf32>
    %135 = vector.shape_cast %134 : vector<1x128x1xf32> to vector<128x1xf32>
    %cst_105 = arith.constant dense<0.000000e+00> : vector<128xf32>
    %136 = vector.multi_reduction <add>, %119, %cst_105 [1] : vector<128x128xf32> to vector<128xf32>
    %137 = vector.shape_cast %136 : vector<128xf32> to vector<128x1xf32>
    %138 = arith.addf %135, %137 : vector<128x1xf32>
    %c2_106 = arith.constant 2 : index
    %c0_107 = arith.constant 0 : index
    %c0_108 = arith.constant 0 : index
    %139 = vector.load %arg13[%c2_106, %c0_107, %c0_108] : memref<4x128x1xf32, #tpu.memory_space<vmem>>, vector<1x128x1xf32>
    %140 = vector.shape_cast %139 : vector<1x128x1xf32> to vector<128x1xf32>
    %141 = vector.shape_cast %138 : vector<128x1xf32> to vector<1x128x1xf32>
    tpu.vector_store %arg13[%c2_106, %c0_107, %c0_108], %141 {strides = array<i32>} : memref<4x128x1xf32, #tpu.memory_space<vmem>>, vector<1x128x1xf32>,
    %c0_109 = arith.constant 0 : index
    %c3 = arith.constant 3 : index
    %c0_110 = arith.constant 0 : index
    %c0_111 = arith.constant 0 : index
    %142 = vector.load %arg3[%c0_109, %c3, %c0_110, %c0_111] : memref<1x4x128x8xf32, #tpu.memory_space<vmem>>, vector<1x1x128x8xf32>
    %143 = vector.shape_cast %142 : vector<1x1x128x8xf32> to vector<128x8xf32>
    %c0_112 = arith.constant 0 : index
    %c3_113 = arith.constant 3 : index
    %c0_114 = arith.constant 0 : index
    %c0_115 = arith.constant 0 : index
    %144 = vector.load %arg4[%c0_112, %c3_113, %c0_114, %c0_115] : memref<1x4x128x8xf32, #tpu.memory_space<vmem>>, vector<1x1x128x8xf32>
    %145 = vector.shape_cast %144 : vector<1x1x128x8xf32> to vector<128x8xf32>
    %c0_116 = arith.constant 0 : index
    %c3_117 = arith.constant 3 : index
    %c0_118 = arith.constant 0 : index
    %c0_119 = arith.constant 0 : index
    %146 = vector.load %arg5[%c0_116, %c3_117, %c0_118, %c0_119] : memref<1x4x128x8xf32, #tpu.memory_space<vmem>>, vector<1x1x128x8xf32>
    %147 = vector.shape_cast %146 : vector<1x1x128x8xf32> to vector<128x8xf32>
    %cst_120 = arith.constant dense<0.000000e+00> : vector<128x128xf32>
    %148 = tpu.matmul %143, %145, %cst_120 {dimension_numbers = #tpu.dot_dimension_numbers<[1], [1], [0], [0], [0, 0, 1, 0], [], []>} : vector<128x8xf32>, vector<128x8xf32>, vector<128x128xf32> -> vector<128x128xf32>
    %149 = vector.broadcast %3 : f32 to vector<128x128xf32>
    %150 = arith.addf %148, %149 : vector<128x128xf32>
    %151 = arith.negf %150 : vector<128x128xf32>
    %152 = math.exp %151 : vector<128x128xf32>
    %cst_121 = arith.constant 1.000000e+00 : f32
    %153 = vector.broadcast %cst_121 : f32 to vector<128x128xf32>
    %154 = arith.addf %153, %152 : vector<128x128xf32>
    %155 = arith.divf %153, %154 : vector<128x128xf32>
    %156 = vector.broadcast %5 : vector<1x128xf32> to vector<128x128xf32>
    %157 = arith.mulf %155, %156 : vector<128x128xf32>
    %cst_122 = arith.constant 1.000000e+00 : f32
    %158 = vector.broadcast %cst_122 : f32 to vector<128x128xf32>
    %159 = arith.subf %158, %157 : vector<128x128xf32>
    %cst_123 = arith.constant 1.17549435E-38 : f32
    %cst_124 = arith.constant 1.000000e+00 : f32
    %160 = vector.broadcast %cst_123 : f32 to vector<128x128xf32>
    %161 = arith.maximumf %160, %159 : vector<128x128xf32>
    %162 = vector.broadcast %cst_124 : f32 to vector<128x128xf32>
    %163 = arith.minimumf %162, %161 : vector<128x128xf32>
    %164 = math.log %163 : vector<128x128xf32>
    %cst_125 = arith.constant dense<0.000000e+00> : vector<128x128xf32>
    %165 = tpu.matmul %164, %6, %cst_125 {dimension_numbers = #tpu.dot_dimension_numbers<[1], [0], [0], [1], [0, 0, 1, 1], [], []>} : vector<128x128xf32>, vector<128x128xf32>, vector<128x128xf32> -> vector<128x128xf32>
    %c3_126 = arith.constant 3 : index
    %c0_127 = arith.constant 0 : index
    %c0_128 = arith.constant 0 : index
    %166 = vector.load %arg13[%c3_126, %c0_127, %c0_128] : memref<4x128x1xf32, #tpu.memory_space<vmem>>, vector<1x128x1xf32>
    %167 = vector.shape_cast %166 : vector<1x128x1xf32> to vector<128x1xf32>
    %168 = vector.broadcast %167 : vector<128x1xf32> to vector<128x128xf32>
    %169 = arith.addf %165, %168 : vector<128x128xf32>
    %170 = math.exp %169 : vector<128x128xf32>
    %171 = arith.mulf %157, %170 : vector<128x128xf32>
    %c3_129 = arith.constant 3 : index
    %c0_130 = arith.constant 0 : index
    %c0_131 = arith.constant 0 : index
    %172 = vector.load %arg12[%c3_129, %c0_130, %c0_131] : memref<4x128x8xf32, #tpu.memory_space<vmem>>, vector<1x128x8xf32>
    %173 = vector.shape_cast %172 : vector<1x128x8xf32> to vector<128x8xf32>
    %cst_132 = arith.constant dense<0.000000e+00> : vector<128x8xf32>
    %174 = tpu.matmul %171, %147, %cst_132 {dimension_numbers = #tpu.dot_dimension_numbers<[1], [0], [0], [1], [0, 0, 1, 1], [], []>} : vector<128x128xf32>, vector<128x8xf32>, vector<128x8xf32> -> vector<128x8xf32>
    %175 = arith.addf %173, %174 : vector<128x8xf32>
    %c3_133 = arith.constant 3 : index
    %c0_134 = arith.constant 0 : index
    %c0_135 = arith.constant 0 : index
    %176 = vector.load %arg12[%c3_133, %c0_134, %c0_135] : memref<4x128x8xf32, #tpu.memory_space<vmem>>, vector<1x128x8xf32>
    %177 = vector.shape_cast %176 : vector<1x128x8xf32> to vector<128x8xf32>
    %178 = vector.shape_cast %175 : vector<128x8xf32> to vector<1x128x8xf32>
    tpu.vector_store %arg12[%c3_133, %c0_134, %c0_135], %178 {strides = array<i32>} : memref<4x128x8xf32, #tpu.memory_space<vmem>>, vector<1x128x8xf32>,
    %c3_136 = arith.constant 3 : index
    %c0_137 = arith.constant 0 : index
    %c0_138 = arith.constant 0 : index
    %179 = vector.load %arg13[%c3_136, %c0_137, %c0_138] : memref<4x128x1xf32, #tpu.memory_space<vmem>>, vector<1x128x1xf32>
    %180 = vector.shape_cast %179 : vector<1x128x1xf32> to vector<128x1xf32>
    %cst_139 = arith.constant dense<0.000000e+00> : vector<128xf32>
    %181 = vector.multi_reduction <add>, %164, %cst_139 [1] : vector<128x128xf32> to vector<128xf32>
    %182 = vector.shape_cast %181 : vector<128xf32> to vector<128x1xf32>
    %183 = arith.addf %180, %182 : vector<128x1xf32>
    %c3_140 = arith.constant 3 : index
    %c0_141 = arith.constant 0 : index
    %c0_142 = arith.constant 0 : index
    %184 = vector.load %arg13[%c3_140, %c0_141, %c0_142] : memref<4x128x1xf32, #tpu.memory_space<vmem>>, vector<1x128x1xf32>
    %185 = vector.shape_cast %184 : vector<1x128x1xf32> to vector<128x1xf32>
    %186 = vector.shape_cast %183 : vector<128x1xf32> to vector<1x128x1xf32>
    tpu.vector_store %arg13[%c3_140, %c0_141, %c0_142], %186 {strides = array<i32>} : memref<4x128x1xf32, #tpu.memory_space<vmem>>, vector<1x128x1xf32>,
    %c0_i32_143 = arith.constant 0 : i32
    %187 = arith.cmpi eq, %arg2, %c0_i32_143 : i32
    %188 = arith.extui %187 : i1 to i32
    %c0_i32_144 = arith.constant 0 : i32
    %189 = arith.cmpi ne, %188, %c0_i32_144 : i32
    scf.if %189 {
      %cst_145 = arith.constant 0.000000e+00 : f32
      %190 = vector.broadcast %cst_145 : f32 to vector<128x32xf32>
      %c0_146 = arith.constant 0 : index
      %c0_147 = arith.constant 0 : index
      %c0_148 = arith.constant 0 : index
      %191 = vector.load %arg12[%c0_146, %c0_147, %c0_148] : memref<4x128x8xf32, #tpu.memory_space<vmem>>, vector<1x128x8xf32>
      %192 = vector.shape_cast %191 : vector<1x128x8xf32> to vector<128x8xf32>
      %c0_149 = arith.constant 0 : index
      %c0_150 = arith.constant 0 : index
      %c0_151 = arith.constant 0 : index
      %193 = vector.load %arg8[%c0_149, %c0_150, %c0_151] : memref<4x8x32xf32, #tpu.memory_space<vmem>>, vector<1x8x32xf32>
      %194 = vector.shape_cast %193 : vector<1x8x32xf32> to vector<8x32xf32>
      %cst_152 = arith.constant dense<0.000000e+00> : vector<128x32xf32>
      %195 = tpu.matmul %192, %194, %cst_152 {dimension_numbers = #tpu.dot_dimension_numbers<[1], [0], [0], [1], [0, 0, 1, 1], [], []>} : vector<128x8xf32>, vector<8x32xf32>, vector<128x32xf32> -> vector<128x32xf32>
      %196 = arith.addf %190, %195 : vector<128x32xf32>
      %c1_153 = arith.constant 1 : index
      %c0_154 = arith.constant 0 : index
      %c0_155 = arith.constant 0 : index
      %197 = vector.load %arg12[%c1_153, %c0_154, %c0_155] : memref<4x128x8xf32, #tpu.memory_space<vmem>>, vector<1x128x8xf32>
      %198 = vector.shape_cast %197 : vector<1x128x8xf32> to vector<128x8xf32>
      %c1_156 = arith.constant 1 : index
      %c0_157 = arith.constant 0 : index
      %c0_158 = arith.constant 0 : index
      %199 = vector.load %arg8[%c1_156, %c0_157, %c0_158] : memref<4x8x32xf32, #tpu.memory_space<vmem>>, vector<1x8x32xf32>
      %200 = vector.shape_cast %199 : vector<1x8x32xf32> to vector<8x32xf32>
      %cst_159 = arith.constant dense<0.000000e+00> : vector<128x32xf32>
      %201 = tpu.matmul %198, %200, %cst_159 {dimension_numbers = #tpu.dot_dimension_numbers<[1], [0], [0], [1], [0, 0, 1, 1], [], []>} : vector<128x8xf32>, vector<8x32xf32>, vector<128x32xf32> -> vector<128x32xf32>
      %202 = arith.addf %196, %201 : vector<128x32xf32>
      %c2_160 = arith.constant 2 : index
      %c0_161 = arith.constant 0 : index
      %c0_162 = arith.constant 0 : index
      %203 = vector.load %arg12[%c2_160, %c0_161, %c0_162] : memref<4x128x8xf32, #tpu.memory_space<vmem>>, vector<1x128x8xf32>
      %204 = vector.shape_cast %203 : vector<1x128x8xf32> to vector<128x8xf32>
      %c2_163 = arith.constant 2 : index
      %c0_164 = arith.constant 0 : index
      %c0_165 = arith.constant 0 : index
      %205 = vector.load %arg8[%c2_163, %c0_164, %c0_165] : memref<4x8x32xf32, #tpu.memory_space<vmem>>, vector<1x8x32xf32>
      %206 = vector.shape_cast %205 : vector<1x8x32xf32> to vector<8x32xf32>
      %cst_166 = arith.constant dense<0.000000e+00> : vector<128x32xf32>
      %207 = tpu.matmul %204, %206, %cst_166 {dimension_numbers = #tpu.dot_dimension_numbers<[1], [0], [0], [1], [0, 0, 1, 1], [], []>} : vector<128x8xf32>, vector<8x32xf32>, vector<128x32xf32> -> vector<128x32xf32>
      %208 = arith.addf %202, %207 : vector<128x32xf32>
      %c3_167 = arith.constant 3 : index
      %c0_168 = arith.constant 0 : index
      %c0_169 = arith.constant 0 : index
      %209 = vector.load %arg12[%c3_167, %c0_168, %c0_169] : memref<4x128x8xf32, #tpu.memory_space<vmem>>, vector<1x128x8xf32>
      %210 = vector.shape_cast %209 : vector<1x128x8xf32> to vector<128x8xf32>
      %c3_170 = arith.constant 3 : index
      %c0_171 = arith.constant 0 : index
      %c0_172 = arith.constant 0 : index
      %211 = vector.load %arg8[%c3_170, %c0_171, %c0_172] : memref<4x8x32xf32, #tpu.memory_space<vmem>>, vector<1x8x32xf32>
      %212 = vector.shape_cast %211 : vector<1x8x32xf32> to vector<8x32xf32>
      %cst_173 = arith.constant dense<0.000000e+00> : vector<128x32xf32>
      %213 = tpu.matmul %210, %212, %cst_173 {dimension_numbers = #tpu.dot_dimension_numbers<[1], [0], [0], [1], [0, 0, 1, 1], [], []>} : vector<128x8xf32>, vector<8x32xf32>, vector<128x32xf32> -> vector<128x32xf32>
      %214 = arith.addf %208, %213 : vector<128x32xf32>
      %c0_174 = arith.constant 0 : index
      %c0_175 = arith.constant 0 : index
      %215 = vector.load %arg9[%c0_174, %c0_175] : memref<1x32xf32, #tpu.memory_space<vmem>>, vector<1x32xf32>
      %216 = vector.broadcast %215 : vector<1x32xf32> to vector<128x32xf32>
      %217 = arith.addf %214, %216 : vector<128x32xf32>
      %c0_176 = arith.constant 0 : index
      %c0_177 = arith.constant 0 : index
      %c0_178 = arith.constant 0 : index
      %218 = vector.load %arg11[%c0_176, %c0_177, %c0_178] : memref<1x128x32xf32, #tpu.memory_space<vmem>>, vector<1x128x32xf32>
      %219 = vector.shape_cast %218 : vector<1x128x32xf32> to vector<128x32xf32>
      %220 = vector.shape_cast %217 : vector<128x32xf32> to vector<1x128x32xf32>
      tpu.vector_store %arg11[%c0_176, %c0_177, %c0_178], %220 {strides = array<i32>} : memref<1x128x32xf32, #tpu.memory_space<vmem>>, vector<1x128x32xf32>,
    } else {
    }
    return
  }
  func.func @transform_0(%arg0: i32, %arg1: i32, %arg2: i32) -> (i32, i32, i32, i32) {
    %c0_i32 = arith.constant 0 : i32
    %c0_i32_0 = arith.constant 0 : i32
    %c0_i32_1 = arith.constant 0 : i32
    return %arg0, %c0_i32, %arg1, %c0_i32_0 : i32, i32, i32, i32
  }
  func.func @transform_1(%arg0: i32, %arg1: i32, %arg2: i32) -> (i32, i32, i32, i32) {
    %c0_i32 = arith.constant 0 : i32
    %c0_i32_0 = arith.constant 0 : i32
    %c0_i32_1 = arith.constant 0 : i32
    return %arg0, %c0_i32, %arg2, %c0_i32_0 : i32, i32, i32, i32
  }
  func.func @transform_2(%arg0: i32, %arg1: i32, %arg2: i32) -> (i32, i32, i32, i32) {
    %c0_i32 = arith.constant 0 : i32
    %c0_i32_0 = arith.constant 0 : i32
    %c0_i32_1 = arith.constant 0 : i32
    return %arg0, %c0_i32, %arg2, %c0_i32_0 : i32, i32, i32, i32
  }
  func.func @transform_3(%arg0: i32, %arg1: i32, %arg2: i32) -> (i32, i32, i32) {
    %c0_i32 = arith.constant 0 : i32
    %c0_i32_0 = arith.constant 0 : i32
    return %arg0, %c0_i32, %arg2 : i32, i32, i32
  }
  func.func @transform_4(%arg0: i32, %arg1: i32, %arg2: i32) -> (i32, i32) {
    %c0_i32 = arith.constant 0 : i32
    %c0_i32_0 = arith.constant 0 : i32
    %c0_i32_1 = arith.constant 0 : i32
    return %c0_i32, %c0_i32_0 : i32, i32
  }
  func.func @transform_5(%arg0: i32, %arg1: i32, %arg2: i32) -> (i32, i32, i32) {
    %c0_i32 = arith.constant 0 : i32
    %c0_i32_0 = arith.constant 0 : i32
    %c0_i32_1 = arith.constant 0 : i32
    %c0_i32_2 = arith.constant 0 : i32
    return %c0_i32, %c0_i32_0, %c0_i32_1 : i32, i32, i32
  }
  func.func @transform_6(%arg0: i32, %arg1: i32, %arg2: i32) -> (i32, i32) {
    %c0_i32 = arith.constant 0 : i32
    %c0_i32_0 = arith.constant 0 : i32
    %c0_i32_1 = arith.constant 0 : i32
    return %c0_i32, %c0_i32_0 : i32, i32
  }
  func.func @transform_7(%arg0: i32, %arg1: i32, %arg2: i32) -> (i32, i32) {
    %c0_i32 = arith.constant 0 : i32
    %c0_i32_0 = arith.constant 0 : i32
    %c0_i32_1 = arith.constant 0 : i32
    return %c0_i32, %c0_i32_0 : i32, i32
  }
  func.func @transform_8(%arg0: i32, %arg1: i32, %arg2: i32) -> (i32, i32, i32) {
    %c0_i32 = arith.constant 0 : i32
    %c0_i32_0 = arith.constant 0 : i32
    return %arg0, %arg1, %c0_i32 : i32, i32, i32
  }
}

</mosaic_0001>

<bundles_post_ra>
// kernel: tpu_custom_call.1
= control target key start
LH: loop header
LB: loop body
LE: loop exit
PB: predicated region body
PF: predicated region fallthrough
CT: control target
= control target key end

     0   :  { %s6491_s29 = smov 0   ;;  %s6493_s30 = smov 0   ;;  %s9664_s0 = inlined_call_operand.vmem [shape: f32[2,4,128,8], index: 0, kind: input, shape index: {}]   ;;  %s9665_s1 = inlined_call_operand.vmem [shape: f32[2,4,128,8], index: 1, kind: input, shape index: {}]   ;;  %s9666_s2 = inlined_call_operand.vmem [shape: f32[2,4,128,8], index: 2, kind: input, shape index: {}]   ;;  %s9667_s3 = inlined_call_operand.vmem [shape: f32[2,1,128], index: 3, kind: input, shape index: {}]   ;;  %s9668_s4 = inlined_call_operand.vmem [shape: f32[128,128], index: 4, kind: input, shape index: {}]   ;;  %s9669_s5 = inlined_call_operand.vmem [shape: f32[4,8,32], index: 5, kind: input, shape index: {}]   ;;  %s9670_s6 = inlined_call_operand.vmem [shape: f32[1,32], index: 6, kind: input, shape index: {}]   ;;  %s9671_s7 = inlined_call_operand.<no memory space> [shape: f32[1,1], index: 7, kind: input, shape index: {}]   ;;  %s9672_s8 = inlined_call_operand.vmem [shape: f32[2,128,32], index: 8, kind: output, shape index: {}]  }
   0x1   :  { %13 = sst [smem:[#allocation4]] %s9671_s7  ;;  %s6495_s9 = smov 0  }
   0x2 LB: > { %s38_s7 = sadd.s32 1, %s6435_s30  ;;  %p5404_p0 = scmp.ge.s32.totalorder %s6439_s9, 1  ;;  %s6439_s9 = sphi %s6495_s9, %s19_s9   ;;  %s6435_s30 = sphi %s6493_s30, %s10013_s30   ;;  %s6431_s29 = sphi %s6491_s29, %s10012_s29  }
   0x3   : > { %p40_p1 = scmp.ge.s32.totalorder %s38_s7, 2  ;;  %p338_p2 = scmp.lt.s32.totalorder %s6439_s9, 3 }
   0x5   : > { %s10015_s7 = smov (%p40_p1, %s38_s7), 0  ;;  %p339_p3 = pnand %p5404_p0, %p338_p2 }
   0x7   : > { %342 = sbr.rel (%p339_p3) target bundleno = 1419 (0x58b), region = 52 }
   0xc   : > { %p405_p4 = scmp.lt.s32.totalorder %s6431_s29, 1  ;;  %vm519_vm0 = vcmask 7168   ;;  %vm454_vm1 = vcmask 64512   ;;  %v6441_v0 = vmov 0.0   ;;  %v6442_v5 = vmov 0   ;;  %s584_s20 = sld [smem:[#allocation4]] }
   0xd   : > { %522 = vst.msk [vmem:[#allocation3 + $0x10] sm:$0xff] %vm519_vm0, %v6441_v0  ;;  %5881 = vset.pattern.permute.xlu1 %v6442_v5  ;;  %5880 = vset.pattern.permute.xlu0 %v6442_v5 }
   0xe   : > { %s10017_s29 = smov (!%p405_p4, %s6431_s29), 1  ;;  %455 = vst.msk [vmem:[#allocation2] sm:$0xff] %vm454_vm1, %v6441_v0  ;;  %5882 = vset.pattern.permute.xlu2 %v6442_v5 }
   0xf   : > { %456 = vst.msk [vmem:[#allocation2 + $0x8] sm:$0xff] %vm454_vm1, %v6441_v0  ;;  %s6518_s10 = sshll.u32 %s10017_s29, 9  ;;  %s6524_s13 = scalar_lea.vmem %s9667_s3, %s10017_s29 }
  0x10   : > { %457 = vst.msk [vmem:[#allocation2 + $0x10] sm:$0xff] %vm454_vm1, %v6441_v0  ;;  %s6532_s16 = scalar_lea.vmem %s9665_s1, %s6518_s10  ;;  %s6720_s19 = scalar_lea.vmem %s9664_s0, %s6518_s10 }
  0x11   : > { %458 = vst.msk [vmem:[#allocation2 + $0x18] sm:$0xff] %vm454_vm1, %v6441_v0  ;;  %v633_v1 = vld [vmem:[%s6532_s16 + $0x78] sm:$0xff]  ;;  %v632_v3 = vld [vmem:[%s6532_s16 + $0x70] sm:$0xff]  ;;  %v631_v6 = vld [vmem:[%s6532_s16 + $0x68] sm:$0xff]  ;;  %s8129_s25 = scalar_lea.vmem %s9666_s2, %s6518_s10  ;;  %s5821_s14 = sshll.u32 %s10017_s29, 7 }
  0x12   : > { %v5492_v2 = vld [vmem:[%s6532_s16 + $0xf8] sm:$0xff]  ;;  %459 = vst.msk [vmem:[#allocation2 + $0x20] sm:$0xff] %vm454_vm1, %v6441_v0  ;;  %5413 = vmatpush.xpose.msk.msra.mxu0 %vm454_vm1, %v633_v1  ;;  %v5491_v4 = vld [vmem:[%s6532_s16 + $0xf0] sm:$0xff]  ;;  %v5490_v7 = vld [vmem:[%s6532_s16 + $0xe8] sm:$0xff]  ;;  %s9605_s21 = scalar_lea.vmem %s9672_s8, %s5821_s14 }
  0x13   : > { %5509 = vmatpush.xpose.msk.msra.mxu3 %vm454_vm1, %v5492_v2  ;;  %460 = vst.msk [vmem:[#allocation2 + $0x28] sm:$0xff] %vm454_vm1, %v6441_v0  ;;  %v630_v9 = vld [vmem:[%s6532_s16 + $0x60] sm:$0xff]  ;;  %v629_v11 = vld [vmem:[%s6532_s16 + $0x58] sm:$0xff]  ;;  %v628_v13 = vld [vmem:[%s6532_s16 + $0x50] sm:$0xff] }
  0x14   : > { %461 = vst.msk [vmem:[#allocation2 + $0x30] sm:$0xff] %vm454_vm1, %v6441_v0  ;;  %v1218_v8 = vld [vmem:[#allocation3 + $0x10] sm:$0xff]  ;;  %v5489_v10 = vld [vmem:[%s6532_s16 + $0xe0] sm:$0xff]  ;;  %v5488_v12 = vld [vmem:[%s6532_s16 + $0xd8] sm:$0xff] }
  0x15   : > { %462 = vst.msk [vmem:[#allocation2 + $0x38] sm:$0xff] %vm454_vm1, %v6441_v0  ;;  %1244 = vperm.xlu1 %5881, %v1218_v8   ;;  %v5487_v14 = vld [vmem:[%s6532_s16 + $0xd0] sm:$0xff]  ;;  %v627_v15 = vld [vmem:[%s6532_s16 + $0x48] sm:$0xff]  ;;  %v626_v17 = vld [vmem:[%s6532_s16 + $0x40] sm:$0xff] }
  0x16   : > { %463 = vst.msk [vmem:[#allocation2 + $0x40] sm:$0xff] %vm454_vm1, %v6441_v0  ;;  %5414 = vmatpush.xpose.msk.msra.mxu0 %vm454_vm1, %v632_v3  ;;  %v5486_v16 = vld [vmem:[%s6532_s16 + $0xc8] sm:$0xff]  ;;  %v5485_v18 = vld [vmem:[%s6532_s16 + $0xc0] sm:$0xff]  ;;  %v625_v19 = vld [vmem:[%s6532_s16 + $0x38] sm:$0xff] }
  0x17   : > { %5510 = vmatpush.xpose.msk.msra.mxu3 %vm454_vm1, %v5491_v4  ;;  %464 = vst.msk [vmem:[#allocation2 + $0x48] sm:$0xff] %vm454_vm1, %v6441_v0  ;;  %v5484_v20 = vld [vmem:[%s6532_s16 + $0xb8] sm:$0xff]  ;;  %v624_v21 = vld [vmem:[%s6532_s16 + $0x30] sm:$0xff]  ;;  %v623_v23 = vld [vmem:[%s6532_s16 + $0x28] sm:$0xff] }
  0x18   : > { %465 = vst.msk [vmem:[#allocation2 + $0x50] sm:$0xff] %vm454_vm1, %v6441_v0  ;;  %v5483_v22 = vld [vmem:[%s6532_s16 + $0xb0] sm:$0xff]  ;;  %v5482_v24 = vld [vmem:[%s6532_s16 + $0xa8] sm:$0xff]  ;;  %v622_v25 = vld [vmem:[%s6532_s16 + $0x20] sm:$0xff] }
  0x19   : > { %466 = vst.msk [vmem:[#allocation2 + $0x58] sm:$0xff] %vm454_vm1, %v6441_v0  ;;  %v5481_v26 = vld [vmem:[%s6532_s16 + $0xa0] sm:$0xff]  ;;  %v621_v27 = vld [vmem:[%s6532_s16 + $0x18] sm:$0xff]  ;;  %v620_v29 = vld [vmem:[%s6532_s16 + $0x10] sm:$0xff] }
  0x1a   : > { %467 = vst.msk [vmem:[#allocation2 + $0x60] sm:$0xff] %vm454_vm1, %v6441_v0  ;;  %5415 = vmatpush.xpose.msk.msra.mxu0 %vm454_vm1, %v631_v6  ;;  %v5480_v28 = vld [vmem:[%s6532_s16 + $0x98] sm:$0xff]  ;;  %v5479_v30 = vld [vmem:[%s6532_s16 + $0x90] sm:$0xff]  ;;  %v619_v31 = vld [vmem:[%s6532_s16 + $0x8] sm:$0xff] }
  0x1b   : > { %5511 = vmatpush.xpose.msk.msra.mxu3 %vm454_vm1, %v5490_v7  ;;  %468 = vst.msk [vmem:[#allocation2 + $0x68] sm:$0xff] %vm454_vm1, %v6441_v0  ;;  %v5478_v32 = vld [vmem:[%s6532_s16 + $0x88] sm:$0xff]  ;;  %v618_v33 = vld [vmem:[%s6532_s16] sm:$0xff]  ;;  %v604_v45 = vld [vmem:[%s6720_s19 + $0x10] sm:$0xff] }
  0x1c   : > { %469 = vst.msk [vmem:[#allocation2 + $0x70] sm:$0xff] %vm454_vm1, %v6441_v0  ;;  %v5477_v34 = vld [vmem:[%s6532_s16 + $0x80] sm:$0xff]  ;;  %v603_v39 = vld [vmem:[%s6720_s19 + $0x8] sm:$0xff]  ;;  %v5463_v46 = vld [vmem:[%s6720_s19 + $0x90] sm:$0xff] }
  0x1d   : > { %470 = vst.msk [vmem:[#allocation2 + $0x78] sm:$0xff] %vm454_vm1, %v6441_v0  ;;  %v602_v35 = vld [vmem:[%s6720_s19] sm:$0xff]  ;;  %v5462_v40 = vld [vmem:[%s6720_s19 + $0x88] sm:$0xff]  ;;  %v605_v50 = vld [vmem:[%s6720_s19 + $0x18] sm:$0xff] }
  0x1e   : > { %471 = vst.msk [vmem:[#allocation2 + $0x80] sm:$0xff] %vm454_vm1, %v6441_v0  ;;  %5416 = vmatpush.xpose.msk.msra.mxu0 %vm454_vm1, %v630_v9  ;;  %v5461_v36 = vld [vmem:[%s6720_s19 + $0x80] sm:$0xff]  ;;  %v5464_v51 = vld [vmem:[%s6720_s19 + $0x98] sm:$0xff]  ;;  %v607_v60 = vld [vmem:[%s6720_s19 + $0x28] sm:$0xff] }
  0x1f   : > { %5512 = vmatpush.xpose.msk.msra.mxu3 %vm454_vm1, %v5489_v10  ;;  %472 = vst.msk [vmem:[#allocation2 + $0x88] sm:$0xff] %vm454_vm1, %v6441_v0  ;;  %v606_v55 = vld [vmem:[%s6720_s19 + $0x20] sm:$0xff]  ;;  %v5466_v61 = vld [vmem:[%s6720_s19 + $0xa8] sm:$0xff]  ;;  %v608_v2 = vld [vmem:[%s6720_s19 + $0x30] sm:$0xff] }
  0x20   : > { %473 = vst.msk [vmem:[#allocation2 + $0x90] sm:$0xff] %vm454_vm1, %v6441_v0  ;;  %v5465_v56 = vld [vmem:[%s6720_s19 + $0xa0] sm:$0xff]  ;;  %v5467_v3 = vld [vmem:[%s6720_s19 + $0xb0] sm:$0xff]  ;;  %v609_v7 = vld [vmem:[%s6720_s19 + $0x38] sm:$0xff] }
  0x21   : > { %474 = vst.msk [vmem:[#allocation2 + $0x98] sm:$0xff] %vm454_vm1, %v6441_v0  ;;  %v5468_v8 = vld [vmem:[%s6720_s19 + $0xb8] sm:$0xff] }
  0x22   : > { %475 = vst.msk [vmem:[#allocation2 + $0xa0] sm:$0xff] %vm454_vm1, %v6441_v0  ;;  %5417 = vmatpush.xpose.msk.msra.mxu0 %vm454_vm1, %v629_v11  ;;  %v5588_v9 = vld [vmem:[%s6532_s16 + $0x178] sm:$0xff] }
  0x23   : > { %5513 = vmatpush.xpose.msk.msra.mxu3 %vm454_vm1, %v5488_v12  ;;  %476 = vst.msk [vmem:[#allocation2 + $0xa8] sm:$0xff] %vm454_vm1, %v6441_v0 }
  0x24   : > { %477 = vst.msk [vmem:[#allocation2 + $0xb0] sm:$0xff] %vm454_vm1, %v6441_v0 }
  0x25   : > { %478 = vst.msk [vmem:[#allocation2 + $0xb8] sm:$0xff] %vm454_vm1, %v6441_v0 }
  0x26   : > { %479 = vst.msk [vmem:[#allocation2 + $0xc0] sm:$0xff] %vm454_vm1, %v6441_v0  ;;  %5418 = vmatpush.xpose.msk.msra.mxu0 %vm454_vm1, %v628_v13  ;;  %v610_v13 = vld [vmem:[%s6720_s19 + $0x40] sm:$0xff] }
  0x27   : > { %5514 = vmatpush.xpose.msk.msra.mxu3 %vm454_vm1, %v5487_v14  ;;  %480 = vst.msk [vmem:[#allocation2 + $0xc8] sm:$0xff] %vm454_vm1, %v6441_v0  ;;  %v5469_v14 = vld [vmem:[%s6720_s19 + $0xc0] sm:$0xff] }
  0x28   : > { %481 = vst.msk [vmem:[#allocation2 + $0xd0] sm:$0xff] %vm454_vm1, %v6441_v0 }
  0x29   : > { %482 = vst.msk [vmem:[#allocation2 + $0xd8] sm:$0xff] %vm454_vm1, %v6441_v0 }
  0x2a   : > { %483 = vst.msk [vmem:[#allocation2 + $0xe0] sm:$0xff] %vm454_vm1, %v6441_v0  ;;  %5419 = vmatpush.xpose.msk.msra.mxu0 %vm454_vm1, %v627_v15  ;;  %v5587_v15 = vld [vmem:[%s6532_s16 + $0x170] sm:$0xff] }
  0x2b   : > { %5515 = vmatpush.xpose.msk.msra.mxu3 %vm454_vm1, %v5486_v16  ;;  %484 = vst.msk [vmem:[#allocation2 + $0xe8] sm:$0xff] %vm454_vm1, %v6441_v0 }
  0x2c   : > { %485 = vst.msk [vmem:[#allocation2 + $0xf0] sm:$0xff] %vm454_vm1, %v6441_v0 }
  0x2d   : > { %486 = vst.msk [vmem:[#allocation2 + $0xf8] sm:$0xff] %vm454_vm1, %v6441_v0 }
  0x2e   : > { %487 = vst.msk [vmem:[#allocation2 + $0x100] sm:$0xff] %vm454_vm1, %v6441_v0  ;;  %5420 = vmatpush.xpose.msk.msra.mxu0 %vm454_vm1, %v626_v17 }
  0x2f   : > { %5516 = vmatpush.xpose.msk.msra.mxu3 %vm454_vm1, %v5485_v18  ;;  %488 = vst.msk [vmem:[#allocation2 + $0x108] sm:$0xff] %vm454_vm1, %v6441_v0 }
  0x30   : > { %489 = vst.msk [vmem:[#allocation2 + $0x110] sm:$0xff] %vm454_vm1, %v6441_v0 }
  0x31   : > { %490 = vst.msk [vmem:[#allocation2 + $0x118] sm:$0xff] %vm454_vm1, %v6441_v0 }
  0x32   : > { %491 = vst.msk [vmem:[#allocation2 + $0x120] sm:$0xff] %vm454_vm1, %v6441_v0  ;;  %5421 = vmatpush.xpose.msk.msra.mxu0 %vm454_vm1, %v625_v19  ;;  %v611_v19 = vld [vmem:[%s6720_s19 + $0x48] sm:$0xff] }
  0x33   : > { %5517 = vmatpush.xpose.msk.msra.mxu3 %vm454_vm1, %v5484_v20  ;;  %492 = vst.msk [vmem:[#allocation2 + $0x128] sm:$0xff] %vm454_vm1, %v6441_v0  ;;  %v5470_v20 = vld [vmem:[%s6720_s19 + $0xc8] sm:$0xff] }
  0x34   : > { %493 = vst.msk [vmem:[#allocation2 + $0x130] sm:$0xff] %vm454_vm1, %v6441_v0 }
  0x35   : > { %494 = vst.msk [vmem:[#allocation2 + $0x138] sm:$0xff] %vm454_vm1, %v6441_v0 }
  0x36   : > { %495 = vst.msk [vmem:[#allocation2 + $0x140] sm:$0xff] %vm454_vm1, %v6441_v0  ;;  %5422 = vmatpush.xpose.msk.msra.mxu0 %vm454_vm1, %v624_v21  ;;  %v5585_v21 = vld [vmem:[%s6532_s16 + $0x160] sm:$0xff] }
  0x37   : > { %496 = vst.msk [vmem:[#allocation2 + $0x148] sm:$0xff] %vm454_vm1, %v6441_v0  ;;  %5518 = vmatpush.xpose.msk.msra.mxu3 %vm454_vm1, %v5483_v22 }
  0x38   : > { %497 = vst.msk [vmem:[#allocation2 + $0x150] sm:$0xff] %vm454_vm1, %v6441_v0 }
  0x39   : > { %498 = vst.msk [vmem:[#allocation2 + $0x158] sm:$0xff] %vm454_vm1, %v6441_v0 }
  0x3a   : > { %499 = vst.msk [vmem:[#allocation2 + $0x160] sm:$0xff] %vm454_vm1, %v6441_v0  ;;  %5423 = vmatpush.xpose.msk.msra.mxu0 %vm454_vm1, %v623_v23  ;;  %v5584_v23 = vld [vmem:[%s6532_s16 + $0x158] sm:$0xff] }
  0x3b   : > { %500 = vst.msk [vmem:[#allocation2 + $0x168] sm:$0xff] %vm454_vm1, %v6441_v0  ;;  %5519 = vmatpush.xpose.msk.msra.mxu3 %vm454_vm1, %v5482_v24 }
  0x3c   : > { %501 = vst.msk [vmem:[#allocation2 + $0x170] sm:$0xff] %vm454_vm1, %v6441_v0 }
  0x3d   : > { %502 = vst.msk [vmem:[#allocation2 + $0x178] sm:$0xff] %vm454_vm1, %v6441_v0 }
  0x3e   : > { %503 = vst.msk [vmem:[#allocation2 + $0x180] sm:$0xff] %vm454_vm1, %v6441_v0  ;;  %5424 = vmatpush.xpose.msk.msra.mxu0 %vm454_vm1, %v622_v25 }
  0x3f   : > { %504 = vst.msk [vmem:[#allocation2 + $0x188] sm:$0xff] %vm454_vm1, %v6441_v0  ;;  %5520 = vmatpush.xpose.msk.msra.mxu3 %vm454_vm1, %v5481_v26  ;;  %v612_v26 = vld [vmem:[%s6720_s19 + $0x50] sm:$0xff] }
  0x40   : > { %505 = vst.msk [vmem:[#allocation2 + $0x190] sm:$0xff] %vm454_vm1, %v6441_v0 }
  0x41   : > { %506 = vst.msk [vmem:[#allocation2 + $0x198] sm:$0xff] %vm454_vm1, %v6441_v0 }
  0x42   : > { %507 = vst.msk [vmem:[#allocation2 + $0x1a0] sm:$0xff] %vm454_vm1, %v6441_v0  ;;  %5425 = vmatpush.xpose.msk.msra.mxu0 %vm454_vm1, %v621_v27  ;;  %v5471_v27 = vld [vmem:[%s6720_s19 + $0xd0] sm:$0xff] }
  0x43   : > { %508 = vst.msk [vmem:[#allocation2 + $0x1a8] sm:$0xff] %vm454_vm1, %v6441_v0  ;;  %5521 = vmatpush.xpose.msk.msra.mxu3 %vm454_vm1, %v5480_v28  ;;  %v5583_v28 = vld [vmem:[%s6532_s16 + $0x150] sm:$0xff] }
  0x44   : > { %509 = vst.msk [vmem:[#allocation2 + $0x1b0] sm:$0xff] %vm454_vm1, %v6441_v0 }
  0x45   : > { %510 = vst.msk [vmem:[#allocation2 + $0x1b8] sm:$0xff] %vm454_vm1, %v6441_v0 }
  0x46   : > { %511 = vst.msk [vmem:[#allocation2 + $0x1c0] sm:$0xff] %vm454_vm1, %v6441_v0  ;;  %5426 = vmatpush.xpose.msk.msra.mxu0 %vm454_vm1, %v620_v29 }
  0x47   : > { %512 = vst.msk [vmem:[#allocation2 + $0x1c8] sm:$0xff] %vm454_vm1, %v6441_v0  ;;  %5522 = vmatpush.xpose.msk.msra.mxu3 %vm454_vm1, %v5479_v30  ;;  %v5582_v30 = vld [vmem:[%s6532_s16 + $0x148] sm:$0xff] }
  0x48   : > { %513 = vst.msk [vmem:[#allocation2 + $0x1d0] sm:$0xff] %vm454_vm1, %v6441_v0 }
  0x49   : > { %514 = vst.msk [vmem:[#allocation2 + $0x1d8] sm:$0xff] %vm454_vm1, %v6441_v0 }
  0x4a   : > { %515 = vst.msk [vmem:[#allocation2 + $0x1e0] sm:$0xff] %vm454_vm1, %v6441_v0  ;;  %5427 = vmatpush.xpose.msk.msra.mxu0 %vm454_vm1, %v619_v31 }
  0x4b   : > { %516 = vst.msk [vmem:[#allocation2 + $0x1e8] sm:$0xff] %vm454_vm1, %v6441_v0  ;;  %5523 = vmatpush.xpose.msk.msra.mxu3 %vm454_vm1, %v5478_v32 }
  0x4c   : > { %517 = vst.msk [vmem:[#allocation2 + $0x1f0] sm:$0xff] %vm454_vm1, %v6441_v0 }
  0x4d   : > { %518 = vst.msk [vmem:[#allocation2 + $0x1f8] sm:$0xff] %vm454_vm1, %v6441_v0 }
  0x4e   : > { %520 = vst.msk [vmem:[#allocation3] sm:$0xff] %vm519_vm0, %v6441_v0  ;;  %5428 = vmatpush.xpose.msk.msra.mxu0 %vm454_vm1, %v618_v33  ;;  %v613_v33 = vld [vmem:[%s6720_s19 + $0x58] sm:$0xff] }
  0x4f   : > { %521 = vst.msk [vmem:[#allocation3 + $0x8] sm:$0xff] %vm519_vm0, %v6441_v0  ;;  %5524 = vmatpush.xpose.msk.msra.mxu3 %vm454_vm1, %v5477_v34  ;;  %v5472_v34 = vld [vmem:[%s6720_s19 + $0xd8] sm:$0xff] }
  0x50   : > { %523 = vst.msk [vmem:[#allocation3 + $0x18] sm:$0xff] %vm519_vm0, %v6441_v0 }
  0x51   : > { %524 = vst.msk [vmem:[#allocation3 + $0x20] sm:$0xff] %vm519_vm0, %v6441_v0  ;;  %5429 = vmatmul.msk.f32.vlgmr.msra.gmra.mxu0 %vm454_vm1, %v602_v35  ;;  %v5581_v35 = vld [vmem:[%s6532_s16 + $0x140] sm:$0xff] }
  0x52   : > { %525 = vst.msk [vmem:[#allocation3 + $0x28] sm:$0xff] %vm519_vm0, %v6441_v0  ;;  %5525 = vmatmul.msk.f32.vlgmr.msra.gmra.mxu3 %vm454_vm1, %v5461_v36  ;;  %5605 = vmatpush.xpose.msk.msrb.mxu0 %vm454_vm1, %v5588_v9  ;;  %v5557_v9 = vld [vmem:[%s6720_s19 + $0x100] sm:$0xff] }
  0x53   : > { %526 = vst.msk [vmem:[#allocation3 + $0x30] sm:$0xff] %vm519_vm0, %v6441_v0 }
  0x54   : > { %527 = vst.msk [vmem:[#allocation3 + $0x38] sm:$0xff] %vm519_vm0, %v6441_v0 }
  0x55   : > { %528 = vst.msk [vmem:[#allocation3 + $0x40] sm:$0xff] %vm519_vm0, %v6441_v0  ;;  %v1216_v37 = vld [vmem:[#allocation3] sm:$0xff] }
  0x56   : > { %529 = vst.msk [vmem:[#allocation3 + $0x48] sm:$0xff] %vm519_vm0, %v6441_v0  ;;  %1234 = vperm.xlu0 %5880, %v1216_v37   ;;  %v1217_v42 = vld [vmem:[#allocation3 + $0x8] sm:$0xff]  ;;  %5606 = vmatpush.xpose.msk.msrb.mxu0 %vm454_vm1, %v5587_v15  ;;  %v5580_v37 = vld [vmem:[%s6532_s16 + $0x138] sm:$0xff] }
  0x57   : > { %530 = vst.msk [vmem:[#allocation3 + $0x50] sm:$0xff] %vm519_vm0, %v6441_v0  ;;  %v1219_v38 = vld [vmem:[#allocation3 + $0x18] sm:$0xff] }
  0x58   : > { %531 = vst.msk [vmem:[#allocation3 + $0x58] sm:$0xff] %vm519_vm0, %v6441_v0  ;;  %1249 = vperm.xlu1 %5881, %v1219_v38   ;;  %v1220_v41 = vld [vmem:[#allocation3 + $0x20] sm:$0xff] }
  0x59   : > { %532 = vst.msk [vmem:[#allocation3 + $0x60] sm:$0xff] %vm519_vm0, %v6441_v0  ;;  %1254 = vperm.xlu2 %5882, %v1220_v41   ;;  %5430 = vmatmul.msk.f32.gmra.mxu0 %vm454_vm1, %v603_v39  ;;  %v1221_v44 = vld [vmem:[#allocation3 + $0x28] sm:$0xff]  ;;  %v5473_v41 = vld [vmem:[%s6720_s19 + $0xe0] sm:$0xff] }
  0x5a   : > { %533 = vst.msk [vmem:[#allocation3 + $0x68] sm:$0xff] %vm519_vm0, %v6441_v0  ;;  %5526 = vmatmul.msk.f32.gmra.mxu3 %vm454_vm1, %v5462_v40  ;;  %v1222_v47 = vld [vmem:[#allocation3 + $0x30] sm:$0xff]  ;;  %v614_v40 = vld [vmem:[%s6720_s19 + $0x60] sm:$0xff] }
  0x5b   : > { %534 = vst.msk [vmem:[#allocation3 + $0x70] sm:$0xff] %vm519_vm0, %v6441_v0  ;;  %v1223_v43 = vld [vmem:[#allocation3 + $0x38] sm:$0xff] }
  0x5c   : > { %535 = vst.msk [vmem:[#allocation3 + $0x78] sm:$0xff] %vm519_vm0, %v6441_v0  ;;  %v1224_v49 = vld [vmem:[#allocation3 + $0x40] sm:$0xff] }
  0x5d   : > { %536 = vst.msk [vmem:[#allocation3 + $0x80] sm:$0xff] %vm519_vm0, %v6441_v0  ;;  %v1225_v52 = vld [vmem:[#allocation3 + $0x48] sm:$0xff] }
  0x5e   : > { %537 = vst.msk [vmem:[#allocation3 + $0x88] sm:$0xff] %vm519_vm0, %v6441_v0  ;;  %1239 = vperm.xlu0 %5880, %v1217_v42   ;;  %v1226_v48 = vld [vmem:[#allocation3 + $0x50] sm:$0xff] }
  0x5f   : > { %538 = vst.msk [vmem:[#allocation3 + $0x90] sm:$0xff] %vm519_vm0, %v6441_v0  ;;  %v1227_v54 = vld [vmem:[#allocation3 + $0x58] sm:$0xff]  ;;  %v5579_v42 = vld [vmem:[%s6532_s16 + $0x130] sm:$0xff] }
  0x60   : > { %539 = vst.msk [vmem:[#allocation3 + $0x98] sm:$0xff] %vm519_vm0, %v6441_v0  ;;  %1269 = vperm.xlu1 %5881, %v1223_v43   ;;  %v1228_v57 = vld [vmem:[#allocation3 + $0x60] sm:$0xff] }
  0x61   : > { %540 = vst.msk [vmem:[#allocation3 + $0xa0] sm:$0xff] %vm519_vm0, %v6441_v0  ;;  %1259 = vperm.xlu2 %5882, %v1221_v44   ;;  %5431 = vmatmul.msk.f32.gmra.mxu0 %vm454_vm1, %v604_v45  ;;  %v1229_v53 = vld [vmem:[#allocation3 + $0x68] sm:$0xff] }
  0x62   : > { %541 = vst.msk [vmem:[#allocation3 + $0xa8] sm:$0xff] %vm519_vm0, %v6441_v0  ;;  %5527 = vmatmul.msk.f32.gmra.mxu3 %vm454_vm1, %v5463_v46  ;;  %v1230_v59 = vld [vmem:[#allocation3 + $0x70] sm:$0xff]  ;;  %v5578_v44 = vld [vmem:[%s6532_s16 + $0x128] sm:$0xff] }
  0x63   : > { %542 = vst.msk [vmem:[#allocation3 + $0xb0] sm:$0xff] %vm519_vm0, %v6441_v0  ;;  %v1231_v62 = vld [vmem:[#allocation3 + $0x78] sm:$0xff] }
  0x64   : > { %543 = vst.msk [vmem:[#allocation3 + $0xb8] sm:$0xff] %vm519_vm0, %v6441_v0  ;;  %v2232_v58 = vld [vmem:[#allocation3 + $0x80] sm:$0xff] }
  0x65   : > { %544 = vst.msk [vmem:[#allocation3 + $0xc0] sm:$0xff] %vm519_vm0, %v6441_v0  ;;  %v2233_v1 = vld [vmem:[#allocation3 + $0x88] sm:$0xff] }
  0x66   : > { %545 = vst.msk [vmem:[#allocation3 + $0xc8] sm:$0xff] %vm519_vm0, %v6441_v0  ;;  %1264 = vperm.xlu0 %5880, %v1222_v47   ;;  %v2234_v4 = vld [vmem:[#allocation3 + $0x90] sm:$0xff]  ;;  %v615_v47 = vld [vmem:[%s6720_s19 + $0x68] sm:$0xff] }
  0x67   : > { %546 = vst.msk [vmem:[#allocation3 + $0xd0] sm:$0xff] %vm519_vm0, %v6441_v0  ;;  %v2235_v63 = vld [vmem:[#allocation3 + $0x98] sm:$0xff] }
  0x68   : > { %547 = vst.msk [vmem:[#allocation3 + $0xd8] sm:$0xff] %vm519_vm0, %v6441_v0  ;;  %1284 = vperm.xlu1 %5881, %v1226_v48   ;;  %v2236_v6 = vld [vmem:[#allocation3 + $0xa0] sm:$0xff]  ;;  %v5474_v48 = vld [vmem:[%s6720_s19 + $0xe8] sm:$0xff] }
  0x69   : > { %548 = vst.msk [vmem:[#allocation3 + $0xe0] sm:$0xff] %vm519_vm0, %v6441_v0  ;;  %1274 = vperm.xlu2 %5882, %v1224_v49   ;;  %5432 = vmatmul.msk.f32.gmra.mxu0 %vm454_vm1, %v605_v50  ;;  %v2237_v10 = vld [vmem:[#allocation3 + $0xa8] sm:$0xff]  ;;  %v5577_v49 = vld [vmem:[%s6532_s16 + $0x120] sm:$0xff] }
  0x6a   : > { %549 = vst.msk [vmem:[#allocation3 + $0xe8] sm:$0xff] %vm519_vm0, %v6441_v0  ;;  %5528 = vmatmul.msk.f32.gmra.mxu3 %vm454_vm1, %v5464_v51  ;;  %v2238_v5 = vld [vmem:[#allocation3 + $0xb0] sm:$0xff]  ;;  %v5576_v51 = vld [vmem:[%s6532_s16 + $0x118] sm:$0xff] }
  0x6b   : > { %550 = vst.msk [vmem:[#allocation3 + $0xf0] sm:$0xff] %vm519_vm0, %v6441_v0  ;;  %v2239_v12 = vld [vmem:[#allocation3 + $0xb8] sm:$0xff] }
  0x6c   : > { %551 = vst.msk [vmem:[#allocation3 + $0xf8] sm:$0xff] %vm519_vm0, %v6441_v0  ;;  %v2240_v16 = vld [vmem:[#allocation3 + $0xc0] sm:$0xff] }
  0x6d   : > { %552 = vst.msk [vmem:[#allocation3 + $0x100] sm:$0xff] %vm519_vm0, %v6441_v0  ;;  %v2241_v11 = vld [vmem:[#allocation3 + $0xc8] sm:$0xff] }
  0x6e   : > { %553 = vst.msk [vmem:[#allocation3 + $0x108] sm:$0xff] %vm519_vm0, %v6441_v0  ;;  %1279 = vperm.xlu0 %5880, %v1225_v52   ;;  %v2242_v18 = vld [vmem:[#allocation3 + $0xd0] sm:$0xff] }
  0x6f   : > { %554 = vst.msk [vmem:[#allocation3 + $0x110] sm:$0xff] %vm519_vm0, %v6441_v0  ;;  %v2243_v22 = vld [vmem:[#allocation3 + $0xd8] sm:$0xff] }
  0x70   : > { %555 = vst.msk [vmem:[#allocation3 + $0x118] sm:$0xff] %vm519_vm0, %v6441_v0  ;;  %1299 = vperm.xlu1 %5881, %v1229_v53   ;;  %v2244_v17 = vld [vmem:[#allocation3 + $0xe0] sm:$0xff] }
  0x71   : > { %556 = vst.msk [vmem:[#allocation3 + $0x120] sm:$0xff] %vm519_vm0, %v6441_v0  ;;  %1289 = vperm.xlu2 %5882, %v1227_v54   ;;  %5433 = vmatmul.msk.f32.gmra.mxu0 %vm454_vm1, %v606_v55  ;;  %v2245_v25 = vld [vmem:[#allocation3 + $0xe8] sm:$0xff]  ;;  %v616_v54 = vld [vmem:[%s6720_s19 + $0x70] sm:$0xff] }
  0x72   : > { %557 = vst.msk [vmem:[#allocation3 + $0x128] sm:$0xff] %vm519_vm0, %v6441_v0  ;;  %5529 = vmatmul.msk.f32.gmra.mxu3 %vm454_vm1, %v5465_v56  ;;  %v2246_v29 = vld [vmem:[#allocation3 + $0xf0] sm:$0xff] }
  0x73   : > { %558 = vst.msk [vmem:[#allocation3 + $0x130] sm:$0xff] %vm519_vm0, %v6441_v0  ;;  %v2247_v24 = vld [vmem:[#allocation3 + $0xf8] sm:$0xff]  ;;  %v5475_v55 = vld [vmem:[%s6720_s19 + $0xf0] sm:$0xff] }
  0x74   : > { %559 = vst.msk [vmem:[#allocation3 + $0x138] sm:$0xff] %vm519_vm0, %v6441_v0  ;;  %v3248_v32 = vld [vmem:[#allocation3 + $0x100] sm:$0xff]  ;;  %v5575_v56 = vld [vmem:[%s6532_s16 + $0x110] sm:$0xff] }
  0x75   : > { %560 = vst.msk [vmem:[#allocation3 + $0x140] sm:$0xff] %vm519_vm0, %v6441_v0  ;;  %v3249_v36 = vld [vmem:[#allocation3 + $0x108] sm:$0xff] }
  0x76   : > { %561 = vst.msk [vmem:[#allocation3 + $0x148] sm:$0xff] %vm519_vm0, %v6441_v0  ;;  %1294 = vperm.xlu0 %5880, %v1228_v57   ;;  %v3250_v31 = vld [vmem:[#allocation3 + $0x110] sm:$0xff] }
  0x77   : > { %562 = vst.msk [vmem:[#allocation3 + $0x150] sm:$0xff] %vm519_vm0, %v6441_v0  ;;  %v3251_v39 = vld [vmem:[#allocation3 + $0x118] sm:$0xff] }
  0x78   : > { %563 = vst.msk [vmem:[#allocation3 + $0x158] sm:$0xff] %vm519_vm0, %v6441_v0  ;;  %2250 = vperm.xlu1 %5881, %v2232_v58   ;;  %v3252_v43 = vld [vmem:[#allocation3 + $0x120] sm:$0xff] }
  0x79   : > { %564 = vst.msk [vmem:[#allocation3 + $0x160] sm:$0xff] %vm519_vm0, %v6441_v0  ;;  %1304 = vperm.xlu2 %5882, %v1230_v59   ;;  %5434 = vmatmul.msk.f32.gmra.mxu0 %vm454_vm1, %v607_v60  ;;  %v3253_v38 = vld [vmem:[#allocation3 + $0x128] sm:$0xff] }
  0x7a   : > { %565 = vst.msk [vmem:[#allocation3 + $0x168] sm:$0xff] %vm519_vm0, %v6441_v0  ;;  %5530 = vmatmul.msk.f32.gmra.mxu3 %vm454_vm1, %v5466_v61  ;;  %v3254_v46 = vld [vmem:[#allocation3 + $0x130] sm:$0xff]  ;;  %v5574_v59 = vld [vmem:[%s6532_s16 + $0x108] sm:$0xff] }
  0x7b   : > { %566 = vst.msk [vmem:[#allocation3 + $0x170] sm:$0xff] %vm519_vm0, %v6441_v0  ;;  %v3255_v50 = vld [vmem:[#allocation3 + $0x138] sm:$0xff] }
  0x7c   : > { %567 = vst.msk [vmem:[#allocation3 + $0x178] sm:$0xff] %vm519_vm0, %v6441_v0  ;;  %v3256_v45 = vld [vmem:[#allocation3 + $0x140] sm:$0xff] }
  0x7d   : > { %568 = vst.msk [vmem:[#allocation3 + $0x180] sm:$0xff] %vm519_vm0, %v6441_v0  ;;  %v3257_v53 = vld [vmem:[#allocation3 + $0x148] sm:$0xff] }
  0x7e   : > { %569 = vst.msk [vmem:[#allocation3 + $0x188] sm:$0xff] %vm519_vm0, %v6441_v0  ;;  %1309 = vperm.xlu0 %5880, %v1231_v62   ;;  %v3258_v58 = vld [vmem:[#allocation3 + $0x150] sm:$0xff]  ;;  %v617_v62 = vld [vmem:[%s6720_s19 + $0x78] sm:$0xff] }
  0x7f   : > { %570 = vst.msk [vmem:[#allocation3 + $0x190] sm:$0xff] %vm519_vm0, %v6441_v0  ;;  %v3259_v52 = vld [vmem:[#allocation3 + $0x158] sm:$0xff] }
  0x80   : > { %571 = vst.msk [vmem:[#allocation3 + $0x198] sm:$0xff] %vm519_vm0, %v6441_v0  ;;  %2265 = vperm.xlu1 %5881, %v2235_v63   ;;  %v3260_v61 = vld [vmem:[#allocation3 + $0x160] sm:$0xff] }
  0x81   : > { %572 = vst.msk [vmem:[#allocation3 + $0x1a0] sm:$0xff] %vm519_vm0, %v6441_v0  ;;  %2255 = vperm.xlu2 %5882, %v2233_v1   ;;  %5435 = vmatmul.msk.f32.gmra.mxu0 %vm454_vm1, %v608_v2  ;;  %v5573_v63 = vld [vmem:[%s6532_s16 + $0x100] sm:$0xff] }
  0x82   : > { %573 = vst.msk [vmem:[#allocation3 + $0x1a8] sm:$0xff] %vm519_vm0, %v6441_v0  ;;  %5531 = vmatmul.msk.f32.gmra.mxu3 %vm454_vm1, %v5467_v3  ;;  %v3262_v60 = vld [vmem:[#allocation3 + $0x170] sm:$0xff] }
  0x83   : > { %574 = vst.msk [vmem:[#allocation3 + $0x1b0] sm:$0xff] %vm519_vm0, %v6441_v0 }
  0x84   : > { %575 = vst.msk [vmem:[#allocation3 + $0x1b8] sm:$0xff] %vm519_vm0, %v6441_v0  ;;  %v4264_v15 = vld [vmem:[#allocation3 + $0x180] sm:$0xff] }
  0x85   : > { %576 = vst.msk [vmem:[#allocation3 + $0x1c0] sm:$0xff] %vm519_vm0, %v6441_v0 }
  0x86   : > { %577 = vst.msk [vmem:[#allocation3 + $0x1c8] sm:$0xff] %vm519_vm0, %v6441_v0  ;;  %2260 = vperm.xlu0 %5880, %v2234_v4   ;;  %v3261_v4 = vld [vmem:[#allocation3 + $0x168] sm:$0xff] }
  0x87   : > { %578 = vst.msk [vmem:[#allocation3 + $0x1d0] sm:$0xff] %vm519_vm0, %v6441_v0  ;;  %v6937_v57 = vpop.permute.xlu1 %1244 }
  0x88   : > { %579 = vst.msk [vmem:[#allocation3 + $0x1d8] sm:$0xff] %vm519_vm0, %v6441_v0  ;;  %2280 = vperm.xlu1 %5881, %v2238_v5   ;;  %v4265_v5 = vld [vmem:[#allocation3 + $0x188] sm:$0xff] }
  0x89   : > { %580 = vst.msk [vmem:[#allocation3 + $0x1e0] sm:$0xff] %vm519_vm0, %v6441_v0  ;;  %2270 = vperm.xlu2 %5882, %v2236_v6   ;;  %5436 = vmatmul.msk.f32.gmra.mxu0 %vm454_vm1, %v609_v7  ;;  %v6954_v6 = vstv %s584_s20  ;;  %v3263_v7 = vld [vmem:[#allocation3 + $0x178] sm:$0xff] }
  0x8a   : > { %581 = vst.msk [vmem:[#allocation3 + $0x1e8] sm:$0xff] %vm519_vm0, %v6441_v0  ;;  %5532 = vmatmul.msk.f32.gmra.mxu3 %vm454_vm1, %v5468_v8 }
  0x8b   : > { %582 = vst.msk [vmem:[#allocation3 + $0x1f0] sm:$0xff] %vm519_vm0, %v6441_v0 }
  0x8c   : > { %583 = vst.msk [vmem:[#allocation3 + $0x1f8] sm:$0xff] %vm519_vm0, %v6441_v0  ;;  %v5586_v0 = vld [vmem:[%s6532_s16 + $0x168] sm:$0xff] }
  0x8d   : > { %5607 = vmatpush.xpose.msk.msrb.mxu0 %vm454_vm1, %v5586_v0 }
  0x8e   : > { %2275 = vperm.xlu0 %5880, %v2237_v10  }
  0x90   : > { %2295 = vperm.xlu1 %5881, %v2241_v11  }
  0x91   : > { %2285 = vperm.xlu2 %5882, %v2239_v12   ;;  %5437 = vmatmul.msk.f32.gmra.mxu0 %vm454_vm1, %v610_v13 }
  0x92   : > { %5533 = vmatmul.msk.f32.gmra.mxu3 %vm454_vm1, %v5469_v14  ;;  %5608 = vmatpush.xpose.msk.msrb.mxu0 %vm454_vm1, %v5585_v21 }
  0x96   : > { %2290 = vperm.xlu0 %5880, %v2240_v16   ;;  %5609 = vmatpush.xpose.msk.msrb.mxu0 %vm454_vm1, %v5584_v23  ;;  %v4268_v16 = vld [vmem:[#allocation3 + $0x1a0] sm:$0xff]  ;;  %v6971_v23 = vld [vmem:[%s9668_s4 + $0x78] sm:$0xff] }
  0x97   : > { %1312 = vmatpush.msra.mxu1 %v6971_v23  ;;  %3344 = vmatpush.msrb.mxu3 %v6971_v23 }
  0x98   : > { %2310 = vperm.xlu1 %5881, %v2244_v17   ;;  %v4266_v17 = vld [vmem:[#allocation3 + $0x190] sm:$0xff] }
  0x99   : > { %2300 = vperm.xlu2 %5882, %v2242_v18   ;;  %5438 = vmatmul.msk.f32.gmra.mxu0 %vm454_vm1, %v611_v19 }
  0x9a   : > { %5534 = vmatmul.msk.f32.gmra.mxu3 %vm454_vm1, %v5470_v20  ;;  %5610 = vmatpush.xpose.msk.msrb.mxu0 %vm454_vm1, %v5583_v28  ;;  %v5558_v20 = vld [vmem:[%s6720_s19 + $0x108] sm:$0xff] }
  0x9e   : > { %2305 = vperm.xlu0 %5880, %v2243_v22   ;;  %5611 = vmatpush.xpose.msk.msrb.mxu0 %vm454_vm1, %v5582_v30  ;;  %v4267_v30 = vld [vmem:[#allocation3 + $0x198] sm:$0xff] }
  0xa0   : > { %2325 = vperm.xlu1 %5881, %v2247_v24   ;;  %v6976_v24 = vld [vmem:[%s9668_s4 + $0x70] sm:$0xff] }
  0xa1   : > { %2315 = vperm.xlu2 %5882, %v2245_v25   ;;  %5439 = vmatmul.msk.f32.gmra.mxu0 %vm454_vm1, %v612_v26 }
  0xa2   : > { %5535 = vmatmul.msk.f32.gmra.mxu3 %vm454_vm1, %v5471_v27  ;;  %5612 = vmatpush.xpose.msk.msrb.mxu0 %vm454_vm1, %v5581_v35  ;;  %v4269_v35 = vld [vmem:[#allocation3 + $0x1a8] sm:$0xff] }
  0xa3   : > { %1313 = vmatpush.msra.mxu1 %v6976_v24  ;;  %3345 = vmatpush.msrb.mxu3 %v6976_v24 }
  0xa6   : > { %2320 = vperm.xlu0 %5880, %v2246_v29   ;;  %5613 = vmatpush.xpose.msk.msrb.mxu0 %vm454_vm1, %v5580_v37  ;;  %v7004_v37 = vld [vmem:[%s9668_s4 + $0x60] sm:$0xff] }
  0xa8   : > { %3276 = vperm.xlu1 %5881, %v3250_v31  }
  0xa9   : > { %3266 = vperm.xlu2 %5882, %v3248_v32   ;;  %5440 = vmatmul.msk.f32.gmra.mxu0 %vm454_vm1, %v613_v33  ;;  %v6991_v32 = vld [vmem:[%s9668_s4 + $0x68] sm:$0xff]  ;;  %v4271_v33 = vld [vmem:[#allocation3 + $0x1b8] sm:$0xff] }
  0xaa   : > { %5536 = vmatmul.msk.f32.gmra.mxu3 %vm454_vm1, %v5472_v34  ;;  %5614 = vmatpush.xpose.msk.msrb.mxu0 %vm454_vm1, %v5579_v42 }
  0xab   : > { %1314 = vmatpush.msra.mxu1 %v6991_v32  ;;  %3346 = vmatpush.msrb.mxu3 %v6991_v32 }
  0xad   : > { %1315 = vmatpush.msra.mxu1 %v7004_v37  ;;  %3347 = vmatpush.msrb.mxu3 %v7004_v37 }
  0xae   : > { %3271 = vperm.xlu0 %5880, %v3249_v36   ;;  %5615 = vmatpush.xpose.msk.msrb.mxu0 %vm454_vm1, %v5578_v44 }
  0xb0   : > { %3291 = vperm.xlu1 %5881, %v3253_v38  }
  0xb1   : > { %3281 = vperm.xlu2 %5882, %v3251_v39   ;;  %5441 = vmatmul.msk.f32.gmra.mxu0 %vm454_vm1, %v614_v40  ;;  %v5559_v39 = vld [vmem:[%s6720_s19 + $0x110] sm:$0xff]  ;;  %v7010_v40 = vld [vmem:[%s9668_s4 + $0x58] sm:$0xff] }
  0xb2   : > { %5537 = vmatmul.msk.f32.gmra.mxu3 %vm454_vm1, %v5473_v41  ;;  %5616 = vmatpush.xpose.msk.msrb.mxu0 %vm454_vm1, %v5577_v49 }
  0xb3   : > { %v6946_v1 = vpop.permute.xlu2 %1254  ;;  %1316 = vmatpush.msra.mxu1 %v7010_v40  ;;  %3348 = vmatpush.msrb.mxu3 %v7010_v40 }
  0xb6   : > { %3286 = vperm.xlu0 %5880, %v3252_v43   ;;  %5617 = vmatpush.xpose.msk.msrb.mxu0 %vm454_vm1, %v5576_v51  ;;  %v4270_v51 = vld [vmem:[#allocation3 + $0x1b0] sm:$0xff] }
  0xb8   : > { %3306 = vperm.xlu1 %5881, %v3256_v45   ;;  %v7021_v45 = vld [vmem:[%s9668_s4 + $0x50] sm:$0xff] }
  0xb9   : > { %3296 = vperm.xlu2 %5882, %v3254_v46   ;;  %5442 = vmatmul.msk.f32.gmra.mxu0 %vm454_vm1, %v615_v47 }
  0xba   : > { %5538 = vmatmul.msk.f32.gmra.mxu3 %vm454_vm1, %v5474_v48  ;;  %5618 = vmatpush.xpose.msk.msrb.mxu0 %vm454_vm1, %v5575_v56  ;;  %v4274_v56 = vld [vmem:[#allocation3 + $0x1d0] sm:$0xff] }
  0xbb   : > { %v6958_v11 = vpop.permute.xlu2 %1259  ;;  %1317 = vmatpush.msra.mxu1 %v7021_v45  ;;  %3349 = vmatpush.msrb.mxu3 %v7021_v45 }
  0xbe   : > { %3301 = vperm.xlu0 %5880, %v3255_v50   ;;  %5619 = vmatpush.xpose.msk.msrb.mxu0 %vm454_vm1, %v5574_v59  ;;  %v7051_v59 = vld [vmem:[%s9668_s4 + $0x40] sm:$0xff] }
  0xc0   : > { %3321 = vperm.xlu1 %5881, %v3259_v52  }
  0xc1   : > { %3311 = vperm.xlu2 %5882, %v3257_v53   ;;  %5443 = vmatmul.msk.f32.gmra.mxu0 %vm454_vm1, %v616_v54  ;;  %v7040_v54 = vld [vmem:[%s9668_s4 + $0x48] sm:$0xff] }
  0xc2   : > { %5539 = vmatmul.msk.f32.gmra.mxu3 %vm454_vm1, %v5475_v55  ;;  %5620 = vmatpush.xpose.msk.msrb.mxu0 %vm454_vm1, %v5573_v63 }
  0xc3   : > { %v6978_v25 = vpop.permute.xlu2 %1274  ;;  %1318 = vmatpush.msra.mxu1 %v7040_v54  ;;  %3350 = vmatpush.msrb.mxu3 %v7040_v54 }
  0xc4   : > { %9698 = vst [vmem:[#allocation6_spill] sm:$0xff] %v6978_v25 }
  0xc5   : > { %1319 = vmatpush.msra.mxu1 %v7051_v59  ;;  %3351 = vmatpush.msrb.mxu3 %v7051_v59 }
  0xc6   : > { %3316 = vperm.xlu0 %5880, %v3258_v58   ;;  %4360 = vmatpush.msra.mxu0 %v6971_v23 }
  0xc8   : > { %3336 = vperm.xlu1 %5881, %v3262_v60   ;;  %v6948_v2 = vpop.permute.xlu0 %1234  ;;  %4361 = vmatpush.msra.mxu0 %v6976_v24  ;;  %v4272_v60 = vld [vmem:[#allocation3 + $0x1c0] sm:$0xff] }
  0xc9   : > { %3326 = vperm.xlu2 %5882, %v3260_v61   ;;  %5444 = vmatmul.msk.f32.gmra.mxu0 %vm454_vm1, %v617_v62 }
  0xca   : > { %v6951_v3 = vpop.permute.xlu1 %1249  ;;  %4362 = vmatpush.msra.mxu0 %v6991_v32 }
  0xcb   : > { %v7023_v46 = vpop.permute.xlu2 %1289 }
  0xcc   : > { %9701 = vst [vmem:[#allocation9_spill] sm:$0xff] %v7023_v46  ;;  %4363 = vmatpush.msra.mxu0 %v7004_v37 }
  0xce   : > { %3331 = vperm.xlu0 %5880, %v3261_v4   ;;  %v765_v8 = vpop.f32.mrf.mxu0  ;;  %4364 = vmatpush.msra.mxu0 %v7010_v40 }
  0xcf   : > { %v766_v10 = vadd.f32 %v765_v8, %v6954_v6 }
  0xd0   : > { %4287 = vperm.xlu1 %5881, %v4265_v5   ;;  %v6960_v12 = vpop.permute.xlu0 %1239  ;;  %v5560_v5 = vld [vmem:[%s6720_s19 + $0x118] sm:$0xff]  ;;  %4365 = vmatpush.msra.mxu0 %v7021_v45 }
  0xd1   : > { %3341 = vperm.xlu2 %5882, %v3263_v7   ;;  %v5445_v13 = vmul.f32 -1.442695, %v766_v10  ;;  %5621 = vmatmul.msk.f32.vlgmr.msrb.gmra.mxu0 %vm454_vm1, %v5557_v9  ;;  %v7062_v7 = vld [vmem:[%s9668_s4 + $0x38] sm:$0xff] }
  0xd2   : > { %v6963_v14 = vpop.permute.xlu1 %1269  ;;  %1320 = vmatpush.msra.mxu1 %v7062_v7  ;;  %3352 = vmatpush.msrb.mxu3 %v7062_v7 }
  0xd3   : > { %9697 = vst [vmem:[#allocation5_spill] sm:$0xff] %v6963_v14  ;;  %5885 = vpow2.f32 %v5445_v13  ;;  %4366 = vmatpush.msra.mxu0 %v7040_v54 }
  0xd5   : > { %v1783_v0 = vpop.f32.mrf.mxu3  ;;  %4367 = vmatpush.msra.mxu0 %v7051_v59 }
  0xd6   : > { %4282 = vperm.xlu0 %5880, %v4264_v15   ;;  %v1784_v18 = vadd.f32 %v1783_v0, %v6954_v6  ;;  %v768_v19 = vpop.f32.mrf.mxu0 }
  0xd7   : > { %v769_v22 = vadd.f32 %v768_v19, %v6954_v6  ;;  %4368 = vmatpush.msra.mxu0 %v7062_v7 }
  0xd8   : > { %4302 = vperm.xlu1 %5881, %v4268_v16   ;;  %v5541_v21 = vmul.f32 -1.442695, %v1784_v18  ;;  %v6980_v26 = vpop.permute.xlu0 %1264 }
  0xd9   : > { %4292 = vperm.xlu2 %5882, %v4266_v17   ;;  %9699 = vst [vmem:[#allocation7_spill] sm:$0xff] %v6980_v26  ;;  %v5886_v27 = vpop.eup %5885  ;;  %v5446_v28 = vmul.f32 -1.442695, %v769_v22  ;;  %5622 = vmatmul.msk.f32.gmra.mxu0 %vm454_vm1, %v5558_v20  ;;  %v7078_v17 = vld [vmem:[%s9668_s4 + $0x30] sm:$0xff]  ;;  %v7085_v20 = vld [vmem:[%s6524_s13] ss:$0 sm:$0xff] }
  0xda   : > { %5887 = vpow2.f32 %v5541_v21  ;;  %v6984_v29 = vpop.permute.xlu1 %1284  ;;  %v6986_v31 = vadd.f32 1.0, %v5886_v27  ;;  %1321 = vmatpush.msra.mxu1 %v7078_v17  ;;  %3353 = vmatpush.msrb.mxu3 %v7078_v17  ;;  %v5571_v26 = vld [vmem:[%s6720_s19 + $0x170] sm:$0xff] }
  0xdb   : > { %9700 = vst [vmem:[#allocation8_spill] sm:$0xff] %v6984_v29  ;;  %5889 = vpow2.f32 %v5446_v28  ;;  %4369 = vmatpush.msra.mxu0 %v7078_v17 }
  0xdc   : > { %5891 = vrcp.f32 %v6986_v31  ;;  %v888_v63 = vand.u32 2147483648, %v6986_v31  ;;  %v886_v8 = vand.u32 2147483647, %v6986_v31  ;;  %vm882_vm3 = vweird.f32 %v6986_v31 }
  0xdd   : > { %v1786_v34 = vpop.f32.mrf.mxu3 }
  0xde   : > { %4297 = vperm.xlu0 %5880, %v4267_v30   ;;  %v1787_v36 = vadd.f32 %v1786_v34, %v6954_v6  ;;  %v771_v38 = vpop.f32.mrf.mxu0  ;;  %v889_v27 = vor.u32 1.1754944e-38, %v888_v63  ;;  %v4273_v30 = vld [vmem:[#allocation3 + $0x1c8] sm:$0xff]  ;;  %v7095_v34 = vpop.permute.xlu2 %1304  ;;  %vm887_vm5 = vcmp.eq.f32.partialorder %v886_v8, 8.507059e+37  ;;  %v7143_v63 = vld [vmem:[%s9668_s4 + $0x18] sm:$0xff] }
  0xdf   : > { %v772_v43 = vadd.f32 %v771_v38, %v6954_v6  ;;  %9705 = vst [vmem:[#allocation13_spill] sm:$0xff] %v7095_v34 }
  0xe0   : > { %v5888_v41 = vpop.eup %5887  ;;  %4317 = vperm.xlu1 %5881, %v4271_v33   ;;  %v5542_v42 = vmul.f32 -1.442695, %v1787_v36  ;;  %v7025_v47 = vpop.permute.xlu0 %1279 }
  0xe1   : > { %4307 = vperm.xlu2 %5882, %v4269_v35   ;;  %v7016_v44 = vadd.f32 1.0, %v5888_v41  ;;  %9702 = vst [vmem:[#allocation10_spill] sm:$0xff] %v7025_v47  ;;  %v5890_v48 = vpop.eup %5889  ;;  %v5447_v49 = vmul.f32 -1.442695, %v772_v43  ;;  %5623 = vmatmul.msk.f32.gmra.mxu0 %vm454_vm1, %v5559_v39  ;;  %v7100_v35 = vld [vmem:[%s9668_s4 + $0x28] sm:$0xff] }
  0xe2   : > { %5893 = vpow2.f32 %v5542_v42  ;;  %v7030_v50 = vpop.eup %5891  ;;  %v7033_v52 = vadd.f32 1.0, %v5890_v48  ;;  %v7035_v53 = vpop.permute.xlu1 %1299  ;;  %v4277_v42 = vld [vmem:[#allocation3 + $0x1e8] sm:$0xff]  ;;  %1322 = vmatpush.msra.mxu1 %v7100_v35  ;;  %3354 = vmatpush.msrb.mxu3 %v7100_v35 }
  0xe3   : > { %5895 = vrcp.f32 %v7016_v44  ;;  %9703 = vst [vmem:[#allocation11_spill] sm:$0xff] %v7035_v53  ;;  %v878_v55 = vmul.f32 %v7030_v50, %v6986_v31  ;;  %vm883_vm2 = vweird.f32 %v7030_v50  ;;  %4370 = vmatpush.msra.mxu0 %v7100_v35 }
  0xe4   : > { %5897 = vpow2.f32 %v5447_v49  ;;  %vm7106_vm4 = vmor %vm882_vm3, %vm883_vm2  ;;  %v901_v38 = vand.u32 2147483647, %v7033_v52  ;;  %v903_v39 = vand.u32 2147483648, %v7033_v52  ;;  %vm897_vm6 = vweird.f32 %v7033_v52 }
  0xe5   : > { %5899 = vrcp.f32 %v7033_v52  ;;  %v1789_v58 = vpop.f32.mrf.mxu3  ;;  %v879_v61 = vsub.f32 1.0, %v878_v55 }
  0xe6   : > { %4312 = vperm.xlu0 %5880, %v4270_v51   ;;  %v1790_v62 = vadd.f32 %v1789_v58, %v6954_v6  ;;  %v774_v4 = vpop.f32.mrf.mxu0  ;;  %v7130_v51 = vld [vmem:[%s9668_s4 + $0x20] sm:$0xff]  ;;  %vm7146_vm7 = vcmp.eq.f32.partialorder %v901_v38, 8.507059e+37 }
  0xe7   : > { %v775_v13 = vadd.f32 %v774_v4, %v6954_v6  ;;  %v880_v15 = vmul.f32 %v7030_v50, %v879_v61  ;;  %1323 = vmatpush.msra.mxu1 %v7130_v51  ;;  %3355 = vmatpush.msrb.mxu3 %v7130_v51 }
  0xe8   : > { %v5894_v9 = vpop.eup %5893  ;;  %4332 = vperm.xlu1 %5881, %v4274_v56   ;;  %v5543_v10 = vmul.f32 -1.442695, %v1790_v62  ;;  %v7080_v18 = vpop.permute.xlu0 %1294  ;;  %v5561_v62 = vld [vmem:[%s6720_s19 + $0x120] sm:$0xff]  ;;  %4371 = vmatpush.msra.mxu0 %v7130_v51 }
  0xe9   : > { %v7071_v16 = vpop.eup %5895  ;;  %4322 = vperm.xlu2 %5882, %v4272_v60   ;;  %v7073_v0 = vadd.f32 1.0, %v5894_v9  ;;  %9704 = vst [vmem:[#allocation12_spill] sm:$0xff] %v7080_v18  ;;  %v5448_v21 = vmul.f32 -1.442695, %v775_v13  ;;  %5624 = vmatmul.msk.f32.gmra.mxu0 %vm454_vm1, %v5560_v5  ;;  %v881_v22 = vadd.f32 %v7030_v50, %v880_v15  ;;  %v904_v5 = vor.u32 1.1754944e-38, %v903_v39 }
  0xea   : > { %v5898_v19 = vpop.eup %5897  ;;  %5901 = vpow2.f32 %v5543_v10  ;;  %v7122_v43 = vmul.f32 %v7071_v16, %v7016_v44  ;;  %v7125_v49 = vpop.permute.xlu1 %2250  ;;  %1324 = vmatpush.msra.mxu1 %v7143_v63  ;;  %3356 = vmatpush.msrb.mxu3 %v7143_v63 }
  0xeb   : > { %v7090_v28 = vpop.eup %5899  ;;  %5903 = vrcp.f32 %v7073_v0  ;;  %v7093_v33 = vadd.f32 1.0, %v5898_v19  ;;  %v885_v31 = vsel %vm7106_vm4, %v7030_v50, %v881_v22  ;;  %9708 = vst [vmem:[#allocation14_spill] sm:$0xff] %v7125_v49  ;;  %v4275_v50 = vld [vmem:[#allocation3 + $0x1d8] sm:$0xff]  ;;  %vm1915_vm12 = vweird.f32 %v7073_v0  ;;  %4372 = vmatpush.msra.mxu0 %v7143_v63 }
  0xec   : > { %v893_v41 = vmul.f32 %v7090_v28, %v7033_v52  ;;  %5905 = vpow2.f32 %v5448_v21  ;;  %v890_v55 = vsel %vm887_vm5, %v889_v27, %v885_v31  ;;  %v7164_v27 = vld [vmem:[%s9668_s4 + $0x10] sm:$0xff]  ;;  %vm898_vm8 = vweird.f32 %v7090_v28 }
  0xed   : > { %5907 = vrcp.f32 %v7093_v33  ;;  %v1792_v48 = vpop.f32.mrf.mxu3  ;;  %v7137_v60 = vmul.f32 %v7085_v20, %v890_v55  ;;  %v916_v36 = vand.u32 2147483647, %v7093_v33  ;;  %vm912_vm9 = vweird.f32 %v7093_v33  ;;  %1325 = vmatpush.msra.mxu1 %v7164_v27  ;;  %vm7197_vm10 = vmor %vm897_vm6, %vm898_vm8  ;;  %3357 = vmatpush.msrb.mxu3 %v7164_v27 }
  0xee   : > { %4327 = vperm.xlu0 %5880, %v4273_v30   ;;  %v894_v56 = vsub.f32 1.0, %v893_v41  ;;  %v1793_v58 = vadd.f32 %v1792_v48, %v6954_v6  ;;  %v777_v61 = vpop.f32.mrf.mxu0  ;;  %v4276_v48 = vld [vmem:[#allocation3 + $0x1e0] sm:$0xff]  ;;  %4373 = vmatpush.msra.mxu0 %v7164_v27  ;;  %v9724_v52 = vsub.f32 1.0, %v7122_v43  ;;  %vm1900_vm4 = vweird.f32 %v7016_v44 }
  0xef   : > { %v778_v10 = vadd.f32 %v777_v61, %v6954_v6  ;;  %v1136_v13 = vsub.f32 1.0, %v7137_v60  ;;  %vm7212_vm11 = vcmp.eq.f32.partialorder %v916_v36, 8.507059e+37  ;;  %vm1901_vm5 = vweird.f32 %v7071_v16 }
  0xf0   : > { %v5902_v8 = vpop.eup %5901  ;;  %4347 = vperm.xlu1 %5881, %v4277_v42   ;;  %v5544_v9 = vmul.f32 -1.442695, %v1793_v58  ;;  %v895_v15 = vmul.f32 %v7090_v28, %v894_v56  ;;  %v7166_v30 = vpop.permute.xlu0 %1309  ;;  %v918_v58 = vand.u32 2147483648, %v7093_v33  ;;  %vm7320_vm6 = vmor %vm1900_vm4, %vm1901_vm5 }
  0xf1   : > { %v7156_v19 = vpop.eup %5903  ;;  %4337 = vperm.xlu2 %5882, %v4275_v50   ;;  %v7159_v22 = vadd.f32 1.0, %v5902_v8  ;;  %9711 = vst [vmem:[#allocation15_spill] sm:$0xff] %v7166_v30  ;;  %v5449_v41 = vmul.f32 -1.442695, %v778_v10  ;;  %5625 = vmatmul.msk.f32.gmra.mxu0 %vm454_vm1, %v5561_v62  ;;  %v1152_v31 = vmax.f32 %v1136_v13, 1.1754944e-38  ;;  %v7184_v50 = vld [vmem:[%s9668_s4 + $0x8] sm:$0xff]  ;;  %v7202_v13 = vpop.permute.xlu2 %2255 }
  0xf2   : > { %v5906_v38 = vpop.eup %5905  ;;  %v1911_v39 = vmul.f32 %v7156_v19, %v7073_v0  ;;  %5909 = vpow2.f32 %v5544_v9  ;;  %v896_v56 = vadd.f32 %v7090_v28, %v895_v15  ;;  %9714 = vst [vmem:[#allocation16_spill] sm:$0xff] %v7202_v13  ;;  %v7207_v15 = vld [vmem:[%s9668_s4] sm:$0xff]  ;;  %1326 = vmatpush.msra.mxu1 %v7184_v50  ;;  %v5562_v9 = vld [vmem:[%s6720_s19 + $0x128] sm:$0xff]  ;;  %vm1916_vm13 = vweird.f32 %v7156_v19  ;;  %3358 = vmatpush.msrb.mxu3 %v7184_v50 }
  0xf3   : > { %v7176_v42 = vpop.eup %5907  ;;  %5911 = vrcp.f32 %v7159_v22  ;;  %v7179_v55 = vadd.f32 1.0, %v5906_v38  ;;  %v1168_v8 = vmin.f32 %v1152_v31, 1.0  ;;  %vm7249_vm15 = vmor %vm1915_vm12, %vm1916_vm13  ;;  %4374 = vmatpush.msra.mxu0 %v7184_v50 }
  0xf4   : > { %v1912_v61 = vsub.f32 1.0, %v1911_v39  ;;  %v908_v62 = vmul.f32 %v7176_v42, %v7093_v33  ;;  %5913 = vpow2.f32 %v5449_v41  ;;  %v900_v38 = vsel %vm7197_vm10, %v7090_v28, %v896_v56  ;;  %v4278_v39 = vld [vmem:[#allocation3 + $0x1f0] sm:$0xff]  ;;  %v7223_v56 = vpop.permute.xlu1 %2265  ;;  %1327 = vmatpush.msra.mxu1 %v7207_v15  ;;  %3359 = vmatpush.msrb.mxu3 %v7207_v15 }
  0xf5   : > { %5915 = vrcp.f32 %v7179_v55  ;;  %v1795_v10 = vpop.f32.mrf.mxu3  ;;  %v905_v28 = vsel %vm7146_vm7, %v904_v5, %v900_v38  ;;  %9717 = vst [vmem:[#allocation17_spill] sm:$0xff] %v7223_v56  ;;  %vm913_vm14 = vweird.f32 %v7176_v42  ;;  %4375 = vmatpush.msra.mxu0 %v7207_v15  ;;  %vm927_vm8 = vweird.f32 %v7179_v55 }
  0xf6   : > { %4342 = vperm.xlu0 %5880, %v4276_v48   ;;  %v909_v41 = vsub.f32 1.0, %v908_v62  ;;  %v1796_v31 = vadd.f32 %v1795_v10, %v6954_v6  ;;  %5917 = vlog2.f32 %v1168_v8  ;;  %v780_v36 = vpop.f32.mrf.mxu0  ;;  %v7227_v21 = vmul.f32 %v7085_v20, %v905_v28  ;;  %2328 = vmatpush.msrb.mxu1 %v6971_v23  ;;  %vm914_vm2 = vmor %vm912_vm9, %vm913_vm14 }
  0xf7   : > { %v1913_v13 = vmul.f32 %v7156_v19, %v1912_v61  ;;  %v1919_v48 = vand.u32 2147483647, %v7073_v0  ;;  %v781_v5 = vadd.f32 %v780_v36, %v6954_v6  ;;  %v919_v28 = vor.u32 1.1754944e-38, %v918_v58 }
  0xf8   : > { %v5910_v62 = vpop.eup %5909  ;;  %v5545_v4 = vmul.f32 -1.442695, %v1796_v31  ;;  %v910_v8 = vmul.f32 %v7176_v42, %v909_v41  ;;  %v1137_v38 = vsub.f32 1.0, %v7227_v21  ;;  %v7262_v49 = vpop.permute.xlu0 %2260  ;;  %2329 = vmatpush.msrb.mxu1 %v6976_v24 }
  0xf9   : > { %v7238_v10 = vpop.eup %5911  ;;  %4352 = vperm.xlu2 %5882, %v4278_v39   ;;  %v7240_v61 = vadd.f32 1.0, %v5910_v62  ;;  %v1914_v31 = vadd.f32 %v7156_v19, %v1913_v13  ;;  %v5450_v39 = vmul.f32 -1.442695, %v781_v5  ;;  %5626 = vmatmul.msk.f32.gmra.mxu0 %vm454_vm1, %v5562_v9  ;;  %v1921_v62 = vand.u32 2147483648, %v7073_v0  ;;  %v4279_v13 = vld [vmem:[#allocation3 + $0x1f8] sm:$0xff]  ;;  %9720 = vst [vmem:[#allocation18_spill] sm:$0xff] %v7262_v49 }
  0xfa   : > { %v5914_v36 = vpop.eup %5913  ;;  %5919 = vpow2.f32 %v5545_v4  ;;  %v911_v23 = vadd.f32 %v7176_v42, %v910_v8  ;;  %v1153_v4 = vmax.f32 %v1137_v38, 1.1754944e-38  ;;  %vm7269_vm3 = vcmp.eq.f32.partialorder %v1919_v48, 8.507059e+37  ;;  %2330 = vmatpush.msrb.mxu1 %v6991_v32  ;;  %v5563_v32 = vld [vmem:[%s6720_s19 + $0x130] sm:$0xff] }
  0xfb   : > { %v7257_v58 = vpop.eup %5915  ;;  %5921 = vrcp.f32 %v7240_v61  ;;  %v7260_v56 = vadd.f32 1.0, %v5914_v36  ;;  %v7276_v5 = vmul.f32 %v7238_v10, %v7159_v22  ;;  %v1918_v8 = vsel %vm7249_vm15, %v7156_v19, %v1914_v31 }
  0xfc   : > { %v5918_v9 = vpop.eup %5917  ;;  %5923 = vpow2.f32 %v5450_v39  ;;  %v915_v24 = vsel %vm914_vm2, %v7176_v42, %v911_v23  ;;  %v1169_v38 = vmin.f32 %v1153_v4, 1.0  ;;  %v923_v42 = vmul.f32 %v7257_v58, %v7179_v55  ;;  %v7296_v23 = vpop.permute.xlu2 %2270  ;;  %2331 = vmatpush.msrb.mxu1 %v7004_v37 }
  0xfd   : > { %5925 = vrcp.f32 %v7260_v56  ;;  %v1798_v33 = vpop.f32.mrf.mxu3  ;;  %v7283_v48 = vmul.f32 0.6931472, %v5918_v9  ;;  %v920_v36 = vsel %vm7212_vm11, %v919_v28, %v915_v24  ;;  %v1922_v41 = vor.u32 1.1754944e-38, %v1921_v62  ;;  %9723 = vst [vmem:[#allocation19_spill] sm:$0xff] %v7296_v23 }
  0xfe   : > { %4357 = vperm.xlu0 %5880, %v4279_v13   ;;  %v1799_v19 = vadd.f32 %v1798_v33, %v6954_v6  ;;  %v7293_v31 = vmul.f32 %v7085_v20, %v920_v36  ;;  %v783_v39 = vpop.f32.mrf.mxu0  ;;  %5927 = vlog2.f32 %v1169_v38  ;;  %v1898_v28 = vmul.f32 %v7071_v16, %v9724_v52  ;;  %v7314_v38 = vpop.permute.xlu1 %2280  ;;  %2332 = vmatpush.msrb.mxu1 %v7010_v40 }
  0xff   : > { %1328 = vmatmul.f32.vlgmr.msra.gmra.mxu1 %v7283_v48  ;;  %v784_v62 = vadd.f32 %v783_v39, %v6954_v6  ;;  %v1923_v24 = vsel %vm7269_vm3, %v1922_v41, %v1918_v8  ;;  %9725 = vst [vmem:[#allocation20_spill] sm:$0xff] %v7314_v38  ;;  %v1904_v0 = vand.u32 2147483647, %v7016_v44  ;;  %vm928_vm9 = vweird.f32 %v7257_v58 }
 0x100   : > { %v5920_v13 = vpop.eup %5919  ;;  %v5546_v4 = vmul.f32 -1.442695, %v1799_v19  ;;  %v1138_v9 = vsub.f32 1.0, %v7293_v31  ;;  %v7317_v36 = vmul.f32 %v7085_v20, %v1923_v24  ;;  %v1899_v19 = vadd.f32 %v7071_v16, %v1898_v28  ;;  %2333 = vmatpush.msrb.mxu1 %v7021_v45  ;;  %vm7397_vm10 = vmor %vm927_vm8, %vm928_vm9 }
 0x101   : > { %v7310_v43 = vpop.eup %5921  ;;  %v7312_v33 = vadd.f32 1.0, %v5920_v13  ;;  %v5451_v41 = vmul.f32 -1.442695, %v784_v62  ;;  %5627 = vmatmul.msk.f32.gmra.mxu0 %vm454_vm1, %v5563_v32  ;;  %v924_v13 = vsub.f32 1.0, %v923_v42  ;;  %v7348_v62 = vpop.permute.xlu0 %2275  ;;  %vm7354_vm7 = vcmp.eq.f32.partialorder %v1904_v0, 8.507059e+37 }
 0x102   : > { %9726 = vst [vmem:[#allocation21_spill] sm:$0xff] %v7317_v36  ;;  %v5924_v37 = vpop.eup %5923  ;;  %v7328_v8 = vmul.f32 %v7310_v43, %v7240_v61  ;;  %5929 = vpow2.f32 %v5546_v4  ;;  %v1154_v52 = vmax.f32 %v1138_v9, 1.1754944e-38  ;;  %v2152_v38 = vsub.f32 1.0, %v7317_v36  ;;  %2334 = vmatpush.msrb.mxu1 %v7040_v54 }
 0x103   : > { %v7332_v28 = vpop.eup %5925  ;;  %5931 = vrcp.f32 %v7312_v33  ;;  %v7335_v24 = vadd.f32 1.0, %v5924_v37  ;;  %v1903_v32 = vsel %vm7320_vm6, %v7071_v16, %v1899_v19  ;;  %9729 = vst [vmem:[#allocation22_spill] sm:$0xff] %v7348_v62  ;;  %v1906_v37 = vand.u32 2147483648, %v7016_v44  ;;  %v5564_v19 = vld [vmem:[%s6720_s19 + $0x138] sm:$0xff] }
 0x104   : > { %v1942_v23 = vsub.f32 1.0, %v7328_v8  ;;  %5933 = vpow2.f32 %v5451_v41  ;;  %v1170_v49 = vmin.f32 %v1154_v52, 1.0  ;;  %v5928_v40 = vpop.eup %5927  ;;  %v7345_v42 = vmul.f32 %v7332_v28, %v7260_v56  ;;  %2335 = vmatpush.msrb.mxu1 %v7051_v59 }
 0x105   : > { %5935 = vrcp.f32 %v7335_v24  ;;  %v1801_v4 = vpop.f32.mrf.mxu3  ;;  %v2168_v9 = vmax.f32 %v2152_v38, 1.1754944e-38  ;;  %v7352_v39 = vmul.f32 0.6931472, %v5928_v40  ;;  %v1907_v52 = vor.u32 1.1754944e-38, %v1906_v37 }
 0x106   : > { %v1802_v8 = vadd.f32 %v1801_v4, %v6954_v6  ;;  %5937 = vlog2.f32 %v1170_v49  ;;  %v786_v16 = vpop.f32.mrf.mxu0  ;;  %v925_v62 = vmul.f32 %v7257_v58, %v924_v13  ;;  %v931_v49 = vand.u32 2147483647, %v7179_v55  ;;  %v7370_v4 = vpop.permute.xlu2 %2285  ;;  %2336 = vmatpush.msrb.mxu1 %v7062_v7 }
 0x107   : > { %v2184_v41 = vmin.f32 %v2168_v9, 1.0  ;;  %v787_v40 = vadd.f32 %v786_v16, %v6954_v6  ;;  %1331 = vmatmul.f32.gmra.mxu1 %v7352_v39  ;;  %9732 = vst [vmem:[#allocation23_spill] sm:$0xff] %v7370_v4  ;;  %v1908_v13 = vsel %vm7354_vm7, %v1907_v52, %v1903_v32  ;;  %v7391_v45 = vpop.permute.xlu1 %2295  ;;  %v933_v7 = vand.u32 2147483648, %v7179_v55  ;;  %v5565_v55 = vld [vmem:[%s6720_s19 + $0x140] sm:$0xff] }
 0x108   : > { %v5930_v44 = vpop.eup %5929  ;;  %v5547_v38 = vmul.f32 -1.442695, %v1802_v8  ;;  %v926_v9 = vadd.f32 %v7257_v58, %v925_v62  ;;  %v939_v62 = vsub.f32 1.0, %v7345_v42  ;;  %9734 = vst [vmem:[#allocation25_spill] sm:$0xff] %v7391_v45  ;;  %vm7412_vm11 = vcmp.eq.f32.partialorder %v931_v49, 8.507059e+37  ;;  %2337 = vmatpush.msrb.mxu1 %v7078_v17 }
 0x109   : > { %v7366_v0 = vpop.eup %5931  ;;  %v7368_v54 = vadd.f32 1.0, %v5930_v44  ;;  %5939 = vlog2.f32 %v2184_v41  ;;  %v5452_v16 = vmul.f32 -1.442695, %v787_v40  ;;  %5628 = vmatmul.msk.f32.gmra.mxu0 %vm454_vm1, %v5564_v19  ;;  %v7382_v44 = vmul.f32 %v7085_v20, %v1908_v13 }
 0x10a   : > { %v5934_v37 = vpop.eup %5933  ;;  %v7378_v8 = vmul.f32 %v7366_v0, %v7312_v33  ;;  %5941 = vpow2.f32 %v5547_v38  ;;  %v930_v40 = vsel %vm7397_vm10, %v7257_v58, %v926_v9  ;;  %v1943_v45 = vmul.f32 %v7310_v43, %v1942_v23  ;;  %2338 = vmatpush.msrb.mxu1 %v7100_v35 }
 0x10b   : > { %9733 = vst [vmem:[#allocation24_spill] sm:$0xff] %v7382_v44  ;;  %v7384_v41 = vpop.eup %5935  ;;  %5943 = vrcp.f32 %v7368_v54  ;;  %v7389_v59 = vadd.f32 1.0, %v5934_v37  ;;  %v2151_v38 = vsub.f32 1.0, %v7382_v44  ;;  %vm1945_vm12 = vweird.f32 %v7240_v61 }
 0x10c   : > { %v5938_v52 = vpop.eup %5937  ;;  %v7404_v42 = vmul.f32 %v7384_v41, %v7335_v24  ;;  %5945 = vpow2.f32 %v5452_v16  ;;  %v934_v36 = vor.u32 1.1754944e-38, %v933_v7  ;;  %vm1946_vm13 = vweird.f32 %v7310_v43  ;;  %2339 = vmatpush.msrb.mxu1 %v7130_v51 }
 0x10d   : > { %v1804_v13 = vpop.f32.mrf.mxu3  ;;  %v7410_v37 = vmul.f32 0.6931472, %v5938_v52  ;;  %v2167_v19 = vmax.f32 %v2151_v38, 1.1754944e-38  ;;  %5947 = vrcp.f32 %v7389_v59  ;;  %v7424_v52 = vpop.permute.xlu0 %2290  ;;  %v1949_v9 = vand.u32 2147483647, %v7240_v61  ;;  %vm7443_vm14 = vmor %vm1945_vm12, %vm1946_vm13 }
 0x10e   : > { %v1805_v4 = vadd.f32 %v1804_v13, %v6954_v6  ;;  %v789_v49 = vpop.f32.mrf.mxu0  ;;  %9739 = vst [vmem:[#allocation26_spill] sm:$0xff] %v7424_v52  ;;  %v1944_v13 = vadd.f32 %v7310_v43, %v1943_v45  ;;  %v935_v35 = vsel %vm7412_vm11, %v934_v36, %v930_v40  ;;  %v7459_v40 = vpop.permute.xlu2 %2300  ;;  %v1951_v51 = vand.u32 2147483648, %v7240_v61  ;;  %2340 = vmatpush.msrb.mxu1 %v7143_v63 }
 0x10f   : > { %v5940_v58 = vpop.eup %5939  ;;  %v790_v38 = vadd.f32 %v789_v49, %v6954_v6  ;;  %1334 = vmatmul.f32.gmra.mxu1 %v7410_v37  ;;  %v2183_v7 = vmin.f32 %v2167_v19, 1.0  ;;  %v7454_v32 = vmul.f32 %v7085_v20, %v935_v35  ;;  %9742 = vst [vmem:[#allocation27_spill] sm:$0xff] %v7459_v40  ;;  %v940_v19 = vmul.f32 %v7332_v28, %v939_v62  ;;  %v7472_v61 = vpop.permute.xlu1 %2310 }
 0x110   : > { %v5942_v17 = vpop.eup %5941  ;;  %v5548_v23 = vmul.f32 -1.442695, %v1805_v4  ;;  %v7437_v52 = vmul.f32 0.6931472, %v5940_v58  ;;  %vm1950_vm15 = vcmp.eq.f32.partialorder %v1949_v9, 8.507059e+37  ;;  %9743 = vst [vmem:[#allocation28_spill] sm:$0xff] %v7472_v61  ;;  %2341 = vmatpush.msrb.mxu1 %v7164_v27  ;;  %vm942_vm2 = vweird.f32 %v7260_v56 }
 0x111   : > { %v7433_v16 = vpop.eup %5943  ;;  %v7435_v44 = vadd.f32 1.0, %v5942_v17  ;;  %v5453_v58 = vmul.f32 -1.442695, %v790_v38  ;;  %5629 = vmatmul.msk.f32.gmra.mxu0 %vm454_vm1, %v5565_v55  ;;  %v1139_v17 = vsub.f32 1.0, %v7454_v32  ;;  %v1948_v55 = vsel %vm7443_vm14, %v7310_v43, %v1944_v13  ;;  %v5566_v9 = vld [vmem:[%s6720_s19 + $0x148] sm:$0xff] }
 0x112   : > { %v5946_v45 = vpop.eup %5945  ;;  %v7450_v49 = vmul.f32 %v7433_v16, %v7368_v54  ;;  %5949 = vpow2.f32 %v5548_v23  ;;  %v1952_v35 = vor.u32 1.1754944e-38, %v1951_v51  ;;  %v941_v63 = vadd.f32 %v7332_v28, %v940_v19  ;;  %2342 = vmatpush.msrb.mxu1 %v7184_v50 }
 0x113   : > { %5951 = vrcp.f32 %v7435_v44  ;;  %v7457_v36 = vadd.f32 1.0, %v5946_v45  ;;  %v7468_v23 = vpop.eup %5947  ;;  %v1155_v4 = vmax.f32 %v1139_v17, 1.1754944e-38  ;;  %vm943_vm3 = vweird.f32 %v7332_v28 }
 0x114   : > { %5953 = vpow2.f32 %v5453_v58  ;;  %v1953_v13 = vsel %vm1950_vm15, %v1952_v35, %v1948_v55  ;;  %v946_v58 = vand.u32 2147483647, %v7260_v56  ;;  %v948_v38 = vand.u32 2147483648, %v7260_v56  ;;  %vm7491_vm4 = vmor %vm942_vm2, %vm943_vm3  ;;  %2343 = vmatpush.msrb.mxu1 %v7207_v15 }
 0x115   : > { %5955 = vrcp.f32 %v7457_v36  ;;  %v1807_v62 = vpop.f32.mrf.mxu3  ;;  %v7485_v27 = vmul.f32 %v7468_v23, %v7389_v59  ;;  %v7489_v17 = vmul.f32 %v7085_v20, %v1953_v13  ;;  %v1171_v50 = vmin.f32 %v1155_v4, 1.0  ;;  %v7499_v35 = vpop.permute.xlu0 %2305 }
 0x116   : > { %v1808_v45 = vadd.f32 %v1807_v62, %v6954_v6  ;;  %5957 = vlog2.f32 %v2183_v7  ;;  %v792_v43 = vpop.f32.mrf.mxu0  ;;  %9747 = vst [vmem:[#allocation30_spill] sm:$0xff] %v7499_v35  ;;  %v949_v61 = vor.u32 1.1754944e-38, %v948_v38  ;;  %vm947_vm5 = vcmp.eq.f32.partialorder %v946_v58, 8.507059e+37 }
 0x117   : > { %v793_v19 = vadd.f32 %v792_v43, %v6954_v6  ;;  %9744 = vst [vmem:[#allocation29_spill] sm:$0xff] %v7489_v17  ;;  %v9748_v38 = vsub.f32 1.0, %v7276_v5  ;;  %vm1930_vm6 = vweird.f32 %v7159_v22  ;;  %vm1931_vm7 = vweird.f32 %v7238_v10 }
 0x118   : > { %v5950_v51 = vpop.eup %5949  ;;  %v5549_v7 = vmul.f32 -1.442695, %v1808_v45  ;;  %v945_v45 = vsel %vm7491_vm4, %v7332_v28, %v941_v63  ;;  %vm7543_vm8 = vmor %vm1930_vm6, %vm1931_vm7  ;;  %vm1960_vm10 = vweird.f32 %v7312_v33  ;;  %vm1961_vm11 = vweird.f32 %v7366_v0 }
 0x119   : > { %v7495_v62 = vpop.eup %5951  ;;  %v7497_v56 = vadd.f32 1.0, %v5950_v51  ;;  %v5454_v13 = vmul.f32 -1.442695, %v793_v19  ;;  %5630 = vmatmul.msk.f32.gmra.mxu0 %vm454_vm1, %v5566_v9  ;;  %v2154_v51 = vsub.f32 1.0, %v7489_v17  ;;  %v950_v28 = vsel %vm947_vm5, %v949_v61, %v945_v45  ;;  %v7526_v61 = vpop.permute.xlu2 %2315  ;;  %vm7602_vm12 = vmor %vm1960_vm10, %vm1961_vm11 }
 0x11a   : > { %v5954_v43 = vpop.eup %5953  ;;  %1554 = vadd.xlane.f32.xlu1 %v7283_v48  ;;  %5959 = vpow2.f32 %v5549_v7  ;;  %v1928_v15 = vmul.f32 %v7238_v10, %v9748_v38  ;;  %v7519_v9 = vmul.f32 %v7495_v62, %v7435_v44  ;;  %9749 = vst [vmem:[#allocation31_spill] sm:$0xff] %v7526_v61  ;;  %v7529_v19 = vmul.f32 %v7085_v20, %v950_v28 }
 0x11b   : > { %v7508_v4 = vpop.eup %5955  ;;  %5961 = vrcp.f32 %v7497_v56  ;;  %v7511_v35 = vadd.f32 1.0, %v5954_v43  ;;  %v2170_v58 = vmax.f32 %v2154_v51, 1.1754944e-38  ;;  %v7535_v51 = vpop.permute.xlu1 %2325  ;;  %v1934_v28 = vand.u32 2147483647, %v7159_v22 }
 0x11c   : > { %v5958_v63 = vpop.eup %5957  ;;  %5963 = vpow2.f32 %v5454_v13  ;;  %v7523_v7 = vmul.f32 %v7508_v4, %v7457_v36  ;;  %v1929_v55 = vadd.f32 %v7238_v10, %v1928_v15  ;;  %9750 = vst [vmem:[#allocation32_spill] sm:$0xff] %v7535_v51  ;;  %v1140_v48 = vsub.f32 1.0, %v7529_v19 }
 0x11d   : > { %5965 = vrcp.f32 %v7511_v35  ;;  %v1810_v5 = vpop.f32.mrf.mxu3  ;;  %v7532_v45 = vmul.f32 0.6931472, %v5958_v63  ;;  %v2186_v13 = vmin.f32 %v2170_v58, 1.0  ;;  %v1936_v58 = vand.u32 2147483648, %v7159_v22 }
 0x11e   : > { %5967 = vlog2.f32 %v1171_v50  ;;  %v1811_v43 = vadd.f32 %v1810_v5, %v6954_v6  ;;  %v795_v38 = vpop.f32.mrf.mxu0  ;;  %v5567_v50 = vld [vmem:[%s6720_s19 + $0x150] sm:$0xff]  ;;  %v1156_v17 = vmax.f32 %v1140_v48, 1.1754944e-38  ;;  %v1933_v30 = vsel %vm7543_vm8, %v7238_v10, %v1929_v55  ;;  %v7567_v55 = vpop.permute.xlu0 %2320 }
 0x11f   : > { %5969 = vlog2.f32 %v2186_v13  ;;  %v796_v15 = vadd.f32 %v795_v38, %v6954_v6  ;;  %vm7555_vm9 = vcmp.eq.f32.partialorder %v1934_v28, 8.507059e+37  ;;  %9755 = vst [vmem:[#allocation33_spill] sm:$0xff] %v7567_v55  ;;  %v9756_v28 = vsub.f32 1.0, %v7378_v8 }
 0x120   : > { %v5960_v61 = vpop.eup %5959  ;;  %v5550_v40 = vmul.f32 -1.442695, %v1811_v43  ;;  %v1172_v10 = vmin.f32 %v1156_v17, 1.0  ;;  %v9762_v55 = vsub.f32 1.0, %v7404_v42  ;;  %vm957_vm14 = vweird.f32 %v7335_v24 }
 0x121   : > { %v7548_v5 = vpop.eup %5961  ;;  %v7550_v51 = vadd.f32 1.0, %v5960_v61  ;;  %v5455_v22 = vmul.f32 -1.442695, %v796_v15  ;;  %v1937_v61 = vor.u32 1.1754944e-38, %v1936_v58  ;;  %5631 = vmatmul.msk.f32.gmra.mxu0 %vm454_vm1, %v5567_v50  ;;  %v7596_v43 = vpop.permute.xlu2 %3266  ;;  %vm958_vm15 = vweird.f32 %v7384_v41 }
 0x122   : > { %v5964_v13 = vpop.eup %5963  ;;  %1556 = vadd.xlane.f32.xlu2 %v7352_v39  ;;  %2571 = vadd.xlane.f32.xlu1 %v7532_v45  ;;  %5971 = vpow2.f32 %v5550_v40  ;;  %v1958_v39 = vmul.f32 %v7366_v0, %v9756_v28  ;;  %v7576_v15 = vmul.f32 %v7548_v5, %v7497_v56  ;;  %9759 = vst [vmem:[#allocation36_spill] sm:$0xff] %v7596_v43  ;;  %v5568_v43 = vld [vmem:[%s6720_s19 + $0x158] sm:$0xff]  ;;  %vm7653_vm2 = vmor %vm957_vm14, %vm958_vm15  ;;  %vm1975_vm3 = vweird.f32 %v7368_v54 }
 0x123   : > { %v7562_v34 = vpop.eup %5965  ;;  %5973 = vrcp.f32 %v7550_v51  ;;  %v7565_v48 = vadd.f32 1.0, %v5964_v13  ;;  %v1938_v58 = vsel %vm7555_vm9, %v1937_v61, %v1933_v30  ;;  %v7616_v46 = vpop.permute.xlu1 %3276  ;;  %vm1976_vm4 = vweird.f32 %v7433_v16 }
 0x124   : > { %v5968_v63 = vpop.eup %5967  ;;  %5975 = vpow2.f32 %v5455_v22  ;;  %v7584_v8 = vmul.f32 %v7085_v20, %v1938_v58  ;;  %v1959_v13 = vadd.f32 %v7366_v0, %v1958_v39  ;;  %v7589_v40 = vmul.f32 %v7562_v34, %v7511_v35  ;;  %9763 = vst [vmem:[#allocation37_spill] sm:$0xff] %v7616_v46  ;;  %vm7680_vm6 = vmor %vm1975_vm3, %vm1976_vm4 }
 0x125   : > { %5977 = vrcp.f32 %v7565_v48  ;;  %v7581_v17 = vmul.f32 0.6931472, %v5968_v63  ;;  %v1813_v50 = vpop.f32.mrf.mxu3  ;;  %v5970_v28 = vpop.eup %5969  ;;  %v1964_v39 = vand.u32 2147483647, %v7312_v33  ;;  %vm972_vm8 = vweird.f32 %v7389_v59 }
 0x126   : > { %9757 = vst [vmem:[#allocation34_spill] sm:$0xff] %v7584_v8  ;;  %5979 = vlog2.f32 %v1172_v10  ;;  %v1814_v22 = vadd.f32 %v1813_v50, %v6954_v6  ;;  %v7594_v30 = vmul.f32 0.6931472, %v5970_v28  ;;  %v2153_v61 = vsub.f32 1.0, %v7584_v8  ;;  %v798_v63 = vpop.f32.mrf.mxu0 }
 0x127   : > { %1337 = vmatmul.f32.gmra.mxu1 %v7581_v17  ;;  %v1966_v28 = vand.u32 2147483648, %v7312_v33  ;;  %v799_v38 = vadd.f32 %v798_v63, %v6954_v6  ;;  %v955_v8 = vmul.f32 %v7384_v41, %v9762_v55  ;;  %vm7621_vm13 = vcmp.eq.f32.partialorder %v1964_v39, 8.507059e+37 }
 0x128   : > { %9758 = vst [vmem:[#allocation35_spill] sm:$0xff] %v7594_v30  ;;  %v5972_v58 = vpop.eup %5971  ;;  %1558 = vadd.xlane.f32.xlu0 %v7410_v37  ;;  %v5551_v10 = vmul.f32 -1.442695, %v1814_v22  ;;  %v2169_v37 = vmax.f32 %v2153_v61, 1.1754944e-38  ;;  %v1963_v22 = vsel %vm7602_vm12, %v7366_v0, %v1959_v13  ;;  %v1979_v33 = vand.u32 2147483647, %v7368_v54 }
 0x129   : > { %v7612_v53 = vpop.eup %5973  ;;  %v7614_v18 = vadd.f32 1.0, %v5972_v58  ;;  %v1967_v55 = vor.u32 1.1754944e-38, %v1966_v28  ;;  %v5456_v61 = vmul.f32 -1.442695, %v799_v38  ;;  %5632 = vmatmul.msk.f32.gmra.mxu0 %vm454_vm1, %v5568_v43  ;;  %v956_v38 = vadd.f32 %v7384_v41, %v955_v8 }
 0x12a   : > { %v5976_v63 = vpop.eup %5975  ;;  %2573 = vadd.xlane.f32.xlu2 %v7437_v52  ;;  %v7628_v42 = vmul.f32 %v7612_v53, %v7550_v51  ;;  %2577 = vadd.xlane.f32.xlu1 %v7594_v30  ;;  %5981 = vpow2.f32 %v5551_v10  ;;  %v2185_v39 = vmin.f32 %v2169_v37, 1.0  ;;  %v7647_v37 = vpop.permute.xlu0 %3271  ;;  %vm1980_vm7 = vcmp.eq.f32.partialorder %v1979_v33, 8.507059e+37 }
 0x12b   : > { %v7631_v58 = vpop.eup %5977  ;;  %5983 = vrcp.f32 %v7614_v18  ;;  %v7635_v13 = vadd.f32 1.0, %v5976_v63  ;;  %v1968_v29 = vsel %vm7621_vm13, %v1967_v55, %v1963_v22  ;;  %9767 = vst [vmem:[#allocation39_spill] sm:$0xff] %v7647_v37  ;;  %v961_v22 = vand.u32 2147483647, %v7335_v24 }
 0x12c   : > { %v5980_v50 = vpop.eup %5979  ;;  %5985 = vpow2.f32 %v5456_v61  ;;  %v7645_v63 = vmul.f32 %v7085_v20, %v1968_v29  ;;  %v963_v29 = vand.u32 2147483648, %v7335_v24  ;;  %v9770_v61 = vsub.f32 1.0, %v7450_v49  ;;  %v5569_v24 = vld [vmem:[%s6720_s19 + $0x160] sm:$0xff] }
 0x12d   : > { %5987 = vrcp.f32 %v7635_v13  ;;  %v1193_v28 = vmul.f32 0.6931472, %v5980_v50  ;;  %v1816_v43 = vpop.f32.mrf.mxu3  ;;  %v7664_v10 = vmul.f32 %v7631_v58, %v7565_v48  ;;  %v960_v46 = vsel %vm7653_vm2, %v7384_v41, %v956_v38 }
 0x12e   : > { %9766 = vst [vmem:[#allocation38_spill] sm:$0xff] %v7645_v63  ;;  %5989 = vlog2.f32 %v2185_v39  ;;  %v2155_v8 = vsub.f32 1.0, %v7645_v63  ;;  %v1817_v55 = vadd.f32 %v1816_v43, %v6954_v6  ;;  %v1973_v39 = vmul.f32 %v7433_v16, %v9770_v61  ;;  %v7676_v63 = vpop.permute.xlu2 %3281 }
 0x12f   : > { %1340 = vmatmul.f32.gmra.mxu1 %v1193_v28  ;;  %v964_v61 = vor.u32 1.1754944e-38, %v963_v29  ;;  %9771 = vst [vmem:[#allocation40_spill] sm:$0xff] %v7676_v63  ;;  %vm962_vm5 = vcmp.eq.f32.partialorder %v961_v22, 8.507059e+37  ;;  %v801_v22 = vpop.f32.mrf.mxu0  ;;  %vm973_vm9 = vweird.f32 %v7468_v23  ;;  %vm1990_vm12 = vweird.f32 %v7435_v44 }
 0x130   : > { %v5982_v50 = vpop.eup %5981  ;;  %v2171_v49 = vmax.f32 %v2155_v8, 1.1754944e-38  ;;  %v5552_v37 = vmul.f32 -1.442695, %v1817_v55  ;;  %v1974_v41 = vadd.f32 %v7433_v16, %v1973_v39  ;;  %vm7737_vm10 = vmor %vm972_vm8, %vm973_vm9  ;;  %vm1991_vm13 = vweird.f32 %v7495_v62 }
 0x131   : > { %v7672_v0 = vpop.eup %5983  ;;  %v7674_v43 = vadd.f32 1.0, %v5982_v50  ;;  %v1981_v50 = vand.u32 2147483648, %v7368_v54  ;;  %5633 = vmatmul.msk.f32.gmra.mxu0 %vm454_vm1, %v5569_v24  ;;  %vm7776_vm14 = vmor %vm1990_vm12, %vm1991_vm13  ;;  %vm987_vm2 = vweird.f32 %v7457_v36  ;;  %vm988_vm3 = vweird.f32 %v7508_v4 }
 0x132   : > { %v5986_v47 = vpop.eup %5985  ;;  %1560 = vadd.xlane.f32.xlu2 %v7581_v17  ;;  %1562 = vadd.xlane.f32.xlu1 %v1193_v28  ;;  %v2187_v29 = vmin.f32 %v2171_v49, 1.0  ;;  %v965_v17 = vsel %vm962_vm5, %v964_v61, %v960_v46  ;;  %v7691_v28 = vpop.permute.xlu1 %3291  ;;  %v7697_v25 = vmul.f32 %v7672_v0, %v7614_v18  ;;  %v1978_v46 = vsel %vm7680_vm6, %v7433_v16, %v1974_v41  ;;  %vm7807_vm4 = vmor %vm987_vm2, %vm988_vm3 }
 0x133   : > { %v7686_v8 = vpop.eup %5987  ;;  %5991 = vrcp.f32 %v7674_v43  ;;  %v7689_v55 = vadd.f32 1.0, %v5986_v47  ;;  %9774 = vst [vmem:[#allocation41_spill] sm:$0xff] %v7691_v28  ;;  %v7700_v54 = vmul.f32 %v7085_v20, %v965_v17  ;;  %v1982_v61 = vor.u32 1.1754944e-38, %v1981_v50  ;;  %v7720_v16 = vpop.permute.xlu0 %3286 }
 0x134   : > { %v5990_v39 = vpop.eup %5989  ;;  %5993 = vpow2.f32 %v5552_v37  ;;  %v7709_v47 = vmul.f32 %v7686_v8, %v7635_v13  ;;  %v802_v37 = vadd.f32 %v801_v22, %v6954_v6  ;;  %9777 = vst [vmem:[#allocation43_spill] sm:$0xff] %v7720_v16  ;;  %v978_v50 = vand.u32 2147483648, %v7389_v59  ;;  %v5570_v16 = vld [vmem:[%s6720_s19 + $0x168] sm:$0xff] }
 0x135   : > { %9775 = vst [vmem:[#allocation42_spill] sm:$0xff] %v7700_v54  ;;  %v7702_v49 = vmul.f32 0.6931472, %v5990_v39  ;;  %5995 = vlog2.f32 %v2187_v29  ;;  %v1141_v24 = vsub.f32 1.0, %v7700_v54  ;;  %v1819_v17 = vpop.f32.mrf.mxu3  ;;  %v9776_v29 = vsub.f32 1.0, %v7485_v27 }
 0x136   : > { %5997 = vrcp.f32 %v7689_v55  ;;  %v1983_v33 = vsel %vm1980_vm7, %v1982_v61, %v1978_v46  ;;  %v976_v39 = vand.u32 2147483647, %v7389_v59  ;;  %v5457_v27 = vmul.f32 -1.442695, %v802_v37  ;;  %v5476_v59 = vld [vmem:[%s6720_s19 + $0xf8] sm:$0xff] }
 0x137   : > { %2575 = vadd.xlane.f32.xlu0 %v7702_v49  ;;  %v970_v38 = vmul.f32 %v7468_v23, %v9776_v29  ;;  %v1157_v41 = vmax.f32 %v1141_v24, 1.1754944e-38  ;;  %v7727_v22 = vmul.f32 %v7085_v20, %v1983_v33  ;;  %v1820_v28 = vadd.f32 %v1819_v17, %v6954_v6  ;;  %5540 = vmatmul.msk.f32.gmra.mxu3 %vm454_vm1, %v5476_v59 }
 0x138   : > { %vm977_vm11 = vcmp.eq.f32.partialorder %v976_v39, 8.507059e+37  ;;  %v979_v20 = vor.u32 1.1754944e-38, %v978_v50  ;;  %5999 = vpow2.f32 %v5457_v27  ;;  %v1994_v27 = vand.u32 2147483647, %v7435_v44 }
 0x139   : > { %v7724_v63 = vpop.eup %5991  ;;  %9778 = vst [vmem:[#allocation44_spill] sm:$0xff] %v7727_v22  ;;  %v971_v29 = vadd.f32 %v7468_v23, %v970_v38  ;;  %v1173_v24 = vmin.f32 %v1157_v41, 1.0  ;;  %v2156_v38 = vsub.f32 1.0, %v7727_v22  ;;  %v7747_v41 = vpop.permute.xlu2 %3296  ;;  %5634 = vmatmul.msk.f32.gmra.mxu0 %vm454_vm1, %v5570_v16  ;;  %vm2005_vm6 = vweird.f32 %v7497_v56 }
 0x13a   : > { %v5994_v14 = vpop.eup %5993  ;;  %v7733_v46 = vmul.f32 %v7724_v63, %v7674_v43  ;;  %9781 = vst [vmem:[#allocation45_spill] sm:$0xff] %v7747_v41  ;;  %v7766_v41 = vpop.permute.xlu1 %3306  ;;  %vm1995_vm15 = vcmp.eq.f32.partialorder %v1994_v27, 8.507059e+37  ;;  %vm2006_vm7 = vweird.f32 %v7548_v5 }
 0x13b   : > { %v5996_v37 = vpop.eup %5995  ;;  %v7741_v33 = vadd.f32 1.0, %v5994_v14  ;;  %v975_v17 = vsel %vm7737_vm10, %v7468_v23, %v971_v29  ;;  %6001 = vlog2.f32 %v1173_v24  ;;  %v2172_v23 = vmax.f32 %v2156_v38, 1.1754944e-38  ;;  %v7761_v29 = vld [vmem:[%s6524_s13] ss:$0 sm:$0xff]  ;;  %9784 = vst [vmem:[#allocation48_spill] sm:$0xff] %v7766_v41  ;;  %v7787_v22 = vpop.permute.xlu0 %3301  ;;  %vm7845_vm8 = vmor %vm2005_vm6, %vm2006_vm7 }
 0x13c   : > { %v7751_v54 = vpop.eup %5997  ;;  %v7754_v50 = vmul.f32 0.6931472, %v5996_v37  ;;  %v980_v14 = vsel %vm977_vm11, %v979_v20, %v975_v17  ;;  %v804_v37 = vpop.f32.mrf.mxu0  ;;  %v5553_v24 = vmul.f32 -1.442695, %v1820_v28  ;;  %v9785_v20 = vsub.f32 1.0, %v7519_v9  ;;  %9789 = vst [vmem:[#allocation49_spill] sm:$0xff] %v7787_v22 }
 0x13d   : > { %6003 = vrcp.f32 %v7741_v33  ;;  %v7764_v61 = vmul.f32 %v7761_v29, %v980_v14  ;;  %v2188_v17 = vmin.f32 %v2172_v23, 1.0  ;;  %v1996_v28 = vand.u32 2147483648, %v7435_v44 }
 0x13e   : > { %9782 = vst [vmem:[#allocation46_spill] sm:$0xff] %v7754_v50  ;;  %2579 = vadd.xlane.f32.xlu2 %v7754_v50  ;;  %v1988_v16 = vmul.f32 %v7495_v62, %v9785_v20  ;;  %6005 = vpow2.f32 %v5553_v24  ;;  %v805_v20 = vadd.f32 %v804_v37, %v6954_v6  ;;  %v6000_v39 = vpop.eup %5999  ;;  %v9788_v23 = vsub.f32 1.0, %v7523_v7 }
 0x13f   : > { %9783 = vst [vmem:[#allocation47_spill] sm:$0xff] %v7764_v61  ;;  %v1142_v59 = vsub.f32 1.0, %v7764_v61  ;;  %6007 = vlog2.f32 %v2188_v17  ;;  %v7789_v50 = vadd.f32 1.0, %v6000_v39  ;;  %v1997_v44 = vor.u32 1.1754944e-38, %v1996_v28 }
 0x140   : > { %v1989_v9 = vadd.f32 %v7495_v62, %v1988_v16  ;;  %v985_v38 = vmul.f32 %v7508_v4, %v9788_v23  ;;  %v5458_v16 = vmul.f32 -1.442695, %v805_v20  ;;  %v7798_v27 = vmul.f32 %v7751_v54, %v7689_v55  ;;  %v1822_v23 = vpop.f32.mrf.mxu3 }
 0x141   : > { %v1158_v41 = vmax.f32 %v1142_v59, 1.1754944e-38  ;;  %v6002_v61 = vpop.eup %6001  ;;  %6009 = vrcp.f32 %v7789_v50  ;;  %5635 = vmatmul.msk.f32.gmra.mxu0 %vm454_vm1, %v5571_v26  ;;  %v2009_v26 = vand.u32 2147483647, %v7497_v56  ;;  %vm1003_vm10 = vweird.f32 %v7562_v34 }
 0x142   : > { %v1993_v24 = vsel %vm7776_vm14, %v7495_v62, %v1989_v9  ;;  %v1195_v7 = vmul.f32 0.6931472, %v6002_v61  ;;  %v986_v59 = vadd.f32 %v7508_v4, %v985_v38  ;;  %v993_v61 = vand.u32 2147483648, %v7457_v36  ;;  %v7813_v38 = vpop.permute.xlu2 %3311 }
 0x143   : > { %v7794_v37 = vpop.eup %6003  ;;  %v1174_v17 = vmin.f32 %v1158_v41, 1.0  ;;  %v1998_v39 = vsel %vm1995_vm15, %v1997_v44, %v1993_v24  ;;  %v991_v41 = vand.u32 2147483647, %v7457_v36  ;;  %9793 = vst [vmem:[#allocation51_spill] sm:$0xff] %v7813_v38  ;;  %v1823_v24 = vadd.f32 %v1822_v23, %v6954_v6  ;;  %v7826_v38 = vpop.permute.xlu1 %3321 }
 0x144   : > { %1343 = vmatmul.f32.gmra.mxu1 %v1195_v7  ;;  %v7805_v62 = vmul.f32 %v7761_v29, %v1998_v39  ;;  %v6006_v9 = vpop.eup %6005  ;;  %v7817_v28 = vmul.f32 %v7794_v37, %v7741_v33  ;;  %v990_v20 = vsel %vm7807_vm4, %v7508_v4, %v986_v59  ;;  %v994_v39 = vor.u32 1.1754944e-38, %v993_v61  ;;  %9794 = vst [vmem:[#allocation52_spill] sm:$0xff] %v7826_v38  ;;  %v807_v22 = vpop.f32.mrf.mxu0 }
 0x145   : > { %6011 = vlog2.f32 %v1174_v17  ;;  %v6008_v44 = vpop.eup %6007  ;;  %v7823_v17 = vadd.f32 1.0, %v6006_v9  ;;  %vm992_vm5 = vcmp.eq.f32.partialorder %v991_v41, 8.507059e+37  ;;  %vm2010_vm9 = vcmp.eq.f32.partialorder %v2009_v26, 8.507059e+37 }
 0x146   : > { %9790 = vst [vmem:[#allocation50_spill] sm:$0xff] %v7805_v62  ;;  %1564 = vadd.xlane.f32.xlu2 %v1195_v7  ;;  %6013 = vpow2.f32 %v5458_v16  ;;  %v2157_v36 = vsub.f32 1.0, %v7805_v62  ;;  %v7829_v30 = vmul.f32 0.6931472, %v6008_v44  ;;  %v5554_v16 = vmul.f32 -1.442695, %v1823_v24 }
 0x147   : > { %v9796_v7 = vsub.f32 1.0, %v7576_v15  ;;  %6015 = vrcp.f32 %v7823_v17  ;;  %v995_v23 = vsel %vm992_vm5, %v994_v39, %v990_v20  ;;  %v7838_v14 = vpop.eup %6009  ;;  %v2011_v44 = vand.u32 2147483648, %v7497_v56  ;;  %v7856_v39 = vpop.permute.xlu0 %3316 }
 0x148   : > { %9795 = vst [vmem:[#allocation53_spill] sm:$0xff] %v7829_v30  ;;  %v2173_v59 = vmax.f32 %v2157_v36, 1.1754944e-38  ;;  %2581 = vadd.xlane.f32.xlu0 %v7829_v30  ;;  %v7842_v41 = vmul.f32 %v7761_v29, %v995_v23  ;;  %6017 = vpow2.f32 %v5554_v16  ;;  %v7852_v20 = vmul.f32 %v7838_v14, %v7789_v50  ;;  %v1825_v26 = vpop.f32.mrf.mxu3 }
 0x149   : > { %v2003_v4 = vmul.f32 %v7548_v5, %v9796_v7  ;;  %v808_v36 = vadd.f32 %v807_v22, %v6954_v6  ;;  %9800 = vst [vmem:[#allocation55_spill] sm:$0xff] %v7856_v39  ;;  %vm1002_vm11 = vweird.f32 %v7511_v35  ;;  %vm2020_vm14 = vweird.f32 %v7550_v51 }
 0x14a   : > { %9797 = vst [vmem:[#allocation54_spill] sm:$0xff] %v7842_v41  ;;  %v2189_v24 = vmin.f32 %v2173_v59, 1.0  ;;  %v2012_v59 = vor.u32 1.1754944e-38, %v2011_v44  ;;  %v7874_v61 = vpop.permute.xlu2 %3326  ;;  %vm7890_vm12 = vmor %vm1002_vm11, %vm1003_vm10  ;;  %v5572_v44 = vld [vmem:[%s6720_s19 + $0x178] sm:$0xff]  ;;  %vm2021_vm15 = vweird.f32 %v7612_v53  ;;  %vm1017_vm4 = vweird.f32 %v7565_v48 }
 0x14b   : > { %v2004_v15 = vadd.f32 %v7548_v5, %v2003_v4  ;;  %v6012_v9 = vpop.eup %6011  ;;  %v1143_v4 = vsub.f32 1.0, %v7842_v41  ;;  %v5459_v39 = vmul.f32 -1.442695, %v808_v36  ;;  %9802 = vst [vmem:[#allocation56_spill] sm:$0xff] %v7874_v61  ;;  %5636 = vmatmul.msk.f32.gmra.mxu0 %vm454_vm1, %v5572_v44  ;;  %vm7922_vm2 = vmor %vm2020_vm14, %vm2021_vm15  ;;  %v9812_v61 = vsub.f32 1.0, %v7664_v10 }
 0x14c   : > { %v6014_v16 = vpop.eup %6013  ;;  %v1197_v7 = vmul.f32 0.6931472, %v6012_v9  ;;  %6019 = vlog2.f32 %v2189_v24  ;;  %v9801_v9 = vsub.f32 1.0, %v7589_v40  ;;  %vm1018_vm5 = vweird.f32 %v7631_v58 }
 0x14d   : > { %v2008_v23 = vsel %vm7845_vm8, %v7548_v5, %v2004_v15  ;;  %v7863_v62 = vadd.f32 1.0, %v6014_v16  ;;  %v1159_v22 = vmax.f32 %v1143_v4, 1.1754944e-38  ;;  %v7869_v30 = vpop.eup %6015  ;;  %v1006_v15 = vand.u32 2147483647, %v7511_v35  ;;  %vm7959_vm6 = vmor %vm1017_vm4, %vm1018_vm5 }
 0x14e   : > { %1346 = vmatmul.f32.gmra.mxu1 %v1197_v7  ;;  %v1000_v41 = vmul.f32 %v7562_v34, %v9801_v9  ;;  %v2013_v5 = vsel %vm2010_vm9, %v2012_v59, %v2008_v23  ;;  %v6018_v24 = vpop.eup %6017  ;;  %v1008_v23 = vand.u32 2147483648, %v7511_v35  ;;  %v7885_v59 = vpop.permute.xlu1 %3336  ;;  %vm2035_vm7 = vweird.f32 %v7614_v18 }
 0x14f   : > { %6021 = vrcp.f32 %v7863_v62  ;;  %v1175_v36 = vmin.f32 %v1159_v22, 1.0  ;;  %v7878_v40 = vmul.f32 %v7761_v29, %v2013_v5  ;;  %v7880_v16 = vadd.f32 1.0, %v6018_v24  ;;  %9804 = vst [vmem:[#allocation58_spill] sm:$0xff] %v7885_v59  ;;  %v810_v9 = vpop.f32.mrf.mxu0 }
 0x150   : > { %6023 = vpow2.f32 %v5459_v39  ;;  %v1001_v4 = vadd.f32 %v7562_v34, %v1000_v41  ;;  %1566 = vadd.xlane.f32.xlu0 %v1197_v7  ;;  %vm1007_vm13 = vcmp.eq.f32.partialorder %v1006_v15, 8.507059e+37  ;;  %v1826_v41 = vadd.f32 %v1825_v26, %v6954_v6 }
 0x151   : > { %9803 = vst [vmem:[#allocation57_spill] sm:$0xff] %v7878_v40  ;;  %6025 = vlog2.f32 %v1175_v36  ;;  %v2158_v22 = vsub.f32 1.0, %v7878_v40  ;;  %v1009_v7 = vor.u32 1.1754944e-38, %v1008_v23  ;;  %v9807_v24 = vsub.f32 1.0, %v7628_v42  ;;  %v7912_v42 = vpop.permute.xlu0 %3331 }
 0x152   : > { %v6020_v5 = vpop.eup %6019  ;;  %6027 = vrcp.f32 %v7880_v16  ;;  %v1005_v35 = vsel %vm7890_vm12, %v7562_v34, %v1001_v4  ;;  %v5555_v59 = vmul.f32 -1.442695, %v1826_v41  ;;  %v2024_v34 = vand.u32 2147483647, %v7550_v51  ;;  %9808 = vst [vmem:[#allocation59_spill] sm:$0xff] %v7912_v42 }
 0x153   : > { %v2018_v36 = vmul.f32 %v7612_v53, %v9807_v24  ;;  %v7903_v56 = vmul.f32 0.6931472, %v6020_v5  ;;  %v2174_v38 = vmax.f32 %v2158_v22, 1.1754944e-38  ;;  %v1010_v26 = vsel %vm1007_vm13, %v1009_v7, %v1005_v35 }
 0x154   : > { %v7916_v23 = vmul.f32 %v7869_v30, %v7823_v17  ;;  %v7920_v44 = vmul.f32 %v7761_v29, %v1010_v26  ;;  %6029 = vpow2.f32 %v5555_v59  ;;  %vm2025_vm3 = vcmp.eq.f32.partialorder %v2024_v34, 8.507059e+37 }
 0x155   : > { %v7907_v15 = vpop.eup %6021  ;;  %v2019_v39 = vadd.f32 %v7612_v53, %v2018_v36  ;;  %2583 = vadd.xlane.f32.xlu1 %v7903_v56  ;;  %v2190_v22 = vmin.f32 %v2174_v38, 1.0  ;;  %v2026_v38 = vand.u32 2147483648, %v7550_v51  ;;  %v811_v36 = vadd.f32 %v810_v9, %v6954_v6 }
 0x156   : > { %v6024_v4 = vpop.eup %6023  ;;  %9809 = vst [vmem:[#allocation60_spill] sm:$0xff] %v7920_v44  ;;  %v7928_v5 = vmul.f32 %v7907_v15, %v7863_v62  ;;  %v1144_v59 = vsub.f32 1.0, %v7920_v44  ;;  %v1015_v41 = vmul.f32 %v7631_v58, %v9812_v61  ;;  %vm2036_vm9 = vweird.f32 %v7672_v0 }
 0x157   : > { %v7930_v35 = vadd.f32 1.0, %v6024_v4  ;;  %v2023_v7 = vsel %vm7922_vm2, %v7612_v53, %v2019_v39  ;;  %v6026_v24 = vpop.eup %6025  ;;  %6031 = vlog2.f32 %v2190_v22  ;;  %v2027_v4 = vor.u32 1.1754944e-38, %v2026_v38  ;;  %v7944_v53 = vpop.permute.xlu2 %3341  ;;  %vm7987_vm10 = vmor %vm2035_vm7, %vm2036_vm9 }
 0x158   : > { %v7938_v26 = vpop.eup %6027  ;;  %v1199_v42 = vmul.f32 0.6931472, %v6026_v24  ;;  %9813 = vst [vmem:[#allocation61_spill] sm:$0xff] %v7944_v53  ;;  %v1160_v39 = vmax.f32 %v1144_v59, 1.1754944e-38  ;;  %v5460_v22 = vmul.f32 -1.442695, %v811_v36  ;;  %v1016_v34 = vadd.f32 %v7631_v58, %v1015_v41  ;;  %v7951_v24 = vpop.permute.xlu1 %4287 }
 0x159   : > { %6033 = vrcp.f32 %v7930_v35  ;;  %v2028_v9 = vsel %vm2025_vm3, %v2027_v4, %v2023_v7  ;;  %v1021_v38 = vand.u32 2147483647, %v7565_v48  ;;  %9814 = vst [vmem:[#allocation62_spill] sm:$0xff] %v7951_v24  ;;  %v7953_v10 = vpop.f32.mrf.mxu0  ;;  %v7965_v36 = vmul.f32 %v7938_v26, %v7880_v16 }
 0x15a   : > { %1349 = vmatmul.f32.gmra.mxu1 %v1199_v42  ;;  %v6030_v61 = vpop.eup %6029  ;;  %v1176_v51 = vmin.f32 %v1160_v39, 1.0  ;;  %v7957_v59 = vmul.f32 %v7761_v29, %v2028_v9  ;;  %6035 = vpow2.f32 %v5460_v22  ;;  %v1020_v41 = vsel %vm7959_vm6, %v7631_v58, %v1016_v34 }
 0x15b   : > { %v7967_v4 = vadd.f32 1.0, %v6030_v61  ;;  %v1023_v39 = vand.u32 2147483648, %v7565_v48  ;;  %v9818_v9 = vsub.f32 1.0, %v7697_v25  ;;  %vm1022_vm8 = vcmp.eq.f32.partialorder %v1021_v38, 8.507059e+37  ;;  %v7983_v48 = vpop.permute.xlu0 %4282 }
 0x15c   : > { %9815 = vst [vmem:[#allocation63_spill] sm:$0xff] %v7957_v59  ;;  %6037 = vlog2.f32 %v1176_v51  ;;  %v2159_v22 = vsub.f32 1.0, %v7957_v59  ;;  %v2039_v51 = vand.u32 2147483647, %v7614_v18  ;;  %v2041_v38 = vand.u32 2147483648, %v7614_v18 }
 0x15d   : > { %v6032_v53 = vpop.eup %6031  ;;  %1568 = vadd.xlane.f32.xlu1 %v1199_v42  ;;  %v2033_v24 = vmul.f32 %v7672_v0, %v9818_v9  ;;  %v1024_v7 = vor.u32 1.1754944e-38, %v1023_v39  ;;  %9819 = vst [vmem:[#allocation64_spill] sm:$0xff] %v7983_v48  ;;  %6039 = vrcp.f32 %v7967_v4  ;;  %v9822_v39 = vsub.f32 1.0, %v7709_v47 }
 0x15e   : > { %v7980_v61 = vmul.f32 0.6931472, %v6032_v53  ;;  %v2175_v58 = vmax.f32 %v2159_v22, 1.1754944e-38  ;;  %vm1032_vm11 = vweird.f32 %v7635_v13  ;;  %vm2040_vm12 = vcmp.eq.f32.partialorder %v2039_v51, 8.507059e+37 }
 0x15f   : > { %v7978_v40 = vpop.eup %6033  ;;  %v2034_v42 = vadd.f32 %v7672_v0, %v2033_v24  ;;  %v1025_v34 = vsel %vm1022_vm8, %v1024_v7, %v1020_v41  ;;  %v1030_v22 = vmul.f32 %v7686_v8, %v9822_v39  ;;  %v2042_v41 = vor.u32 1.1754944e-38, %v2041_v38  ;;  %v8011_v47 = vpop.permute.xlu2 %4292 }
 0x160   : > { %2585 = vadd.xlane.f32.xlu2 %v7980_v61  ;;  %v7995_v53 = vmul.f32 %v7978_v40, %v7930_v35  ;;  %v6036_v24 = vpop.eup %6035  ;;  %v2191_v9 = vmin.f32 %v2175_v58, 1.0  ;;  %v8002_v48 = vmul.f32 %v7761_v29, %v1025_v34  ;;  %9824 = vst [vmem:[#allocation66_spill] sm:$0xff] %v8011_v47  ;;  %vm1033_vm13 = vweird.f32 %v7686_v8  ;;  %v8022_v38 = vpop.permute.xlu1 %4302 }
 0x161   : > { %v2038_v59 = vsel %vm7987_vm10, %v7672_v0, %v2034_v42  ;;  %v8008_v44 = vadd.f32 1.0, %v6036_v24  ;;  %v1031_v18 = vadd.f32 %v7686_v8, %v1030_v22  ;;  %v1036_v34 = vand.u32 2147483647, %v7635_v13  ;;  %vm8017_vm14 = vmor %vm1032_vm11, %vm1033_vm13  ;;  %9827 = vst [vmem:[#allocation67_spill] sm:$0xff] %v8022_v38  ;;  %v2802_v39 = vpop.f32.mrf.mxu0 }
 0x162   : > { %9823 = vst [vmem:[#allocation65_spill] sm:$0xff] %v8002_v48  ;;  %v6038_v7 = vpop.eup %6037  ;;  %6041 = vlog2.f32 %v2191_v9  ;;  %v1145_v58 = vsub.f32 1.0, %v8002_v48  ;;  %v2043_v0 = vsel %vm2040_vm12, %v2042_v41, %v2038_v59  ;;  %v1038_v51 = vand.u32 2147483648, %v7635_v13 }
 0x163   : > { %v1201_v25 = vmul.f32 0.6931472, %v6038_v7  ;;  %6043 = vrcp.f32 %v8008_v44  ;;  %v8024_v22 = vpop.eup %6039  ;;  %v8028_v47 = vmul.f32 %v7761_v29, %v2043_v0  ;;  %v1035_v59 = vsel %vm8017_vm14, %v7686_v8, %v1031_v18  ;;  %v8043_v42 = vpop.permute.xlu0 %4297 }
 0x164   : > { %v1161_v9 = vmax.f32 %v1145_v58, 1.1754944e-38  ;;  %v1039_v7 = vor.u32 1.1754944e-38, %v1038_v51  ;;  %v2800_v13 = vadd.f32 %v7953_v10, %v6954_v6  ;;  %v9829_v38 = vsub.f32 1.0, %v7733_v46  ;;  %9830 = vst [vmem:[#allocation69_spill] sm:$0xff] %v8043_v42 }
 0x165   : > { %9828 = vst [vmem:[#allocation68_spill] sm:$0xff] %v8028_v47  ;;  %1352 = vmatmul.f32.gmra.mxu1 %v1201_v25  ;;  %v2160_v58 = vsub.f32 1.0, %v8028_v47  ;;  %vm1037_vm15 = vcmp.eq.f32.partialorder %v1036_v34, 8.507059e+37  ;;  %vm2050_vm2 = vweird.f32 %v7674_v43  ;;  %vm2051_vm3 = vweird.f32 %v7724_v63 }
 0x166   : > { %v2048_v48 = vmul.f32 %v7724_v63, %v9829_v38  ;;  %v1177_v24 = vmin.f32 %v1161_v9, 1.0  ;;  %v1040_v0 = vsel %vm1037_vm15, %v1039_v7, %v1035_v59  ;;  %v5637_v8 = vmul.f32 -1.442695, %v2800_v13  ;;  %vm8048_vm4 = vmor %vm2050_vm2, %vm2051_vm3 }
 0x167   : > { %v2176_v46 = vmax.f32 %v2160_v58, 1.1754944e-38  ;;  %v8046_v51 = vmul.f32 %v7761_v29, %v1040_v0  ;;  %v2054_v34 = vand.u32 2147483647, %v7674_v43  ;;  %vm1048_vm6 = vweird.f32 %v7751_v54 }
 0x168   : > { %1570 = vadd.xlane.f32.xlu2 %v1201_v25  ;;  %v2049_v18 = vadd.f32 %v7724_v63, %v2048_v48  ;;  %v6042_v10 = vpop.eup %6041  ;;  %6045 = vlog2.f32 %v1177_v24  ;;  %v8057_v48 = vmul.f32 %v8024_v22, %v7967_v4  ;;  %v2056_v24 = vand.u32 2147483648, %v7674_v43  ;;  %v8075_v43 = vpop.permute.xlu2 %4307 }
 0x169   : > { %v8053_v25 = vpop.eup %6043  ;;  %v8059_v9 = vmul.f32 0.6931472, %v6042_v10  ;;  %6047 = vpow2.f32 %v5637_v8  ;;  %v2192_v59 = vmin.f32 %v2176_v46, 1.0  ;;  %v1146_v7 = vsub.f32 1.0, %v8046_v51  ;;  %9834 = vst [vmem:[#allocation70_spill] sm:$0xff] %v8075_v43  ;;  %v8082_v41 = vpop.permute.xlu1 %4317 }
 0x16a   : > { %v2053_v13 = vsel %vm8048_vm4, %v7724_v63, %v2049_v18  ;;  %vm2055_vm5 = vcmp.eq.f32.partialorder %v2054_v34, 8.507059e+37  ;;  %v8069_v58 = vmul.f32 %v8053_v25, %v8008_v44  ;;  %v2057_v0 = vor.u32 1.1754944e-38, %v2056_v24  ;;  %v2805_v18 = vpop.f32.mrf.mxu0  ;;  %9835 = vst [vmem:[#allocation71_spill] sm:$0xff] %v8082_v41 }
 0x16b   : > { %2587 = vadd.xlane.f32.xlu0 %v8059_v9  ;;  %v9833_v10 = vsub.f32 1.0, %v7798_v27  ;;  %6049 = vlog2.f32 %v2192_v59  ;;  %v1162_v46 = vmax.f32 %v1146_v7, 1.1754944e-38  ;;  %vm1047_vm7 = vweird.f32 %v7689_v55 }
 0x16c   : > { %v1051_v63 = vand.u32 2147483647, %v7689_v55  ;;  %v2058_v38 = vsel %vm2055_vm5, %v2057_v0, %v2053_v13  ;;  %v1053_v24 = vand.u32 2147483648, %v7689_v55  ;;  %v2803_v27 = vadd.f32 %v2802_v39, %v6954_v6  ;;  %vm1049_vm8 = vmor %vm1047_vm7, %vm1048_vm6 }
 0x16d   : > { %v1045_v8 = vmul.f32 %v7751_v54, %v9833_v10  ;;  %v1178_v42 = vmin.f32 %v1162_v46, 1.0  ;;  %v8085_v43 = vmul.f32 %v7761_v29, %v2058_v38  ;;  %v9837_v59 = vsub.f32 1.0, %v7817_v28  ;;  %v8099_v28 = vpop.permute.xlu0 %4312 }
 0x16e   : > { %v6046_v10 = vpop.eup %6045  ;;  %vm1052_vm9 = vcmp.eq.f32.partialorder %v1051_v63, 8.507059e+37  ;;  %v1054_v39 = vor.u32 1.1754944e-38, %v1053_v24  ;;  %vm2065_vm10 = vweird.f32 %v7741_v33  ;;  %vm2066_vm11 = vweird.f32 %v7794_v37  ;;  %9838 = vst [vmem:[#allocation73_spill] sm:$0xff] %v8099_v28  ;;  %v648_v28 = vld [vmem:[%s8129_s25 + $0x70] sm:$0xff] }
 0x16f   : > { %v1046_v34 = vadd.f32 %v7751_v54, %v1045_v8  ;;  %9836 = vst [vmem:[#allocation72_spill] sm:$0xff] %v8085_v43  ;;  %v2063_v7 = vmul.f32 %v7794_v37, %v9837_v59  ;;  %v6048_v13 = vpop.eup %6047  ;;  %v1203_v0 = vmul.f32 0.6931472, %v6046_v10  ;;  %v5638_v8 = vmul.f32 -1.442695, %v2803_v27  ;;  %vm8105_vm12 = vmor %vm2065_vm10, %vm2066_vm11 }
 0x170   : > { %6051 = vlog2.f32 %v1178_v42  ;;  %v8093_v41 = vadd.f32 1.0, %v6048_v13  ;;  %v2161_v46 = vsub.f32 1.0, %v8085_v43  ;;  %v2069_v24 = vand.u32 2147483647, %v7741_v33 }
 0x171   : > { %v1050_v55 = vsel %vm1049_vm8, %v7751_v54, %v1046_v34  ;;  %v2064_v38 = vadd.f32 %v7794_v37, %v2063_v7  ;;  %1355 = vmatmul.f32.gmra.mxu1 %v1203_v0  ;;  %6053 = vpow2.f32 %v5638_v8  ;;  %v6050_v54 = vpop.eup %6049  ;;  %v2071_v59 = vand.u32 2147483648, %v7741_v33 }
 0x172   : > { %v1055_v47 = vsel %vm1052_vm9, %v1054_v39, %v1050_v55  ;;  %6055 = vrcp.f32 %v8093_v41  ;;  %v2177_v42 = vmax.f32 %v2161_v46, 1.1754944e-38  ;;  %v8110_v27 = vmul.f32 0.6931472, %v6050_v54  ;;  %v2808_v34 = vpop.f32.mrf.mxu0 }
 0x173   : > { %v8103_v63 = vmul.f32 %v7761_v29, %v1055_v47  ;;  %1572 = vadd.xlane.f32.xlu0 %v1203_v0  ;;  %v2068_v10 = vsel %vm8105_vm12, %v7794_v37, %v2064_v38  ;;  %v9842_v7 = vsub.f32 1.0, %v7852_v20  ;;  %vm8120_vm13 = vcmp.eq.f32.partialorder %v2069_v24, 8.507059e+37  ;;  %v8135_v0 = vpop.permute.xlu2 %4322 }
 0x174   : > { %v2193_v13 = vmin.f32 %v2177_v42, 1.0  ;;  %vm1062_vm14 = vweird.f32 %v7789_v50  ;;  %2589 = vadd.xlane.f32.xlu1 %v8110_v27  ;;  %v2072_v33 = vor.u32 1.1754944e-38, %v2071_v59  ;;  %vm1063_vm15 = vweird.f32 %v7838_v14  ;;  %9845 = vst [vmem:[#allocation75_spill] sm:$0xff] %v8135_v0  ;;  %v649_v0 = vld [vmem:[%s8129_s25 + $0x78] sm:$0xff] }
 0x175   : > { %9839 = vst [vmem:[#allocation74_spill] sm:$0xff] %v8103_v63  ;;  %v1060_v47 = vmul.f32 %v7838_v14, %v9842_v7  ;;  %v1147_v55 = vsub.f32 1.0, %v8103_v63  ;;  %v1066_v20 = vand.u32 2147483647, %v7789_v50  ;;  %vm8137_vm2 = vmor %vm1062_vm14, %vm1063_vm15  ;;  %v1068_v54 = vand.u32 2147483648, %v7789_v50  ;;  %1441 = vmatpush.msra.mxu2 %v649_v0 }
 0x176   : > { %v6052_v8 = vpop.eup %6051  ;;  %6057 = vlog2.f32 %v2193_v13  ;;  %v2806_v42 = vadd.f32 %v2805_v18, %v6954_v6  ;;  %v9850_v39 = vsub.f32 1.0, %v7916_v23  ;;  %vm2080_vm4 = vweird.f32 %v7823_v17 }
 0x177   : > { %v1061_v37 = vadd.f32 %v7838_v14, %v1060_v47  ;;  %v1163_v46 = vmax.f32 %v1147_v55, 1.1754944e-38  ;;  %v6054_v24 = vpop.eup %6053  ;;  %v1205_v7 = vmul.f32 0.6931472, %v6052_v8  ;;  %v2073_v47 = vsel %vm8120_vm13, %v2072_v33, %v2068_v10  ;;  %v8149_v55 = vpop.permute.xlu1 %4332  ;;  %1442 = vmatpush.msra.mxu2 %v648_v28 }
 0x178   : > { %9848 = vst [vmem:[#allocation76_spill] sm:$0xff] %v8149_v55  ;;  %v8153_v43 = vpop.eup %6055  ;;  %v8157_v63 = vmul.f32 %v7761_v29, %v2073_v47  ;;  %v1069_v8 = vor.u32 1.1754944e-38, %v1068_v54  ;;  %vm1067_vm3 = vcmp.eq.f32.partialorder %v1066_v20, 8.507059e+37  ;;  %v5639_v10 = vmul.f32 -1.442695, %v2806_v42  ;;  %v8179_v54 = vpop.permute.xlu0 %4327 }
 0x179   : > { %v1065_v13 = vsel %vm8137_vm2, %v7838_v14, %v1061_v37  ;;  %v1179_v18 = vmin.f32 %v1163_v46, 1.0  ;;  %1358 = vmatmul.f32.gmra.mxu1 %v1205_v7  ;;  %v2078_v14 = vmul.f32 %v7869_v30, %v9850_v39  ;;  %vm2081_vm5 = vweird.f32 %v7869_v30  ;;  %9853 = vst [vmem:[#allocation78_spill] sm:$0xff] %v8179_v54 }
 0x17a   : > { %9849 = vst [vmem:[#allocation77_spill] sm:$0xff] %v8157_v63  ;;  %v2162_v33 = vsub.f32 1.0, %v8157_v63  ;;  %v1070_v37 = vsel %vm1067_vm3, %v1069_v8, %v1065_v13  ;;  %v8167_v46 = vmul.f32 %v8153_v43, %v8093_v41  ;;  %v8169_v0 = vadd.f32 1.0, %v6054_v24  ;;  %vm8175_vm6 = vmor %vm2080_vm4, %vm2081_vm5 }
 0x17b   : > { %6059 = vlog2.f32 %v1179_v18  ;;  %v8172_v20 = vmul.f32 %v7761_v29, %v1070_v37  ;;  %v2079_v23 = vadd.f32 %v7869_v30, %v2078_v14  ;;  %v2084_v28 = vand.u32 2147483647, %v7823_v17 }
 0x17c   : > { %v6058_v42 = vpop.eup %6057  ;;  %v2178_v47 = vmax.f32 %v2162_v33, 1.1754944e-38  ;;  %6061 = vpow2.f32 %v5639_v10  ;;  %v2086_v13 = vand.u32 2147483648, %v7823_v17  ;;  %1574 = vadd.xlane.f32.xlu1 %v1205_v7  ;;  %v9854_v39 = vsub.f32 1.0, %v7928_v5 }
 0x17d   : > { %v8183_v24 = vmul.f32 0.6931472, %v6058_v42  ;;  %v1148_v18 = vsub.f32 1.0, %v8172_v20  ;;  %v2083_v8 = vsel %vm8175_vm6, %v7869_v30, %v2079_v23  ;;  %vm2085_vm7 = vcmp.eq.f32.partialorder %v2084_v28, 8.507059e+37  ;;  %v8197_v30 = vpop.permute.xlu2 %4337  ;;  %v647_v28 = vld [vmem:[%s8129_s25 + $0x68] sm:$0xff] }
 0x17e   : > { %v1075_v14 = vmul.f32 %v7907_v15, %v9854_v39  ;;  %v2194_v37 = vmin.f32 %v2178_v47, 1.0  ;;  %v2087_v10 = vor.u32 1.1754944e-38, %v2086_v13  ;;  %vm1077_vm8 = vweird.f32 %v7863_v62  ;;  %9855 = vst [vmem:[#allocation79_spill] sm:$0xff] %v8197_v30  ;;  %v2811_v13 = vpop.f32.mrf.mxu0  ;;  %1443 = vmatpush.msra.mxu2 %v647_v28  ;;  %v8287_v30 = vpop.f32.mrf.mxu1 }
 0x17f   : > { %2591 = vadd.xlane.f32.xlu2 %v8183_v24  ;;  %v1164_v17 = vmax.f32 %v1148_v18, 1.1754944e-38  ;;  %vm1078_vm9 = vweird.f32 %v7907_v15  ;;  %v1081_v33 = vand.u32 2147483647, %v7863_v62  ;;  %v1083_v42 = vand.u32 2147483648, %v7863_v62 }
 0x180   : > { %v1076_v7 = vadd.f32 %v7907_v15, %v1075_v14  ;;  %6063 = vlog2.f32 %v2194_v37  ;;  %v2088_v23 = vsel %vm2085_vm7, %v2087_v10, %v2083_v8  ;;  %vm8199_vm10 = vmor %vm1077_vm8, %vm1078_vm9  ;;  %v2809_v47 = vadd.f32 %v2808_v34, %v6954_v6  ;;  %v8212_v37 = vpop.permute.xlu1 %4347  ;;  %v646_v10 = vld [vmem:[%s8129_s25 + $0x60] sm:$0xff] }
 0x181   : > { %v6060_v5 = vpop.eup %6059  ;;  %v1180_v39 = vmin.f32 %v1164_v17, 1.0  ;;  %v8207_v14 = vmul.f32 %v7761_v29, %v2088_v23  ;;  %9859 = vst [vmem:[#allocation81_spill] sm:$0xff] %v8212_v37  ;;  %6065 = vrcp.f32 %v8169_v0  ;;  %vm1082_vm11 = vcmp.eq.f32.partialorder %v1081_v33, 8.507059e+37  ;;  %1444 = vmatpush.msra.mxu2 %v646_v10  ;;  %v644_v33 = vld [vmem:[%s8129_s25 + $0x50] sm:$0xff] }
 0x182   : > { %v1207_v18 = vmul.f32 0.6931472, %v6060_v5  ;;  %v1080_v8 = vsel %vm8199_vm10, %v7907_v15, %v1076_v7  ;;  %v6062_v50 = vpop.eup %6061  ;;  %v1084_v62 = vor.u32 1.1754944e-38, %v1083_v42  ;;  %v5640_v34 = vmul.f32 -1.442695, %v2809_v47  ;;  %v645_v5 = vld [vmem:[%s8129_s25 + $0x58] sm:$0xff] }
 0x183   : > { %9858 = vst [vmem:[#allocation80_spill] sm:$0xff] %v8207_v14  ;;  %6067 = vlog2.f32 %v1180_v39  ;;  %v8217_v17 = vadd.f32 1.0, %v6062_v50  ;;  %v2163_v23 = vsub.f32 1.0, %v8207_v14  ;;  %v9860_v15 = vsub.f32 1.0, %v7965_v36  ;;  %v8231_v39 = vpop.permute.xlu0 %4342  ;;  %1445 = vmatpush.msra.mxu2 %v645_v5 }
 0x184   : > { %1361 = vmatmul.f32.gmra.mxu1 %v1207_v18  ;;  %v1085_v28 = vsel %vm1082_vm11, %v1084_v62, %v1080_v8  ;;  %6069 = vpow2.f32 %v5640_v34  ;;  %vm2095_vm12 = vweird.f32 %v7880_v16  ;;  %9861 = vst [vmem:[#allocation82_spill] sm:$0xff] %v8231_v39  ;;  %vm2096_vm13 = vweird.f32 %v7938_v26  ;;  %v641_v39 = vld [vmem:[%s8129_s25 + $0x38] sm:$0xff] }
 0x185   : > { %v2093_v7 = vmul.f32 %v7938_v26, %v9860_v15  ;;  %6071 = vrcp.f32 %v8217_v17  ;;  %v2179_v42 = vmax.f32 %v2163_v23, 1.1754944e-38  ;;  %v8228_v50 = vmul.f32 %v7761_v29, %v1085_v28  ;;  %vm8244_vm14 = vmor %vm2095_vm12, %vm2096_vm13  ;;  %1446 = vmatpush.msra.mxu2 %v644_v33 }
 0x186   : > { %v6064_v36 = vpop.eup %6063  ;;  %v2099_v8 = vand.u32 2147483647, %v7880_v16  ;;  %v2101_v10 = vand.u32 2147483648, %v7880_v16  ;;  %v9862_v62 = vsub.f32 1.0, %v7995_v53  ;;  %vm1092_vm15 = vweird.f32 %v7930_v35 }
 0x187   : > { %v2094_v47 = vadd.f32 %v7938_v26, %v2093_v7  ;;  %v8239_v23 = vmul.f32 0.6931472, %v6064_v36  ;;  %1576 = vadd.xlane.f32.xlu2 %v1207_v18  ;;  %v2195_v15 = vmin.f32 %v2179_v42, 1.0  ;;  %v1149_v7 = vsub.f32 1.0, %v8228_v50  ;;  %v8249_v28 = vpop.eup %6065 }
 0x188   : > { %v1090_v34 = vmul.f32 %v7978_v40, %v9862_v62  ;;  %vm2100_vm2 = vcmp.eq.f32.partialorder %v2099_v8, 8.507059e+37  ;;  %v2102_v18 = vor.u32 1.1754944e-38, %v2101_v10  ;;  %vm1093_vm3 = vweird.f32 %v7978_v40  ;;  %v8258_v62 = vpop.permute.xlu2 %4352 }
 0x189   : > { %v2098_v53 = vsel %vm8244_vm14, %v7938_v26, %v2094_v47  ;;  %v6068_v36 = vpop.eup %6067  ;;  %2593 = vadd.xlane.f32.xlu0 %v8239_v23  ;;  %6073 = vlog2.f32 %v2195_v15  ;;  %v1165_v16 = vmax.f32 %v1149_v7, 1.1754944e-38  ;;  %v1096_v33 = vand.u32 2147483647, %v7930_v35  ;;  %9865 = vst [vmem:[#allocation83_spill] sm:$0xff] %v8258_v62  ;;  %vm8262_vm4 = vmor %vm1092_vm15, %vm1093_vm3  ;;  %v643_v15 = vld [vmem:[%s8129_s25 + $0x48] sm:$0xff]  ;;  %v8269_v7 = vpop.f32.mrf.mxu0 }
 0x18a   : > { %v1091_v42 = vadd.f32 %v7978_v40, %v1090_v34  ;;  %v6070_v38 = vpop.eup %6069  ;;  %v1209_v5 = vmul.f32 0.6931472, %v6068_v36  ;;  %v2103_v26 = vsel %vm2100_vm2, %v2102_v18, %v2098_v53  ;;  %v1098_v8 = vand.u32 2147483648, %v7930_v35  ;;  %v1538_v34 = vld [vmem:[#allocation3] sm:$0xff]  ;;  %1447 = vmatpush.msra.mxu2 %v643_v15 }
 0x18b   : > { %v2812_v10 = vadd.f32 %v2811_v13, %v6954_v6  ;;  %v8271_v59 = vpop.eup %6071  ;;  %v1181_v62 = vmin.f32 %v1165_v16, 1.0  ;;  %v8273_v36 = vadd.f32 1.0, %v6070_v38  ;;  %v8276_v53 = vmul.f32 %v7761_v29, %v2103_v26  ;;  %v642_v13 = vld [vmem:[%s8129_s25 + $0x40] sm:$0xff] }
 0x18c   : > { %v1095_v18 = vsel %vm8262_vm4, %v7978_v40, %v1091_v42  ;;  %v8284_v37 = vmul.f32 %v8249_v28, %v8169_v0  ;;  %1364 = vmatmul.f32.gmra.mxu1 %v1209_v5  ;;  %vm1097_vm5 = vcmp.eq.f32.partialorder %v1096_v33, 8.507059e+37  ;;  %v1099_v16 = vor.u32 1.1754944e-38, %v1098_v8  ;;  %1448 = vmatpush.msra.mxu2 %v642_v13  ;;  %v640_v8 = vld [vmem:[%s8129_s25 + $0x30] sm:$0xff] }
 0x18d   : > { %9868 = vst [vmem:[#allocation84_spill] sm:$0xff] %v8276_v53  ;;  %v1555_v35 = vpop.xlane.xlu1 %1554  ;;  %v5641_v38 = vmul.f32 -1.442695, %v2812_v10  ;;  %6075 = vlog2.f32 %v1181_v62  ;;  %v2164_v26 = vsub.f32 1.0, %v8276_v53  ;;  %v9869_v40 = vsub.f32 1.0, %v8057_v48  ;;  %v636_v53 = vld [vmem:[%s8129_s25 + $0x10] sm:$0xff] }
 0x18e   : > { %v1586_v47 = vadd.f32 %v1555_v35, %v1538_v34  ;;  %v8295_v15 = vmul.f32 %v8271_v59, %v8217_v17  ;;  %6077 = vrcp.f32 %v8273_v36  ;;  %v1100_v33 = vsel %vm1097_vm5, %v1099_v16, %v1095_v18  ;;  %v8305_v35 = vpop.permute.xlu0 %4357  ;;  %1449 = vmatpush.msra.mxu2 %v641_v39 }
 0x18f   : > { %v2108_v42 = vmul.f32 %v8024_v22, %v9869_v40  ;;  %vm2110_vm6 = vweird.f32 %v7967_v4  ;;  %v6074_v62 = vpop.eup %6073  ;;  %v2180_v10 = vmax.f32 %v2164_v26, 1.1754944e-38  ;;  %v8301_v34 = vmul.f32 %v7761_v29, %v1100_v33  ;;  %9871 = vst [vmem:[#allocation86_spill] sm:$0xff] %v8305_v35  ;;  %v639_v26 = vld [vmem:[%s8129_s25 + $0x28] sm:$0xff]  ;;  %v638_v33 = vld [vmem:[%s8129_s25 + $0x20] sm:$0xff] }
 0x190   : > { %6079 = vpow2.f32 %v5641_v38  ;;  %1603 = vst.msk [vmem:[#allocation3] sm:$0xff] %vm519_vm0, %v1586_v47  ;;  %v8307_v13 = vmul.f32 0.6931472, %v6074_v62  ;;  %vm2111_vm7 = vweird.f32 %v8024_v22  ;;  %v2114_v18 = vand.u32 2147483647, %v7967_v4  ;;  %1450 = vmatpush.msra.mxu2 %v640_v8  ;;  %v637_v47 = vld [vmem:[%s8129_s25 + $0x18] sm:$0xff] }
 0x191   : > { %9870 = vst [vmem:[#allocation85_spill] sm:$0xff] %v8301_v34  ;;  %v2109_v48 = vadd.f32 %v8024_v22, %v2108_v42  ;;  %v2116_v16 = vand.u32 2147483648, %v7967_v4  ;;  %1578 = vadd.xlane.f32.xlu0 %v1209_v5  ;;  %v2196_v29 = vmin.f32 %v2180_v10, 1.0  ;;  %v1150_v38 = vsub.f32 1.0, %v8301_v34  ;;  %vm8316_vm8 = vmor %vm2110_vm6, %vm2111_vm7  ;;  %v2817_v4 = vpop.f32.mrf.mxu0 }
 0x192   : > { %v9874_v39 = vsub.f32 1.0, %v8069_v58  ;;  %vm1107_vm9 = vweird.f32 %v8008_v44  ;;  %2595 = vadd.xlane.f32.xlu1 %v8307_v13  ;;  %vm2115_vm10 = vcmp.eq.f32.partialorder %v2114_v18, 8.507059e+37  ;;  %vm1108_vm11 = vweird.f32 %v8053_v25  ;;  %1451 = vmatpush.msra.mxu2 %v639_v26 }
 0x193   : > { %v2113_v5 = vsel %vm8316_vm8, %v8024_v22, %v2109_v48  ;;  %v2117_v42 = vor.u32 1.1754944e-38, %v2116_v16  ;;  %v6076_v62 = vpop.eup %6075  ;;  %6081 = vlog2.f32 %v2196_v29  ;;  %v1166_v58 = vmax.f32 %v1150_v38, 1.1754944e-38  ;;  %vm8336_vm12 = vmor %vm1107_vm9, %vm1108_vm11  ;;  %v1539_v38 = vld [vmem:[#allocation3 + $0x8] sm:$0xff] }
 0x194   : > { %v1105_v40 = vmul.f32 %v8053_v25, %v9874_v39  ;;  %v1111_v8 = vand.u32 2147483647, %v8008_v44  ;;  %v8332_v35 = vpop.eup %6077  ;;  %v1211_v22 = vmul.f32 0.6931472, %v6076_v62  ;;  %v1113_v16 = vand.u32 2147483648, %v8008_v44  ;;  %1452 = vmatpush.msra.mxu2 %v638_v33 }
 0x195   : > { %v1557_v39 = vpop.xlane.xlu2 %1556  ;;  %v2118_v48 = vsel %vm2115_vm10, %v2117_v42, %v2113_v5  ;;  %v2815_v29 = vadd.f32 %v8269_v7, %v6954_v6  ;;  %v1182_v5 = vmin.f32 %v1166_v58, 1.0  ;;  %v8348_v42 = vld [vmem:[%s6524_s13] ss:$0 sm:$0xff]  ;;  %v8359_v54 = vmul.f32 %v8332_v35, %v8273_v36  ;;  %v635_v7 = vld [vmem:[%s8129_s25 + $0x8] sm:$0xff] }
 0x196   : > { %v1106_v10 = vadd.f32 %v8053_v25, %v1105_v40  ;;  %v8344_v40 = vpop.f32.mrf.mxu1  ;;  %v6080_v26 = vpop.eup %6079  ;;  %v8351_v55 = vmul.f32 %v8348_v42, %v2118_v48  ;;  %1367 = vmatmul.f32.gmra.mxu1 %v1211_v22  ;;  %v1114_v62 = vor.u32 1.1754944e-38, %v1113_v16  ;;  %vm1112_vm13 = vcmp.eq.f32.partialorder %v1111_v8, 8.507059e+37  ;;  %1453 = vmatpush.msra.mxu2 %v637_v47 }
 0x197   : > { %v5642_v58 = vmul.f32 -1.442695, %v2815_v29  ;;  %6083 = vlog2.f32 %v1182_v5  ;;  %v1587_v14 = vadd.f32 %v1557_v39, %v1539_v38  ;;  %v8363_v18 = vadd.f32 1.0, %v6080_v26  ;;  %v1540_v29 = vld [vmem:[#allocation3 + $0x10] sm:$0xff] }
 0x198   : > { %v1110_v44 = vsel %vm8336_vm12, %v8053_v25, %v1106_v10  ;;  %v2165_v48 = vsub.f32 1.0, %v8351_v55  ;;  %v1330_v33 = vadd.f32 %v8287_v30, %v6948_v2  ;;  %v2818_v10 = vadd.f32 %v2817_v4, %v6954_v6  ;;  %v2556_v2 = vld [vmem:[#allocation3 + $0x88] sm:$0xff]  ;;  %1454 = vmatpush.msra.mxu2 %v636_v53 }
 0x199   : > { %v1115_v25 = vsel %vm1112_vm13, %v1114_v62, %v1110_v44  ;;  %v6082_v63 = vpop.eup %6081  ;;  %6085 = vpow2.f32 %v5642_v58  ;;  %1604 = vst.msk [vmem:[#allocation3 + $0x8] sm:$0xff] %vm519_vm0, %v1587_v14  ;;  %v9877_v8 = vsub.f32 1.0, %v8167_v46  ;;  %vm2916_vm14 = vweird.f32 %v8093_v41  ;;  %v2820_v26 = vpop.f32.mrf.mxu0  ;;  %v634_v44 = vld [vmem:[%s8129_s25] sm:$0xff]  ;;  %v5508_v58 = vld [vmem:[%s8129_s25 + $0xf8] sm:$0xff] }
 0x19a   : > { %v2181_v34 = vmax.f32 %v2165_v48, 1.1754944e-38  ;;  %v8370_v16 = vmul.f32 %v8348_v42, %v1115_v25  ;;  %v8376_v30 = vmul.f32 0.6931472, %v6082_v63  ;;  %1580 = vadd.xlane.f32.xlu1 %v1211_v22  ;;  %v1377_v4 = vmul.f32 1.442695, %v1330_v33  ;;  %1455 = vmatpush.msra.mxu2 %v635_v7  ;;  %v5507_v63 = vld [vmem:[%s8129_s25 + $0xf0] sm:$0xff] }
 0x19b   : > { %v2914_v39 = vmul.f32 %v8153_v43, %v9877_v8  ;;  %v1559_v38 = vpop.xlane.xlu0 %1558  ;;  %v5643_v47 = vmul.f32 -1.442695, %v2818_v10  ;;  %vm2917_vm15 = vweird.f32 %v8153_v43  ;;  %v2920_v53 = vand.u32 2147483647, %v8093_v41  ;;  %v2572_v10 = vpop.xlane.xlu1 %2571 }
 0x19c   : > { %v2197_v62 = vmin.f32 %v2181_v34, 1.0  ;;  %v1151_v14 = vsub.f32 1.0, %v8370_v16  ;;  %2597 = vadd.xlane.f32.xlu2 %v8376_v30  ;;  %6087 = vpow2.f32 %v1377_v4  ;;  %vm8385_vm2 = vmor %vm2916_vm14, %vm2917_vm15  ;;  %v2922_v34 = vand.u32 2147483648, %v8093_v41  ;;  %1456 = vmatpush.msra.mxu2 %v634_v44 }
 0x19d   : > { %v2915_v46 = vadd.f32 %v8153_v43, %v2914_v39  ;;  %v2574_v5 = vpop.xlane.xlu2 %2573  ;;  %v1588_v22 = vadd.f32 %v1559_v38, %v1540_v29  ;;  %v6084_v48 = vpop.eup %6083  ;;  %vm2921_vm3 = vcmp.eq.f32.partialorder %v2920_v53, 8.507059e+37  ;;  %v2821_v38 = vadd.f32 %v2820_v26, %v6954_v6 }
 0x19e   : > { %6089 = vlog2.f32 %v2197_v62  ;;  %v1167_v25 = vmax.f32 %v1151_v14, 1.1754944e-38  ;;  %v2604_v33 = vadd.f32 %v2574_v5, %v2556_v2  ;;  %v1213_v8 = vmul.f32 0.6931472, %v6084_v48  ;;  %2458 = vmatpush.msrb.mxu2 %v5508_v58  ;;  %v1335_v4 = vpop.f32.mrf.mxu1 }
 0x19f   : > { %v2919_v7 = vsel %vm8385_vm2, %v8153_v43, %v2915_v46  ;;  %6091 = vpow2.f32 %v5643_v47  ;;  %v2923_v39 = vor.u32 1.1754944e-38, %v2922_v34  ;;  %1605 = vst.msk [vmem:[#allocation3 + $0x10] sm:$0xff] %vm519_vm0, %v1588_v22  ;;  %v6086_v41 = vpop.eup %6085  ;;  %v1333_v43 = vadd.f32 %v8344_v40, %v6960_v12  ;;  %v2555_v40 = vld [vmem:[#allocation3 + $0x80] sm:$0xff] }
 0x1a0   : > { %6093 = vrcp.f32 %v8363_v18  ;;  %v1183_v29 = vmin.f32 %v1167_v25, 1.0  ;;  %2620 = vst.msk [vmem:[#allocation3 + $0x88] sm:$0xff] %vm519_vm0, %v2604_v33  ;;  %1370 = vmatmul.f32.gmra.mxu1 %v1213_v8  ;;  %v8400_v2 = vadd.f32 1.0, %v6086_v41  ;;  %v9880_v62 = vsub.f32 1.0, %v8284_v37  ;;  %2459 = vmatpush.msrb.mxu2 %v5507_v63 }
 0x1a1   : > { %v2924_v47 = vsel %vm2921_vm3, %v2923_v39, %v2919_v7  ;;  %vm2931_vm4 = vweird.f32 %v8169_v0  ;;  %v2958_v46 = vsub.f32 1.0, %v8359_v54  ;;  %v1379_v12 = vmul.f32 1.442695, %v1333_v43  ;;  %v2823_v37 = vpop.f32.mrf.mxu0  ;;  %v1541_v7 = vld [vmem:[#allocation3 + $0x18] sm:$0xff] }
 0x1a2   : > { %v2929_v14 = vmul.f32 %v8249_v28, %v9880_v62  ;;  %6095 = vlog2.f32 %v1183_v29  ;;  %v8408_v5 = vmul.f32 %v8348_v42, %v2924_v47  ;;  %v6088_v26 = vpop.eup %6087  ;;  %v5644_v44 = vmul.f32 -1.442695, %v2821_v38 }
 0x1a3   : > { %6097 = vrcp.f32 %v8400_v2  ;;  %vm2932_vm5 = vweird.f32 %v8249_v28  ;;  %v2935_v48 = vand.u32 2147483647, %v8169_v0  ;;  %v2937_v25 = vand.u32 2147483648, %v8169_v0 }
 0x1a4   : > { %v2930_v58 = vadd.f32 %v8249_v28, %v2929_v14  ;;  %v6090_v53 = vpop.eup %6089  ;;  %v3167_v34 = vsub.f32 1.0, %v8408_v5  ;;  %6099 = vpow2.f32 %v1379_v12  ;;  %vm8417_vm6 = vmor %vm2931_vm4, %vm2932_vm5  ;;  %1582 = vadd.xlane.f32.xlu2 %v1213_v8  ;;  %v2603_v43 = vadd.f32 %v2572_v10, %v2555_v40 }
 0x1a5   : > { %v1561_v33 = vpop.xlane.xlu2 %1560  ;;  %v6092_v39 = vpop.eup %6091  ;;  %v8423_v41 = vmul.f32 0.6931472, %v6090_v53  ;;  %6101 = vpow2.f32 %v5644_v44  ;;  %vm2936_vm7 = vcmp.eq.f32.partialorder %v2935_v48, 8.507059e+37  ;;  %v2938_v0 = vor.u32 1.1754944e-38, %v2937_v25  ;;  %v2558_v25 = vld [vmem:[#allocation3 + $0x98] sm:$0xff] }
 0x1a6   : > { %v2934_v29 = vsel %vm8417_vm6, %v8249_v28, %v2930_v58  ;;  %v8428_v38 = vpop.eup %6093  ;;  %v8430_v47 = vadd.f32 1.0, %v6092_v39  ;;  %v3183_v62 = vmax.f32 %v3167_v34, 1.1754944e-38  ;;  %2619 = vst.msk [vmem:[#allocation3 + $0x80] sm:$0xff] %vm519_vm0, %v2603_v43  ;;  %v1589_v14 = vadd.f32 %v1561_v33, %v1541_v7  ;;  %v2578_v58 = vpop.xlane.xlu1 %2577 }
 0x1a7   : > { %2599 = vadd.xlane.f32.xlu0 %v8423_v41  ;;  %v1409_v8 = vmul.f32 %v6088_v26, %v7137_v60  ;;  %v1336_v12 = vadd.f32 %v1335_v4, %v6937_v57  ;;  %vm2946_vm8 = vweird.f32 %v8217_v17  ;;  %v2939_v40 = vsel %vm2936_vm7, %v2938_v0, %v2934_v29  ;;  %v1338_v26 = vpop.f32.mrf.mxu1 }
 0x1a8   : > { %v6096_v28 = vpop.eup %6095  ;;  %6103 = vrcp.f32 %v8430_v47  ;;  %v3199_v10 = vmin.f32 %v3183_v62, 1.0  ;;  %v2824_v44 = vadd.f32 %v2823_v37, %v6954_v6  ;;  %v8442_v34 = vmul.f32 %v8348_v42, %v2939_v40  ;;  %1606 = vst.msk [vmem:[#allocation3 + $0x18] sm:$0xff] %vm519_vm0, %v1589_v14 }
 0x1a9   : > { %v8439_v63 = vpop.eup %6097  ;;  %v1215_v53 = vmul.f32 0.6931472, %v6096_v28  ;;  %1457 = vmatmul.f32.vlgmr.msra.gmra.mxu2 %v1409_v8  ;;  %v1381_v57 = vmul.f32 1.442695, %v1336_v12  ;;  %v9883_v60 = vsub.f32 1.0, %v8295_v15  ;;  %v8450_v37 = vmul.f32 %v8428_v38, %v8363_v18  ;;  %v2826_v43 = vpop.f32.mrf.mxu0  ;;  %v5506_v8 = vld [vmem:[%s8129_s25 + $0xe8] sm:$0xff] }
 0x1aa   : > { %v6100_v22 = vpop.eup %6099  ;;  %6105 = vlog2.f32 %v3199_v10  ;;  %v5645_v48 = vmul.f32 -1.442695, %v2824_v44  ;;  %vm2947_vm9 = vweird.f32 %v8271_v59  ;;  %v3168_v33 = vsub.f32 1.0, %v8442_v34  ;;  %2460 = vmatpush.msrb.mxu2 %v5506_v8 }
 0x1ab   : > { %v2944_v4 = vmul.f32 %v8271_v59, %v9883_v60  ;;  %v6102_v7 = vpop.eup %6101  ;;  %1373 = vmatmul.f32.gmra.mxu1 %v1215_v53  ;;  %6107 = vpow2.f32 %v1381_v57  ;;  %vm8457_vm10 = vmor %vm2946_vm8, %vm2947_vm9  ;;  %v2950_v29 = vand.u32 2147483647, %v8217_v17  ;;  %v8464_v62 = vmul.f32 %v8439_v63, %v8400_v2 }
 0x1ac   : > { %v8466_v0 = vadd.f32 1.0, %v6102_v7  ;;  %6109 = vpow2.f32 %v5645_v48  ;;  %v2952_v14 = vand.u32 2147483648, %v8217_v17  ;;  %v3184_v12 = vmax.f32 %v3168_v33, 1.1754944e-38 }
 0x1ad   : > { %v2945_v15 = vadd.f32 %v8271_v59, %v2944_v4  ;;  %vm2951_vm11 = vcmp.eq.f32.partialorder %v2950_v29, 8.507059e+37  ;;  %v2606_v10 = vadd.f32 %v2578_v58, %v2558_v25  ;;  %v1410_v57 = vmul.f32 %v6100_v22, %v7227_v21 }
 0x1ae   : > { %v8473_v40 = vpop.eup %6103  ;;  %6111 = vrcp.f32 %v8466_v0  ;;  %v2953_v44 = vor.u32 1.1754944e-38, %v2952_v14  ;;  %v1339_v60 = vadd.f32 %v1338_v26, %v6951_v3  ;;  %v2973_v17 = vsub.f32 1.0, %v8450_v37  ;;  %v2557_v3 = vld [vmem:[#allocation3 + $0x90] sm:$0xff]  ;;  %v1563_v14 = vpop.xlane.xlu1 %1562 }
 0x1af   : > { %v2949_v28 = vsel %vm8457_vm10, %v8271_v59, %v2945_v15  ;;  %1584 = vadd.xlane.f32.xlu0 %v1215_v53  ;;  %v3200_v4 = vmin.f32 %v3184_v12, 1.0  ;;  %2622 = vst.msk [vmem:[#allocation3 + $0x98] sm:$0xff] %vm519_vm0, %v2606_v10  ;;  %v2827_v59 = vadd.f32 %v2826_v43, %v6954_v6  ;;  %v2959_v58 = vmul.f32 %v8332_v35, %v2958_v46  ;;  %v2559_v46 = vld [vmem:[#allocation3 + $0xa0] sm:$0xff]  ;;  %v2576_v43 = vpop.xlane.xlu0 %2575 }
 0x1b0   : > { %v6106_v48 = vpop.eup %6105  ;;  %v2954_v25 = vsel %vm2951_vm11, %v2953_v44, %v2949_v28  ;;  %v1383_v7 = vmul.f32 1.442695, %v1339_v60  ;;  %vm2961_vm12 = vweird.f32 %v8273_v36  ;;  %vm2962_vm13 = vweird.f32 %v8332_v35  ;;  %v1542_v44 = vld [vmem:[#allocation3 + $0x20] sm:$0xff] }
 0x1b1   : > { %v2580_v21 = vpop.xlane.xlu2 %2579  ;;  %v6108_v26 = vpop.eup %6107  ;;  %v2988_v53 = vsub.f32 1.0, %v8464_v62  ;;  %v3216_v22 = vmul.f32 0.6931472, %v6106_v48  ;;  %6113 = vlog2.f32 %v3200_v4  ;;  %v8488_v37 = vmul.f32 %v8348_v42, %v2954_v25  ;;  %1460 = vmatmul.f32.gmra.mxu2 %v1410_v57  ;;  %vm8490_vm14 = vmor %vm2961_vm12, %vm2962_vm13  ;;  %v5505_v4 = vld [vmem:[%s8129_s25 + $0xe0] sm:$0xff] }
 0x1b2   : > { %v6110_v33 = vpop.eup %6109  ;;  %6115 = vpow2.f32 %v1383_v7  ;;  %v5646_v15 = vmul.f32 -1.442695, %v2827_v59  ;;  %v2960_v39 = vadd.f32 %v8332_v35, %v2959_v58  ;;  %v2965_v29 = vand.u32 2147483647, %v8273_v36  ;;  %v1341_v57 = vpop.f32.mrf.mxu1  ;;  %2461 = vmatpush.msrb.mxu2 %v5505_v4  ;;  %v2560_v4 = vld [vmem:[#allocation3 + $0xa8] sm:$0xff] }
 0x1b3   : > { %2344 = vmatmul.f32.vlgmr.msrb.gmra.mxu1 %v7532_v45  ;;  %3360 = vmatmul.f32.vlgmr.msrb.gmra.mxu3 %v3216_v22  ;;  %v8497_v8 = vadd.f32 1.0, %v6110_v33  ;;  %v3169_v12 = vsub.f32 1.0, %v8488_v37  ;;  %v2967_v28 = vand.u32 2147483648, %v8273_v36  ;;  %v2605_v10 = vadd.f32 %v2576_v43, %v2557_v3  ;;  %v2829_v60 = vpop.f32.mrf.mxu0 }
 0x1b4   : > { %v8502_v59 = vpop.eup %6111  ;;  %6117 = vpow2.f32 %v5646_v15  ;;  %v2964_v58 = vsel %vm8490_vm14, %v8332_v35, %v2960_v39  ;;  %vm8507_vm15 = vcmp.eq.f32.partialorder %v2965_v29, 8.507059e+37  ;;  %v2607_v48 = vadd.f32 %v2580_v21, %v2559_v46  ;;  %3587 = vadd.xlane.f32.xlu2 %v3216_v22 }
 0x1b5   : > { %v8513_v36 = vmul.f32 %v8473_v40, %v8430_v47  ;;  %v8517_v25 = vmul.f32 %v8502_v59, %v8466_v0  ;;  %v3185_v7 = vmax.f32 %v3169_v12, 1.1754944e-38  ;;  %v2968_v3 = vor.u32 1.1754944e-38, %v2967_v28  ;;  %2621 = vst.msk [vmem:[#allocation3 + $0x90] sm:$0xff] %vm519_vm0, %v2605_v10 }
 0x1b6   : > { %2623 = vst.msk [vmem:[#allocation3 + $0xa0] sm:$0xff] %vm519_vm0, %v2607_v48  ;;  %v1590_v35 = vadd.f32 %v1563_v14, %v1542_v44  ;;  %v1411_v54 = vmul.f32 %v6108_v26, %v7293_v31  ;;  %v1342_v21 = vadd.f32 %v1341_v57, %v6946_v1  ;;  %v2830_v22 = vadd.f32 %v2829_v60, %v6954_v6  ;;  %v1543_v1 = vld [vmem:[#allocation3 + $0x28] sm:$0xff] }
 0x1b7   : > { %v6114_v46 = vpop.eup %6113  ;;  %6119 = vrcp.f32 %v8497_v8  ;;  %v3201_v33 = vmin.f32 %v3185_v7, 1.0  ;;  %v2969_v15 = vsel %vm8507_vm15, %v2968_v3, %v2964_v58  ;;  %v2974_v39 = vmul.f32 %v8428_v38, %v2973_v17  ;;  %v5504_v3 = vld [vmem:[%s8129_s25 + $0xd8] sm:$0xff] }
 0x1b8   : > { %v6116_v29 = vpop.eup %6115  ;;  %v3218_v43 = vmul.f32 0.6931472, %v6114_v46  ;;  %v8529_v12 = vmul.f32 %v8348_v42, %v2969_v15  ;;  %1607 = vst.msk [vmem:[#allocation3 + $0x20] sm:$0xff] %vm519_vm0, %v1590_v35  ;;  %v1385_v31 = vmul.f32 1.442695, %v1342_v21  ;;  %vm2976_vm2 = vweird.f32 %v8363_v18  ;;  %2462 = vmatpush.msrb.mxu2 %v5504_v3 }
 0x1b9   : > { %v1565_v26 = vpop.xlane.xlu2 %1564  ;;  %6121 = vlog2.f32 %v3201_v33  ;;  %1463 = vmatmul.f32.gmra.mxu2 %v1411_v54  ;;  %v5647_v14 = vmul.f32 -1.442695, %v2830_v22  ;;  %v2975_v28 = vadd.f32 %v8428_v38, %v2974_v39  ;;  %vm2977_vm3 = vweird.f32 %v8428_v38 }
 0x1ba   : > { %v6118_v17 = vpop.eup %6117  ;;  %v3170_v10 = vsub.f32 1.0, %v8529_v12  ;;  %6123 = vpow2.f32 %v1385_v31  ;;  %vm8536_vm4 = vmor %vm2976_vm2, %vm2977_vm3  ;;  %v2980_v57 = vand.u32 2147483647, %v8363_v18  ;;  %v2982_v60 = vand.u32 2147483648, %v8363_v18  ;;  %3589 = vadd.xlane.f32.xlu0 %v3218_v43 }
 0x1bb   : > { %2347 = vmatmul.f32.gmra.mxu1 %v7437_v52  ;;  %3363 = vmatmul.f32.gmra.mxu3 %v3218_v43  ;;  %v8543_v58 = vadd.f32 1.0, %v6118_v17  ;;  %6125 = vpow2.f32 %v5647_v14  ;;  %v2979_v45 = vsel %vm8536_vm4, %v8428_v38, %v2975_v28  ;;  %v1591_v48 = vadd.f32 %v1565_v26, %v1543_v1  ;;  %v2832_v7 = vpop.f32.mrf.mxu0  ;;  %v2582_v21 = vpop.xlane.xlu0 %2581 }
 0x1bc   : > { %v3003_v35 = vsub.f32 1.0, %v8513_v36  ;;  %v3186_v54 = vmax.f32 %v3170_v10, 1.1754944e-38  ;;  %vm2981_vm5 = vcmp.eq.f32.partialorder %v2980_v57, 8.507059e+37  ;;  %v2983_v18 = vor.u32 1.1754944e-38, %v2982_v60 }
 0x1bd   : > { %v8550_v22 = vpop.eup %6119  ;;  %6127 = vrcp.f32 %v8543_v58  ;;  %v2608_v52 = vadd.f32 %v2582_v21, %v2560_v4  ;;  %1608 = vst.msk [vmem:[#allocation3 + $0x28] sm:$0xff] %vm519_vm0, %v1591_v48  ;;  %v1412_v46 = vmul.f32 %v6116_v29, %v7454_v32  ;;  %v2833_v38 = vadd.f32 %v2832_v7, %v6954_v6  ;;  %v1544_v48 = vld [vmem:[#allocation3 + $0x30] sm:$0xff] }
 0x1be   : > { %v3018_v33 = vsub.f32 1.0, %v8517_v25  ;;  %v3202_v15 = vmin.f32 %v3186_v54, 1.0  ;;  %v2984_v36 = vsel %vm2981_vm5, %v2983_v18, %v2979_v45  ;;  %v2989_v39 = vmul.f32 %v8439_v63, %v2988_v53  ;;  %v5503_v21 = vld [vmem:[%s8129_s25 + $0xd0] sm:$0xff] }
 0x1bf   : > { %v6122_v43 = vpop.eup %6121  ;;  %v8561_v31 = vmul.f32 %v8348_v42, %v2984_v36  ;;  %2624 = vst.msk [vmem:[#allocation3 + $0xa8] sm:$0xff] %vm519_vm0, %v2608_v52  ;;  %v5648_v1 = vmul.f32 -1.442695, %v2833_v38  ;;  %vm2991_vm6 = vweird.f32 %v8400_v2  ;;  %vm2992_vm7 = vweird.f32 %v8439_v63  ;;  %2463 = vmatpush.msrb.mxu2 %v5503_v21  ;;  %v9901_v25 = vld [vmem:[#allocation7_spill] sm:$0xff] }
 0x1c0   : > { %v6124_v32 = vpop.eup %6123  ;;  %v8566_v29 = vmul.f32 0.6931472, %v6122_v43  ;;  %6129 = vlog2.f32 %v3202_v15  ;;  %v2990_v26 = vadd.f32 %v8439_v63, %v2989_v39  ;;  %vm8569_vm8 = vmor %vm2991_vm6, %vm2992_vm7  ;;  %v2995_v53 = vand.u32 2147483647, %v8400_v2  ;;  %v2561_v43 = vld [vmem:[#allocation3 + $0xb0] sm:$0xff] }
 0x1c1   : > { %v6126_v14 = vpop.eup %6125  ;;  %v8576_v28 = vmul.f32 %v8550_v22, %v8497_v8  ;;  %v3171_v17 = vsub.f32 1.0, %v8561_v31  ;;  %1466 = vmatmul.f32.gmra.mxu2 %v1412_v46  ;;  %v1344_v10 = vpop.f32.mrf.mxu1  ;;  %6131 = vpow2.f32 %v5648_v1  ;;  %v2997_v44 = vand.u32 2147483648, %v8400_v2 }
 0x1c2   : > { %v8580_v57 = vadd.f32 1.0, %v6126_v14  ;;  %v1345_v60 = vadd.f32 %v1344_v10, %v6958_v11  ;;  %v2994_v4 = vsel %vm8569_vm8, %v8439_v63, %v2990_v26  ;;  %vm8586_vm9 = vcmp.eq.f32.partialorder %v2995_v53, 8.507059e+37 }
 0x1c3   : > { %v8590_v7 = vpop.eup %6127  ;;  %2350 = vmatmul.f32.gmra.mxu1 %v7702_v49  ;;  %3366 = vmatmul.f32.gmra.mxu3 %v8566_v29  ;;  %v3187_v2 = vmax.f32 %v3171_v17, 1.1754944e-38  ;;  %v2998_v3 = vor.u32 1.1754944e-38, %v2997_v44  ;;  %v1413_v54 = vmul.f32 %v6124_v32, %v7529_v19  ;;  %v2835_v11 = vpop.f32.mrf.mxu0  ;;  %v3004_v18 = vmul.f32 %v8473_v40, %v3003_v35 }
 0x1c4   : > { %6133 = vrcp.f32 %v8580_v57  ;;  %v1387_v63 = vmul.f32 1.442695, %v1345_v60  ;;  %v1567_v52 = vpop.xlane.xlu0 %1566  ;;  %v2836_v46 = vadd.f32 %v2835_v11, %v6954_v6  ;;  %vm3006_vm10 = vweird.f32 %v8430_v47 }
 0x1c5   : > { %v3203_v49 = vmin.f32 %v3187_v2, 1.0  ;;  %v2999_v38 = vsel %vm8586_vm9, %v2998_v3, %v2994_v4  ;;  %v1592_v15 = vadd.f32 %v1567_v52, %v1544_v48  ;;  %v3005_v19 = vadd.f32 %v8473_v40, %v3004_v18  ;;  %v9900_v18 = vld [vmem:[#allocation35_spill] sm:$0xff] }
 0x1c6   : > { %v6130_v36 = vpop.eup %6129  ;;  %v8605_v35 = vmul.f32 %v8590_v7, %v8543_v58  ;;  %6135 = vpow2.f32 %v1387_v63  ;;  %v8608_v39 = vmul.f32 %v8348_v42, %v2999_v38  ;;  %v5649_v1 = vmul.f32 -1.442695, %v2836_v46  ;;  %v5502_v63 = vld [vmem:[%s8129_s25 + $0xc8] sm:$0xff] }
 0x1c7   : > { %v6132_v32 = vpop.eup %6131  ;;  %v3222_v26 = vmul.f32 0.6931472, %v6130_v36  ;;  %6137 = vlog2.f32 %v3203_v49  ;;  %1609 = vst.msk [vmem:[#allocation3 + $0x30] sm:$0xff] %vm519_vm0, %v1592_v15  ;;  %vm3007_vm11 = vweird.f32 %v8473_v40  ;;  %v3010_v62 = vand.u32 2147483647, %v8430_v47  ;;  %2464 = vmatpush.msrb.mxu2 %v5502_v63  ;;  %v9902_v36 = vld [vmem:[#allocation42_spill] sm:$0xff] }
 0x1c8   : > { %v8613_v53 = vadd.f32 1.0, %v6132_v32  ;;  %v3172_v14 = vsub.f32 1.0, %v8608_v39  ;;  %v2584_v17 = vpop.xlane.xlu1 %2583  ;;  %6139 = vpow2.f32 %v5649_v1  ;;  %vm8618_vm12 = vmor %vm3006_vm10, %vm3007_vm11  ;;  %v3012_v44 = vand.u32 2147483648, %v8430_v47  ;;  %v1828_v32 = vpop.f32.mrf.mxu3 }
 0x1c9   : > { %v2609_v60 = vadd.f32 %v2584_v17, %v2561_v43  ;;  %1469 = vmatmul.f32.gmra.mxu2 %v1413_v54  ;;  %v3009_v4 = vsel %vm8618_vm12, %v8473_v40, %v3005_v19  ;;  %vm8626_vm13 = vcmp.eq.f32.partialorder %v3010_v62, 8.507059e+37  ;;  %v3019_v48 = vmul.f32 %v8502_v59, %v3018_v33  ;;  %3593 = vadd.xlane.f32.xlu2 %v3222_v26  ;;  %v1545_v17 = vld [vmem:[#allocation3 + $0x38] sm:$0xff] }
 0x1ca   : > { %v8633_v2 = vpop.eup %6133  ;;  %v3033_v47 = vsub.f32 1.0, %v8576_v28  ;;  %v3188_v3 = vmax.f32 %v3172_v14, 1.1754944e-38  ;;  %v3013_v11 = vor.u32 1.1754944e-38, %v3012_v44  ;;  %v3048_v40 = vsub.f32 1.0, %v8605_v35 }
 0x1cb   : > { %v1347_v54 = vpop.f32.mrf.mxu1  ;;  %2353 = vmatmul.f32.gmra.mxu1 %v9900_v18  ;;  %3369 = vmatmul.f32.gmra.mxu3 %v3222_v26  ;;  %6141 = vrcp.f32 %v8613_v53  ;;  %2625 = vst.msk [vmem:[#allocation3 + $0xb0] sm:$0xff] %vm519_vm0, %v2609_v60  ;;  %v2838_v33 = vpop.f32.mrf.mxu0  ;;  %vm3021_vm14 = vweird.f32 %v8466_v0  ;;  %vm3022_vm15 = vweird.f32 %v8502_v59  ;;  %v3020_v1 = vadd.f32 %v8502_v59, %v3019_v48 }
 0x1cc   : > { %v1348_v21 = vadd.f32 %v1347_v54, %v9901_v25  ;;  %v6136_v52 = vpop.eup %6135  ;;  %v3204_v28 = vmin.f32 %v3188_v3, 1.0  ;;  %v3014_v46 = vsel %vm8626_vm13, %v3013_v11, %v3009_v4  ;;  %v2839_v49 = vadd.f32 %v2838_v33, %v6954_v6  ;;  %vm8658_vm2 = vmor %vm3021_vm14, %vm3022_vm15 }
 0x1cd   : > { %v6138_v38 = vpop.eup %6137  ;;  %v8648_v19 = vmul.f32 %v8348_v42, %v3014_v46  ;;  %v1414_v43 = vmul.f32 %v6136_v52, %v9902_v36  ;;  %v8654_v62 = vmul.f32 %v8633_v2, %v8580_v57  ;;  %v3025_v45 = vand.u32 2147483647, %v8466_v0 }
 0x1ce   : > { %v1389_v15 = vmul.f32 1.442695, %v1348_v21  ;;  %v6140_v26 = vpop.eup %6139  ;;  %v3224_v14 = vmul.f32 0.6931472, %v6138_v38  ;;  %6143 = vlog2.f32 %v3204_v28  ;;  %v5650_v10 = vmul.f32 -1.442695, %v2839_v49 }
 0x1cf   : > { %v8662_v60 = vadd.f32 1.0, %v6140_v26  ;;  %v3173_v4 = vsub.f32 1.0, %v8648_v19  ;;  %v3027_v3 = vand.u32 2147483648, %v8466_v0  ;;  %v1829_v54 = vadd.f32 %v1828_v32, %v6954_v6  ;;  %v2562_v21 = vld [vmem:[#allocation3 + $0xb8] sm:$0xff] }
 0x1d0   : > { %6145 = vpow2.f32 %v1389_v15  ;;  %v1569_v48 = vpop.xlane.xlu1 %1568  ;;  %v3034_v11 = vmul.f32 %v8550_v22, %v3033_v47  ;;  %3595 = vadd.xlane.f32.xlu0 %v3224_v14  ;;  %v3024_v63 = vsel %vm8658_vm2, %v8502_v59, %v3020_v1  ;;  %v3063_v0 = vsub.f32 1.0, %v8654_v62  ;;  %v9905_v47 = vld [vmem:[#allocation46_spill] sm:$0xff]  ;;  %v5501_v59 = vld [vmem:[%s8129_s25 + $0xc0] sm:$0xff] }
 0x1d1   : > { %6147 = vpow2.f32 %v5650_v10  ;;  %v8669_v18 = vpop.eup %6141  ;;  %v3189_v25 = vmax.f32 %v3173_v4, 1.1754944e-38  ;;  %v1593_v33 = vadd.f32 %v1569_v48, %v1545_v17  ;;  %1472 = vmatmul.f32.gmra.mxu2 %v1414_v43  ;;  %vm3026_vm3 = vcmp.eq.f32.partialorder %v3025_v45, 8.507059e+37  ;;  %v9908_v45 = vld [vmem:[#allocation47_spill] sm:$0xff] }
 0x1d2   : > { %6149 = vrcp.f32 %v8662_v60  ;;  %v3028_v52 = vor.u32 1.1754944e-38, %v3027_v3  ;;  %v5556_v28 = vmul.f32 -1.442695, %v1829_v54  ;;  %v3035_v15 = vadd.f32 %v8550_v22, %v3034_v11  ;;  %2465 = vmatpush.msrb.mxu2 %v5501_v59  ;;  %v1546_v59 = vld [vmem:[#allocation3 + $0x40] sm:$0xff] }
 0x1d3   : > { %2356 = vmatmul.f32.gmra.mxu1 %v9905_v47  ;;  %3372 = vmatmul.f32.gmra.mxu3 %v3224_v14  ;;  %v3205_v46 = vmin.f32 %v3189_v25, 1.0  ;;  %v2586_v49 = vpop.xlane.xlu2 %2585  ;;  %1610 = vst.msk [vmem:[#allocation3 + $0x38] sm:$0xff] %vm519_vm0, %v1593_v33  ;;  %v2841_v38 = vpop.f32.mrf.mxu0  ;;  %vm3036_vm4 = vweird.f32 %v8497_v8  ;;  %vm3037_vm5 = vweird.f32 %v8550_v22  ;;  %v8689_v17 = vmul.f32 %v8669_v18, %v8613_v53 }
 0x1d4   : > { %v6144_v36 = vpop.eup %6143  ;;  %v2610_v43 = vadd.f32 %v2586_v49, %v2562_v21  ;;  %v3029_v1 = vsel %vm3026_vm3, %v3028_v52, %v3024_v63  ;;  %6151 = vpow2.f32 %v5556_v28  ;;  %v2842_v32 = vadd.f32 %v2841_v38, %v6954_v6  ;;  %vm8683_vm6 = vmor %vm3036_vm4, %vm3037_vm5 }
 0x1d5   : > { %v8691_v10 = vmul.f32 0.6931472, %v6144_v36  ;;  %6153 = vlog2.f32 %v3205_v46  ;;  %v8694_v44 = vmul.f32 %v8348_v42, %v3029_v1  ;;  %v3040_v54 = vand.u32 2147483647, %v8497_v8  ;;  %v9912_v1 = vld [vmem:[#allocation53_spill] sm:$0xff] }
 0x1d6   : > { %v6146_v14 = vpop.eup %6145  ;;  %2626 = vst.msk [vmem:[#allocation3 + $0xb8] sm:$0xff] %vm519_vm0, %v2610_v43  ;;  %v5651_v3 = vmul.f32 -1.442695, %v2842_v32  ;;  %v3042_v11 = vand.u32 2147483648, %v8497_v8  ;;  %v3039_v52 = vsel %vm8683_vm6, %v8550_v22, %v3035_v15  ;;  %v3049_v28 = vmul.f32 %v8590_v7, %v3048_v40  ;;  %v9909_v8 = vld [vmem:[#allocation5_spill] sm:$0xff] }
 0x1d7   : > { %v6148_v4 = vpop.eup %6147  ;;  %v1415_v48 = vmul.f32 %v6146_v14, %v9908_v45  ;;  %v1350_v21 = vpop.f32.mrf.mxu1  ;;  %v3174_v63 = vsub.f32 1.0, %v8694_v44  ;;  %vm8716_vm7 = vcmp.eq.f32.partialorder %v3040_v54, 8.507059e+37  ;;  %vm3051_vm8 = vweird.f32 %v8543_v58 }
 0x1d8   : > { %v8700_v25 = vpop.eup %6149  ;;  %v8702_v33 = vadd.f32 1.0, %v6148_v4  ;;  %v1351_v46 = vadd.f32 %v1350_v21, %v9909_v8  ;;  %6155 = vpow2.f32 %v5651_v3  ;;  %v3043_v22 = vor.u32 1.1754944e-38, %v3042_v11 }
 0x1d9   : > { %v8713_v47 = vmul.f32 %v8700_v25, %v8662_v60  ;;  %v3190_v38 = vmax.f32 %v3174_v63, 1.1754944e-38  ;;  %1475 = vmatmul.f32.gmra.mxu2 %v1415_v48  ;;  %v3050_v35 = vadd.f32 %v8590_v7, %v3049_v28  ;;  %vm3052_vm9 = vweird.f32 %v8590_v7  ;;  %v5500_v63 = vld [vmem:[%s8129_s25 + $0xb8] sm:$0xff]  ;;  %v2563_v28 = vld [vmem:[#allocation3 + $0xc0] sm:$0xff] }
 0x1da   : > { %v6152_v40 = vpop.eup %6151  ;;  %v1391_v15 = vmul.f32 1.442695, %v1351_v46  ;;  %6157 = vrcp.f32 %v8702_v33  ;;  %v3055_v36 = vand.u32 2147483647, %v8543_v58  ;;  %v3044_v4 = vsel %vm8716_vm7, %v3043_v22, %v3039_v52  ;;  %vm8733_vm10 = vmor %vm3051_vm8, %vm3052_vm9  ;;  %2466 = vmatpush.msrb.mxu2 %v5500_v63 }
 0x1db   : > { %v6154_v43 = vpop.eup %6153  ;;  %2359 = vmatmul.f32.gmra.mxu1 %v9912_v1  ;;  %3375 = vmatmul.f32.gmra.mxu3 %v8691_v10  ;;  %v3206_v32 = vmin.f32 %v3190_v38, 1.0  ;;  %v1571_v26 = vpop.xlane.xlu2 %1570  ;;  %v8727_v14 = vadd.f32 1.0, %v6152_v40  ;;  %v3057_v3 = vand.u32 2147483648, %v8543_v58  ;;  %v8739_v21 = vmul.f32 %v8348_v42, %v3044_v4 }
 0x1dc   : > { %v2844_v45 = vpop.f32.mrf.mxu0  ;;  %v3228_v54 = vmul.f32 0.6931472, %v6154_v43  ;;  %6159 = vpow2.f32 %v1391_v15  ;;  %v1594_v11 = vadd.f32 %v1571_v26, %v1546_v59  ;;  %v3054_v8 = vsel %vm8733_vm10, %v8590_v7, %v3050_v35 }
 0x1dd   : > { %6161 = vlog2.f32 %v3206_v32  ;;  %v2845_v52 = vadd.f32 %v2844_v45, %v6954_v6  ;;  %vm8746_vm11 = vcmp.eq.f32.partialorder %v3055_v36, 8.507059e+37  ;;  %v3175_v58 = vsub.f32 1.0, %v8739_v21 }
 0x1de   : > { %1611 = vst.msk [vmem:[#allocation3 + $0x40] sm:$0xff] %vm519_vm0, %v1594_v11  ;;  %v3058_v49 = vor.u32 1.1754944e-38, %v3057_v3  ;;  %v3064_v38 = vmul.f32 %v8633_v2, %v3063_v0  ;;  %3599 = vadd.xlane.f32.xlu2 %v3228_v54  ;;  %v6156_v59 = vpop.eup %6155  ;;  %v3078_v22 = vsub.f32 1.0, %v8689_v17  ;;  %v2588_v40 = vpop.xlane.xlu0 %2587  ;;  %vm3066_vm12 = vweird.f32 %v8580_v57  ;;  %v9919_v11 = vld [vmem:[#allocation54_spill] sm:$0xff] }
 0x1df   : > { %v5652_v7 = vmul.f32 -1.442695, %v2845_v52  ;;  %vm3067_vm13 = vweird.f32 %v8633_v2  ;;  %v3093_v15 = vsub.f32 1.0, %v8713_v47  ;;  %v2611_v36 = vadd.f32 %v2588_v40, %v2563_v28 }
 0x1e0   : > { %v8758_v35 = vpop.eup %6157  ;;  %v3191_v43 = vmax.f32 %v3175_v58, 1.1754944e-38  ;;  %v3059_v62 = vsel %vm8746_vm11, %v3058_v49, %v3054_v8  ;;  %vm8763_vm14 = vmor %vm3066_vm12, %vm3067_vm13  ;;  %6163 = vrcp.f32 %v8727_v14  ;;  %v3065_v1 = vadd.f32 %v8633_v2, %v3064_v38  ;;  %v5499_v8 = vld [vmem:[%s8129_s25 + $0xb0] sm:$0xff]  ;;  %v9920_v58 = vld [vmem:[#allocation6_spill] sm:$0xff] }
 0x1e1   : > { %v8769_v17 = vmul.f32 %v8348_v42, %v3059_v62  ;;  %v3070_v32 = vand.u32 2147483647, %v8580_v57  ;;  %2627 = vst.msk [vmem:[#allocation3 + $0xc0] sm:$0xff] %vm519_vm0, %v2611_v36  ;;  %v8774_v26 = vadd.f32 1.0, %v6156_v59  ;;  %6165 = vpow2.f32 %v5652_v7  ;;  %2467 = vmatpush.msrb.mxu2 %v5499_v8  ;;  %v2564_v62 = vld [vmem:[#allocation3 + $0xc8] sm:$0xff] }
 0x1e2   : > { %v6160_v47 = vpop.eup %6159  ;;  %v3207_v4 = vmin.f32 %v3191_v43, 1.0  ;;  %v3072_v45 = vand.u32 2147483648, %v8580_v57  ;;  %v1353_v3 = vpop.f32.mrf.mxu1  ;;  %v3069_v52 = vsel %vm8763_vm14, %v8633_v2, %v3065_v1  ;;  %v8786_v46 = vmul.f32 %v8758_v35, %v8702_v33 }
 0x1e3   : > { %v6162_v48 = vpop.eup %6161  ;;  %2362 = vmatmul.f32.gmra.mxu1 %v7903_v56  ;;  %3378 = vmatmul.f32.gmra.mxu3 %v3228_v54  ;;  %v1416_v63 = vmul.f32 %v6160_v47, %v9919_v11  ;;  %v3176_v28 = vsub.f32 1.0, %v8769_v17  ;;  %vm3071_vm15 = vcmp.eq.f32.partialorder %v3070_v32, 8.507059e+37  ;;  %v1354_v49 = vadd.f32 %v1353_v3, %v9920_v58  ;;  %v1547_v54 = vld [vmem:[#allocation3 + $0x48] sm:$0xff] }
 0x1e4   : > { %v3230_v57 = vmul.f32 0.6931472, %v6162_v48  ;;  %v3073_v56 = vor.u32 1.1754944e-38, %v3072_v45  ;;  %6167 = vlog2.f32 %v3207_v4  ;;  %v3079_v59 = vmul.f32 %v8669_v18, %v3078_v22 }
 0x1e5   : > { %1478 = vmatmul.f32.gmra.mxu2 %v1416_v63  ;;  %v3192_v38 = vmax.f32 %v3176_v28, 1.1754944e-38  ;;  %vm3081_vm2 = vweird.f32 %v8613_v53  ;;  %v1393_v2 = vmul.f32 1.442695, %v1354_v49  ;;  %vm3082_vm3 = vweird.f32 %v8669_v18  ;;  %v5498_v49 = vld [vmem:[%s8129_s25 + $0xa8] sm:$0xff] }
 0x1e6   : > { %v3074_v40 = vsel %vm3071_vm15, %v3073_v56, %v3069_v52  ;;  %v3085_v7 = vand.u32 2147483647, %v8613_v53  ;;  %3601 = vadd.xlane.f32.xlu0 %v3230_v57  ;;  %v8793_v36 = vpop.eup %6163  ;;  %6169 = vrcp.f32 %v8774_v26  ;;  %v1573_v43 = vpop.xlane.xlu0 %1572  ;;  %v3080_v22 = vadd.f32 %v8669_v18, %v3079_v59  ;;  %vm8802_vm4 = vmor %vm3081_vm2, %vm3082_vm3  ;;  %2468 = vmatpush.msrb.mxu2 %v5498_v49 }
 0x1e7   : > { %v3208_v0 = vmin.f32 %v3192_v38, 1.0  ;;  %v8797_v1 = vmul.f32 %v8348_v42, %v3074_v40  ;;  %v6166_v32 = vpop.eup %6165  ;;  %6171 = vpow2.f32 %v1393_v2  ;;  %v1595_v47 = vadd.f32 %v1573_v43, %v1547_v54  ;;  %v2590_v48 = vpop.xlane.xlu1 %2589 }
 0x1e8   : > { %v3108_v45 = vsub.f32 1.0, %v8786_v46  ;;  %v8807_v3 = vadd.f32 1.0, %v6166_v32  ;;  %v2612_v11 = vadd.f32 %v2590_v48, %v2564_v62  ;;  %vm8811_vm5 = vcmp.eq.f32.partialorder %v3085_v7, 8.507059e+37  ;;  %v9929_v32 = vld [vmem:[#allocation60_spill] sm:$0xff] }
 0x1e9   : > { %6173 = vlog2.f32 %v3208_v0  ;;  %v3177_v42 = vsub.f32 1.0, %v8797_v1  ;;  %1612 = vst.msk [vmem:[#allocation3 + $0x48] sm:$0xff] %vm519_vm0, %v1595_v47  ;;  %v3087_v28 = vand.u32 2147483648, %v8613_v53  ;;  %v3094_v52 = vmul.f32 %v8700_v25, %v3093_v15 }
 0x1ea   : > { %v6168_v8 = vpop.eup %6167  ;;  %6175 = vrcp.f32 %v8807_v3  ;;  %v3084_v58 = vsel %vm8802_vm4, %v8669_v18, %v3080_v22  ;;  %vm3096_vm6 = vweird.f32 %v8662_v60  ;;  %2628 = vst.msk [vmem:[#allocation3 + $0xc8] sm:$0xff] %vm519_vm0, %v2612_v11  ;;  %vm3097_vm7 = vweird.f32 %v8700_v25  ;;  %v1548_v22 = vld [vmem:[#allocation3 + $0x50] sm:$0xff] }
 0x1eb   : > { %2365 = vmatmul.f32.gmra.mxu1 %v7980_v61  ;;  %3381 = vmatmul.f32.gmra.mxu3 %v3230_v57  ;;  %v3193_v46 = vmax.f32 %v3177_v42, 1.1754944e-38  ;;  %v3088_v56 = vor.u32 1.1754944e-38, %v3087_v28  ;;  %v3095_v53 = vadd.f32 %v8700_v25, %v3094_v52  ;;  %v3100_v61 = vand.u32 2147483647, %v8662_v60  ;;  %vm8832_vm8 = vmor %vm3096_vm6, %vm3097_vm7 }
 0x1ec   : > { %v8828_v15 = vpop.eup %6169  ;;  %v2121_v57 = vmul.f32 %v8793_v36, %v8727_v14  ;;  %v3102_v38 = vand.u32 2147483648, %v8662_v60  ;;  %v8837_v2 = vmul.f32 0.6931472, %v6168_v8  ;;  %v8850_v60 = vld [vmem:[%s6524_s13] ss:$0 sm:$0xff]  ;;  %v3109_v28 = vmul.f32 %v8758_v35, %v3108_v45 }
 0x1ed   : > { %v3209_v18 = vmin.f32 %v3193_v46, 1.0  ;;  %v6172_v59 = vpop.eup %6171  ;;  %v3089_v40 = vsel %vm8811_vm5, %v3088_v56, %v3084_v58  ;;  %v3099_v7 = vsel %vm8832_vm8, %v8700_v25, %v3095_v53  ;;  %vm8844_vm9 = vcmp.eq.f32.partialorder %v3100_v61, 8.507059e+37  ;;  %v9930_v25 = vld [vmem:[#allocation10_spill] sm:$0xff]  ;;  %v2565_v46 = vld [vmem:[#allocation3 + $0xd0] sm:$0xff] }
 0x1ee   : > { %v1356_v0 = vpop.f32.mrf.mxu1  ;;  %v1417_v47 = vmul.f32 %v6172_v59, %v9929_v32  ;;  %v8853_v4 = vmul.f32 %v8850_v60, %v3089_v40  ;;  %v3103_v48 = vor.u32 1.1754944e-38, %v3102_v38  ;;  %v3122_v42 = vmul.f32 %v8828_v15, %v8774_v26  ;;  %v5497_v59 = vld [vmem:[%s8129_s25 + $0xa0] sm:$0xff] }
 0x1ef   : > { %v6174_v62 = vpop.eup %6173  ;;  %6177 = vlog2.f32 %v3209_v18  ;;  %v1357_v11 = vadd.f32 %v1356_v0, %v9930_v25  ;;  %v2122_v8 = vsub.f32 1.0, %v2121_v57  ;;  %v1575_v58 = vpop.xlane.xlu1 %1574  ;;  %v3117_v53 = vand.u32 2147483648, %v8702_v33  ;;  %2469 = vmatpush.msrb.mxu2 %v5497_v59 }
 0x1f0   : > { %v3234_v63 = vmul.f32 0.6931472, %v6174_v62  ;;  %v8859_v52 = vpop.eup %6175  ;;  %1481 = vmatmul.f32.gmra.mxu2 %v1417_v47  ;;  %v3178_v49 = vsub.f32 1.0, %v8853_v4  ;;  %v3104_v56 = vsel %vm8844_vm9, %v3103_v48, %v3099_v7  ;;  %v1596_v45 = vadd.f32 %v1575_v58, %v1548_v22  ;;  %v9933_v58 = vld [vmem:[#allocation8_spill] sm:$0xff] }
 0x1f1   : > { %v1395_v61 = vmul.f32 1.442695, %v1357_v11  ;;  %v8867_v18 = vmul.f32 %v8859_v52, %v8807_v3  ;;  %v8870_v54 = vmul.f32 %v8850_v60, %v3104_v56  ;;  %v3110_v40 = vadd.f32 %v8758_v35, %v3109_v28 }
 0x1f2   : > { %3605 = vadd.xlane.f32.xlu2 %v3234_v63  ;;  %v2592_v57 = vpop.xlane.xlu2 %2591  ;;  %v8874_v38 = vmax.f32 %v3178_v49, 1.1754944e-38  ;;  %vm3111_vm10 = vweird.f32 %v8702_v33  ;;  %vm3112_vm11 = vweird.f32 %v8758_v35  ;;  %v3123_v7 = vsub.f32 1.0, %v3122_v42  ;;  %1613 = vst.msk [vmem:[#allocation3 + $0x50] sm:$0xff] %vm519_vm0, %v1596_v45 }
 0x1f3   : > { %2368 = vmatmul.f32.gmra.mxu1 %v8059_v9  ;;  %3384 = vmatmul.f32.gmra.mxu3 %v8837_v2  ;;  %6179 = vpow2.f32 %v1395_v61  ;;  %v2613_v43 = vadd.f32 %v2592_v57, %v2565_v46  ;;  %v3179_v62 = vsub.f32 1.0, %v8870_v54  ;;  %vm8882_vm12 = vmor %vm3111_vm10, %vm3112_vm11  ;;  %v3138_v22 = vsub.f32 1.0, %v8867_v18 }
 0x1f4   : > { %v3114_v32 = vsel %vm8882_vm12, %v8758_v35, %v3110_v40  ;;  %v3115_v47 = vand.u32 2147483647, %v8702_v33  ;;  %v3118_v48 = vor.u32 1.1754944e-38, %v3117_v53  ;;  %v2123_v11 = vmul.f32 %v8793_v36, %v2122_v8  ;;  %v1549_v8 = vld [vmem:[#allocation3 + $0x58] sm:$0xff] }
 0x1f5   : > { %v6178_v0 = vpop.eup %6177  ;;  %2629 = vst.msk [vmem:[#allocation3 + $0xd0] sm:$0xff] %vm519_vm0, %v2613_v43  ;;  %v3195_v25 = vmax.f32 %v3179_v62, 1.1754944e-38  ;;  %vm2125_vm13 = vweird.f32 %v8727_v14  ;;  %v3210_v46 = vmin.f32 %v8874_v38, 1.0  ;;  %vm2126_vm15 = vweird.f32 %v8793_v36  ;;  %v2566_v62 = vld [vmem:[#allocation3 + $0xd8] sm:$0xff] }
 0x1f6   : > { %v8892_v42 = vmul.f32 0.6931472, %v6178_v0  ;;  %v1359_v28 = vpop.f32.mrf.mxu1  ;;  %vm3116_vm14 = vcmp.eq.f32.partialorder %v3115_v47, 8.507059e+37  ;;  %v2129_v35 = vand.u32 2147483647, %v8727_v14  ;;  %v2124_v53 = vadd.f32 %v8793_v36, %v2123_v11  ;;  %vm8901_vm2 = vmor %vm2125_vm13, %vm2126_vm15  ;;  %v9938_v0 = vld [vmem:[#allocation65_spill] sm:$0xff] }
 0x1f7   : > { %v1360_v33 = vadd.f32 %v1359_v28, %v9933_v58  ;;  %v3211_v49 = vmin.f32 %v3195_v25, 1.0  ;;  %v3119_v56 = vsel %vm3116_vm14, %v3118_v48, %v3114_v32  ;;  %v2131_v57 = vand.u32 2147483648, %v8727_v14 }
 0x1f8   : > { %3607 = vadd.xlane.f32.xlu0 %v8892_v42  ;;  %v8907_v18 = vmul.f32 %v8850_v60, %v3119_v56  ;;  %vm8909_vm3 = vcmp.eq.f32.partialorder %v2129_v35, 8.507059e+37  ;;  %v3124_v38 = vmul.f32 %v8828_v15, %v3123_v7  ;;  %v2128_v43 = vsel %vm8901_vm2, %v8793_v36, %v2124_v53 }
 0x1f9   : > { %v6180_v59 = vpop.eup %6179  ;;  %v1397_v40 = vmul.f32 1.442695, %v1360_v33  ;;  %6181 = vlog2.f32 %v3211_v49  ;;  %vm3126_vm4 = vweird.f32 %v8774_v26  ;;  %v2132_v7 = vor.u32 1.1754944e-38, %v2131_v57 }
 0x1fa   : > { %v1577_v9 = vpop.xlane.xlu2 %1576  ;;  %v1418_v32 = vmul.f32 %v6180_v59, %v9938_v0  ;;  %v3180_v14 = vsub.f32 1.0, %v8907_v18  ;;  %v3125_v47 = vadd.f32 %v8828_v15, %v3124_v38  ;;  %vm3127_vm5 = vweird.f32 %v8828_v15  ;;  %v9941_v59 = vld [vmem:[#allocation9_spill] sm:$0xff] }
 0x1fb   : > { %2371 = vmatmul.f32.gmra.mxu1 %v8110_v27  ;;  %3387 = vmatmul.f32.gmra.mxu3 %v3234_v63  ;;  %6183 = vpow2.f32 %v1397_v40  ;;  %v1597_v48 = vadd.f32 %v1577_v9, %v1549_v8  ;;  %v3130_v36 = vand.u32 2147483647, %v8774_v26  ;;  %v5496_v27 = vld [vmem:[%s8129_s25 + $0x98] sm:$0xff]  ;;  %v2133_v63 = vsel %vm8909_vm3, %v2132_v7, %v2128_v43  ;;  %vm8930_vm6 = vmor %vm3126_vm4, %vm3127_vm5  ;;  %v2567_v7 = vld [vmem:[#allocation3 + $0xe0] sm:$0xff] }
 0x1fc   : > { %v2594_v25 = vpop.xlane.xlu0 %2593  ;;  %1484 = vmatmul.f32.gmra.mxu2 %v1418_v32  ;;  %v3196_v11 = vmax.f32 %v3180_v14, 1.1754944e-38  ;;  %v3132_v35 = vand.u32 2147483648, %v8774_v26  ;;  %6185 = vlog2.f32 %v3210_v46  ;;  %v8937_v33 = vmul.f32 %v8850_v60, %v2133_v63 }
 0x1fd   : > { %v2614_v58 = vadd.f32 %v2594_v25, %v2566_v62  ;;  %1614 = vst.msk [vmem:[#allocation3 + $0x58] sm:$0xff] %vm519_vm0, %v1597_v48  ;;  %2470 = vmatpush.msrb.mxu2 %v5496_v27  ;;  %v3129_v56 = vsel %vm8930_vm6, %v8828_v15, %v3125_v47  ;;  %vm3131_vm7 = vcmp.eq.f32.partialorder %v3130_v36, 8.507059e+37  ;;  %v3139_v8 = vmul.f32 %v8859_v52, %v3138_v22  ;;  %v1550_v22 = vld [vmem:[#allocation3 + $0x60] sm:$0xff]  ;;  %v5495_v36 = vld [vmem:[%s8129_s25 + $0x90] sm:$0xff] }
 0x1fe   : > { %v3212_v49 = vmin.f32 %v3196_v11, 1.0  ;;  %v3133_v53 = vor.u32 1.1754944e-38, %v3132_v35  ;;  %v2166_v26 = vsub.f32 1.0, %v8937_v33  ;;  %v3147_v57 = vand.u32 2147483648, %v8807_v3  ;;  %v5603_v25 = vld [vmem:[%s8129_s25 + $0x170] sm:$0xff] }
 0x1ff   : > { %v6182_v61 = vpop.eup %6181  ;;  %2630 = vst.msk [vmem:[#allocation3 + $0xd8] sm:$0xff] %vm519_vm0, %v2614_v58  ;;  %v3140_v62 = vadd.f32 %v8859_v52, %v3139_v8  ;;  %vm3141_vm8 = vweird.f32 %v8807_v3  ;;  %vm3142_vm9 = vweird.f32 %v8859_v52  ;;  %v3145_v0 = vand.u32 2147483647, %v8807_v3  ;;  %2471 = vmatpush.msrb.mxu2 %v5495_v36 }
 0x200   : > { %v8945_v46 = vmul.f32 0.6931472, %v6182_v61  ;;  %6187 = vlog2.f32 %v3212_v49  ;;  %v2182_v43 = vmax.f32 %v2166_v26, 1.1754944e-38  ;;  %v3134_v15 = vsel %vm3131_vm7, %v3133_v53, %v3129_v56  ;;  %vm8956_vm10 = vmor %vm3141_vm8, %vm3142_vm9 }
 0x201   : > { %v1362_v45 = vpop.f32.mrf.mxu1  ;;  %v6184_v38 = vpop.eup %6183  ;;  %v3144_v3 = vsel %vm8956_vm10, %v8859_v52, %v3140_v62  ;;  %vm3146_vm11 = vcmp.eq.f32.partialorder %v3145_v0, 8.507059e+37  ;;  %v8968_v63 = vmul.f32 %v8850_v60, %v3134_v15  ;;  %v5602_v62 = vld [vmem:[%s8129_s25 + $0x168] sm:$0xff] }
 0x202   : > { %v1363_v40 = vadd.f32 %v1362_v45, %v9941_v59  ;;  %v1419_v9 = vmul.f32 %v6184_v38, %v8046_v51  ;;  %v6186_v32 = vpop.eup %6185  ;;  %v2198_v47 = vmin.f32 %v2182_v43, 1.0  ;;  %3611 = vadd.xlane.f32.xlu2 %v8945_v46  ;;  %v5604_v51 = vld [vmem:[%s8129_s25 + $0x178] sm:$0xff]  ;;  %v1551_v38 = vld [vmem:[#allocation3 + $0x68] sm:$0xff] }
 0x203   : > { %2374 = vmatmul.f32.gmra.mxu1 %v8183_v24  ;;  %3390 = vmatmul.f32.gmra.mxu3 %v8892_v42  ;;  %v3148_v42 = vor.u32 1.1754944e-38, %v3147_v57  ;;  %v8970_v58 = vmul.f32 0.6931472, %v6186_v32  ;;  %v3181_v26 = vsub.f32 1.0, %v8968_v63  ;;  %v9945_v43 = vld [vmem:[#allocation74_spill] sm:$0xff]  ;;  %v5600_v24 = vld [vmem:[%s8129_s25 + $0x158] sm:$0xff] }
 0x204   : > { %v1399_v14 = vmul.f32 1.442695, %v1363_v40  ;;  %v1579_v48 = vpop.xlane.xlu0 %1578  ;;  %1487 = vmatmul.f32.gmra.mxu2 %v1419_v9  ;;  %3474 = vmatpush.msra.mxu1 %v5604_v51  ;;  %v5601_v9 = vld [vmem:[%s8129_s25 + $0x160] sm:$0xff]  ;;  %v2568_v0 = vld [vmem:[#allocation3 + $0xe8] sm:$0xff]  ;;  %v5599_v51 = vld [vmem:[%s8129_s25 + $0x150] sm:$0xff] }
 0x205   : > { %v1598_v11 = vadd.f32 %v1579_v48, %v1550_v22  ;;  %v2596_v27 = vpop.xlane.xlu1 %2595  ;;  %v3149_v28 = vsel %vm3146_vm11, %v3148_v42, %v3144_v3 }
 0x206   : > { %6189 = vpow2.f32 %v1399_v14  ;;  %v6188_v35 = vpop.eup %6187  ;;  %v2615_v49 = vadd.f32 %v2596_v27, %v2567_v7  ;;  %v8973_v56 = vmul.f32 %v8850_v60, %v3149_v28  ;;  %3475 = vmatpush.msra.mxu1 %v5603_v25  ;;  %v9944_v60 = vld [vmem:[#allocation12_spill] sm:$0xff]  ;;  %v3197_v14 = vmax.f32 %v3181_v26, 1.1754944e-38  ;;  %v5494_v7 = vld [vmem:[%s8129_s25 + $0x88] sm:$0xff]  ;;  %v5493_v26 = vld [vmem:[%s8129_s25 + $0x80] sm:$0xff] }
 0x207   : > { %6191 = vlog2.f32 %v2198_v47  ;;  %1615 = vst.msk [vmem:[#allocation3 + $0x60] sm:$0xff] %vm519_vm0, %v1598_v11  ;;  %v8976_v52 = vmul.f32 0.6931472, %v6188_v35  ;;  %2472 = vmatpush.msrb.mxu2 %v5494_v7  ;;  %v9946_v11 = vld [vmem:[#allocation11_spill] sm:$0xff]  ;;  %v5598_v28 = vld [vmem:[%s8129_s25 + $0x148] sm:$0xff]  ;;  %v5597_v35 = vld [vmem:[%s8129_s25 + $0x140] sm:$0xff] }
 0x208   : > { %2631 = vst.msk [vmem:[#allocation3 + $0xe0] sm:$0xff] %vm519_vm0, %v2615_v49  ;;  %v3182_v53 = vsub.f32 1.0, %v8973_v56  ;;  %3476 = vmatpush.msra.mxu1 %v5602_v62  ;;  %v3213_v36 = vmin.f32 %v3197_v14, 1.0  ;;  %v5594_v14 = vld [vmem:[%s8129_s25 + $0x128] sm:$0xff]  ;;  %v5684_v7 = vld [vmem:[%s6532_s16 + $0x1f8] sm:$0xff] }
 0x209   : > { %v1365_v61 = vpop.f32.mrf.mxu1  ;;  %3613 = vadd.xlane.f32.xlu0 %v8976_v52  ;;  %2473 = vmatpush.msrb.mxu2 %v5493_v26  ;;  %v1426_v26 = vld [vmem:[#allocation2 + $0x8] sm:$0xff] }
 0x20a   : > { %v1366_v8 = vadd.f32 %v1365_v61, %v9944_v60  ;;  %v3198_v45 = vmax.f32 %v3182_v53, 1.1754944e-38  ;;  %3477 = vmatpush.msra.mxu1 %v5601_v9  ;;  %v1552_v53 = vld [vmem:[#allocation3 + $0x70] sm:$0xff] }
 0x20b   : > { %2377 = vmatmul.f32.gmra.mxu1 %v8239_v23  ;;  %3393 = vmatmul.f32.gmra.mxu3 %v8970_v58 }
 0x20c   : > { %v6190_v57 = vpop.eup %6189  ;;  %v1401_v40 = vmul.f32 1.442695, %v1366_v8  ;;  %v3214_v22 = vmin.f32 %v3198_v45, 1.0  ;;  %3478 = vmatpush.msra.mxu1 %v5600_v24  ;;  %v2569_v8 = vld [vmem:[#allocation3 + $0xf0] sm:$0xff]  ;;  %5701 = vmatpush.xpose.msk.msra.mxu2 %vm454_vm1, %v5684_v7  ;;  %v9953_v7 = vld [vmem:[#allocation24_spill] sm:$0xff] }
 0x20d   : > { %v6192_v59 = vpop.eup %6191  ;;  %v1420_v15 = vmul.f32 %v6190_v57, %v9945_v43  ;;  %v1581_v32 = vpop.xlane.xlu1 %1580 }
 0x20e   : > { %v8988_v23 = vmul.f32 0.6931472, %v6192_v59  ;;  %6193 = vpow2.f32 %v1401_v40  ;;  %v1599_v47 = vadd.f32 %v1581_v32, %v1551_v38  ;;  %3479 = vmatpush.msra.mxu1 %v5599_v51  ;;  %v9949_v51 = vld [vmem:[#allocation85_spill] sm:$0xff] }
 0x20f   : > { %1490 = vmatmul.f32.gmra.mxu2 %v1420_v15  ;;  %v2598_v42 = vpop.xlane.xlu2 %2597  ;;  %6195 = vlog2.f32 %v3214_v22  ;;  %v9947_v15 = vld [vmem:[#allocation13_spill] sm:$0xff]  ;;  %v1553_v22 = vld [vmem:[#allocation3 + $0x78] sm:$0xff] }
 0x210   : > { %2601 = vadd.xlane.f32.xlu1 %v8988_v23  ;;  %v2616_v48 = vadd.f32 %v2598_v42, %v2568_v0  ;;  %1616 = vst.msk [vmem:[#allocation3 + $0x68] sm:$0xff] %vm519_vm0, %v1599_v47  ;;  %6197 = vlog2.f32 %v3213_v36  ;;  %3480 = vmatpush.msra.mxu1 %v5598_v28  ;;  %v5595_v0 = vld [vmem:[%s8129_s25 + $0x130] sm:$0xff] }
 0x211   : > { %v9948_v42 = vld [vmem:[#allocation15_spill] sm:$0xff] }
 0x212   : > { %2632 = vst.msk [vmem:[#allocation3 + $0xe8] sm:$0xff] %vm519_vm0, %v2616_v48  ;;  %3481 = vmatpush.msra.mxu1 %v5597_v35  ;;  %v5591_v48 = vld [vmem:[%s8129_s25 + $0x110] sm:$0xff] }
 0x213   : > { %2380 = vmatmul.f32.gmra.mxu1 %v8307_v13  ;;  %3396 = vmatmul.f32.gmra.mxu3 %v8945_v46  ;;  %v1368_v25 = vpop.f32.mrf.mxu1  ;;  %v5596_v46 = vld [vmem:[%s8129_s25 + $0x138] sm:$0xff] }
 0x214   : > { %v6194_v3 = vpop.eup %6193  ;;  %v1369_v27 = vadd.f32 %v1368_v25, %v9946_v11  ;;  %3482 = vmatpush.msra.mxu1 %v5596_v46  ;;  %v1425_v25 = vld [vmem:[#allocation2] sm:$0xff]  ;;  %v5590_v11 = vld [vmem:[%s8129_s25 + $0x108] sm:$0xff] }
 0x215   : > { %v6196_v49 = vpop.eup %6195  ;;  %v1421_v61 = vmul.f32 %v6194_v3, %v8172_v20  ;;  %v5682_v46 = vld [vmem:[%s6532_s16 + $0x1e8] sm:$0xff] }
 0x216   : > { %v1403_v13 = vmul.f32 1.442695, %v1369_v27  ;;  %v3246_v60 = vmul.f32 0.6931472, %v6196_v49  ;;  %v6198_v59 = vpop.eup %6197  ;;  %3483 = vmatpush.msra.mxu1 %v5595_v0  ;;  %v5683_v27 = vld [vmem:[%s6532_s16 + $0x1f0] sm:$0xff]  ;;  %v5589_v49 = vld [vmem:[%s8129_s25 + $0x100] sm:$0xff] }
 0x217   : > { %v1583_v45 = vpop.xlane.xlu2 %1582  ;;  %1493 = vmatmul.f32.gmra.mxu2 %v1421_v61  ;;  %v9010_v62 = vmul.f32 0.6931472, %v6198_v59  ;;  %v9951_v59 = vld [vmem:[#allocation36_spill] sm:$0xff] }
 0x218   : > { %6199 = vpow2.f32 %v1403_v13  ;;  %v1600_v57 = vadd.f32 %v1583_v45, %v1552_v53  ;;  %3591 = vadd.xlane.f32.xlu1 %v8566_v29  ;;  %3617 = vadd.xlane.f32.xlu2 %v3246_v60  ;;  %v9950_v53 = vld [vmem:[#allocation14_spill] sm:$0xff] }
 0x219   : > { %3484 = vmatpush.msra.mxu1 %v5594_v14  ;;  %5702 = vmatpush.xpose.msk.msra.mxu2 %vm454_vm1, %v5683_v27  ;;  %v6405_v14 = vld [vmem:[%s9668_s4 + $0x50] sm:$0xff]  ;;  %v6408_v27 = vld [vmem:[%s9668_s4 + $0x38] sm:$0xff] }
 0x21a   : > { %v2600_v38 = vpop.xlane.xlu0 %2599  ;;  %1617 = vst.msk [vmem:[#allocation3 + $0x70] sm:$0xff] %vm519_vm0, %v1600_v57 }
 0x21b   : > { %2383 = vmatmul.f32.gmra.mxu1 %v8376_v30  ;;  %3399 = vmatmul.f32.gmra.mxu3 %v8976_v52  ;;  %v2617_v20 = vadd.f32 %v2600_v38, %v2569_v8  ;;  %v6401_v8 = vld [vmem:[%s9668_s4 + $0x70] sm:$0xff]  ;;  %v6402_v38 = vld [vmem:[%s9668_s4 + $0x68] sm:$0xff] }
 0x21d   : > { %2633 = vst.msk [vmem:[#allocation3 + $0xf0] sm:$0xff] %vm519_vm0, %v2617_v20  ;;  %v1371_v40 = vpop.f32.mrf.mxu1  ;;  %5703 = vmatpush.xpose.msk.msra.mxu2 %vm454_vm1, %v5682_v46 }
 0x21e   : > { %v6200_v43 = vpop.eup %6199  ;;  %v1372_v29 = vadd.f32 %v1371_v40, %v9947_v15 }
 0x21f   : > { %v1422_v30 = vmul.f32 %v6200_v43, %v8228_v50  ;;  %v5593_v50 = vld [vmem:[%s8129_s25 + $0x120] sm:$0xff] }
 0x220   : > { %v1405_v9 = vmul.f32 1.442695, %v1372_v29  ;;  %3597 = vadd.xlane.f32.xlu1 %v8691_v10  ;;  %v5592_v10 = vld [vmem:[%s8129_s25 + $0x118] sm:$0xff]  ;;  %3485 = vmatpush.msra.mxu1 %v5593_v50 }
 0x221   : > { %1496 = vmatmul.f32.gmra.mxu2 %v1422_v30  ;;  %v9952_v29 = vld [vmem:[#allocation16_spill] sm:$0xff] }
 0x222   : > { %v1585_v52 = vpop.xlane.xlu0 %1584  ;;  %6201 = vpow2.f32 %v1405_v9  ;;  %3486 = vmatpush.msra.mxu1 %v5592_v10  ;;  %v6404_v30 = vld [vmem:[%s9668_s4 + $0x58] sm:$0xff]  ;;  %v1427_v9 = vld [vmem:[#allocation2 + $0x10] sm:$0xff] }
 0x223   : > { %2386 = vmatmul.f32.gmra.mxu1 %v8423_v41  ;;  %3402 = vmatmul.f32.gmra.mxu3 %v9010_v62  ;;  %v1601_v32 = vadd.f32 %v1585_v52, %v1553_v22 }
 0x224   : > { %3487 = vmatpush.msra.mxu1 %v5591_v48  ;;  %v6407_v48 = vld [vmem:[%s9668_s4 + $0x40] sm:$0xff] }
 0x225   : > { %1618 = vst.msk [vmem:[#allocation3 + $0x78] sm:$0xff] %vm519_vm0, %v1601_v32  ;;  %v5681_v32 = vld [vmem:[%s6532_s16 + $0x1e0] sm:$0xff] }
 0x226   : > { %3488 = vmatpush.msra.mxu1 %v5590_v11  ;;  %5704 = vmatpush.xpose.msk.msra.mxu2 %vm454_vm1, %v5681_v32 }
 0x228   : > { %v1374_v47 = vpop.f32.mrf.mxu1  ;;  %v6202_v24 = vpop.eup %6201  ;;  %3603 = vadd.xlane.f32.xlu1 %v8837_v2  ;;  %3489 = vmatpush.msra.mxu1 %v5589_v49 }
 0x229   : > { %v1375_v41 = vadd.f32 %v1374_v47, %v9948_v42  ;;  %v1423_v36 = vmul.f32 %v6202_v24, %v9949_v51  ;;  %v6406_v47 = vld [vmem:[%s9668_s4 + $0x48] sm:$0xff]  ;;  %v9954_v42 = vld [vmem:[#allocation39_spill] sm:$0xff] }
 0x22b   : > { %v1407_v3 = vmul.f32 1.442695, %v1375_v41  ;;  %2389 = vmatmul.f32.gmra.mxu1 %v8988_v23  ;;  %3405 = vmatmul.f32.gmra.mxu3 %v3246_v60  ;;  %v6400_v23 = vld [vmem:[%s9668_s4 + $0x78] sm:$0xff] }
 0x22c   : > { %1499 = vmatmul.f32.gmra.mxu2 %v1423_v36  ;;  %v1458_v28 = vpop.f32.mrf.mxu2  ;;  %5822 = vmatpush.msrb.mxu1 %v6400_v23  ;;  %v9956_v23 = vld [vmem:[#allocation21_spill] sm:$0xff] }
 0x22d   : > { %6203 = vpow2.f32 %v1407_v3  ;;  %v1506_v35 = vadd.f32 %v1458_v28, %v1425_v25  ;;  %v9955_v3 = vld [vmem:[#allocation18_spill] sm:$0xff] }
 0x22e   : > { %5823 = vmatpush.msrb.mxu1 %v6401_v8  ;;  %v9957_v8 = vld [vmem:[#allocation37_spill] sm:$0xff] }
 0x22f   : > { %1522 = vst.msk [vmem:[#allocation2] sm:$0xff] %vm454_vm1, %v1506_v35  ;;  %v1428_v35 = vld [vmem:[#allocation2 + $0x18] sm:$0xff] }
 0x230   : > { %v2345_v2 = vpop.f32.mrf.mxu1  ;;  %3609 = vadd.xlane.f32.xlu1 %v8970_v58  ;;  %5824 = vmatpush.msrb.mxu1 %v6402_v38 }
 0x231   : > { %v2346_v61 = vadd.f32 %v2345_v2, %v9950_v53  ;;  %v5680_v53 = vld [vmem:[%s6532_s16 + $0x1d8] sm:$0xff] }
 0x232   : > { %5705 = vmatpush.xpose.msk.msra.mxu2 %vm454_vm1, %v5680_v53  ;;  %v9963_v53 = vld [vmem:[#allocation43_spill] sm:$0xff] }
 0x233   : > { %v6204_v13 = vpop.eup %6203  ;;  %v2393_v60 = vmul.f32 1.442695, %v2346_v61  ;;  %v6409_v61 = vld [vmem:[%s9668_s4 + $0x30] sm:$0xff] }
 0x234   : > { %v1424_v45 = vmul.f32 %v6204_v13, %v8370_v16  ;;  %v1461_v57 = vpop.f32.mrf.mxu2  ;;  %v6403_v16 = vld [vmem:[%s9668_s4 + $0x60] sm:$0xff] }
 0x235   : > { %6205 = vpow2.f32 %v2393_v60  ;;  %v1507_v58 = vadd.f32 %v1461_v57, %v1426_v26  ;;  %5825 = vmatpush.msrb.mxu1 %v6403_v16  ;;  %v6411_v57 = vld [vmem:[%s9668_s4 + $0x20] sm:$0xff]  ;;  %v6412_v16 = vld [vmem:[%s9668_s4 + $0x18] sm:$0xff] }
 0x236   : > { %1502 = vmatmul.f32.gmra.mxu2 %v1424_v45  ;;  %v3361_v20 = vpop.f32.mrf.mxu3 }
 0x237   : > { %v3362_v40 = vadd.f32 %v3361_v20, %v9951_v59  ;;  %1523 = vst.msk [vmem:[#allocation2 + $0x8] sm:$0xff] %vm454_vm1, %v1507_v58  ;;  %5826 = vmatpush.msrb.mxu1 %v6404_v30  ;;  %v9958_v59 = vld [vmem:[#allocation17_spill] sm:$0xff]  ;;  %v5679_v30 = vld [vmem:[%s6532_s16 + $0x1d0] sm:$0xff] }
 0x238   : > { %v2348_v43 = vpop.f32.mrf.mxu1  ;;  %3615 = vadd.xlane.f32.xlu1 %v9010_v62  ;;  %5706 = vmatpush.xpose.msk.msra.mxu2 %vm454_vm1, %v5679_v30 }
 0x239   : > { %v3409_v15 = vmul.f32 1.442695, %v3362_v40  ;;  %v2349_v22 = vadd.f32 %v2348_v43, %v9952_v29  ;;  %5827 = vmatpush.msrb.mxu1 %v6405_v14 }
 0x23b   : > { %v6206_v52 = vpop.eup %6205  ;;  %6207 = vpow2.f32 %v3409_v15  ;;  %v2395_v0 = vmul.f32 1.442695, %v2349_v22  ;;  %5828 = vmatpush.msrb.mxu1 %v6406_v47  ;;  %v1429_v15 = vld [vmem:[#allocation2 + $0x20] sm:$0xff] }
 0x23c   : > { %v2425_v50 = vmul.f32 %v6206_v52, %v9953_v7  ;;  %v1464_v10 = vpop.f32.mrf.mxu2  ;;  %v9959_v52 = vld [vmem:[#allocation34_spill] sm:$0xff] }
 0x23d   : > { %6209 = vpow2.f32 %v2395_v0  ;;  %v1508_v62 = vadd.f32 %v1464_v10, %v1427_v9  ;;  %5829 = vmatpush.msrb.mxu1 %v6407_v48  ;;  %v6413_v9 = vld [vmem:[%s9668_s4 + $0x10] sm:$0xff] }
 0x23e   : > { %2474 = vmatmul.f32.vlgmr.msrb.gmra.mxu2 %v2425_v50  ;;  %v3364_v24 = vpop.f32.mrf.mxu3  ;;  %v9960_v50 = vld [vmem:[#allocation40_spill] sm:$0xff] }
 0x23f   : > { %v3365_v41 = vadd.f32 %v3364_v24, %v9954_v42  ;;  %1524 = vst.msk [vmem:[#allocation2 + $0x10] sm:$0xff] %vm454_vm1, %v1508_v62  ;;  %5830 = vmatpush.msrb.mxu1 %v6408_v27  ;;  %v6415_v62 = vld [vmem:[%s9668_s4] sm:$0xff] }
 0x240   : > { %v2351_v51 = vpop.f32.mrf.mxu1  ;;  %v9962_v27 = vld [vmem:[#allocation29_spill] sm:$0xff] }
 0x241   : > { %v6208_v36 = vpop.eup %6207  ;;  %v3411_v25 = vmul.f32 1.442695, %v3365_v41  ;;  %v2352_v11 = vadd.f32 %v2351_v51, %v9955_v3  ;;  %5831 = vmatpush.msrb.mxu1 %v6409_v61  ;;  %v9961_v41 = vld [vmem:[#allocation19_spill] sm:$0xff] }
 0x242   : > { %v3441_v28 = vmul.f32 %v6208_v36, %v8408_v5  ;;  %v6410_v5 = vld [vmem:[%s9668_s4 + $0x28] sm:$0xff] }
 0x243   : > { %v6210_v49 = vpop.eup %6209  ;;  %6211 = vpow2.f32 %v3411_v25  ;;  %v2397_v2 = vmul.f32 1.442695, %v2352_v11  ;;  %5832 = vmatpush.msrb.mxu1 %v6410_v5  ;;  %v1430_v36 = vld [vmem:[#allocation2 + $0x28] sm:$0xff] }
 0x244   : > { %3490 = vmatmul.f32.vlgmr.msra.gmra.mxu1 %v3441_v28  ;;  %v2426_v26 = vmul.f32 %v6210_v49, %v9956_v23  ;;  %v1467_v13 = vpop.f32.mrf.mxu2  ;;  %v5678_v11 = vld [vmem:[%s6532_s16 + $0x1c8] sm:$0xff] }
 0x245   : > { %6213 = vpow2.f32 %v2397_v2  ;;  %v1509_v60 = vadd.f32 %v1467_v13, %v1428_v35  ;;  %5833 = vmatpush.msrb.mxu1 %v6411_v57  ;;  %5707 = vmatpush.xpose.msk.msra.mxu2 %vm454_vm1, %v5678_v11  ;;  %v9964_v13 = vld [vmem:[#allocation22_spill] sm:$0xff]  ;;  %v5677_v57 = vld [vmem:[%s6532_s16 + $0x1c0] sm:$0xff]  ;;  %v5675_v11 = vld [vmem:[%s6532_s16 + $0x1b0] sm:$0xff] }
 0x246   : > { %2477 = vmatmul.f32.gmra.mxu2 %v2426_v26  ;;  %v3367_v46 = vpop.f32.mrf.mxu3 }
 0x247   : > { %v3368_v45 = vadd.f32 %v3367_v46, %v9957_v8  ;;  %1525 = vst.msk [vmem:[#allocation2 + $0x18] sm:$0xff] %vm454_vm1, %v1509_v60  ;;  %5834 = vmatpush.msrb.mxu1 %v6412_v16  ;;  %v1431_v46 = vld [vmem:[#allocation2 + $0x30] sm:$0xff]  ;;  %v9966_v16 = vld [vmem:[#allocation41_spill] sm:$0xff] }
 0x248   : > { %v2354_v58 = vpop.f32.mrf.mxu1 }
 0x249   : > { %v6212_v38 = vpop.eup %6211  ;;  %v3413_v20 = vmul.f32 1.442695, %v3368_v45  ;;  %v2355_v40 = vadd.f32 %v2354_v58, %v9958_v59  ;;  %5835 = vmatpush.msrb.mxu1 %v6413_v9  ;;  %v9965_v58 = vld [vmem:[#allocation38_spill] sm:$0xff]  ;;  %5708 = vmatpush.xpose.msk.msra.mxu2 %vm454_vm1, %v5677_v57 }
 0x24a   : > { %v3442_v43 = vmul.f32 %v6212_v38, %v8442_v34  ;;  %v6414_v34 = vld [vmem:[%s9668_s4 + $0x8] sm:$0xff] }
 0x24b   : > { %v6214_v29 = vpop.eup %6213  ;;  %6215 = vpow2.f32 %v3413_v20  ;;  %v2399_v22 = vmul.f32 1.442695, %v2355_v40  ;;  %5836 = vmatpush.msrb.mxu1 %v6414_v34 }
 0x24c   : > { %3493 = vmatmul.f32.gmra.mxu1 %v3442_v43  ;;  %v2427_v0 = vmul.f32 %v6214_v29, %v9959_v52  ;;  %v1470_v32 = vpop.f32.mrf.mxu2 }
 0x24d   : > { %6217 = vpow2.f32 %v2399_v22  ;;  %v1510_v14 = vadd.f32 %v1470_v32, %v1429_v15  ;;  %5837 = vmatpush.msrb.mxu1 %v6415_v62  ;;  %v9967_v22 = vld [vmem:[#allocation20_spill] sm:$0xff] }
 0x24e   : > { %2480 = vmatmul.f32.gmra.mxu2 %v2427_v0  ;;  %v3370_v7 = vpop.f32.mrf.mxu3  ;;  %v5676_v32 = vld [vmem:[%s6532_s16 + $0x1b8] sm:$0xff] }
 0x24f   : > { %v3371_v10 = vadd.f32 %v3370_v7, %v9960_v50  ;;  %1526 = vst.msk [vmem:[#allocation2 + $0x20] sm:$0xff] %vm454_vm1, %v1510_v14  ;;  %v9968_v14 = vld [vmem:[#allocation44_spill] sm:$0xff]  ;;  %5709 = vmatpush.xpose.msk.msra.mxu2 %vm454_vm1, %v5676_v32  ;;  %v1434_v32 = vld [vmem:[#allocation2 + $0x48] sm:$0xff] }
 0x250   : > { %v2357_v47 = vpop.f32.mrf.mxu1  ;;  %v1432_v50 = vld [vmem:[#allocation2 + $0x38] sm:$0xff] }
 0x251   : > { %v6216_v24 = vpop.eup %6215  ;;  %v3415_v42 = vmul.f32 1.442695, %v3371_v10  ;;  %v2358_v48 = vadd.f32 %v2357_v47, %v9961_v41  ;;  %v9969_v10 = vld [vmem:[#allocation45_spill] sm:$0xff]  ;;  %v9970_v41 = vld [vmem:[#allocation23_spill] sm:$0xff] }
 0x252   : > { %v3443_v51 = vmul.f32 %v6216_v24, %v8488_v37 }
 0x253   : > { %v6218_v25 = vpop.eup %6217  ;;  %6219 = vpow2.f32 %v3415_v42  ;;  %v2401_v3 = vmul.f32 1.442695, %v2358_v48  ;;  %5710 = vmatpush.xpose.msk.msra.mxu2 %vm454_vm1, %v5675_v11 }
 0x254   : > { %3496 = vmatmul.f32.gmra.mxu1 %v3443_v51  ;;  %v2428_v28 = vmul.f32 %v6218_v25, %v9962_v27  ;;  %v1473_v35 = vpop.f32.mrf.mxu2  ;;  %v9971_v27 = vld [vmem:[#allocation50_spill] sm:$0xff] }
 0x255   : > { %6221 = vpow2.f32 %v2401_v3  ;;  %v1511_v49 = vadd.f32 %v1473_v35, %v1430_v36 }
 0x256   : > { %2483 = vmatmul.f32.gmra.mxu2 %v2428_v28  ;;  %v3373_v2 = vpop.f32.mrf.mxu3 }
 0x257   : > { %v3374_v61 = vadd.f32 %v3373_v2, %v9963_v53  ;;  %1527 = vst.msk [vmem:[#allocation2 + $0x28] sm:$0xff] %vm454_vm1, %v1511_v49  ;;  %v9972_v49 = vld [vmem:[#allocation49_spill] sm:$0xff] }
 0x258   : > { %v2360_v37 = vpop.f32.mrf.mxu1 }
 0x259   : > { %v6220_v23 = vpop.eup %6219  ;;  %v3417_v26 = vmul.f32 1.442695, %v3374_v61  ;;  %v2361_v60 = vadd.f32 %v2360_v37, %v9964_v13  ;;  %v9973_v37 = vld [vmem:[#allocation26_spill] sm:$0xff]  ;;  %v1433_v13 = vld [vmem:[#allocation2 + $0x40] sm:$0xff] }
 0x25a   : > { %v3444_v5 = vmul.f32 %v6220_v23, %v8529_v12 }
 0x25b   : > { %v6222_v8 = vpop.eup %6221  ;;  %6223 = vpow2.f32 %v3417_v26  ;;  %v2403_v45 = vmul.f32 1.442695, %v2361_v60 }
 0x25c   : > { %3499 = vmatmul.f32.gmra.mxu1 %v3444_v5  ;;  %v2429_v38 = vmul.f32 %v6222_v8, %v9965_v58  ;;  %v1476_v20 = vpop.f32.mrf.mxu2  ;;  %v9974_v8 = vld [vmem:[#allocation57_spill] sm:$0xff] }
 0x25d   : > { %6225 = vpow2.f32 %v2403_v45  ;;  %v1512_v59 = vadd.f32 %v1476_v20, %v1431_v46  ;;  %v5674_v46 = vld [vmem:[%s6532_s16 + $0x1a8] sm:$0xff]  ;;  %v9975_v20 = vld [vmem:[#allocation48_spill] sm:$0xff] }
 0x25e   : > { %2486 = vmatmul.f32.gmra.mxu2 %v2429_v38  ;;  %v3376_v40 = vpop.f32.mrf.mxu3 }
 0x25f   : > { %v3377_v43 = vadd.f32 %v3376_v40, %v9966_v16  ;;  %1528 = vst.msk [vmem:[#allocation2 + $0x30] sm:$0xff] %vm454_vm1, %v1512_v59  ;;  %5711 = vmatpush.xpose.msk.msra.mxu2 %vm454_vm1, %v5674_v46  ;;  %v9983_v46 = vld [vmem:[#allocation72_spill] sm:$0xff] }
 0x260   : > { %v2363_v12 = vpop.f32.mrf.mxu1 }
 0x261   : > { %v6224_v15 = vpop.eup %6223  ;;  %v3419_v29 = vmul.f32 1.442695, %v3377_v43  ;;  %v2364_v30 = vadd.f32 %v2363_v12, %v9967_v22  ;;  %v9976_v43 = vld [vmem:[#allocation25_spill] sm:$0xff] }
 0x262   : > { %v3445_v9 = vmul.f32 %v6224_v15, %v8561_v31 }
 0x263   : > { %v6226_v52 = vpop.eup %6225  ;;  %6227 = vpow2.f32 %v3419_v29  ;;  %v2405_v0 = vmul.f32 1.442695, %v2364_v30  ;;  %v5673_v30 = vld [vmem:[%s6532_s16 + $0x1a0] sm:$0xff] }
 0x264   : > { %3502 = vmatmul.f32.gmra.mxu1 %v3445_v9  ;;  %v2430_v34 = vmul.f32 %v6226_v52, %v9968_v14  ;;  %v9977_v9 = vld [vmem:[#allocation63_spill] sm:$0xff]  ;;  %5712 = vmatpush.xpose.msk.msra.mxu2 %vm454_vm1, %v5673_v30  ;;  %v9986_v30 = vld [vmem:[#allocation77_spill] sm:$0xff] }
 0x265   : > { %6229 = vpow2.f32 %v2405_v0  ;;  %v9978_v14 = vld [vmem:[#allocation51_spill] sm:$0xff] }
 0x266   : > { %2489 = vmatmul.f32.gmra.mxu2 %v2430_v34  ;;  %v3379_v7 = vpop.f32.mrf.mxu3 }
 0x267   : > { %v3380_v62 = vadd.f32 %v3379_v7, %v9969_v10 }
 0x268   : > { %v2366_v47 = vpop.f32.mrf.mxu1  ;;  %v1479_v24 = vpop.f32.mrf.mxu2 }
 0x269   : > { %v6228_v42 = vpop.eup %6227  ;;  %v3421_v31 = vmul.f32 1.442695, %v3380_v62  ;;  %v2367_v48 = vadd.f32 %v2366_v47, %v9970_v41  ;;  %v1513_v51 = vadd.f32 %v1479_v24, %v1432_v50  ;;  %v9979_v62 = vld [vmem:[#allocation27_spill] sm:$0xff] }
 0x26a   : > { %v3446_v36 = vmul.f32 %v6228_v42, %v8608_v39  ;;  %v2570_v42 = vld [vmem:[#allocation3 + $0xf8] sm:$0xff] }
 0x26b   : > { %v6230_v25 = vpop.eup %6229  ;;  %6231 = vpow2.f32 %v3421_v31  ;;  %v2407_v3 = vmul.f32 1.442695, %v2367_v48  ;;  %1529 = vst.msk [vmem:[#allocation2 + $0x38] sm:$0xff] %vm454_vm1, %v1513_v51 }
 0x26c   : > { %3505 = vmatmul.f32.gmra.mxu1 %v3446_v36  ;;  %v2431_v28 = vmul.f32 %v6230_v25, %v9971_v27  ;;  %v5672_v36 = vld [vmem:[%s6532_s16 + $0x198] sm:$0xff] }
 0x26d   : > { %6233 = vpow2.f32 %v2407_v3  ;;  %v9980_v25 = vld [vmem:[#allocation68_spill] sm:$0xff]  ;;  %5713 = vmatpush.xpose.msk.msra.mxu2 %vm454_vm1, %v5672_v36  ;;  %v9990_v36 = vld [vmem:[#allocation59_spill] sm:$0xff] }
 0x26e   : > { %2492 = vmatmul.f32.gmra.mxu2 %v2431_v28  ;;  %v3382_v35 = vpop.f32.mrf.mxu3  ;;  %v9981_v28 = vld [vmem:[#allocation55_spill] sm:$0xff] }
 0x26f   : > { %v3383_v2 = vadd.f32 %v3382_v35, %v9972_v49 }
 0x270   : > { %v2369_v53 = vpop.f32.mrf.mxu1 }
 0x271   : > { %v6232_v61 = vpop.eup %6231  ;;  %v3423_v39 = vmul.f32 1.442695, %v3383_v2  ;;  %v2370_v23 = vadd.f32 %v2369_v53, %v9973_v37 }
 0x272   : > { %v3447_v26 = vmul.f32 %v6232_v61, %v8648_v19 }
 0x273   : > { %v6234_v60 = vpop.eup %6233  ;;  %6235 = vpow2.f32 %v3423_v39  ;;  %v2409_v5 = vmul.f32 1.442695, %v2370_v23  ;;  %v1482_v57 = vpop.f32.mrf.mxu2  ;;  %v9982_v39 = vld [vmem:[#allocation30_spill] sm:$0xff] }
 0x274   : > { %3508 = vmatmul.f32.gmra.mxu1 %v3447_v26  ;;  %v2432_v45 = vmul.f32 %v6234_v60, %v9974_v8  ;;  %v1514_v58 = vadd.f32 %v1482_v57, %v1433_v13  ;;  %v9984_v57 = vld [vmem:[#allocation52_spill] sm:$0xff] }
 0x275   : > { %6237 = vpow2.f32 %v2409_v5  ;;  %v5671_v5 = vld [vmem:[%s6532_s16 + $0x190] sm:$0xff] }
 0x276   : > { %2495 = vmatmul.f32.gmra.mxu2 %v2432_v45  ;;  %v3385_v38 = vpop.f32.mrf.mxu3  ;;  %1530 = vst.msk [vmem:[#allocation2 + $0x40] sm:$0xff] %vm454_vm1, %v1514_v58 }
 0x277   : > { %v3386_v59 = vadd.f32 %v3385_v38, %v9975_v20  ;;  %5714 = vmatpush.xpose.msk.msra.mxu2 %vm454_vm1, %v5671_v5  ;;  %v1436_v20 = vld [vmem:[#allocation2 + $0x58] sm:$0xff] }
 0x278   : > { %v2372_v19 = vpop.f32.mrf.mxu1 }
 0x279   : > { %v6236_v40 = vpop.eup %6235  ;;  %v3425_v16 = vmul.f32 1.442695, %v3386_v59  ;;  %v2373_v12 = vadd.f32 %v2372_v19, %v9976_v43  ;;  %v9985_v19 = vld [vmem:[#allocation28_spill] sm:$0xff] }
 0x27a   : > { %v3448_v15 = vmul.f32 %v6236_v40, %v8694_v44 }
 0x27b   : > { %v6238_v29 = vpop.eup %6237  ;;  %6239 = vpow2.f32 %v3425_v16  ;;  %v2411_v22 = vmul.f32 1.442695, %v2373_v12 }
 0x27c   : > { %3511 = vmatmul.f32.gmra.mxu1 %v3448_v15  ;;  %v2433_v52 = vmul.f32 %v6238_v29, %v9977_v9 }
 0x27d   : > { %6241 = vpow2.f32 %v2411_v22  ;;  %v5670_v22 = vld [vmem:[%s6532_s16 + $0x188] sm:$0xff] }
 0x27e   : > { %2498 = vmatmul.f32.gmra.mxu2 %v2433_v52  ;;  %v3388_v0 = vpop.f32.mrf.mxu3 }
 0x27f   : > { %v3389_v34 = vadd.f32 %v3388_v0, %v9978_v14  ;;  %v1485_v50 = vpop.f32.mrf.mxu2  ;;  %5715 = vmatpush.xpose.msk.msra.mxu2 %vm454_vm1, %v5670_v22  ;;  %v5669_v0 = vld [vmem:[%s6532_s16 + $0x180] sm:$0xff] }
 0x280   : > { %v2375_v7 = vpop.f32.mrf.mxu1  ;;  %v1515_v24 = vadd.f32 %v1485_v50, %v1434_v32  ;;  %v9987_v32 = vld [vmem:[#allocation56_spill] sm:$0xff]  ;;  %v9988_v50 = vld [vmem:[#allocation31_spill] sm:$0xff] }
 0x281   : > { %v6240_v10 = vpop.eup %6239  ;;  %v3427_v44 = vmul.f32 1.442695, %v3389_v34  ;;  %v2376_v47 = vadd.f32 %v2375_v7, %v9979_v62 }
 0x282   : > { %v3449_v31 = vmul.f32 %v6240_v10, %v8739_v21  ;;  %1531 = vst.msk [vmem:[#allocation2 + $0x48] sm:$0xff] %vm454_vm1, %v1515_v24  ;;  %v1435_v21 = vld [vmem:[#allocation2 + $0x50] sm:$0xff] }
 0x283   : > { %v6242_v41 = vpop.eup %6241  ;;  %6243 = vpow2.f32 %v3427_v44  ;;  %v2413_v48 = vmul.f32 1.442695, %v2376_v47  ;;  %v2602_v51 = vpop.xlane.xlu1 %2601  ;;  %5716 = vmatpush.xpose.msk.msra.mxu2 %vm454_vm1, %v5669_v0  ;;  %v1437_v44 = vld [vmem:[#allocation2 + $0x60] sm:$0xff] }
 0x284   : > { %3514 = vmatmul.f32.gmra.mxu1 %v3449_v31  ;;  %v2434_v3 = vmul.f32 %v6242_v41, %v9980_v25  ;;  %v2618_v11 = vadd.f32 %v2602_v51, %v2570_v42  ;;  %v9989_v31 = vld [vmem:[#allocation80_spill] sm:$0xff]  ;;  %v5653_v0 = vld [vmem:[%s6720_s19 + $0x180] sm:$0xff] }
 0x285   : > { %6245 = vpow2.f32 %v2413_v48 }
 0x286   : > { %2501 = vmatmul.f32.gmra.mxu2 %v2434_v3  ;;  %v3391_v27 = vpop.f32.mrf.mxu3  ;;  %2634 = vst.msk [vmem:[#allocation3 + $0xf8] sm:$0xff] %vm519_vm0, %v2618_v11 }
 0x287   : > { %v3392_v35 = vadd.f32 %v3391_v27, %v9981_v28  ;;  %v1488_v2 = vpop.f32.mrf.mxu2 }
 0x288   : > { %v2378_v49 = vpop.f32.mrf.mxu1  ;;  %v1516_v23 = vadd.f32 %v1488_v2, %v1435_v21  ;;  %v9991_v21 = vld [vmem:[#allocation33_spill] sm:$0xff]  ;;  %v1438_v2 = vld [vmem:[#allocation2 + $0x68] sm:$0xff] }
 0x289   : > { %v6244_v53 = vpop.eup %6243  ;;  %v3429_v61 = vmul.f32 1.442695, %v3392_v35  ;;  %v2379_v37 = vadd.f32 %v2378_v49, %v9982_v39 }
 0x28a   : > { %v3450_v26 = vmul.f32 %v6244_v53, %v8769_v17  ;;  %1532 = vst.msk [vmem:[#allocation2 + $0x50] sm:$0xff] %vm454_vm1, %v1516_v23  ;;  %v9992_v53 = vld [vmem:[#allocation84_spill] sm:$0xff] }
 0x28b   : > { %v6246_v13 = vpop.eup %6245  ;;  %6247 = vpow2.f32 %v3429_v61  ;;  %v2415_v60 = vmul.f32 1.442695, %v2379_v37 }
 0x28c   : > { %3517 = vmatmul.f32.gmra.mxu1 %v3450_v26  ;;  %v2435_v8 = vmul.f32 %v6246_v13, %v9983_v46  ;;  %v9993_v26 = vld [vmem:[#allocation58_spill] sm:$0xff] }
 0x28d   : > { %6249 = vpow2.f32 %v2415_v60 }
 0x28e   : > { %2504 = vmatmul.f32.gmra.mxu2 %v2435_v8  ;;  %v3394_v45 = vpop.f32.mrf.mxu3 }
 0x28f   : > { %v3395_v58 = vadd.f32 %v3394_v45, %v9984_v57 }
 0x290   : > { %v2381_v38 = vpop.f32.mrf.mxu1 }
 0x291   : > { %v6248_v17 = vpop.eup %6247  ;;  %v3431_v59 = vmul.f32 1.442695, %v3395_v58  ;;  %v2382_v40 = vadd.f32 %v2381_v38, %v9985_v19 }
 0x292   : > { %v3451_v16 = vmul.f32 %v6248_v17, %v8797_v1  ;;  %v1491_v43 = vpop.f32.mrf.mxu2 }
 0x293   : > { %v6250_v12 = vpop.eup %6249  ;;  %6251 = vpow2.f32 %v3431_v59  ;;  %v2417_v15 = vmul.f32 1.442695, %v2382_v40  ;;  %v1517_v29 = vadd.f32 %v1491_v43, %v1436_v20  ;;  %v1439_v20 = vld [vmem:[#allocation2 + $0x70] sm:$0xff]  ;;  %v9995_v59 = vld [vmem:[#allocation61_spill] sm:$0xff] }
 0x294   : > { %3520 = vmatmul.f32.gmra.mxu1 %v3451_v16  ;;  %v2436_v9 = vmul.f32 %v6250_v12, %v9986_v30 }
 0x295   : > { %6253 = vpow2.f32 %v2417_v15  ;;  %1533 = vst.msk [vmem:[#allocation2 + $0x58] sm:$0xff] %vm454_vm1, %v1517_v29  ;;  %v1440_v29 = vld [vmem:[#allocation2 + $0x78] sm:$0xff] }
 0x296   : > { %2507 = vmatmul.f32.gmra.mxu2 %v2436_v9  ;;  %v3397_v52 = vpop.f32.mrf.mxu3 }
 0x297   : > { %v3398_v14 = vadd.f32 %v3397_v52, %v9987_v32  ;;  %v3458_v32 = vld [vmem:[#allocation2 + $0x100] sm:$0xff] }
 0x298   : > { %v2384_v1 = vpop.f32.mrf.mxu1 }
 0x299   : > { %v6252_v34 = vpop.eup %6251  ;;  %v3433_v7 = vmul.f32 1.442695, %v3398_v14  ;;  %v2385_v10 = vadd.f32 %v2384_v1, %v9988_v50  ;;  %v3459_v50 = vld [vmem:[#allocation2 + $0x108] sm:$0xff] }
 0x29a   : > { %v3452_v62 = vmul.f32 %v6252_v34, %v8853_v4  ;;  %v1494_v42 = vpop.f32.mrf.mxu2 }
 0x29b   : > { %v6254_v47 = vpop.eup %6253  ;;  %6255 = vpow2.f32 %v3433_v7  ;;  %v2419_v24 = vmul.f32 1.442695, %v2385_v10  ;;  %v1518_v48 = vadd.f32 %v1494_v42, %v1437_v44  ;;  %v5654_v7 = vld [vmem:[%s6720_s19 + $0x188] sm:$0xff]  ;;  %v2444_v42 = vld [vmem:[#allocation2 + $0x90] sm:$0xff] }
 0x29c   : > { %3523 = vmatmul.f32.gmra.mxu1 %v3452_v62  ;;  %v2437_v41 = vmul.f32 %v6254_v47, %v9989_v31  ;;  %v3460_v31 = vld [vmem:[#allocation2 + $0x110] sm:$0xff] }
 0x29d   : > { %6257 = vpow2.f32 %v2419_v24  ;;  %1534 = vst.msk [vmem:[#allocation2 + $0x60] sm:$0xff] %vm454_vm1, %v1518_v48  ;;  %v5655_v24 = vld [vmem:[%s6720_s19 + $0x190] sm:$0xff] }
 0x29e   : > { %2510 = vmatmul.f32.gmra.mxu2 %v2437_v41  ;;  %v3400_v51 = vpop.f32.mrf.mxu3 }
 0x29f   : > { %v3401_v25 = vadd.f32 %v3400_v51, %v9990_v36 }
 0x2a0   : > { %v2387_v3 = vpop.f32.mrf.mxu1 }
 0x2a1   : > { %v6256_v11 = vpop.eup %6255  ;;  %v3435_v27 = vmul.f32 1.442695, %v3401_v25  ;;  %v2388_v4 = vadd.f32 %v2387_v3, %v9991_v21  ;;  %v5656_v25 = vld [vmem:[%s6720_s19 + $0x198] sm:$0xff] }
 0x2a2   : > { %v3453_v28 = vmul.f32 %v6256_v11, %v8870_v54  ;;  %v9994_v54 = vld [vmem:[#allocation32_spill] sm:$0xff] }
 0x2a3   : > { %v6258_v35 = vpop.eup %6257  ;;  %6259 = vpow2.f32 %v3435_v27  ;;  %v2421_v49 = vmul.f32 1.442695, %v2388_v4  ;;  %v2445_v3 = vld [vmem:[#allocation2 + $0x98] sm:$0xff] }
 0x2a4   : > { %3526 = vmatmul.f32.gmra.mxu1 %v3453_v28  ;;  %v2438_v61 = vmul.f32 %v6258_v35, %v9992_v53  ;;  %v1497_v39 = vpop.f32.mrf.mxu2  ;;  %v3461_v11 = vld [vmem:[#allocation2 + $0x118] sm:$0xff]  ;;  %v5657_v35 = vld [vmem:[%s6720_s19 + $0x1a0] sm:$0xff] }
 0x2a5   : > { %6261 = vpow2.f32 %v2421_v49  ;;  %v1519_v23 = vadd.f32 %v1497_v39, %v1438_v2  ;;  %v2446_v49 = vld [vmem:[#allocation2 + $0xa0] sm:$0xff] }
 0x2a6   : > { %2513 = vmatmul.f32.gmra.mxu2 %v2438_v61  ;;  %v3403_v37 = vpop.f32.mrf.mxu3  ;;  %v3462_v2 = vld [vmem:[#allocation2 + $0x120] sm:$0xff] }
 0x2a7   : > { %v3404_v13 = vadd.f32 %v3403_v37, %v9993_v26  ;;  %1535 = vst.msk [vmem:[#allocation2 + $0x68] sm:$0xff] %vm454_vm1, %v1519_v23  ;;  %v5658_v23 = vld [vmem:[%s6720_s19 + $0x1a8] sm:$0xff] }
 0x2a8   : > { %v2390_v60 = vpop.f32.mrf.mxu1  ;;  %v2447_v26 = vld [vmem:[#allocation2 + $0xa8] sm:$0xff] }
 0x2a9   : > { %v6260_v5 = vpop.eup %6259  ;;  %v3437_v46 = vmul.f32 1.442695, %v3404_v13  ;;  %v2391_v8 = vadd.f32 %v2390_v60, %v9994_v54  ;;  %v3463_v13 = vld [vmem:[#allocation2 + $0x128] sm:$0xff] }
 0x2aa   : > { %v3454_v45 = vmul.f32 %v6260_v5, %v8907_v18 }
 0x2ab   : > { %v6262_v57 = vpop.eup %6261  ;;  %6263 = vpow2.f32 %v3437_v46  ;;  %v2423_v58 = vmul.f32 1.442695, %v2391_v8  ;;  %v5659_v8 = vld [vmem:[%s6720_s19 + $0x1b0] sm:$0xff] }
 0x2ac   : > { %3529 = vmatmul.f32.gmra.mxu1 %v3454_v45  ;;  %v2439_v38 = vmul.f32 %v6262_v57, %v8351_v55  ;;  %v2448_v45 = vld [vmem:[#allocation2 + $0xb0] sm:$0xff] }
 0x2ad   : > { %6265 = vpow2.f32 %v2423_v58  ;;  %v3464_v57 = vld [vmem:[#allocation2 + $0x130] sm:$0xff] }
 0x2ae   : > { %2516 = vmatmul.f32.gmra.mxu2 %v2439_v38  ;;  %v3406_v17 = vpop.f32.mrf.mxu3 }
 0x2af   : > { %v3407_v19 = vadd.f32 %v3406_v17, %v9995_v59  ;;  %v1500_v40 = vpop.f32.mrf.mxu2  ;;  %v5660_v59 = vld [vmem:[%s6720_s19 + $0x1b8] sm:$0xff] }
 0x2b0   : > { %v1520_v16 = vadd.f32 %v1500_v40, %v1439_v20  ;;  %v3465_v40 = vld [vmem:[#allocation2 + $0x138] sm:$0xff] }
 0x2b1   : > { %v6264_v43 = vpop.eup %6263  ;;  %v3439_v12 = vmul.f32 1.442695, %v3407_v19  ;;  %v2449_v19 = vld [vmem:[#allocation2 + $0xb8] sm:$0xff] }
 0x2b2   : > { %1536 = vst.msk [vmem:[#allocation2 + $0x70] sm:$0xff] %vm454_vm1, %v1520_v16  ;;  %v3455_v18 = vmul.f32 %v6264_v43, %v8968_v63  ;;  %v2442_v63 = vld [vmem:[#allocation2 + $0x80] sm:$0xff] }
 0x2b3   : > { %v6266_v15 = vpop.eup %6265  ;;  %6267 = vpow2.f32 %v3439_v12 }
 0x2b4   : > { %3532 = vmatmul.f32.gmra.mxu1 %v3455_v18  ;;  %v2440_v55 = vmul.f32 %v6266_v15, %v8937_v33  ;;  %v5661_v15 = vld [vmem:[%s6720_s19 + $0x1c0] sm:$0xff] }
 0x2b6   : > { %2519 = vmatmul.f32.gmra.mxu2 %v2440_v55  ;;  %v2450_v55 = vld [vmem:[#allocation2 + $0xc0] sm:$0xff] }
 0x2b9   : > { %v6268_v22 = vpop.eup %6267  ;;  %v1503_v30 = vpop.f32.mrf.mxu2 }
 0x2ba   : > { %v1521_v9 = vadd.f32 %v1503_v30, %v1440_v29  ;;  %v3456_v52 = vmul.f32 %v6268_v22, %v8973_v56  ;;  %v2443_v56 = vld [vmem:[#allocation2 + $0x88] sm:$0xff]  ;;  %v3466_v29 = vld [vmem:[#allocation2 + $0x140] sm:$0xff] }
 0x2bc   : > { %1537 = vst.msk [vmem:[#allocation2 + $0x78] sm:$0xff] %vm454_vm1, %v1521_v9  ;;  %3535 = vmatmul.f32.gmra.mxu1 %v3456_v52 }
 0x2be   : > { %5717 = vmatmul.msk.f32.vlgmr.msra.gmra.mxu2 %vm454_vm1, %v5653_v0  ;;  %v5662_v0 = vld [vmem:[%s6720_s19 + $0x1c8] sm:$0xff] }
 0x2c1   : > { %v2475_v14 = vpop.f32.mrf.mxu2  ;;  %v3491_v1 = vpop.f32.mrf.mxu1 }
 0x2c2   : > { %v2523_v33 = vadd.f32 %v2475_v14, %v2442_v63  ;;  %v3539_v34 = vadd.f32 %v3491_v1, %v3458_v32  ;;  %v2451_v63 = vld [vmem:[#allocation2 + $0xc8] sm:$0xff] }
 0x2c3   : > { %v3467_v32 = vld [vmem:[#allocation2 + $0x148] sm:$0xff] }
 0x2c4   : > { %2539 = vst.msk [vmem:[#allocation2 + $0x80] sm:$0xff] %vm454_vm1, %v2523_v33 }
 0x2c5   : > { %3555 = vst.msk [vmem:[#allocation2 + $0x100] sm:$0xff] %vm454_vm1, %v3539_v34 }
 0x2c6   : > { %5718 = vmatmul.msk.f32.gmra.mxu2 %vm454_vm1, %v5654_v7  ;;  %v5663_v7 = vld [vmem:[%s6720_s19 + $0x1d0] sm:$0xff] }
 0x2c9   : > { %v2478_v10 = vpop.f32.mrf.mxu2  ;;  %v3494_v44 = vpop.f32.mrf.mxu1 }
 0x2ca   : > { %v2524_v62 = vadd.f32 %v2478_v10, %v2443_v56  ;;  %v3540_v47 = vadd.f32 %v3494_v44, %v3459_v50  ;;  %v2452_v56 = vld [vmem:[#allocation2 + $0xd0] sm:$0xff] }
 0x2cb   : > { %v3468_v50 = vld [vmem:[#allocation2 + $0x150] sm:$0xff] }
 0x2cc   : > { %2540 = vst.msk [vmem:[#allocation2 + $0x88] sm:$0xff] %vm454_vm1, %v2524_v62 }
 0x2cd   : > { %3556 = vst.msk [vmem:[#allocation2 + $0x108] sm:$0xff] %vm454_vm1, %v3540_v47 }
 0x2ce   : > { %5719 = vmatmul.msk.f32.gmra.mxu2 %vm454_vm1, %v5655_v24  ;;  %v5664_v24 = vld [vmem:[%s6720_s19 + $0x1d8] sm:$0xff] }
 0x2d1   : > { %v2481_v41 = vpop.f32.mrf.mxu2  ;;  %v3497_v48 = vpop.f32.mrf.mxu1 }
 0x2d2   : > { %v2525_v51 = vadd.f32 %v2481_v41, %v2444_v42  ;;  %v3541_v36 = vadd.f32 %v3497_v48, %v3460_v31  ;;  %v3571_v42 = vld [vmem:[#allocation3 + $0x100] sm:$0xff]  ;;  %v3588_v31 = vpop.xlane.xlu2 %3587  ;;  %v2453_v48 = vld [vmem:[#allocation2 + $0xd8] sm:$0xff] }
 0x2d3   : > { %v3619_v41 = vadd.f32 %v3588_v31, %v3571_v42 }
 0x2d4   : > { %2541 = vst.msk [vmem:[#allocation2 + $0x90] sm:$0xff] %vm454_vm1, %v2525_v51  ;;  %v3469_v51 = vld [vmem:[#allocation2 + $0x158] sm:$0xff] }
 0x2d5   : > { %3557 = vst.msk [vmem:[#allocation2 + $0x110] sm:$0xff] %vm454_vm1, %v3541_v36 }
 0x2d6   : > { %5720 = vmatmul.msk.f32.gmra.mxu2 %vm454_vm1, %v5656_v25  ;;  %3635 = vst.msk [vmem:[#allocation3 + $0x100] sm:$0xff] %vm519_vm0, %v3619_v41 }
 0x2d9   : > { %v2484_v27 = vpop.f32.mrf.mxu2  ;;  %v3500_v21 = vpop.f32.mrf.mxu1 }
 0x2da   : > { %v2526_v4 = vadd.f32 %v2484_v27, %v2445_v3  ;;  %v3542_v28 = vadd.f32 %v3500_v21, %v3461_v11  ;;  %v5665_v27 = vld [vmem:[%s6720_s19 + $0x1e0] sm:$0xff]  ;;  %v3572_v21 = vld [vmem:[#allocation3 + $0x108] sm:$0xff] }
 0x2dc   : > { %2542 = vst.msk [vmem:[#allocation2 + $0x98] sm:$0xff] %vm454_vm1, %v2526_v4  ;;  %v3590_v4 = vpop.xlane.xlu0 %3589 }
 0x2dd   : > { %3558 = vst.msk [vmem:[#allocation2 + $0x118] sm:$0xff] %vm454_vm1, %v3542_v28  ;;  %v3620_v28 = vadd.f32 %v3590_v4, %v3572_v21  ;;  %v3578_v4 = vld [vmem:[#allocation3 + $0x138] sm:$0xff] }
 0x2de   : > { %5721 = vmatmul.msk.f32.gmra.mxu2 %vm454_vm1, %v5657_v35  ;;  %v2454_v35 = vld [vmem:[#allocation2 + $0xe0] sm:$0xff] }
 0x2df   : > { %3636 = vst.msk [vmem:[#allocation3 + $0x108] sm:$0xff] %vm519_vm0, %v3620_v28 }
 0x2e1   : > { %v2487_v53 = vpop.f32.mrf.mxu2  ;;  %v3503_v61 = vpop.f32.mrf.mxu1 }
 0x2e2   : > { %v2527_v39 = vadd.f32 %v2487_v53, %v2446_v49  ;;  %v3543_v37 = vadd.f32 %v3503_v61, %v3462_v2  ;;  %v3470_v49 = vld [vmem:[#allocation2 + $0x160] sm:$0xff] }
 0x2e4   : > { %2543 = vst.msk [vmem:[#allocation2 + $0xa0] sm:$0xff] %vm454_vm1, %v2527_v39 }
 0x2e5   : > { %3559 = vst.msk [vmem:[#allocation2 + $0x120] sm:$0xff] %vm454_vm1, %v3543_v37  ;;  %v5666_v37 = vld [vmem:[%s6720_s19 + $0x1e8] sm:$0xff] }
 0x2e6   : > { %5722 = vmatmul.msk.f32.gmra.mxu2 %vm454_vm1, %v5658_v23  ;;  %v2455_v23 = vld [vmem:[#allocation2 + $0xe8] sm:$0xff] }
 0x2e9   : > { %v2490_v60 = vpop.f32.mrf.mxu2  ;;  %v3506_v5 = vpop.f32.mrf.mxu1 }
 0x2ea   : > { %v2528_v46 = vadd.f32 %v2490_v60, %v2447_v26  ;;  %v3544_v54 = vadd.f32 %v3506_v5, %v3463_v13  ;;  %v3471_v26 = vld [vmem:[#allocation2 + $0x168] sm:$0xff] }
 0x2ec   : > { %2544 = vst.msk [vmem:[#allocation2 + $0xa8] sm:$0xff] %vm454_vm1, %v2528_v46 }
 0x2ed   : > { %3560 = vst.msk [vmem:[#allocation2 + $0x128] sm:$0xff] %vm454_vm1, %v3544_v54  ;;  %v5667_v54 = vld [vmem:[%s6720_s19 + $0x1f0] sm:$0xff] }
 0x2ee   : > { %5723 = vmatmul.msk.f32.gmra.mxu2 %vm454_vm1, %v5659_v8  ;;  %v2456_v8 = vld [vmem:[#allocation2 + $0xf0] sm:$0xff] }
 0x2f1   : > { %v2493_v58 = vpop.f32.mrf.mxu2  ;;  %v3509_v38 = vpop.f32.mrf.mxu1 }
 0x2f2   : > { %v2529_v20 = vadd.f32 %v2493_v58, %v2448_v45  ;;  %v3545_v17 = vadd.f32 %v3509_v38, %v3464_v57  ;;  %v3472_v45 = vld [vmem:[#allocation2 + $0x170] sm:$0xff] }
 0x2f4   : > { %2545 = vst.msk [vmem:[#allocation2 + $0xb0] sm:$0xff] %vm454_vm1, %v2529_v20 }
 0x2f5   : > { %3561 = vst.msk [vmem:[#allocation2 + $0x130] sm:$0xff] %vm454_vm1, %v3545_v17  ;;  %v3573_v17 = vld [vmem:[#allocation3 + $0x110] sm:$0xff] }
 0x2f6   : > { %5724 = vmatmul.msk.f32.gmra.mxu2 %vm454_vm1, %v5660_v59  ;;  %v3592_v59 = vpop.xlane.xlu1 %3591 }
 0x2f9   : > { %v2496_v16 = vpop.f32.mrf.mxu2  ;;  %v3512_v43 = vpop.f32.mrf.mxu1 }
 0x2fa   : > { %v2530_v12 = vadd.f32 %v2496_v16, %v2449_v19  ;;  %v3546_v18 = vadd.f32 %v3512_v43, %v3465_v40  ;;  %v5668_v19 = vld [vmem:[%s6720_s19 + $0x1f8] sm:$0xff]  ;;  %v3621_v40 = vadd.f32 %v3592_v59, %v3573_v17  ;;  %v3579_v17 = vld [vmem:[#allocation3 + $0x140] sm:$0xff] }
 0x2fb   : > { %v2457_v16 = vld [vmem:[#allocation2 + $0xf8] sm:$0xff] }
 0x2fc   : > { %2546 = vst.msk [vmem:[#allocation2 + $0xb8] sm:$0xff] %vm454_vm1, %v2530_v12  ;;  %v3473_v43 = vld [vmem:[#allocation2 + $0x178] sm:$0xff] }
 0x2fd   : > { %3562 = vst.msk [vmem:[#allocation2 + $0x138] sm:$0xff] %vm454_vm1, %v3546_v18 }
 0x2fe   : > { %5725 = vmatmul.msk.f32.gmra.mxu2 %vm454_vm1, %v5661_v15  ;;  %3637 = vst.msk [vmem:[#allocation3 + $0x110] sm:$0xff] %vm519_vm0, %v3621_v40 }
 0x301   : > { %v2499_v22 = vpop.f32.mrf.mxu2  ;;  %v3515_v30 = vpop.f32.mrf.mxu1 }
 0x302   : > { %v2531_v9 = vadd.f32 %v2499_v22, %v2450_v55  ;;  %v3547_v52 = vadd.f32 %v3515_v30, %v3466_v29  ;;  %v3574_v29 = vld [vmem:[#allocation3 + $0x118] sm:$0xff]  ;;  %v3594_v22 = vpop.xlane.xlu2 %3593 }
 0x303   : > { %v3622_v30 = vadd.f32 %v3594_v22, %v3574_v29 }
 0x304   : > { %2547 = vst.msk [vmem:[#allocation2 + $0xc0] sm:$0xff] %vm454_vm1, %v2531_v9 }
 0x305   : > { %3563 = vst.msk [vmem:[#allocation2 + $0x140] sm:$0xff] %vm454_vm1, %v3547_v52 }
 0x306   : > { %5726 = vmatmul.msk.f32.gmra.mxu2 %vm454_vm1, %v5662_v0  ;;  %3638 = vst.msk [vmem:[#allocation3 + $0x118] sm:$0xff] %vm519_vm0, %v3622_v30  ;;  %v3575_v0 = vld [vmem:[#allocation3 + $0x120] sm:$0xff] }
 0x309   : > { %v2502_v14 = vpop.f32.mrf.mxu2  ;;  %v3518_v1 = vpop.f32.mrf.mxu1 }
 0x30a   : > { %v2532_v33 = vadd.f32 %v2502_v14, %v2451_v63  ;;  %v3548_v34 = vadd.f32 %v3518_v1, %v3467_v32  ;;  %v3596_v63 = vpop.xlane.xlu0 %3595  ;;  %v3600_v42 = vpop.xlane.xlu2 %3599 }
 0x30b   : > { %v3623_v32 = vadd.f32 %v3596_v63, %v3575_v0 }
 0x30c   : > { %2548 = vst.msk [vmem:[#allocation2 + $0xc8] sm:$0xff] %vm454_vm1, %v2532_v33 }
 0x30d   : > { %3564 = vst.msk [vmem:[#allocation2 + $0x148] sm:$0xff] %vm454_vm1, %v3548_v34  ;;  %v3576_v34 = vld [vmem:[#allocation3 + $0x128] sm:$0xff] }
 0x30e   : > { %5727 = vmatmul.msk.f32.gmra.mxu2 %vm454_vm1, %v5663_v7  ;;  %3639 = vst.msk [vmem:[#allocation3 + $0x120] sm:$0xff] %vm519_vm0, %v3623_v32  ;;  %v3598_v7 = vpop.xlane.xlu1 %3597 }
 0x311   : > { %v2505_v10 = vpop.f32.mrf.mxu2  ;;  %v3521_v44 = vpop.f32.mrf.mxu1 }
 0x312   : > { %v2533_v62 = vadd.f32 %v2505_v10, %v2452_v56  ;;  %v3549_v47 = vadd.f32 %v3521_v44, %v3468_v50  ;;  %v3624_v56 = vadd.f32 %v3598_v7, %v3576_v34  ;;  %v3602_v28 = vpop.xlane.xlu0 %3601  ;;  %v3580_v7 = vld [vmem:[#allocation3 + $0x148] sm:$0xff] }
 0x314   : > { %2549 = vst.msk [vmem:[#allocation2 + $0xd0] sm:$0xff] %vm454_vm1, %v2533_v62 }
 0x315   : > { %3565 = vst.msk [vmem:[#allocation2 + $0x150] sm:$0xff] %vm454_vm1, %v3549_v47 }
 0x316   : > { %5728 = vmatmul.msk.f32.gmra.mxu2 %vm454_vm1, %v5664_v24  ;;  %3640 = vst.msk [vmem:[#allocation3 + $0x128] sm:$0xff] %vm519_vm0, %v3624_v56  ;;  %v3577_v24 = vld [vmem:[#allocation3 + $0x130] sm:$0xff]  ;;  %v3604_v59 = vpop.xlane.xlu1 %3603  ;;  %v3606_v56 = vpop.xlane.xlu2 %3605 }
 0x317   : > { %v3625_v31 = vadd.f32 %v3600_v42, %v3577_v24  ;;  %v3627_v40 = vadd.f32 %v3604_v59, %v3579_v17 }
 0x319   : > { %v2508_v36 = vpop.f32.mrf.mxu2  ;;  %v3524_v25 = vpop.f32.mrf.mxu1  ;;  %3641 = vst.msk [vmem:[#allocation3 + $0x130] sm:$0xff] %vm519_vm0, %v3625_v31 }
 0x31a   : > { %v2534_v3 = vadd.f32 %v2508_v36, %v2453_v48  ;;  %v3550_v11 = vadd.f32 %v3524_v25, %v3469_v51  ;;  %3643 = vst.msk [vmem:[#allocation3 + $0x140] sm:$0xff] %vm519_vm0, %v3627_v40 }
 0x31c   : > { %2550 = vst.msk [vmem:[#allocation2 + $0xd8] sm:$0xff] %vm454_vm1, %v2534_v3 }
 0x31d   : > { %3566 = vst.msk [vmem:[#allocation2 + $0x158] sm:$0xff] %vm454_vm1, %v3550_v11 }
 0x31e   : > { %5729 = vmatmul.msk.f32.gmra.mxu2 %vm454_vm1, %v5665_v27 }
 0x321   : > { %v2511_v2 = vpop.f32.mrf.mxu2  ;;  %v3527_v53 = vpop.f32.mrf.mxu1 }
 0x322   : > { %v2535_v61 = vadd.f32 %v2511_v2, %v2454_v35  ;;  %v3551_v39 = vadd.f32 %v3527_v53, %v3470_v49  ;;  %v3626_v2 = vadd.f32 %v3602_v28, %v3578_v4 }
 0x324   : > { %2551 = vst.msk [vmem:[#allocation2 + $0xe0] sm:$0xff] %vm454_vm1, %v2535_v61 }
 0x325   : > { %3567 = vst.msk [vmem:[#allocation2 + $0x160] sm:$0xff] %vm454_vm1, %v3551_v39 }
 0x326   : > { %5730 = vmatmul.msk.f32.gmra.mxu2 %vm454_vm1, %v5666_v37  ;;  %3642 = vst.msk [vmem:[#allocation3 + $0x138] sm:$0xff] %vm519_vm0, %v3626_v2 }
 0x329   : > { %v2514_v13 = vpop.f32.mrf.mxu2  ;;  %v3530_v60 = vpop.f32.mrf.mxu1 }
 0x32a   : > { %v2536_v5 = vadd.f32 %v2514_v13, %v2455_v23  ;;  %v3552_v46 = vadd.f32 %v3530_v60, %v3471_v26 }
 0x32c   : > { %2552 = vst.msk [vmem:[#allocation2 + $0xe8] sm:$0xff] %vm454_vm1, %v2536_v5 }
 0x32d   : > { %3568 = vst.msk [vmem:[#allocation2 + $0x168] sm:$0xff] %vm454_vm1, %v3552_v46 }
 0x32e   : > { %5731 = vmatmul.msk.f32.gmra.mxu2 %vm454_vm1, %v5667_v54  ;;  %v9272_v54 = vld [vmem:[%s6524_s13] ss:$0 sm:$0xff] }
 0x331   : > { %v2517_v57 = vpop.f32.mrf.mxu2  ;;  %v3533_v58 = vpop.f32.mrf.mxu1 }
 0x332   : > { %v2537_v38 = vadd.f32 %v2517_v57, %v2456_v8  ;;  %v3553_v20 = vadd.f32 %v3533_v58, %v3472_v45 }
 0x334   : > { %2553 = vst.msk [vmem:[#allocation2 + $0xf0] sm:$0xff] %vm454_vm1, %v2537_v38 }
 0x335   : > { %3569 = vst.msk [vmem:[#allocation2 + $0x170] sm:$0xff] %vm454_vm1, %v3553_v20 }
 0x336   : > { %5732 = vmatmul.msk.f32.gmra.mxu2 %vm454_vm1, %v5668_v19 }
 0x339   : > { %v2520_v12 = vpop.f32.mrf.mxu2  ;;  %v3536_v18 = vpop.f32.mrf.mxu1 }
 0x33a   : > { %v2538_v15 = vadd.f32 %v2520_v12, %v2457_v16  ;;  %v3554_v55 = vadd.f32 %v3536_v18, %v3473_v43 }
 0x33c   : > { %2554 = vst.msk [vmem:[#allocation2 + $0xf8] sm:$0xff] %vm454_vm1, %v2538_v15 }
 0x33d   : > { %3570 = vst.msk [vmem:[#allocation2 + $0x178] sm:$0xff] %vm454_vm1, %v3554_v55 }
 0x341   : > { %v3815_v9 = vpop.f32.mrf.mxu2 }
 0x342   : > { %v3816_v52 = vadd.f32 %v3815_v9, %v6954_v6 }
 0x344   : > { %v5733_v14 = vmul.f32 -1.442695, %v3816_v52 }
 0x346   : > { %6269 = vpow2.f32 %v5733_v14 }
 0x349   : > { %v3818_v1 = vpop.f32.mrf.mxu2 }
 0x34a   : > { %v3819_v33 = vadd.f32 %v3818_v1, %v6954_v6 }
 0x34c   : > { %v6270_v50 = vpop.eup %6269  ;;  %v5734_v10 = vmul.f32 -1.442695, %v3819_v33 }
 0x34d   : > { %v3911_v44 = vadd.f32 1.0, %v6270_v50 }
 0x34e   : > { %6271 = vpow2.f32 %v5734_v10  ;;  %v3628_v10 = vadd.f32 %v3606_v56, %v3580_v7 }
 0x34f   : > { %6273 = vrcp.f32 %v3911_v44  ;;  %v3938_v27 = vand.u32 2147483648, %v3911_v44  ;;  %v3936_v49 = vand.u32 2147483647, %v3911_v44  ;;  %vm3932_vm13 = vweird.f32 %v3911_v44 }
 0x350   : > { %3644 = vst.msk [vmem:[#allocation3 + $0x148] sm:$0xff] %vm519_vm0, %v3628_v10 }
 0x351   : > { %v3821_v62 = vpop.f32.mrf.mxu2  ;;  %v3939_v26 = vor.u32 1.1754944e-38, %v3938_v27  ;;  %vm3937_vm15 = vcmp.eq.f32.partialorder %v3936_v49, 8.507059e+37 }
 0x352   : > { %v3822_v47 = vadd.f32 %v3821_v62, %v6954_v6 }
 0x354   : > { %v6272_v41 = vpop.eup %6271  ;;  %v5735_v48 = vmul.f32 -1.442695, %v3822_v47 }
 0x355   : > { %v6274_v51 = vpop.eup %6273  ;;  %v3912_v36 = vadd.f32 1.0, %v6272_v41 }
 0x356   : > { %v3928_v25 = vmul.f32 %v6274_v51, %v3911_v44  ;;  %6275 = vpow2.f32 %v5735_v48  ;;  %vm3933_vm12 = vweird.f32 %v6274_v51 }
 0x357   : > { %6277 = vrcp.f32 %v3912_v36  ;;  %vm3934_vm14 = vmor %vm3932_vm13, %vm3933_vm12  ;;  %v3951_v57 = vand.u32 2147483647, %v3912_v36  ;;  %v3953_v58 = vand.u32 2147483648, %v3912_v36  ;;  %vm3947_vm3 = vweird.f32 %v3912_v36 }
 0x358   : > { %v3929_v3 = vsub.f32 1.0, %v3928_v25 }
 0x359   : > { %v3824_v11 = vpop.f32.mrf.mxu2  ;;  %vm3952_vm5 = vcmp.eq.f32.partialorder %v3951_v57, 8.507059e+37  ;;  %v3954_v29 = vor.u32 1.1754944e-38, %v3953_v58 }
 0x35a   : > { %v3825_v21 = vadd.f32 %v3824_v11, %v6954_v6  ;;  %v3930_v35 = vmul.f32 %v6274_v51, %v3929_v3 }
 0x35c   : > { %v6276_v53 = vpop.eup %6275  ;;  %v5736_v61 = vmul.f32 -1.442695, %v3825_v21  ;;  %v3931_v39 = vadd.f32 %v6274_v51, %v3930_v35  ;;  %v5700_v21 = vld [vmem:[%s8129_s25 + $0x1f8] sm:$0xff] }
 0x35d   : > { %v6278_v37 = vpop.eup %6277  ;;  %v9267_v23 = vadd.f32 1.0, %v6276_v53  ;;  %4490 = vmatpush.msrb.mxu2 %v5700_v21  ;;  %5838 = vmatpush.msra.mxu3 %v5700_v21 }
 0x35e   : > { %v3943_v13 = vmul.f32 %v6278_v37, %v3912_v36  ;;  %6279 = vpow2.f32 %v5736_v61  ;;  %v3935_v60 = vsel %vm3934_vm14, %v6274_v51, %v3931_v39  ;;  %vm3948_vm2 = vweird.f32 %v6278_v37  ;;  %v3581_v61 = vld [vmem:[#allocation3 + $0x150] sm:$0xff]  ;;  %v3608_v39 = vpop.xlane.xlu0 %3607 }
 0x35f   : > { %6281 = vrcp.f32 %v9267_v23  ;;  %v3940_v5 = vsel %vm3937_vm15, %v3939_v26, %v3935_v60  ;;  %vm3949_vm4 = vmor %vm3947_vm3, %vm3948_vm2  ;;  %v3966_v14 = vand.u32 2147483647, %v9267_v23  ;;  %v3968_v1 = vand.u32 2147483648, %v9267_v23 }
 0x360   : > { %v3944_v46 = vsub.f32 1.0, %v3943_v13  ;;  %v9275_v8 = vmul.f32 %v9272_v54, %v3940_v5  ;;  %vm3962_vm7 = vweird.f32 %v9267_v23 }
 0x361   : > { %v3827_v45 = vpop.f32.mrf.mxu2  ;;  %vm3967_vm9 = vcmp.eq.f32.partialorder %v3966_v14, 8.507059e+37  ;;  %v3969_v41 = vor.u32 1.1754944e-38, %v3968_v1 }
 0x362   : > { %v3828_v38 = vadd.f32 %v3827_v45, %v6954_v6  ;;  %v4183_v20 = vsub.f32 1.0, %v9275_v8  ;;  %v3945_v19 = vmul.f32 %v6278_v37, %v3944_v46 }
 0x364   : > { %v6280_v16 = vpop.eup %6279  ;;  %v5737_v43 = vmul.f32 -1.442695, %v3828_v38  ;;  %v4199_v12 = vmax.f32 %v4183_v20, 1.1754944e-38  ;;  %v3946_v18 = vadd.f32 %v6278_v37, %v3945_v19 }
 0x365   : > { %v6282_v15 = vpop.eup %6281  ;;  %v9279_v55 = vadd.f32 1.0, %v6280_v16  ;;  %v5699_v16 = vld [vmem:[%s8129_s25 + $0x1f0] sm:$0xff] }
 0x366   : > { %v3958_v22 = vmul.f32 %v6282_v15, %v9267_v23  ;;  %6283 = vpow2.f32 %v5737_v43  ;;  %v4215_v30 = vmin.f32 %v4199_v12, 1.0  ;;  %v3950_v9 = vsel %vm3949_vm4, %v6278_v37, %v3946_v18  ;;  %4491 = vmatpush.msrb.mxu2 %v5699_v16  ;;  %5839 = vmatpush.msra.mxu3 %v5699_v16 }
 0x367   : > { %6285 = vrcp.f32 %v9279_v55  ;;  %v3955_v52 = vsel %vm3952_vm5, %v3954_v29, %v3950_v9  ;;  %vm3963_vm6 = vweird.f32 %v6282_v15  ;;  %v3981_v35 = vand.u32 2147483647, %v9279_v55 }
 0x368   : > { %v3959_v0 = vsub.f32 1.0, %v3958_v22  ;;  %6287 = vlog2.f32 %v4215_v30  ;;  %v9285_v63 = vmul.f32 %v9272_v54, %v3955_v52  ;;  %vm3964_vm8 = vmor %vm3962_vm7, %vm3963_vm6  ;;  %v3983_v49 = vand.u32 2147483648, %v9279_v55  ;;  %v3582_v22 = vld [vmem:[#allocation3 + $0x158] sm:$0xff]  ;;  %v3610_v30 = vpop.xlane.xlu1 %3609 }
 0x369   : > { %v3830_v32 = vpop.f32.mrf.mxu2  ;;  %v3629_v23 = vadd.f32 %v3608_v39, %v3581_v61  ;;  %vm3977_vm11 = vweird.f32 %v9279_v55  ;;  %vm3982_vm13 = vcmp.eq.f32.partialorder %v3981_v35, 8.507059e+37  ;;  %v3630_v52 = vadd.f32 %v3610_v30, %v3582_v22 }
 0x36a   : > { %v3831_v33 = vadd.f32 %v3830_v32, %v6954_v6  ;;  %v4184_v34 = vsub.f32 1.0, %v9285_v63  ;;  %v3960_v50 = vmul.f32 %v6282_v15, %v3959_v0  ;;  %v3984_v57 = vor.u32 1.1754944e-38, %v3983_v49 }
 0x36b   : > { %3645 = vst.msk [vmem:[#allocation3 + $0x150] sm:$0xff] %vm519_vm0, %v3629_v23 }
 0x36c   : > { %v6284_v44 = vpop.eup %6283  ;;  %v5738_v62 = vmul.f32 -1.442695, %v3831_v33  ;;  %v4200_v47 = vmax.f32 %v4184_v34, 1.1754944e-38  ;;  %v3961_v24 = vadd.f32 %v6282_v15, %v3960_v50  ;;  %3646 = vst.msk [vmem:[#allocation3 + $0x158] sm:$0xff] %vm519_vm0, %v3630_v52 }
 0x36d   : > { %v6286_v42 = vpop.eup %6285  ;;  %v9292_v31 = vadd.f32 1.0, %v6284_v44 }
 0x36e   : > { %v6288_v48 = vpop.eup %6287  ;;  %v3973_v51 = vmul.f32 %v6286_v42, %v9279_v55  ;;  %6289 = vpow2.f32 %v5738_v62  ;;  %v4216_v36 = vmin.f32 %v4200_v47, 1.0  ;;  %v3965_v25 = vsel %vm3964_vm8, %v6282_v15, %v3961_v24 }
 0x36f   : > { %6291 = vrcp.f32 %v9292_v31  ;;  %v4232_v3 = vmul.f32 0.6931472, %v6288_v48  ;;  %v3970_v11 = vsel %vm3967_vm9, %v3969_v41, %v3965_v25  ;;  %vm3978_vm10 = vweird.f32 %v6286_v42 }
 0x370   : > { %v3974_v27 = vsub.f32 1.0, %v3973_v51  ;;  %6293 = vlog2.f32 %v4216_v36  ;;  %v9299_v4 = vmul.f32 %v9272_v54, %v3970_v11  ;;  %vm3979_vm12 = vmor %vm3977_vm11, %vm3978_vm10  ;;  %v3996_v18 = vand.u32 2147483647, %v9292_v31  ;;  %v3612_v11 = vpop.xlane.xlu2 %3611 }
 0x371   : > { %v3833_v28 = vpop.f32.mrf.mxu2  ;;  %4603 = vadd.xlane.f32.xlu0 %v4232_v3  ;;  %4376 = vmatmul.f32.vlgmr.msra.gmra.mxu0 %v4232_v3  ;;  %v3998_v15 = vand.u32 2147483648, %v9292_v31  ;;  %vm3992_vm15 = vweird.f32 %v9292_v31  ;;  %v3583_v3 = vld [vmem:[#allocation3 + $0x160] sm:$0xff] }
 0x372   : > { %v3834_v2 = vadd.f32 %v3833_v28, %v6954_v6  ;;  %v4185_v53 = vsub.f32 1.0, %v9299_v4  ;;  %v3975_v37 = vmul.f32 %v6286_v42, %v3974_v27  ;;  %vm3997_vm3 = vcmp.eq.f32.partialorder %v3996_v18, 8.507059e+37 }
 0x373   : > { %v3999_v7 = vor.u32 1.1754944e-38, %v3998_v15  ;;  %v3631_v21 = vadd.f32 %v3612_v11, %v3583_v3 }
 0x374   : > { %v6290_v26 = vpop.eup %6289  ;;  %v5739_v13 = vmul.f32 -1.442695, %v3834_v2  ;;  %v4201_v60 = vmax.f32 %v4185_v53, 1.1754944e-38  ;;  %v3976_v5 = vadd.f32 %v6286_v42, %v3975_v37 }
 0x375   : > { %v6292_v46 = vpop.eup %6291  ;;  %v9306_v45 = vadd.f32 1.0, %v6290_v26  ;;  %3647 = vst.msk [vmem:[#allocation3 + $0x160] sm:$0xff] %vm519_vm0, %v3631_v21 }
 0x376   : > { %v6294_v58 = vpop.eup %6293  ;;  %v3988_v38 = vmul.f32 %v6292_v46, %v9292_v31  ;;  %6295 = vpow2.f32 %v5739_v13  ;;  %v4217_v20 = vmin.f32 %v4201_v60, 1.0  ;;  %v3980_v17 = vsel %vm3979_vm12, %v6286_v42, %v3976_v5  ;;  %v5698_v42 = vld [vmem:[%s8129_s25 + $0x1e8] sm:$0xff] }
 0x377   : > { %6297 = vrcp.f32 %v9306_v45  ;;  %v4234_v59 = vmul.f32 0.6931472, %v6294_v58  ;;  %v3985_v19 = vsel %vm3982_vm13, %v3984_v57, %v3980_v17  ;;  %vm3993_vm14 = vweird.f32 %v6292_v46  ;;  %4492 = vmatpush.msrb.mxu2 %v5698_v42  ;;  %5840 = vmatpush.msra.mxu3 %v5698_v42  ;;  %v3616_v42 = vpop.xlane.xlu1 %3615 }
 0x378   : > { %v3989_v40 = vsub.f32 1.0, %v3988_v38  ;;  %6299 = vlog2.f32 %v4217_v20  ;;  %v9313_v43 = vmul.f32 %v9272_v54, %v3985_v19  ;;  %vm3994_vm2 = vmor %vm3992_vm15, %vm3993_vm14  ;;  %v4011_v48 = vand.u32 2147483647, %v9306_v45  ;;  %v3584_v19 = vld [vmem:[#allocation3 + $0x168] sm:$0xff] }
 0x379   : > { %v3836_v12 = vpop.f32.mrf.mxu2  ;;  %4605 = vadd.xlane.f32.xlu1 %v4234_v59  ;;  %4379 = vmatmul.f32.gmra.mxu0 %v4234_v59  ;;  %v4013_v51 = vand.u32 2147483648, %v9306_v45  ;;  %vm4007_vm5 = vweird.f32 %v9306_v45 }
 0x37a   : > { %v3837_v55 = vadd.f32 %v3836_v12, %v6954_v6  ;;  %v4186_v29 = vsub.f32 1.0, %v9313_v43  ;;  %v3990_v9 = vmul.f32 %v6292_v46, %v3989_v40  ;;  %vm4012_vm7 = vcmp.eq.f32.partialorder %v4011_v48, 8.507059e+37  ;;  %v3614_v40 = vpop.xlane.xlu0 %3613 }
 0x37b   : > { %v4014_v39 = vor.u32 1.1754944e-38, %v4013_v51  ;;  %v3632_v12 = vadd.f32 %v3614_v40, %v3584_v19 }
 0x37c   : > { %v6296_v0 = vpop.eup %6295  ;;  %v5740_v32 = vmul.f32 -1.442695, %v3837_v55  ;;  %v4202_v14 = vmax.f32 %v4186_v29, 1.1754944e-38  ;;  %v3991_v1 = vadd.f32 %v6292_v46, %v3990_v9 }
 0x37d   : > { %v6298_v33 = vpop.eup %6297  ;;  %v9320_v34 = vadd.f32 1.0, %v6296_v0  ;;  %3648 = vst.msk [vmem:[#allocation3 + $0x168] sm:$0xff] %vm519_vm0, %v3632_v12 }
 0x37e   : > { %v6300_v56 = vpop.eup %6299  ;;  %v4003_v50 = vmul.f32 %v6298_v33, %v9306_v45  ;;  %6301 = vpow2.f32 %v5740_v32  ;;  %v4218_v10 = vmin.f32 %v4202_v14, 1.0  ;;  %v3995_v44 = vsel %vm3994_vm2, %v6292_v46, %v3991_v1  ;;  %v5697_v45 = vld [vmem:[%s8129_s25 + $0x1e0] sm:$0xff] }
 0x37f   : > { %6303 = vrcp.f32 %v9320_v34  ;;  %v4236_v62 = vmul.f32 0.6931472, %v6300_v56  ;;  %v4000_v47 = vsel %vm3997_vm3, %v3999_v7, %v3995_v44  ;;  %vm4008_vm4 = vweird.f32 %v6298_v33  ;;  %4493 = vmatpush.msrb.mxu2 %v5697_v45  ;;  %5841 = vmatpush.msra.mxu3 %v5697_v45  ;;  %v5696_v7 = vld [vmem:[%s8129_s25 + $0x1d8] sm:$0xff] }
 0x380   : > { %v4004_v24 = vsub.f32 1.0, %v4003_v50  ;;  %6305 = vlog2.f32 %v4218_v10  ;;  %v9327_v31 = vmul.f32 %v9272_v54, %v4000_v47  ;;  %vm4009_vm6 = vmor %vm4007_vm5, %vm4008_vm4  ;;  %v4026_v38 = vand.u32 2147483647, %v9320_v34  ;;  %v3586_v45 = vld [vmem:[#allocation3 + $0x178] sm:$0xff] }
 0x381   : > { %v3839_v41 = vpop.f32.mrf.mxu2  ;;  %4607 = vadd.xlane.f32.xlu2 %v4236_v62  ;;  %4382 = vmatmul.f32.gmra.mxu0 %v4236_v62  ;;  %v4028_v20 = vand.u32 2147483648, %v9320_v34  ;;  %vm4022_vm9 = vweird.f32 %v9320_v34 }
 0x382   : > { %v3840_v36 = vadd.f32 %v3839_v41, %v6954_v6  ;;  %v4187_v25 = vsub.f32 1.0, %v9327_v31  ;;  %v4005_v27 = vmul.f32 %v6298_v33, %v4004_v24  ;;  %vm4027_vm11 = vcmp.eq.f32.partialorder %v4026_v38, 8.507059e+37  ;;  %4494 = vmatpush.msrb.mxu2 %v5696_v7  ;;  %v3585_v24 = vld [vmem:[#allocation3 + $0x170] sm:$0xff]  ;;  %5842 = vmatpush.msra.mxu3 %v5696_v7 }
 0x383   : > { %v4029_v9 = vor.u32 1.1754944e-38, %v4028_v20  ;;  %v3633_v48 = vadd.f32 %v3616_v42, %v3585_v24 }
 0x384   : > { %v6302_v28 = vpop.eup %6301  ;;  %v5741_v35 = vmul.f32 -1.442695, %v3840_v36  ;;  %v4203_v49 = vmax.f32 %v4187_v25, 1.1754944e-38  ;;  %v4006_v2 = vadd.f32 %v6298_v33, %v4005_v27 }
 0x385   : > { %v6304_v53 = vpop.eup %6303  ;;  %v9334_v61 = vadd.f32 1.0, %v6302_v28  ;;  %3649 = vst.msk [vmem:[#allocation3 + $0x170] sm:$0xff] %vm519_vm0, %v3633_v48 }
 0x386   : > { %v6306_v37 = vpop.eup %6305  ;;  %v4018_v23 = vmul.f32 %v6304_v53, %v9320_v34  ;;  %6307 = vpow2.f32 %v5741_v35  ;;  %v4219_v26 = vmin.f32 %v4203_v49, 1.0  ;;  %v4010_v13 = vsel %vm4009_vm6, %v6298_v33, %v4006_v2 }
 0x387   : > { %6309 = vrcp.f32 %v9334_v61  ;;  %v4238_v60 = vmul.f32 0.6931472, %v6306_v37  ;;  %v4015_v5 = vsel %vm4012_vm7, %v4014_v39, %v4010_v13  ;;  %vm4023_vm8 = vweird.f32 %v6304_v53  ;;  %v5695_v37 = vld [vmem:[%s8129_s25 + $0x1d0] sm:$0xff] }
 0x388   : > { %v4019_v46 = vsub.f32 1.0, %v4018_v23  ;;  %6311 = vlog2.f32 %v4219_v26  ;;  %v9341_v57 = vmul.f32 %v9272_v54, %v4015_v5  ;;  %vm4024_vm10 = vmor %vm4022_vm9, %vm4023_vm8  ;;  %v4041_v10 = vand.u32 2147483647, %v9334_v61  ;;  %4495 = vmatpush.msrb.mxu2 %v5695_v37  ;;  %5843 = vmatpush.msra.mxu3 %v5695_v37 }
 0x389   : > { %v3842_v58 = vpop.f32.mrf.mxu2  ;;  %4609 = vadd.xlane.f32.xlu0 %v4238_v60  ;;  %4385 = vmatmul.f32.gmra.mxu0 %v4238_v60  ;;  %v4043_v44 = vand.u32 2147483648, %v9334_v61  ;;  %vm4037_vm13 = vweird.f32 %v9334_v61 }
 0x38a   : > { %v3843_v17 = vadd.f32 %v3842_v58, %v6954_v6  ;;  %v4188_v59 = vsub.f32 1.0, %v9341_v57  ;;  %v4020_v16 = vmul.f32 %v6304_v53, %v4019_v46  ;;  %vm4042_vm15 = vcmp.eq.f32.partialorder %v4041_v10, 8.507059e+37  ;;  %v3618_v58 = vpop.xlane.xlu2 %3617 }
 0x38b   : > { %v4044_v21 = vor.u32 1.1754944e-38, %v4043_v44  ;;  %v3634_v20 = vadd.f32 %v3618_v58, %v3586_v45 }
 0x38c   : > { %v6308_v18 = vpop.eup %6307  ;;  %v5742_v15 = vmul.f32 -1.442695, %v3843_v17  ;;  %v4204_v55 = vmax.f32 %v4188_v59, 1.1754944e-38  ;;  %v4021_v29 = vadd.f32 %v6304_v53, %v4020_v16 }
 0x38d   : > { %v6310_v22 = vpop.eup %6309  ;;  %v9348_v30 = vadd.f32 1.0, %v6308_v18  ;;  %3650 = vst.msk [vmem:[#allocation3 + $0x178] sm:$0xff] %vm519_vm0, %v3634_v20 }
 0x38e   : > { %v6312_v52 = vpop.eup %6311  ;;  %v4033_v0 = vmul.f32 %v6310_v22, %v9334_v61  ;;  %6313 = vpow2.f32 %v5742_v15  ;;  %v4220_v32 = vmin.f32 %v4204_v55, 1.0  ;;  %v4025_v14 = vsel %vm4024_vm10, %v6304_v53, %v4021_v29 }
 0x38f   : > { %6315 = vrcp.f32 %v9348_v30  ;;  %v4240_v1 = vmul.f32 0.6931472, %v6312_v52  ;;  %v4030_v33 = vsel %vm4027_vm11, %v4029_v9, %v4025_v14  ;;  %vm4038_vm12 = vweird.f32 %v6310_v22 }
 0x390   : > { %v4034_v34 = vsub.f32 1.0, %v4033_v0  ;;  %6317 = vlog2.f32 %v4220_v32  ;;  %v9355_v56 = vmul.f32 %v9272_v54, %v4030_v33  ;;  %vm4039_vm14 = vmor %vm4037_vm13, %vm4038_vm12  ;;  %v4056_v13 = vand.u32 2147483647, %v9348_v30  ;;  %v5694_v0 = vld [vmem:[%s8129_s25 + $0x1c8] sm:$0xff] }
 0x391   : > { %v3845_v50 = vpop.f32.mrf.mxu2  ;;  %4611 = vadd.xlane.f32.xlu1 %v4240_v1  ;;  %4388 = vmatmul.f32.gmra.mxu0 %v4240_v1  ;;  %v4058_v60 = vand.u32 2147483648, %v9348_v30  ;;  %vm4052_vm3 = vweird.f32 %v9348_v30 }
 0x392   : > { %v3846_v62 = vadd.f32 %v3845_v50, %v6954_v6  ;;  %v4189_v47 = vsub.f32 1.0, %v9355_v56  ;;  %v4035_v41 = vmul.f32 %v6310_v22, %v4034_v34  ;;  %vm4057_vm5 = vcmp.eq.f32.partialorder %v4056_v13, 8.507059e+37  ;;  %4496 = vmatpush.msrb.mxu2 %v5694_v0  ;;  %5844 = vmatpush.msra.mxu3 %v5694_v0 }
 0x393   : > { %v4059_v18 = vor.u32 1.1754944e-38, %v4058_v60 }
 0x394   : > { %v6314_v51 = vpop.eup %6313  ;;  %v5743_v36 = vmul.f32 -1.442695, %v3846_v62  ;;  %v4205_v25 = vmax.f32 %v4189_v47, 1.1754944e-38  ;;  %v4036_v3 = vadd.f32 %v6310_v22, %v4035_v41 }
 0x395   : > { %v6316_v11 = vpop.eup %6315  ;;  %v9362_v27 = vadd.f32 1.0, %v6314_v51 }
 0x396   : > { %v6318_v28 = vpop.eup %6317  ;;  %v4048_v35 = vmul.f32 %v6316_v11, %v9348_v30  ;;  %6319 = vpow2.f32 %v5743_v36  ;;  %v4221_v49 = vmin.f32 %v4205_v25, 1.0  ;;  %v4040_v2 = vsel %vm4039_vm14, %v6310_v22, %v4036_v3 }
 0x397   : > { %6321 = vrcp.f32 %v9362_v27  ;;  %v4242_v53 = vmul.f32 0.6931472, %v6318_v28  ;;  %v4045_v39 = vsel %vm4042_vm15, %v4044_v21, %v4040_v2  ;;  %vm4053_vm2 = vweird.f32 %v6316_v11 }
 0x398   : > { %v4049_v61 = vsub.f32 1.0, %v4048_v35  ;;  %6323 = vlog2.f32 %v4221_v49  ;;  %v9369_v23 = vmul.f32 %v9272_v54, %v4045_v39  ;;  %vm4054_vm4 = vmor %vm4052_vm3, %vm4053_vm2  ;;  %v4071_v1 = vand.u32 2147483647, %v9362_v27 }
 0x399   : > { %v3848_v26 = vpop.f32.mrf.mxu2  ;;  %4613 = vadd.xlane.f32.xlu2 %v4242_v53  ;;  %4391 = vmatmul.f32.gmra.mxu0 %v4242_v53  ;;  %v4073_v33 = vand.u32 2147483648, %v9362_v27  ;;  %vm4067_vm7 = vweird.f32 %v9362_v27 }
 0x39a   : > { %v3849_v5 = vadd.f32 %v3848_v26, %v6954_v6  ;;  %v4190_v46 = vsub.f32 1.0, %v9369_v23  ;;  %v4050_v38 = vmul.f32 %v6316_v11, %v4049_v61  ;;  %vm4072_vm9 = vcmp.eq.f32.partialorder %v4071_v1, 8.507059e+37 }
 0x39b   : > { %v4074_v41 = vor.u32 1.1754944e-38, %v4073_v33  ;;  %v5690_v33 = vld [vmem:[%s8129_s25 + $0x1a8] sm:$0xff] }
 0x39c   : > { %v6320_v17 = vpop.eup %6319  ;;  %v5744_v59 = vmul.f32 -1.442695, %v3849_v5  ;;  %v4206_v19 = vmax.f32 %v4190_v46, 1.1754944e-38  ;;  %v4051_v40 = vadd.f32 %v6316_v11, %v4050_v38  ;;  %v5693_v38 = vld [vmem:[%s8129_s25 + $0x1c0] sm:$0xff] }
 0x39d   : > { %v6322_v16 = vpop.eup %6321  ;;  %v9376_v12 = vadd.f32 1.0, %v6320_v17  ;;  %4497 = vmatpush.msrb.mxu2 %v5693_v38  ;;  %5845 = vmatpush.msra.mxu3 %v5693_v38 }
 0x39e   : > { %v6324_v15 = vpop.eup %6323  ;;  %v4063_v55 = vmul.f32 %v6322_v16, %v9362_v27  ;;  %6325 = vpow2.f32 %v5744_v59  ;;  %v4222_v29 = vmin.f32 %v4206_v19, 1.0  ;;  %v4055_v22 = vsel %vm4054_vm4, %v6316_v11, %v4051_v40 }
 0x39f   : > { %6327 = vrcp.f32 %v9376_v12  ;;  %v4244_v9 = vmul.f32 0.6931472, %v6324_v15  ;;  %v4060_v52 = vsel %vm4057_vm5, %v4059_v18, %v4055_v22  ;;  %vm4068_vm6 = vweird.f32 %v6322_v16 }
 0x3a0   : > { %v4064_v30 = vsub.f32 1.0, %v4063_v55  ;;  %6329 = vlog2.f32 %v4222_v29  ;;  %v9383_v32 = vmul.f32 %v9272_v54, %v4060_v52  ;;  %vm4069_vm8 = vmor %vm4067_vm7, %vm4068_vm6  ;;  %v4086_v35 = vand.u32 2147483647, %v9376_v12  ;;  %v5692_v29 = vld [vmem:[%s8129_s25 + $0x1b8] sm:$0xff] }
 0x3a1   : > { %v3851_v14 = vpop.f32.mrf.mxu2  ;;  %4615 = vadd.xlane.f32.xlu0 %v4244_v9  ;;  %4394 = vmatmul.f32.gmra.mxu0 %v4244_v9  ;;  %v4088_v49 = vand.u32 2147483648, %v9376_v12  ;;  %vm4082_vm11 = vweird.f32 %v9376_v12  ;;  %v5691_v9 = vld [vmem:[%s8129_s25 + $0x1b0] sm:$0xff] }
 0x3a2   : > { %v3852_v34 = vadd.f32 %v3851_v14, %v6954_v6  ;;  %v4191_v7 = vsub.f32 1.0, %v9383_v32  ;;  %v4065_v50 = vmul.f32 %v6322_v16, %v4064_v30  ;;  %vm4087_vm13 = vcmp.eq.f32.partialorder %v4086_v35, 8.507059e+37  ;;  %4498 = vmatpush.msrb.mxu2 %v5692_v29  ;;  %5846 = vmatpush.msra.mxu3 %v5692_v29  ;;  %v5782_v35 = vld [vmem:[%s9669_s5 + $0x10] sm:$0xff] }
 0x3a3   : > { %v4089_v46 = vor.u32 1.1754944e-38, %v4088_v49  ;;  %5012 = vmatpush.msrb.mxu0 %v5782_v35 }
 0x3a4   : > { %v6326_v10 = vpop.eup %6325  ;;  %v5745_v44 = vmul.f32 -1.442695, %v3852_v34  ;;  %v4207_v62 = vmax.f32 %v4191_v7, 1.1754944e-38  ;;  %v4066_v47 = vadd.f32 %v6322_v16, %v4065_v50  ;;  %4499 = vmatpush.msrb.mxu2 %v5691_v9  ;;  %5847 = vmatpush.msra.mxu3 %v5691_v9 }
 0x3a5   : > { %v6328_v24 = vpop.eup %6327  ;;  %v9390_v42 = vadd.f32 1.0, %v6326_v10 }
 0x3a6   : > { %v6330_v48 = vpop.eup %6329  ;;  %v4078_v51 = vmul.f32 %v6328_v24, %v9376_v12  ;;  %6331 = vpow2.f32 %v5745_v44  ;;  %v4223_v36 = vmin.f32 %v4207_v62, 1.0  ;;  %v4070_v25 = vsel %vm4069_vm8, %v6322_v16, %v4066_v47  ;;  %4500 = vmatpush.msrb.mxu2 %v5690_v33  ;;  %5848 = vmatpush.msra.mxu3 %v5690_v33 }
 0x3a7   : > { %6333 = vrcp.f32 %v9390_v42  ;;  %v4246_v3 = vmul.f32 0.6931472, %v6330_v48  ;;  %v4075_v11 = vsel %vm4072_vm9, %v4074_v41, %v4070_v25  ;;  %vm4083_vm10 = vweird.f32 %v6328_v24  ;;  %v5689_v41 = vld [vmem:[%s8129_s25 + $0x1a0] sm:$0xff] }
 0x3a8   : > { %v4079_v21 = vsub.f32 1.0, %v4078_v51  ;;  %6335 = vlog2.f32 %v4223_v36  ;;  %v9395_v27 = vmul.f32 %v9272_v54, %v4075_v11  ;;  %vm4084_vm12 = vmor %vm4082_vm11, %vm4083_vm10  ;;  %v4101_v18 = vand.u32 2147483647, %v9390_v42  ;;  %4501 = vmatpush.msrb.mxu2 %v5689_v41  ;;  %5849 = vmatpush.msra.mxu3 %v5689_v41 }
 0x3a9   : > { %v3854_v28 = vpop.f32.mrf.mxu2  ;;  %4617 = vadd.xlane.f32.xlu1 %v4246_v3  ;;  %4397 = vmatmul.f32.gmra.mxu0 %v4246_v3  ;;  %v4103_v15 = vand.u32 2147483648, %v9390_v42  ;;  %vm4097_vm15 = vweird.f32 %v9390_v42 }
 0x3aa   : > { %v3855_v2 = vadd.f32 %v3854_v28, %v6954_v6  ;;  %v4192_v53 = vsub.f32 1.0, %v9395_v27  ;;  %v4080_v39 = vmul.f32 %v6328_v24, %v4079_v21  ;;  %vm4102_vm3 = vcmp.eq.f32.partialorder %v4101_v18, 8.507059e+37  ;;  %v5688_v28 = vld [vmem:[%s8129_s25 + $0x198] sm:$0xff] }
 0x3ab   : > { %v4104_v50 = vor.u32 1.1754944e-38, %v4103_v15  ;;  %4502 = vmatpush.msrb.mxu2 %v5688_v28  ;;  %5850 = vmatpush.msra.mxu3 %v5688_v28 }
 0x3ac   : > { %v6332_v61 = vpop.eup %6331  ;;  %v5746_v37 = vmul.f32 -1.442695, %v3855_v2  ;;  %v4208_v26 = vmax.f32 %v4192_v53, 1.1754944e-38  ;;  %v4081_v13 = vadd.f32 %v6328_v24, %v4080_v39 }
 0x3ad   : > { %v6334_v60 = vpop.eup %6333  ;;  %v9402_v5 = vadd.f32 1.0, %v6332_v61 }
 0x3ae   : > { %v6336_v45 = vpop.eup %6335  ;;  %v4093_v58 = vmul.f32 %v6334_v60, %v9390_v42  ;;  %6337 = vpow2.f32 %v5746_v37  ;;  %v4224_v20 = vmin.f32 %v4208_v26, 1.0  ;;  %v4085_v17 = vsel %vm4084_vm12, %v6328_v24, %v4081_v13 }
 0x3af   : > { %6339 = vrcp.f32 %v9402_v5  ;;  %v4248_v59 = vmul.f32 0.6931472, %v6336_v45  ;;  %v4090_v19 = vsel %vm4087_vm13, %v4089_v46, %v4085_v17  ;;  %vm4098_vm14 = vweird.f32 %v6334_v60 }
 0x3b0   : > { %v4094_v40 = vsub.f32 1.0, %v4093_v58  ;;  %6341 = vlog2.f32 %v4224_v20  ;;  %v9408_v16 = vmul.f32 %v9272_v54, %v4090_v19  ;;  %vm4099_vm2 = vmor %vm4097_vm15, %vm4098_vm14  ;;  %v4118_v25 = vand.u32 2147483648, %v9402_v5 }
 0x3b1   : > { %v3857_v12 = vpop.f32.mrf.mxu2  ;;  %4619 = vadd.xlane.f32.xlu2 %v4248_v59  ;;  %4400 = vmatmul.f32.gmra.mxu0 %v4248_v59  ;;  %v4116_v49 = vand.u32 2147483647, %v9402_v5  ;;  %vm4112_vm5 = vweird.f32 %v9402_v5 }
 0x3b2   : > { %v3858_v55 = vadd.f32 %v3857_v12, %v6954_v6  ;;  %v4193_v22 = vsub.f32 1.0, %v9408_v16  ;;  %v4095_v52 = vmul.f32 %v6334_v60, %v4094_v40  ;;  %v4119_v26 = vor.u32 1.1754944e-38, %v4118_v25  ;;  %v5687_v40 = vld [vmem:[%s8129_s25 + $0x190] sm:$0xff] }
 0x3b3   : > { %vm4117_vm7 = vcmp.eq.f32.partialorder %v4116_v49, 8.507059e+37  ;;  %4503 = vmatpush.msrb.mxu2 %v5687_v40  ;;  %5851 = vmatpush.msra.mxu3 %v5687_v40 }
 0x3b4   : > { %v6338_v30 = vpop.eup %6337  ;;  %v5747_v0 = vmul.f32 -1.442695, %v3858_v55  ;;  %v4209_v14 = vmax.f32 %v4193_v22, 1.1754944e-38  ;;  %v4096_v1 = vadd.f32 %v6334_v60, %v4095_v52 }
 0x3b5   : > { %v6340_v34 = vpop.eup %6339  ;;  %v9418_v7 = vadd.f32 1.0, %v6338_v30 }
 0x3b6   : > { %v6342_v10 = vpop.eup %6341  ;;  %v4108_v44 = vmul.f32 %v6340_v34, %v9402_v5  ;;  %6343 = vpow2.f32 %v5747_v0  ;;  %v4225_v62 = vmin.f32 %v4209_v14, 1.0  ;;  %v4100_v47 = vsel %vm4099_vm2, %v6334_v60, %v4096_v1 }
 0x3b7   : > { %6345 = vrcp.f32 %v9418_v7  ;;  %v4250_v24 = vmul.f32 0.6931472, %v6342_v10  ;;  %v4105_v42 = vsel %vm4102_vm3, %v4104_v50, %v4100_v47  ;;  %vm4113_vm4 = vweird.f32 %v6340_v34  ;;  %v5686_v47 = vld [vmem:[%s8129_s25 + $0x188] sm:$0xff] }
 0x3b8   : > { %v4109_v48 = vsub.f32 1.0, %v4108_v44  ;;  %6347 = vlog2.f32 %v4225_v62  ;;  %v9424_v51 = vmul.f32 %v9272_v54, %v4105_v42  ;;  %vm4114_vm6 = vmor %vm4112_vm5, %vm4113_vm4  ;;  %v4133_v17 = vand.u32 2147483648, %v9418_v7  ;;  %4504 = vmatpush.msrb.mxu2 %v5686_v47  ;;  %5852 = vmatpush.msra.mxu3 %v5686_v47  ;;  %v4589_v47 = vld [vmem:[#allocation3 + $0x190] sm:$0xff] }
 0x3b9   : > { %v3860_v36 = vpop.f32.mrf.mxu2  ;;  %4621 = vadd.xlane.f32.xlu0 %v4250_v24  ;;  %4403 = vmatmul.f32.gmra.mxu0 %v4250_v24  ;;  %v4131_v19 = vand.u32 2147483647, %v9418_v7  ;;  %vm4127_vm9 = vweird.f32 %v9418_v7 }
 0x3ba   : > { %v3861_v3 = vadd.f32 %v3860_v36, %v6954_v6  ;;  %v4194_v11 = vsub.f32 1.0, %v9424_v51  ;;  %v4110_v21 = vmul.f32 %v6340_v34, %v4109_v48  ;;  %v4134_v9 = vor.u32 1.1754944e-38, %v4133_v17  ;;  %v5749_v17 = vld [vmem:[%s9669_s5 + $0x8] sm:$0xff] }
 0x3bb   : > { %vm4132_vm11 = vcmp.eq.f32.partialorder %v4131_v19, 8.507059e+37  ;;  %4768 = vmatpush.msra.mxu1 %v5749_v17 }
 0x3bc   : > { %v6344_v2 = vpop.eup %6343  ;;  %v5748_v53 = vmul.f32 -1.442695, %v3861_v3  ;;  %v4210_v39 = vmax.f32 %v4194_v11, 1.1754944e-38  ;;  %v4111_v61 = vadd.f32 %v6340_v34, %v4110_v21 }
 0x3bd   : > { %v6346_v6 = vpop.eup %6345  ;;  %v3925_v37 = vadd.f32 1.0, %v6344_v2 }
 0x3be   : > { %v6348_v13 = vpop.eup %6347  ;;  %v4123_v60 = vmul.f32 %v6346_v6, %v9418_v7  ;;  %6349 = vpow2.f32 %v5748_v53  ;;  %v4226_v46 = vmin.f32 %v4210_v39, 1.0  ;;  %v4115_v45 = vsel %vm4114_vm6, %v6340_v34, %v4111_v61 }
 0x3bf   : > { %6351 = vrcp.f32 %v3925_v37  ;;  %v4252_v38 = vmul.f32 0.6931472, %v6348_v13  ;;  %v4120_v5 = vsel %vm4117_vm7, %v4119_v26, %v4115_v45  ;;  %vm4128_vm8 = vweird.f32 %v6346_v6 }
 0x3c0   : > { %v4124_v58 = vsub.f32 1.0, %v4123_v60  ;;  %6353 = vlog2.f32 %v4226_v46  ;;  %v9438_v20 = vmul.f32 %v9272_v54, %v4120_v5  ;;  %vm4129_vm10 = vmor %vm4127_vm9, %vm4128_vm8  ;;  %v4148_v10 = vand.u32 2147483648, %v3925_v37 }
 0x3c1   : > { %4623 = vadd.xlane.f32.xlu1 %v4252_v38  ;;  %4406 = vmatmul.f32.gmra.mxu0 %v4252_v38  ;;  %v4146_v44 = vand.u32 2147483647, %v3925_v37  ;;  %vm4142_vm13 = vweird.f32 %v3925_v37 }
 0x3c2   : > { %v4125_v59 = vmul.f32 %v6346_v6, %v4124_v58  ;;  %v4195_v12 = vsub.f32 1.0, %v9438_v20  ;;  %v4149_v48 = vor.u32 1.1754944e-38, %v4148_v10 }
 0x3c3   : > { %vm4147_vm15 = vcmp.eq.f32.partialorder %v4146_v44, 8.507059e+37 }
 0x3c4   : > { %v6350_v18 = vpop.eup %6349  ;;  %v4126_v15 = vadd.f32 %v6346_v6, %v4125_v59  ;;  %v4211_v22 = vmax.f32 %v4195_v12, 1.1754944e-38  ;;  %v5685_v59 = vld [vmem:[%s8129_s25 + $0x180] sm:$0xff] }
 0x3c5   : > { %v6352_v55 = vpop.eup %6351  ;;  %v3926_v29 = vadd.f32 1.0, %v6350_v18  ;;  %4505 = vmatpush.msrb.mxu2 %v5685_v59  ;;  %5853 = vmatpush.msra.mxu3 %v5685_v59  ;;  %v9999_v59 = vld [vmem:[#allocation69_spill] sm:$0xff] }
 0x3c6   : > { %v6354_v52 = vpop.eup %6353  ;;  %v4138_v30 = vmul.f32 %v6352_v55, %v3925_v37  ;;  %v4130_v0 = vsel %vm4129_vm10, %v6346_v6, %v4126_v15  ;;  %v4227_v1 = vmin.f32 %v4211_v22, 1.0  ;;  %vm4143_vm12 = vweird.f32 %v6352_v55  ;;  %v4587_v15 = vld [vmem:[#allocation3 + $0x180] sm:$0xff] }
 0x3c7   : > { %6355 = vrcp.f32 %v3926_v29  ;;  %v4254_v14 = vmul.f32 0.6931472, %v6354_v52  ;;  %v4135_v33 = vsel %vm4132_vm11, %v4134_v9, %v4130_v0  ;;  %vm4144_vm14 = vmor %vm4142_vm13, %vm4143_vm12  ;;  %v4163_v2 = vand.u32 2147483648, %v3926_v29  ;;  %v4932_v52 = vld [vmem:[#allocation2 + $0x108] sm:$0xff]  ;;  %v4686_v0 = vld [vmem:[%s9669_s5] sm:$0xff] }
 0x3c8   : > { %v4139_v34 = vsub.f32 1.0, %v4138_v30  ;;  %v9446_v50 = vmul.f32 %v9272_v54, %v4135_v33  ;;  %6357 = vlog2.f32 %v4227_v1  ;;  %v4161_v61 = vand.u32 2147483647, %v3926_v29  ;;  %v4588_v30 = vld [vmem:[#allocation3 + $0x188] sm:$0xff]  ;;  %4881 = vmatpush.msra.mxu2 %v4686_v0  ;;  %v4691_v0 = vld [vmem:[#allocation2 + $0xa0] sm:$0xff] }
 0x3c9   : > { %4625 = vadd.xlane.f32.xlu2 %v4254_v14  ;;  %4409 = vmatmul.f32.gmra.mxu0 %v4254_v14  ;;  %vm4157_vm3 = vweird.f32 %v3926_v29  ;;  %v4164_v26 = vor.u32 1.1754944e-38, %v4163_v2  ;;  %v5799_v2 = vld [vmem:[%s9669_s5 + $0x18] sm:$0xff] }
 0x3ca   : > { %v4140_v7 = vmul.f32 %v6352_v55, %v4139_v34  ;;  %v4196_v62 = vsub.f32 1.0, %v9446_v50  ;;  %vm4162_vm5 = vcmp.eq.f32.partialorder %v4161_v61, 8.507059e+37  ;;  %v9996_v34 = vld [vmem:[#allocation64_spill] sm:$0xff]  ;;  %5159 = vmatpush.msrb.mxu3 %v5799_v2 }
 0x3cc   : > { %v4141_v24 = vadd.f32 %v6352_v55, %v4140_v7  ;;  %v4212_v42 = vmax.f32 %v4196_v62, 1.1754944e-38  ;;  %v4687_v7 = vld [vmem:[#allocation2 + $0x80] sm:$0xff]  ;;  %v4933_v62 = vld [vmem:[#allocation2 + $0x110] sm:$0xff] }
 0x3cd   : > { %v6356_v41 = vpop.eup %6355 }
 0x3ce   : > { %v4145_v36 = vsel %vm4144_vm14, %v6352_v55, %v4141_v24  ;;  %v4153_v25 = vmul.f32 %v6356_v41, %v3926_v29  ;;  %v4228_v3 = vmin.f32 %v4212_v42, 1.0  ;;  %v6358_v11 = vpop.eup %6357  ;;  %vm4158_vm2 = vweird.f32 %v6356_v41 }
 0x3cf   : > { %v4150_v21 = vsel %vm4147_vm15, %v4149_v48, %v4145_v36  ;;  %v4256_v35 = vmul.f32 0.6931472, %v6358_v11  ;;  %vm4159_vm4 = vmor %vm4157_vm3, %vm4158_vm2  ;;  %v9997_v48 = vld [vmem:[#allocation62_spill] sm:$0xff] }
 0x3d0   : > { %v4154_v28 = vsub.f32 1.0, %v4153_v25  ;;  %6359 = vlog2.f32 %v4228_v3  ;;  %v9451_v49 = vmul.f32 %v9272_v54, %v4150_v21  ;;  %v4688_v25 = vld [vmem:[#allocation2 + $0x88] sm:$0xff]  ;;  %v4934_v21 = vld [vmem:[#allocation2 + $0x118] sm:$0xff] }
 0x3d1   : > { %4627 = vadd.xlane.f32.xlu0 %v4256_v35  ;;  %4412 = vmatmul.f32.gmra.mxu0 %v4256_v35  ;;  %v4590_v35 = vld [vmem:[#allocation3 + $0x198] sm:$0xff] }
 0x3d2   : > { %v4155_v53 = vmul.f32 %v6356_v41, %v4154_v28  ;;  %v4197_v39 = vsub.f32 1.0, %v9451_v49 }
 0x3d4   : > { %v4213_v6 = vmax.f32 %v4197_v39, 1.1754944e-38  ;;  %v4156_v37 = vadd.f32 %v6356_v41, %v4155_v53 }
 0x3d6   : > { %v6360_v13 = vpop.eup %6359  ;;  %v4229_v60 = vmin.f32 %v4213_v6, 1.0  ;;  %v4160_v46 = vsel %vm4159_vm4, %v6356_v41, %v4156_v37  ;;  %v9998_v6 = vld [vmem:[#allocation66_spill] sm:$0xff] }
 0x3d7   : > { %v4258_v45 = vmul.f32 0.6931472, %v6360_v13  ;;  %v4165_v58 = vsel %vm4162_vm5, %v4164_v26, %v4160_v46  ;;  %v4689_v26 = vld [vmem:[#allocation2 + $0x90] sm:$0xff]  ;;  %v4591_v46 = vld [vmem:[#allocation3 + $0x1a0] sm:$0xff] }
 0x3d8   : > { %6361 = vlog2.f32 %v4229_v60  ;;  %v9455_v38 = vmul.f32 %v9272_v54, %v4165_v58  ;;  %v4931_v54 = vld [vmem:[#allocation2 + $0x100] sm:$0xff] }
 0x3d9   : > { %4629 = vadd.xlane.f32.xlu1 %v4258_v45  ;;  %4415 = vmatmul.f32.gmra.mxu0 %v4258_v45  ;;  %v4935_v60 = vld [vmem:[#allocation2 + $0x120] sm:$0xff] }
 0x3da   : > { %v4198_v5 = vsub.f32 1.0, %v9455_v38 }
 0x3dc   : > { %v4214_v19 = vmax.f32 %v4198_v5, 1.1754944e-38 }
 0x3de   : > { %v6362_v40 = vpop.eup %6361  ;;  %v4230_v12 = vmin.f32 %v4214_v19, 1.0 }
 0x3df   : > { %v4260_v18 = vmul.f32 0.6931472, %v6362_v40  ;;  %v4690_v40 = vld [vmem:[#allocation2 + $0x98] sm:$0xff] }
 0x3e0   : > { %6363 = vlog2.f32 %v4230_v12 }
 0x3e1   : > { %4418 = vmatmul.f32.vlgmr.msrb.gmra.mxu1 %v4260_v18  ;;  %4631 = vadd.xlane.f32.xlu2 %v4260_v18 }
 0x3e2   : > { %5783 = vmatmul.msk.f32.vlgmr.msrb.gmra.mxu0 %vm454_vm1, %v4931_v54  ;;  %v4936_v54 = vld [vmem:[#allocation2 + $0x128] sm:$0xff] }
 0x3e4   : > { %v4604_v55 = vpop.xlane.xlu0 %4603 }
 0x3e5   : > { %v4635_v29 = vadd.f32 %v4604_v55, %v4587_v15  ;;  %v4670_v55 = vld [vmem:[#allocation2] sm:$0xff] }
 0x3e6   : > { %v6364_v22 = vpop.eup %6363 }
 0x3e7   : > { %4651 = vst.msk [vmem:[#allocation3 + $0x180] sm:$0xff] %vm519_vm0, %v4635_v29  ;;  %v4262_v9 = vmul.f32 0.6931472, %v6364_v22 }
 0x3e9   : > { %4421 = vmatmul.f32.gmra.mxu1 %v4262_v9  ;;  %4633 = vadd.xlane.f32.xlu0 %v4262_v9 }
 0x3ea   : > { %5784 = vmatmul.msk.f32.gmra.mxu0 %vm454_vm1, %v4932_v52  ;;  %v10000_v52 = vld [vmem:[#allocation67_spill] sm:$0xff] }
 0x3ec   : > { %v4606_v14 = vpop.xlane.xlu1 %4605 }
 0x3ed   : > { %v4636_v1 = vadd.f32 %v4606_v14, %v4588_v30 }
 0x3ee   : > { %v4377_v33 = vpop.f32.mrf.mxu0 }
 0x3ef   : > { %4652 = vst.msk [vmem:[#allocation3 + $0x188] sm:$0xff] %vm519_vm0, %v4636_v1  ;;  %v4378_v10 = vadd.f32 %v4377_v33, %v9996_v34  ;;  %v4593_v33 = vld [vmem:[#allocation3 + $0x1b0] sm:$0xff] }
 0x3f1   : > { %v4425_v44 = vmul.f32 1.442695, %v4378_v10  ;;  %5750 = vmatmul.msk.f32.vlgmr.msra.gmra.mxu1 %vm454_vm1, %v4687_v7  ;;  %v4671_v10 = vld [vmem:[#allocation2 + $0x8] sm:$0xff] }
 0x3f2   : > { %5785 = vmatmul.msk.f32.gmra.mxu0 %vm454_vm1, %v4933_v62 }
 0x3f3   : > { %6365 = vpow2.f32 %v4425_v44 }
 0x3f4   : > { %v4608_v24 = vpop.xlane.xlu2 %4607 }
 0x3f5   : > { %v4637_v42 = vadd.f32 %v4608_v24, %v4589_v47  ;;  %v10001_v47 = vld [vmem:[#allocation70_spill] sm:$0xff] }
 0x3f6   : > { %v4380_v41 = vpop.f32.mrf.mxu0 }
 0x3f7   : > { %4653 = vst.msk [vmem:[#allocation3 + $0x190] sm:$0xff] %vm519_vm0, %v4637_v42  ;;  %v4381_v36 = vadd.f32 %v4380_v41, %v9997_v48  ;;  %v4692_v42 = vld [vmem:[#allocation2 + $0xa8] sm:$0xff] }
 0x3f9   : > { %v6366_v3 = vpop.eup %6365  ;;  %v4427_v11 = vmul.f32 1.442695, %v4381_v36  ;;  %5751 = vmatmul.msk.f32.gmra.mxu1 %vm454_vm1, %v4688_v25  ;;  %v4938_v36 = vld [vmem:[#allocation2 + $0x138] sm:$0xff] }
 0x3fa   : > { %v4457_v28 = vmul.f32 %v6366_v3, %v9275_v8  ;;  %5786 = vmatmul.msk.f32.gmra.mxu0 %vm454_vm1, %v4934_v21  ;;  %v4672_v3 = vld [vmem:[#allocation2 + $0x10] sm:$0xff] }
 0x3fb   : > { %6367 = vpow2.f32 %v4427_v11 }
 0x3fc   : > { %v4610_v53 = vpop.xlane.xlu0 %4609  ;;  %4506 = vmatmul.f32.vlgmr.msrb.gmra.mxu2 %v4457_v28 }
 0x3fd   : > { %v4638_v39 = vadd.f32 %v4610_v53, %v4590_v35  ;;  %v10002_v35 = vld [vmem:[#allocation73_spill] sm:$0xff]  ;;  %v4693_v53 = vld [vmem:[#allocation2 + $0xb0] sm:$0xff] }
 0x3fe   : > { %v4383_v61 = vpop.f32.mrf.mxu0 }
 0x3ff   : > { %4654 = vst.msk [vmem:[#allocation3 + $0x198] sm:$0xff] %vm519_vm0, %v4638_v39  ;;  %v4384_v37 = vadd.f32 %v4383_v61, %v9998_v6  ;;  %v4939_v6 = vld [vmem:[#allocation2 + $0x140] sm:$0xff] }
 0x401   : > { %v6368_v13 = vpop.eup %6367  ;;  %v4429_v8 = vmul.f32 1.442695, %v4384_v37  ;;  %5752 = vmatmul.msk.f32.gmra.mxu1 %vm454_vm1, %v4689_v26  ;;  %v4673_v26 = vld [vmem:[#allocation2 + $0x18] sm:$0xff] }
 0x402   : > { %5787 = vmatmul.msk.f32.gmra.mxu0 %vm454_vm1, %v4935_v60  ;;  %v4458_v45 = vmul.f32 %v6368_v13, %v9285_v63  ;;  %v4592_v63 = vld [vmem:[#allocation3 + $0x1a8] sm:$0xff] }
 0x403   : > { %6369 = vpow2.f32 %v4429_v8 }
 0x404   : > { %v4612_v58 = vpop.xlane.xlu1 %4611  ;;  %4509 = vmatmul.f32.gmra.mxu2 %v4458_v45 }
 0x405   : > { %v4639_v5 = vadd.f32 %v4612_v58, %v4591_v46  ;;  %v10003_v46 = vld [vmem:[#allocation71_spill] sm:$0xff]  ;;  %v4694_v58 = vld [vmem:[#allocation2 + $0xb8] sm:$0xff] }
 0x406   : > { %v4386_v17 = vpop.f32.mrf.mxu0 }
 0x407   : > { %4655 = vst.msk [vmem:[#allocation3 + $0x1a0] sm:$0xff] %vm519_vm0, %v4639_v5  ;;  %v4387_v19 = vadd.f32 %v4386_v17, %v9999_v59  ;;  %v4940_v59 = vld [vmem:[#allocation2 + $0x148] sm:$0xff] }
 0x409   : > { %v6370_v12 = vpop.eup %6369  ;;  %v4431_v18 = vmul.f32 1.442695, %v4387_v19  ;;  %5753 = vmatmul.msk.f32.gmra.mxu1 %vm454_vm1, %v4690_v40  ;;  %v4674_v40 = vld [vmem:[#allocation2 + $0x20] sm:$0xff] }
 0x40a   : > { %v4459_v15 = vmul.f32 %v6370_v12, %v9299_v4  ;;  %5788 = vmatmul.msk.f32.gmra.mxu0 %vm454_vm1, %v4936_v54  ;;  %v4937_v4 = vld [vmem:[#allocation2 + $0x130] sm:$0xff] }
 0x40b   : > { %6371 = vpow2.f32 %v4431_v18 }
 0x40c   : > { %v4614_v29 = vpop.xlane.xlu2 %4613  ;;  %4512 = vmatmul.f32.vlgmr.msra.gmra.mxu3 %v4459_v15  ;;  %5766 = vmatmul.msk.f32.vlgmr.msra.gmra.mxu2 %vm454_vm1, %v4670_v55  ;;  %v10004_v15 = vld [vmem:[#allocation75_spill] sm:$0xff]  ;;  %v4695_v55 = vld [vmem:[#allocation2 + $0xc0] sm:$0xff] }
 0x40d   : > { %v4640_v22 = vadd.f32 %v4614_v29, %v4592_v63 }
 0x40e   : > { %v4389_v9 = vpop.f32.mrf.mxu0 }
 0x40f   : > { %4656 = vst.msk [vmem:[#allocation3 + $0x1a8] sm:$0xff] %vm519_vm0, %v4640_v22  ;;  %v4390_v30 = vadd.f32 %v4389_v9, %v10000_v52  ;;  %v4941_v9 = vld [vmem:[#allocation2 + $0x150] sm:$0xff] }
 0x410   : > { %v4597_v52 = vld [vmem:[#allocation3 + $0x1d0] sm:$0xff] }
 0x411   : > { %v6372_v14 = vpop.eup %6371  ;;  %v4433_v1 = vmul.f32 1.442695, %v4390_v30  ;;  %5754 = vmatmul.msk.f32.gmra.mxu1 %vm454_vm1, %v4691_v0  ;;  %v4675_v30 = vld [vmem:[#allocation2 + $0x28] sm:$0xff] }
 0x412   : > { %5789 = vmatmul.msk.f32.gmra.mxu0 %vm454_vm1, %v4937_v4  ;;  %v4460_v34 = vmul.f32 %v6372_v14, %v9313_v43  ;;  %v4594_v43 = vld [vmem:[#allocation3 + $0x1b8] sm:$0xff]  ;;  %v10005_v4 = vld [vmem:[#allocation78_spill] sm:$0xff] }
 0x413   : > { %6373 = vpow2.f32 %v4433_v1 }
 0x414   : > { %v4616_v7 = vpop.xlane.xlu0 %4615  ;;  %4515 = vmatmul.f32.gmra.mxu3 %v4460_v34  ;;  %5767 = vmatmul.msk.f32.gmra.mxu2 %vm454_vm1, %v4671_v10  ;;  %v4696_v34 = vld [vmem:[#allocation2 + $0xc8] sm:$0xff] }
 0x415   : > { %v4641_v44 = vadd.f32 %v4616_v7, %v4593_v33 }
 0x416   : > { %v4392_v62 = vpop.f32.mrf.mxu0 }
 0x417   : > { %4657 = vst.msk [vmem:[#allocation3 + $0x1b0] sm:$0xff] %vm519_vm0, %v4641_v44  ;;  %v4393_v24 = vadd.f32 %v4392_v62, %v10001_v47  ;;  %v4942_v44 = vld [vmem:[#allocation2 + $0x158] sm:$0xff]  ;;  %v4676_v47 = vld [vmem:[#allocation2 + $0x30] sm:$0xff] }
 0x419   : > { %v6374_v41 = vpop.eup %6373  ;;  %v4435_v48 = vmul.f32 1.442695, %v4393_v24  ;;  %5755 = vmatmul.msk.f32.gmra.mxu1 %vm454_vm1, %v4692_v42 }
 0x41a   : > { %5790 = vmatmul.msk.f32.gmra.mxu0 %vm454_vm1, %v4938_v36  ;;  %v4461_v25 = vmul.f32 %v6374_v41, %v9327_v31  ;;  %v4595_v31 = vld [vmem:[#allocation3 + $0x1c0] sm:$0xff] }
 0x41b   : > { %6375 = vpow2.f32 %v4435_v48  ;;  %v10006_v48 = vld [vmem:[#allocation76_spill] sm:$0xff] }
 0x41c   : > { %v4618_v11 = vpop.xlane.xlu1 %4617  ;;  %4518 = vmatmul.f32.gmra.mxu3 %v4461_v25  ;;  %5768 = vmatmul.msk.f32.gmra.mxu2 %vm454_vm1, %v4672_v3  ;;  %v4943_v3 = vld [vmem:[#allocation2 + $0x160] sm:$0xff] }
 0x41d   : > { %v4642_v21 = vadd.f32 %v4618_v11, %v4594_v43  ;;  %v4697_v43 = vld [vmem:[#allocation2 + $0xd0] sm:$0xff] }
 0x41e   : > { %v4395_v28 = vpop.f32.mrf.mxu0 }
 0x41f   : > { %4658 = vst.msk [vmem:[#allocation3 + $0x1b8] sm:$0xff] %vm519_vm0, %v4642_v21  ;;  %v4396_v2 = vadd.f32 %v4395_v28, %v10002_v35  ;;  %v4599_v21 = vld [vmem:[#allocation3 + $0x1e0] sm:$0xff]  ;;  %v4677_v28 = vld [vmem:[#allocation2 + $0x38] sm:$0xff] }
 0x421   : > { %v6376_v39 = vpop.eup %6375  ;;  %v4437_v61 = vmul.f32 1.442695, %v4396_v2  ;;  %5756 = vmatmul.msk.f32.gmra.mxu1 %vm454_vm1, %v4693_v53 }
 0x422   : > { %5791 = vmatmul.msk.f32.gmra.mxu0 %vm454_vm1, %v4939_v6  ;;  %v4462_v37 = vmul.f32 %v6376_v39, %v9341_v57  ;;  %v4596_v57 = vld [vmem:[#allocation3 + $0x1c8] sm:$0xff]  ;;  %v10007_v39 = vld [vmem:[#allocation79_spill] sm:$0xff]  ;;  %v4698_v6 = vld [vmem:[#allocation2 + $0xd8] sm:$0xff] }
 0x423   : > { %6377 = vpow2.f32 %v4437_v61 }
 0x424   : > { %v4620_v13 = vpop.xlane.xlu2 %4619  ;;  %4521 = vmatmul.f32.gmra.mxu3 %v4462_v37  ;;  %5769 = vmatmul.msk.f32.gmra.mxu2 %vm454_vm1, %v4673_v26 }
 0x425   : > { %v4643_v8 = vadd.f32 %v4620_v13, %v4595_v31  ;;  %v4944_v31 = vld [vmem:[#allocation2 + $0x168] sm:$0xff] }
 0x426   : > { %v4398_v60 = vpop.f32.mrf.mxu0 }
 0x427   : > { %4659 = vst.msk [vmem:[#allocation3 + $0x1c0] sm:$0xff] %vm519_vm0, %v4643_v8  ;;  %v4399_v45 = vadd.f32 %v4398_v60, %v10003_v46  ;;  %v4678_v8 = vld [vmem:[#allocation2 + $0x40] sm:$0xff] }
 0x429   : > { %v6378_v5 = vpop.eup %6377  ;;  %v4439_v17 = vmul.f32 1.442695, %v4399_v45  ;;  %5757 = vmatmul.msk.f32.gmra.mxu1 %vm454_vm1, %v4694_v58  ;;  %v10008_v58 = vld [vmem:[#allocation82_spill] sm:$0xff] }
 0x42a   : > { %5792 = vmatmul.msk.f32.gmra.mxu0 %vm454_vm1, %v4940_v59  ;;  %v4463_v19 = vmul.f32 %v6378_v5, %v9355_v56  ;;  %v4945_v59 = vld [vmem:[#allocation2 + $0x170] sm:$0xff] }
 0x42b   : > { %6379 = vpow2.f32 %v4439_v17  ;;  %v4699_v17 = vld [vmem:[#allocation2 + $0xe0] sm:$0xff] }
 0x42c   : > { %v4622_v12 = vpop.xlane.xlu0 %4621  ;;  %4524 = vmatmul.f32.gmra.mxu3 %v4463_v19  ;;  %5770 = vmatmul.msk.f32.gmra.mxu2 %vm454_vm1, %v4674_v40 }
 0x42d   : > { %v4644_v18 = vadd.f32 %v4622_v12, %v4596_v57  ;;  %v4679_v12 = vld [vmem:[#allocation2 + $0x48] sm:$0xff] }
 0x42e   : > { %v4401_v54 = vpop.f32.mrf.mxu0 }
 0x42f   : > { %4660 = vst.msk [vmem:[#allocation3 + $0x1c8] sm:$0xff] %vm519_vm0, %v4644_v18  ;;  %v4402_v63 = vadd.f32 %v4401_v54, %v10004_v15 }
 0x431   : > { %v6380_v29 = vpop.eup %6379  ;;  %v4441_v22 = vmul.f32 1.442695, %v4402_v63  ;;  %5758 = vmatmul.msk.f32.gmra.mxu1 %vm454_vm1, %v4695_v55  ;;  %v10009_v63 = vld [vmem:[#allocation81_spill] sm:$0xff] }
 0x432   : > { %5793 = vmatmul.msk.f32.gmra.mxu0 %vm454_vm1, %v4941_v9  ;;  %v4464_v56 = vmul.f32 %v6380_v29, %v9369_v23  ;;  %v4598_v23 = vld [vmem:[#allocation3 + $0x1d8] sm:$0xff]  ;;  %v4700_v29 = vld [vmem:[#allocation2 + $0xe8] sm:$0xff] }
 0x433   : > { %6381 = vpow2.f32 %v4441_v22  ;;  %v4946_v22 = vld [vmem:[#allocation2 + $0x178] sm:$0xff] }
 0x434   : > { %4527 = vmatmul.f32.gmra.mxu3 %v4464_v56  ;;  %5771 = vmatmul.msk.f32.gmra.mxu2 %vm454_vm1, %v4675_v30  ;;  %v4624_v0 = vpop.xlane.xlu1 %4623  ;;  %v4680_v30 = vld [vmem:[#allocation2 + $0x50] sm:$0xff] }
 0x435   : > { %v4645_v14 = vadd.f32 %v4624_v0, %v4597_v52 }
 0x436   : > { %v4404_v1 = vpop.f32.mrf.mxu0 }
 0x437   : > { %v4405_v33 = vadd.f32 %v4404_v1, %v10005_v4  ;;  %4661 = vst.msk [vmem:[#allocation3 + $0x1d0] sm:$0xff] %vm519_vm0, %v4645_v14  ;;  %v10010_v4 = vld [vmem:[#allocation83_spill] sm:$0xff] }
 0x439   : > { %v6382_v10 = vpop.eup %6381  ;;  %v4443_v7 = vmul.f32 1.442695, %v4405_v33  ;;  %5759 = vmatmul.msk.f32.gmra.mxu1 %vm454_vm1, %v4696_v34  ;;  %v4701_v34 = vld [vmem:[#allocation2 + $0xf0] sm:$0xff] }
 0x43a   : > { %5794 = vmatmul.msk.f32.gmra.mxu0 %vm454_vm1, %v4942_v44  ;;  %v4465_v62 = vmul.f32 %v6382_v10, %v9383_v32  ;;  %v4681_v44 = vld [vmem:[#allocation2 + $0x58] sm:$0xff] }
 0x43b   : > { %6383 = vpow2.f32 %v4443_v7 }
 0x43c   : > { %v4626_v24 = vpop.xlane.xlu2 %4625  ;;  %4530 = vmatmul.f32.gmra.mxu3 %v4465_v62  ;;  %5772 = vmatmul.msk.f32.gmra.mxu2 %vm454_vm1, %v4676_v47  ;;  %v10011_v62 = vld [vmem:[#allocation86_spill] sm:$0xff] }
 0x43d   : > { %v4646_v42 = vadd.f32 %v4626_v24, %v4598_v23  ;;  %v4702_v24 = vld [vmem:[#allocation2 + $0xf8] sm:$0xff] }
 0x43e   : > { %v4407_v41 = vpop.f32.mrf.mxu0 }
 0x43f   : > { %4662 = vst.msk [vmem:[#allocation3 + $0x1d8] sm:$0xff] %vm519_vm0, %v4646_v42  ;;  %v4408_v36 = vadd.f32 %v4407_v41, %v10006_v48 }
 0x441   : > { %v6384_v25 = vpop.eup %6383  ;;  %5760 = vmatmul.msk.f32.gmra.mxu1 %vm454_vm1, %v4697_v43  ;;  %v4445_v11 = vmul.f32 1.442695, %v4408_v36  ;;  %v4682_v36 = vld [vmem:[#allocation2 + $0x60] sm:$0xff] }
 0x442   : > { %5795 = vmatmul.msk.f32.gmra.mxu0 %vm454_vm1, %v4943_v3  ;;  %v4466_v32 = vmul.f32 %v6384_v25, %v9395_v27  ;;  %v4600_v27 = vld [vmem:[#allocation3 + $0x1e8] sm:$0xff]  ;;  %v4684_v3 = vld [vmem:[#allocation2 + $0x70] sm:$0xff] }
 0x443   : > { %6385 = vpow2.f32 %v4445_v11  ;;  %v4683_v25 = vld [vmem:[#allocation2 + $0x68] sm:$0xff]  ;;  %v4474_v11 = vld [vmem:[#allocation2 + $0x180] sm:$0xff] }
 0x444   : > { %4533 = vmatmul.f32.gmra.mxu3 %v4466_v32  ;;  %5773 = vmatmul.msk.f32.gmra.mxu2 %vm454_vm1, %v4677_v28  ;;  %v4628_v35 = vpop.xlane.xlu0 %4627  ;;  %v4475_v28 = vld [vmem:[#allocation2 + $0x188] sm:$0xff] }
 0x445   : > { %v4647_v2 = vadd.f32 %v4628_v35, %v4599_v21 }
 0x446   : > { %v4410_v53 = vpop.f32.mrf.mxu0 }
 0x447   : > { %4663 = vst.msk [vmem:[#allocation3 + $0x1e0] sm:$0xff] %vm519_vm0, %v4647_v2  ;;  %v4411_v61 = vadd.f32 %v4410_v53, %v10007_v39 }
 0x449   : > { %5761 = vmatmul.msk.f32.gmra.mxu1 %vm454_vm1, %v4698_v6  ;;  %v6386_v37 = vpop.eup %6385  ;;  %v4447_v26 = vmul.f32 1.442695, %v4411_v61 }
 0x44a   : > { %5796 = vmatmul.msk.f32.gmra.mxu0 %vm454_vm1, %v4944_v31  ;;  %v4467_v13 = vmul.f32 %v6386_v37, %v9408_v16  ;;  %v4601_v16 = vld [vmem:[#allocation3 + $0x1f0] sm:$0xff]  ;;  %v4477_v31 = vld [vmem:[#allocation2 + $0x198] sm:$0xff] }
 0x44b   : > { %6387 = vpow2.f32 %v4447_v26 }
 0x44c   : > { %v4630_v60 = vpop.xlane.xlu1 %4629  ;;  %5774 = vmatmul.msk.f32.gmra.mxu2 %vm454_vm1, %v4678_v8  ;;  %4536 = vmatmul.f32.gmra.mxu3 %v4467_v13  ;;  %v4478_v13 = vld [vmem:[#allocation2 + $0x1a0] sm:$0xff] }
 0x44d   : > { %v4648_v46 = vadd.f32 %v4630_v60, %v4600_v27 }
 0x44e   : > { %v4413_v45 = vpop.f32.mrf.mxu0 }
 0x44f   : > { %4664 = vst.msk [vmem:[#allocation3 + $0x1e8] sm:$0xff] %vm519_vm0, %v4648_v46  ;;  %v4414_v5 = vadd.f32 %v4413_v45, %v10008_v58  ;;  %v4479_v45 = vld [vmem:[#allocation2 + $0x1a8] sm:$0xff] }
 0x451   : > { %5762 = vmatmul.msk.f32.gmra.mxu1 %vm454_vm1, %v4699_v17  ;;  %v6388_v57 = vpop.eup %6387  ;;  %v4449_v19 = vmul.f32 1.442695, %v4414_v5 }
 0x452   : > { %5797 = vmatmul.msk.f32.gmra.mxu0 %vm454_vm1, %v4945_v59  ;;  %v4468_v40 = vmul.f32 %v6388_v57, %v9424_v51  ;;  %v4602_v51 = vld [vmem:[#allocation3 + $0x1f8] sm:$0xff]  ;;  %v4480_v59 = vld [vmem:[#allocation2 + $0x1b0] sm:$0xff] }
 0x453   : > { %6389 = vpow2.f32 %v4449_v19 }
 0x454   : > { %v4632_v18 = vpop.xlane.xlu2 %4631  ;;  %5775 = vmatmul.msk.f32.gmra.mxu2 %vm454_vm1, %v4679_v12  ;;  %4539 = vmatmul.f32.gmra.mxu3 %v4468_v40  ;;  %v4481_v40 = vld [vmem:[#allocation2 + $0x1b8] sm:$0xff] }
 0x455   : > { %v4649_v54 = vadd.f32 %v4632_v18, %v4601_v16 }
 0x456   : > { %v4416_v15 = vpop.f32.mrf.mxu0 }
 0x457   : > { %4665 = vst.msk [vmem:[#allocation3 + $0x1f0] sm:$0xff] %vm519_vm0, %v4649_v54  ;;  %v4417_v55 = vadd.f32 %v4416_v15, %v10009_v63  ;;  %v4482_v15 = vld [vmem:[#allocation2 + $0x1c0] sm:$0xff] }
 0x459   : > { %5763 = vmatmul.msk.f32.gmra.mxu1 %vm454_vm1, %v4700_v29  ;;  %v6390_v9 = vpop.eup %6389  ;;  %v4451_v56 = vmul.f32 1.442695, %v4417_v55 }
 0x45a   : > { %5798 = vmatmul.msk.f32.gmra.mxu0 %vm454_vm1, %v4946_v22  ;;  %v4469_v52 = vmul.f32 %v6390_v9, %v9438_v20  ;;  %v4483_v22 = vld [vmem:[#allocation2 + $0x1c8] sm:$0xff] }
 0x45b   : > { %6391 = vpow2.f32 %v4451_v56 }
 0x45c   : > { %v4634_v0 = vpop.xlane.xlu0 %4633  ;;  %5776 = vmatmul.msk.f32.gmra.mxu2 %vm454_vm1, %v4680_v30  ;;  %4542 = vmatmul.f32.gmra.mxu3 %v4469_v52  ;;  %v4484_v52 = vld [vmem:[#allocation2 + $0x1d0] sm:$0xff] }
 0x45d   : > { %v4650_v14 = vadd.f32 %v4634_v0, %v4602_v51 }
 0x45e   : > { %v4419_v1 = vpop.f32.mrf.mxu1 }
 0x45f   : > { %4666 = vst.msk [vmem:[#allocation3 + $0x1f8] sm:$0xff] %vm519_vm0, %v4650_v14  ;;  %v4420_v33 = vadd.f32 %v4419_v1, %v10010_v4  ;;  %v4485_v1 = vld [vmem:[#allocation2 + $0x1d8] sm:$0xff]  ;;  %vm5245_vm0 = vcmask 261120  }
 0x461   : > { %v4453_v10 = vmul.f32 1.442695, %v4420_v33  ;;  %5764 = vmatmul.msk.f32.gmra.mxu1 %vm454_vm1, %v4701_v34  ;;  %v6392_v7 = vpop.eup %6391 }
 0x462   : > { %v4470_v20 = vmul.f32 %v6392_v7, %v9446_v50 }
 0x463   : > { %6393 = vpow2.f32 %v4453_v10  ;;  %v4486_v10 = vld [vmem:[#allocation2 + $0x1e0] sm:$0xff] }
 0x464   : > { %5777 = vmatmul.msk.f32.gmra.mxu2 %vm454_vm1, %v4681_v44  ;;  %4545 = vmatmul.f32.gmra.mxu3 %v4470_v20 }
 0x466   : > { %v4422_v23 = vpop.f32.mrf.mxu1 }
 0x467   : > { %v4423_v47 = vadd.f32 %v4422_v23, %v10011_v62  ;;  %v4487_v23 = vld [vmem:[#allocation2 + $0x1e8] sm:$0xff] }
 0x469   : > { %v6394_v42 = vpop.eup %6393  ;;  %v4455_v41 = vmul.f32 1.442695, %v4423_v47  ;;  %5765 = vmatmul.msk.f32.gmra.mxu1 %vm454_vm1, %v4702_v24 }
 0x46a   : > { %v4471_v48 = vmul.f32 %v6394_v42, %v9451_v49  ;;  %v4685_v49 = vld [vmem:[#allocation2 + $0x78] sm:$0xff] }
 0x46b   : > { %6395 = vpow2.f32 %v4455_v41 }
 0x46c   : > { %5778 = vmatmul.msk.f32.gmra.mxu2 %vm454_vm1, %v4682_v36  ;;  %4548 = vmatmul.f32.gmra.mxu3 %v4471_v48  ;;  %v5014_v48 = vpop.f32.mrf.mxu0  ;;  %v4488_v36 = vld [vmem:[#allocation2 + $0x1f0] sm:$0xff] }
 0x46e   : > { %v4770_v42 = vpop.f32.mrf.mxu1 }
 0x471   : > { %v6396_v50 = vpop.eup %6395 }
 0x472   : > { %v4472_v43 = vmul.f32 %v6396_v50, %v9455_v38  ;;  %v4476_v38 = vld [vmem:[#allocation2 + $0x190] sm:$0xff] }
 0x474   : > { %5779 = vmatmul.msk.f32.gmra.mxu2 %vm454_vm1, %v4683_v25  ;;  %4551 = vmatmul.f32.gmra.mxu3 %v4472_v43 }
 0x47c   : > { %5780 = vmatmul.msk.f32.gmra.mxu2 %vm454_vm1, %v4684_v3 }
 0x47f   : > { %v4507_v32 = vpop.f32.mrf.mxu2 }
 0x480   : > { %v4555_v21 = vadd.f32 %v4507_v32, %v4474_v11  ;;  %v4773_v11 = vpop.f32.mrf.mxu1  ;;  %v4489_v32 = vld [vmem:[#allocation2 + $0x1f8] sm:$0xff] }
 0x482   : > { %4571 = vst.msk [vmem:[#allocation2 + $0x180] sm:$0xff] %vm454_vm1, %v4555_v21  ;;  %v5017_v21 = vpop.f32.mrf.mxu0 }
 0x484   : > { %5781 = vmatmul.msk.f32.gmra.mxu2 %vm454_vm1, %v4685_v49 }
 0x487   : > { %v4510_v35 = vpop.f32.mrf.mxu2 }
 0x488   : > { %v4556_v2 = vadd.f32 %v4510_v35, %v4475_v28 }
 0x489   : > { %v5078_v53 = vld [vmem:[#allocation2 + $0x180] sm:$0xff] }
 0x48a   : > { %4572 = vst.msk [vmem:[#allocation2 + $0x188] sm:$0xff] %vm454_vm1, %v4556_v2  ;;  %5800 = vmatmul.msk.f32.vlgmr.msrb.gmra.mxu3 %vm454_vm1, %v5078_v53  ;;  %v4776_v53 = vpop.f32.mrf.mxu1 }
 0x48f   : > { %v4513_v39 = vpop.f32.mrf.mxu3  ;;  %v4883_v62 = vpop.f32.mrf.mxu2 }
 0x490   : > { %v4557_v61 = vadd.f32 %v4513_v39, %v4476_v38  ;;  %v5020_v38 = vpop.f32.mrf.mxu0 }
 0x491   : > { %v5079_v6 = vld [vmem:[#allocation2 + $0x188] sm:$0xff] }
 0x492   : > { %4573 = vst.msk [vmem:[#allocation2 + $0x190] sm:$0xff] %vm454_vm1, %v4557_v61  ;;  %5801 = vmatmul.msk.f32.gmra.mxu3 %vm454_vm1, %v5079_v6  ;;  %v4779_v6 = vpop.f32.mrf.mxu1 }
 0x497   : > { %v4516_v37 = vpop.f32.mrf.mxu3  ;;  %v4886_v25 = vpop.f32.mrf.mxu2 }
 0x498   : > { %v4558_v26 = vadd.f32 %v4516_v37, %v4477_v31  ;;  %v4884_v31 = vadd.f32 %v4883_v62, %v4770_v42  ;;  %v5023_v37 = vpop.f32.mrf.mxu0 }
 0x499   : > { %v5080_v27 = vld [vmem:[#allocation2 + $0x190] sm:$0xff] }
 0x49a   : > { %4574 = vst.msk [vmem:[#allocation2 + $0x198] sm:$0xff] %vm454_vm1, %v4558_v26  ;;  %5802 = vmatmul.msk.f32.gmra.mxu3 %vm454_vm1, %v5080_v27  ;;  %v5062_v26 = vadd.f32 %v5014_v48, %v4884_v31  ;;  %v9600_v27 = vld [vmem:[%s9670_s6] ss:$0 sm:$0xff] }
 0x49f   : > { %v4519_v8 = vpop.f32.mrf.mxu3  ;;  %v4889_v2 = vpop.f32.mrf.mxu2 }
 0x4a0   : > { %v4559_v60 = vadd.f32 %v4519_v8, %v4478_v13 }
 0x4a1   : > { %v5081_v46 = vld [vmem:[#allocation2 + $0x198] sm:$0xff] }
 0x4a2   : > { %4575 = vst.msk [vmem:[#allocation2 + $0x1a0] sm:$0xff] %vm454_vm1, %v4559_v60  ;;  %5803 = vmatmul.msk.f32.gmra.mxu3 %vm454_vm1, %v5081_v46  ;;  %v4887_v60 = vadd.f32 %v4886_v25, %v4773_v11 }
 0x4a7   : > { %v4522_v58 = vpop.f32.mrf.mxu3  ;;  %v4892_v61 = vpop.f32.mrf.mxu2 }
 0x4a8   : > { %v4560_v5 = vadd.f32 %v4522_v58, %v4479_v45  ;;  %v4782_v58 = vpop.f32.mrf.mxu1 }
 0x4a9   : > { %v5082_v17 = vld [vmem:[#allocation2 + $0x1a0] sm:$0xff] }
 0x4aa   : > { %4576 = vst.msk [vmem:[#allocation2 + $0x1a8] sm:$0xff] %vm454_vm1, %v4560_v5  ;;  %5804 = vmatmul.msk.f32.gmra.mxu3 %vm454_vm1, %v5082_v17  ;;  %v5063_v5 = vadd.f32 %v5017_v21, %v4887_v60 }
 0x4af   : > { %v4525_v57 = vpop.f32.mrf.mxu3  ;;  %v4895_v46 = vpop.f32.mrf.mxu2 }
 0x4b0   : > { %v4561_v19 = vadd.f32 %v4525_v57, %v4480_v59  ;;  %v5026_v59 = vpop.f32.mrf.mxu0 }
 0x4b1   : > { %v5083_v16 = vld [vmem:[#allocation2 + $0x1a8] sm:$0xff] }
 0x4b2   : > { %4577 = vst.msk [vmem:[#allocation2 + $0x1b0] sm:$0xff] %vm454_vm1, %v4561_v19  ;;  %5805 = vmatmul.msk.f32.gmra.mxu3 %vm454_vm1, %v5083_v16  ;;  %v4890_v19 = vadd.f32 %v4889_v2, %v4776_v53 }
 0x4b7   : > { %v4528_v12 = vpop.f32.mrf.mxu3 }
 0x4b8   : > { %v4562_v18 = vadd.f32 %v4528_v12, %v4481_v40  ;;  %v4898_v40 = vpop.f32.mrf.mxu2  ;;  %v4785_v12 = vpop.f32.mrf.mxu1 }
 0x4b9   : > { %v5084_v54 = vld [vmem:[#allocation2 + $0x1b0] sm:$0xff] }
 0x4ba   : > { %4578 = vst.msk [vmem:[#allocation2 + $0x1b8] sm:$0xff] %vm454_vm1, %v4562_v18  ;;  %5806 = vmatmul.msk.f32.gmra.mxu3 %vm454_vm1, %v5084_v54  ;;  %v5064_v18 = vadd.f32 %v5020_v38, %v4890_v19 }
 0x4bf   : > { %v4531_v63 = vpop.f32.mrf.mxu3 }
 0x4c0   : > { %v4563_v55 = vadd.f32 %v4531_v63, %v4482_v15  ;;  %v5029_v63 = vpop.f32.mrf.mxu0 }
 0x4c1   : > { %v5085_v29 = vld [vmem:[#allocation2 + $0x1b8] sm:$0xff] }
 0x4c2   : > { %4579 = vst.msk [vmem:[#allocation2 + $0x1c0] sm:$0xff] %vm454_vm1, %v4563_v55  ;;  %5807 = vmatmul.msk.f32.gmra.mxu3 %vm454_vm1, %v5085_v29  ;;  %v4893_v55 = vadd.f32 %v4892_v61, %v4779_v6 }
 0x4c7   : > { %v4534_v9 = vpop.f32.mrf.mxu3 }
 0x4c8   : > { %v4564_v56 = vadd.f32 %v4534_v9, %v4483_v22  ;;  %v4901_v22 = vpop.f32.mrf.mxu2  ;;  %v5065_v9 = vadd.f32 %v5023_v37, %v4893_v55 }
 0x4c9   : > { %v5086_v51 = vld [vmem:[#allocation2 + $0x1c0] sm:$0xff] }
 0x4ca   : > { %4580 = vst.msk [vmem:[#allocation2 + $0x1c8] sm:$0xff] %vm454_vm1, %v4564_v56  ;;  %5808 = vmatmul.msk.f32.gmra.mxu3 %vm454_vm1, %v5086_v51  ;;  %v4788_v51 = vpop.f32.mrf.mxu1 }
 0x4cf   : > { %v4537_v30 = vpop.f32.mrf.mxu3 }
 0x4d0   : > { %v4565_v0 = vadd.f32 %v4537_v30, %v4484_v52  ;;  %v4896_v30 = vadd.f32 %v4895_v46, %v4782_v58 }
 0x4d1   : > { %v5087_v14 = vld [vmem:[#allocation2 + $0x1c8] sm:$0xff] }
 0x4d2   : > { %5809 = vmatmul.msk.f32.gmra.mxu3 %vm454_vm1, %v5087_v14  ;;  %4581 = vst.msk [vmem:[#allocation2 + $0x1d0] sm:$0xff] %vm454_vm1, %v4565_v0  ;;  %v5032_v14 = vpop.f32.mrf.mxu0 }
 0x4d7   : > { %v4540_v4 = vpop.f32.mrf.mxu3 }
 0x4d8   : > { %v4566_v33 = vadd.f32 %v4540_v4, %v4485_v1  ;;  %v5066_v1 = vadd.f32 %v5026_v59, %v4896_v30 }
 0x4d9   : > { %v5088_v34 = vld [vmem:[#allocation2 + $0x1d0] sm:$0xff] }
 0x4da   : > { %4582 = vst.msk [vmem:[#allocation2 + $0x1d8] sm:$0xff] %vm454_vm1, %v4566_v33  ;;  %5810 = vmatmul.msk.f32.gmra.mxu3 %vm454_vm1, %v5088_v34  ;;  %v4904_v33 = vpop.f32.mrf.mxu2 }
 0x4df   : > { %v4543_v7 = vpop.f32.mrf.mxu3 }
 0x4e0   : > { %v4567_v20 = vadd.f32 %v4543_v7, %v4486_v10  ;;  %v4791_v10 = vpop.f32.mrf.mxu1  ;;  %v4899_v7 = vadd.f32 %v4898_v40, %v4785_v12 }
 0x4e1   : > { %v5089_v44 = vld [vmem:[#allocation2 + $0x1d8] sm:$0xff] }
 0x4e2   : > { %4583 = vst.msk [vmem:[#allocation2 + $0x1e0] sm:$0xff] %vm454_vm1, %v4567_v20  ;;  %5811 = vmatmul.msk.f32.gmra.mxu3 %vm454_vm1, %v5089_v44  ;;  %v5035_v44 = vpop.f32.mrf.mxu0  ;;  %v4907_v42 = vpop.f32.mrf.mxu2 }
 0x4e7   : > { %v4546_v47 = vpop.f32.mrf.mxu3 }
 0x4e8   : > { %v4568_v24 = vadd.f32 %v4546_v47, %v4487_v23  ;;  %v5067_v23 = vadd.f32 %v5029_v63, %v4899_v7  ;;  %v4794_v48 = vpop.f32.mrf.mxu1 }
 0x4e9   : > { %v5090_v41 = vld [vmem:[#allocation2 + $0x1e0] sm:$0xff]  ;;  %v4908_v53 = vadd.f32 %v4907_v42, %v4794_v48 }
 0x4ea   : > { %4584 = vst.msk [vmem:[#allocation2 + $0x1e8] sm:$0xff] %vm454_vm1, %v4568_v24  ;;  %5812 = vmatmul.msk.f32.gmra.mxu3 %vm454_vm1, %v5090_v41  ;;  %v4902_v24 = vadd.f32 %v4901_v22, %v4788_v51 }
 0x4ef   : > { %v4549_v50 = vpop.f32.mrf.mxu3 }
 0x4f0   : > { %v4569_v43 = vadd.f32 %v4549_v50, %v4488_v36  ;;  %v5068_v36 = vadd.f32 %v5032_v14, %v4902_v24  ;;  %v4797_v21 = vpop.f32.mrf.mxu1 }
 0x4f1   : > { %v5091_v3 = vld [vmem:[#allocation2 + $0x1e8] sm:$0xff] }
 0x4f2   : > { %4585 = vst.msk [vmem:[#allocation2 + $0x1f0] sm:$0xff] %vm454_vm1, %v4569_v43  ;;  %5813 = vmatmul.msk.f32.gmra.mxu3 %vm454_vm1, %v5091_v3  ;;  %v5038_v43 = vpop.f32.mrf.mxu0  ;;  %v4905_v3 = vadd.f32 %v4904_v33, %v4791_v10 }
 0x4f3   : > { %v5070_v61 = vadd.f32 %v5038_v43, %v4908_v53 }
 0x4f7   : > { %v4552_v49 = vpop.f32.mrf.mxu3 }
 0x4f8   : > { %v4570_v28 = vadd.f32 %v4552_v49, %v4489_v32  ;;  %v4910_v32 = vpop.f32.mrf.mxu2  ;;  %v5069_v49 = vadd.f32 %v5035_v44, %v4905_v3  ;;  %v4800_v31 = vpop.f32.mrf.mxu1 }
 0x4f9   : > { %v5092_v35 = vld [vmem:[#allocation2 + $0x1f0] sm:$0xff] }
 0x4fa   : > { %4586 = vst.msk [vmem:[#allocation2 + $0x1f8] sm:$0xff] %vm454_vm1, %v4570_v28  ;;  %5814 = vmatmul.msk.f32.gmra.mxu3 %vm454_vm1, %v5092_v35  ;;  %v5041_v2 = vpop.f32.mrf.mxu0 }
 0x501   : > { %v5093_v39 = vld [vmem:[#allocation2 + $0x1f8] sm:$0xff] }
 0x502   : > { %5815 = vmatmul.msk.f32.gmra.mxu3 %vm454_vm1, %v5093_v39  ;;  %v4913_v39 = vpop.f32.mrf.mxu2 }
 0x503   : > { %v4914_v59 = vadd.f32 %v4913_v39, %v4800_v31 }
 0x50d   : > { %v5161_v13 = vpop.f32.mrf.mxu3 }
 0x50e   : > { %v5209_v8 = vadd.f32 %v5161_v13, %v5062_v26  ;;  %v4911_v26 = vadd.f32 %v4910_v32, %v4797_v21 }
 0x510   : > { %v5229_v45 = vadd.f32 %v9600_v27, %v5209_v8  ;;  %v5044_v8 = vpop.f32.mrf.mxu0  ;;  %v5071_v60 = vadd.f32 %v5041_v2, %v4911_v26 }
 0x511   : > { %v5072_v19 = vadd.f32 %v5044_v8, %v4914_v59 }
 0x512   : > { %5246 = vst.msk [vmem:[%s9605_s21] sm:$0xff] %vm5245_vm0, %v5229_v45  ;;  %v4916_v45 = vpop.f32.mrf.mxu2 }
 0x515   : > { %v5164_v17 = vpop.f32.mrf.mxu3 }
 0x516   : > { %v5210_v57 = vadd.f32 %v5164_v17, %v5063_v5  ;;  %v4803_v5 = vpop.f32.mrf.mxu1 }
 0x518   : > { %v5230_v16 = vadd.f32 %v9600_v27, %v5210_v57  ;;  %v5047_v57 = vpop.f32.mrf.mxu0 }
 0x51a   : > { %5247 = vst.msk [vmem:[%s9605_s21 + $0x8] sm:$0xff] %vm5245_vm0, %v5230_v16  ;;  %v4919_v12 = vpop.f32.mrf.mxu2 }
 0x51d   : > { %v5167_v54 = vpop.f32.mrf.mxu3 }
 0x51e   : > { %v5211_v15 = vadd.f32 %v5167_v54, %v5064_v18  ;;  %v4917_v18 = vadd.f32 %v4916_v45, %v4803_v5 }
 0x520   : > { %v5231_v29 = vadd.f32 %v9600_v27, %v5211_v15  ;;  %v4806_v15 = vpop.f32.mrf.mxu1  ;;  %v5073_v63 = vadd.f32 %v5047_v57, %v4917_v18  ;;  %v5050_v55 = vpop.f32.mrf.mxu0 }
 0x522   : > { %5248 = vst.msk [vmem:[%s9605_s21 + $0x10] sm:$0xff] %vm5245_vm0, %v5231_v29  ;;  %v4922_v51 = vpop.f32.mrf.mxu2 }
 0x525   : > { %v5170_v56 = vpop.f32.mrf.mxu3 }
 0x526   : > { %v5212_v52 = vadd.f32 %v5170_v56, %v5065_v9  ;;  %v4920_v9 = vadd.f32 %v4919_v12, %v4806_v15 }
 0x528   : > { %v5232_v0 = vadd.f32 %v9600_v27, %v5212_v52  ;;  %v4809_v52 = vpop.f32.mrf.mxu1  ;;  %v5074_v30 = vadd.f32 %v5050_v55, %v4920_v9 }
 0x52a   : > { %5249 = vst.msk [vmem:[%s9605_s21 + $0x18] sm:$0xff] %vm5245_vm0, %v5232_v0 }
 0x52d   : > { %v5173_v4 = vpop.f32.mrf.mxu3 }
 0x52e   : > { %v5213_v34 = vadd.f32 %v5173_v4, %v5066_v1  ;;  %v5053_v1 = vpop.f32.mrf.mxu0  ;;  %v4923_v4 = vadd.f32 %v4922_v51, %v4809_v52 }
 0x530   : > { %v5233_v20 = vadd.f32 %v9600_v27, %v5213_v34  ;;  %v4925_v34 = vpop.f32.mrf.mxu2  ;;  %v5075_v10 = vadd.f32 %v5053_v1, %v4923_v4  ;;  %v4812_v7 = vpop.f32.mrf.mxu1 }
 0x532   : > { %5250 = vst.msk [vmem:[%s9605_s21 + $0x20] sm:$0xff] %vm5245_vm0, %v5233_v20 }
 0x535   : > { %v5176_v62 = vpop.f32.mrf.mxu3 }
 0x536   : > { %v5214_v47 = vadd.f32 %v5176_v62, %v5067_v23  ;;  %v4926_v23 = vadd.f32 %v4925_v34, %v4812_v7 }
 0x538   : > { %v5234_v41 = vadd.f32 %v9600_v27, %v5214_v47  ;;  %v5056_v47 = vpop.f32.mrf.mxu0  ;;  %v4928_v42 = vpop.f32.mrf.mxu2 }
 0x539   : > { %v5076_v24 = vadd.f32 %v5056_v47, %v4926_v23 }
 0x53a   : > { %5251 = vst.msk [vmem:[%s9605_s21 + $0x28] sm:$0xff] %vm5245_vm0, %v5234_v41 }
 0x53d   : > { %v5179_v50 = vpop.f32.mrf.mxu3 }
 0x53e   : > { %v5215_v25 = vadd.f32 %v5179_v50, %v5068_v36  ;;  %v4815_v36 = vpop.f32.mrf.mxu1 }
 0x53f   : > { %v4929_v50 = vadd.f32 %v4928_v42, %v4815_v36 }
 0x540   : > { %v5235_v11 = vadd.f32 %v9600_v27, %v5215_v25  ;;  %v5059_v25 = vpop.f32.mrf.mxu0 }
 0x541   : > { %v5077_v3 = vadd.f32 %v5059_v25, %v4929_v50 }
 0x542   : > { %5252 = vst.msk [vmem:[%s9605_s21 + $0x30] sm:$0xff] %vm5245_vm0, %v5235_v11 }
 0x545   : > { %v5182_v28 = vpop.f32.mrf.mxu3 }
 0x546   : > { %v5216_v35 = vadd.f32 %v5182_v28, %v5069_v49 }
 0x548   : > { %v5236_v38 = vadd.f32 %v9600_v27, %v5216_v35 }
 0x54a   : > { %5253 = vst.msk [vmem:[%s9605_s21 + $0x38] sm:$0xff] %vm5245_vm0, %v5236_v38 }
 0x54d   : > { %v5185_v6 = vpop.f32.mrf.mxu3 }
 0x54e   : > { %v5217_v37 = vadd.f32 %v5185_v6, %v5070_v61 }
 0x550   : > { %v5237_v13 = vadd.f32 %v9600_v27, %v5217_v37 }
 0x552   : > { %5254 = vst.msk [vmem:[%s9605_s21 + $0x40] sm:$0xff] %vm5245_vm0, %v5237_v13 }
 0x555   : > { %v5188_v46 = vpop.f32.mrf.mxu3 }
 0x556   : > { %v5218_v58 = vadd.f32 %v5188_v46, %v5071_v60 }
 0x558   : > { %v5238_v17 = vadd.f32 %v9600_v27, %v5218_v58 }
 0x55a   : > { %5255 = vst.msk [vmem:[%s9605_s21 + $0x48] sm:$0xff] %vm5245_vm0, %v5238_v17 }
 0x55d   : > { %v5191_v16 = vpop.f32.mrf.mxu3 }
 0x55e   : > { %v5219_v40 = vadd.f32 %v5191_v16, %v5072_v19 }
 0x560   : > { %v5239_v54 = vadd.f32 %v9600_v27, %v5219_v40 }
 0x562   : > { %5256 = vst.msk [vmem:[%s9605_s21 + $0x50] sm:$0xff] %vm5245_vm0, %v5239_v54 }
 0x565   : > { %v5194_v29 = vpop.f32.mrf.mxu3 }
 0x566   : > { %v5220_v22 = vadd.f32 %v5194_v29, %v5073_v63 }
 0x568   : > { %v5240_v56 = vadd.f32 %v9600_v27, %v5220_v22 }
 0x56a   : > { %5257 = vst.msk [vmem:[%s9605_s21 + $0x58] sm:$0xff] %vm5245_vm0, %v5240_v56 }
 0x56d   : > { %v5197_v0 = vpop.f32.mrf.mxu3 }
 0x56e   : > { %v5221_v14 = vadd.f32 %v5197_v0, %v5074_v30 }
 0x570   : > { %v5241_v33 = vadd.f32 %v9600_v27, %v5221_v14 }
 0x572   : > { %5258 = vst.msk [vmem:[%s9605_s21 + $0x60] sm:$0xff] %vm5245_vm0, %v5241_v33 }
 0x575   : > { %v5200_v20 = vpop.f32.mrf.mxu3 }
 0x576   : > { %v5222_v44 = vadd.f32 %v5200_v20, %v5075_v10 }
 0x578   : > { %v5242_v62 = vadd.f32 %v9600_v27, %v5222_v44 }
 0x57a   : > { %5259 = vst.msk [vmem:[%s9605_s21 + $0x68] sm:$0xff] %vm5245_vm0, %v5242_v62 }
 0x57d   : > { %v5203_v41 = vpop.f32.mrf.mxu3 }
 0x57e   : > { %v5223_v48 = vadd.f32 %v5203_v41, %v5076_v24 }
 0x580   : > { %v5243_v43 = vadd.f32 %v9600_v27, %v5223_v48 }
 0x582   : > { %5260 = vst.msk [vmem:[%s9605_s21 + $0x70] sm:$0xff] %vm5245_vm0, %v5243_v43 }
 0x585   : > { %v5206_v11 = vpop.f32.mrf.mxu3 }
 0x586   : > { %v5224_v32 = vadd.f32 %v5206_v11, %v5077_v3 }
 0x588   : > { %v5244_v21 = vadd.f32 %v9600_v27, %v5224_v32 }
 0x58a   : > { %5261 = vst.msk [vmem:[%s9605_s21 + $0x78] sm:$0xff] %vm5245_vm0, %v5244_v21 }
 0x58b PF: > { %s19_s9 = sadd.s32 1, %s6439_s9   ;;  %s10012_s29 = smov %s6435_s30 }
 0x58c   : > { %p16_p5 = scmp.ge.s32.totalorder %s19_s9, 4   ;;  %s10013_s30 = smov %s10015_s7 }
 0x58e   :  { %18 = sbr.rel (!%p16_p5) target bundleno = 2 (0x2), region = 117 }

</bundles_post_ra>
